<compile_context>
chip_gen: v7x
topology: tpu7x:2x2x1
jax: 0.10.0
libtpu: 0.0.40
codegen_flags: <defaults>
</compile_context>

<pallas_src>
import jax
import jax.numpy as jnp
from jax import lax
from jax.experimental import pallas as pl
from jax.experimental.pallas import tpu as pltpu

# ---------------------------------------------------------------------------
# Static network geometry (CIFAR: 32x32 input, as implied by fc1 = 128*4*4).
# ---------------------------------------------------------------------------
B = 2
H1 = W1 = 32
H2 = W2 = 16
H3 = W3 = 8
C0, C1, C2, C3 = 3, 32, 64, 128

R1, R2, R3 = H1 * W1, H2 * W2, H3 * W3        # 1024, 256, 64
PAD2, PAD3 = W2, W3                           # guard rows = W (multiples of 8)
ROWS2, ROWS3 = R2 + 2 * PAD2, R3 + 2 * PAD3   # 288, 80
NP3 = (H3 // 2) * (W3 // 2)                   # 16 spatial positions into fc1
K1 = 32                                       # conv1 im2col depth (27 -> padded)


# ---------------------------------------------------------------------------
# In-kernel building blocks
# ---------------------------------------------------------------------------
def _zero_guard_rows(a_ref, *, pad, R):
    """Zero ONLY the guard rows of an im2col-w activation buffer."""
    nb, rows_total, lanes = a_ref.shape
    a_ref[:, :pad, :] = jnp.zeros((nb, pad, lanes), a_ref.dtype)
    a_ref[:, pad + R:, :] = jnp.zeros((nb, rows_total - pad - R, lanes), a_ref.dtype)


def _write_im2col_w(p, a_ref, *, R, W, C, pad):
    """Write pooled activation p (B*R, C) f32 into a_ref's payload rows as the
    three kw-shifted lane blocks [w-1 | w | w+1], borders masked to zero.

    a_ref: (B, pad + R + pad, 3*C); guard rows already zero.
    Shift-by-one is done on the f32 value (one sublane relayout per side per
    layer); the stored dtype is a_ref.dtype (bf16 for a2, f32 for a3).
    """
    rows = B * R
    dt = a_ref.dtype
    col = lax.broadcasted_iota(jnp.int32, (rows, 1), 0) & (W - 1)   # w of each row
    zrow = jnp.zeros((1, C), jnp.float32)
    at_wm1 = jnp.concatenate([zrow, p[:rows - 1, :]], axis=0)       # value at (h, w-1)
    at_wp1 = jnp.concatenate([p[1:, :], zrow], axis=0)              # value at (h, w+1)
    left = jnp.where(col != 0, at_wm1, 0.0)
    right = jnp.where(col != W - 1, at_wp1, 0.0)
    a_ref[:, pad:pad + R, 0:C] = left.reshape(B, R, C).astype(dt)
    a_ref[:, pad:pad + R, C:2 * C] = p.reshape(B, R, C).astype(dt)
    a_ref[:, pad:pad + R, 2 * C:3 * C] = right.reshape(B, R, C).astype(dt)


def _conv3x3_bias_relu(a_ref, w_ref, b_ref, *, R, W, Cin, Cout, pad):
    """3x3 same-conv via 3 K-folded matmuls (one per kh) + bias + ReLU.

    a_ref: (B, pad+R+pad, 3*Cin) im2col-w buffer (guard rows zero).
    w_ref: (3, 3*Cin, Cout) bf16, dim1 = kw*Cin + cin.
    b_ref: (1, Cout) f32.
    Returns (B*R, Cout) f32, rows ordered (b, h, w).
    """
    rows = B * R
    acc = jnp.zeros((rows, Cout), jnp.float32)
    for kh in range(3):
        off = pad + (kh - 1) * W                       # 0, W, 2W: sublane-aligned
        lhs = a_ref[:, off:off + R, :].reshape(rows, 3 * Cin).astype(jnp.bfloat16)
        acc = acc + jnp.dot(lhs, w_ref[kh], preferred_element_type=jnp.float32)
    return jnp.maximum(acc + b_ref[...], 0.0)


def _maxpool2x2(y, stage_ref, *, H, W, C):
    """2x2 max pool: y (B*H*W, C) f32, rows (b,h,w) -> (B*(H/2)*(W/2), C) f32.

    H direction: layout-safe outer reshape + elementwise max.
    W direction: max with the next row (shift-by-one), then ONE stride-2 load.
    """
    Hp, Wp = H // 2, W // 2
    yr = y.reshape(B, Hp, 2, W, C)                               # split h -> (hp, h%2)
    yh = jnp.maximum(yr[:, :, 0], yr[:, :, 1]).reshape(B * Hp * W, C)
    nxt = jnp.concatenate([yh[1:, :], jnp.zeros((1, C), jnp.float32)], axis=0)
    stage_ref[...] = jnp.maximum(yh, nxt)                        # row r = max(r, r+1)
    n = B * Hp * Wp
    return stage_ref[pl.ds(0, n, stride=2), :]                   # even rows -> (b,hp,wp)


# ---------------------------------------------------------------------------
# The fused kernel
# ---------------------------------------------------------------------------
def _cnn_cifar_kernel(x_ref, w1_ref, b1_ref, w2_ref, b2_ref, w3_ref, b3_ref,
                      wf1_ref, bf1_ref, wf2_ref, bf2_ref, o_ref,
                      a2_ref, a3_ref, s1_ref, s2_ref, s3_ref, s4_ref, flat_ref):
    # Guard rows only; payload is fully overwritten before being read.
    _zero_guard_rows(a2_ref, pad=PAD2, R=R2)
    _zero_guard_rows(a3_ref, pad=PAD3, R=R3)

    # ---- conv1: single im2col matmul (27 taps folded into K) + bias + ReLU + pool
    y1 = jnp.maximum(
        jnp.dot(x_ref[...], w1_ref[...], preferred_element_type=jnp.float32)
        + b1_ref[...], 0.0)                                       # (B*R1, C1) f32
    p1 = _maxpool2x2(y1, s1_ref, H=H1, W=W1, C=C1)                # (B*R2, C1)
    _write_im2col_w(p1, a2_ref, R=R2, W=W2, C=C1, pad=PAD2)

    # ---- conv2 (3 matmuls, K = 3*C1, aligned reads) + bias + ReLU + pool
    y2 = _conv3x3_bias_relu(a2_ref, w2_ref, b2_ref,
                            R=R2, W=W2, Cin=C1, Cout=C2, pad=PAD2)
    p2 = _maxpool2x2(y2, s2_ref, H=H2, W=W2, C=C2)                # (B*R3, C2)
    _write_im2col_w(p2, a3_ref, R=R3, W=W3, C=C2, pad=PAD3)

    # ---- conv3 (3 matmuls, K = 3*C2) + bias + ReLU + pool
    y3 = _conv3x3_bias_relu(a3_ref, w3_ref, b3_ref,
                            R=R3, W=W3, Cin=C2, Cout=C3, pad=PAD3)
    p3 = _maxpool2x2(y3, s3_ref, H=H3, W=W3, C=C3)                # (B*NP3, C3)

    # ---- flatten (h, w, c) into lane-contiguous rows (fc1 weights pre-permuted):
    # 16 aligned 128-lane block stores instead of a 16-way lane concat chain.
    s4_ref[...] = p3                                              # rows (b, p), p=h*4+w
    for p in range(NP3):
        flat_ref[:, p * C3:(p + 1) * C3] = s4_ref[pl.ds(p, B, stride=NP3), :]
    flat = flat_ref[...].astype(jnp.bfloat16)                     # (B, 2048)

    # ---- fc1 + ReLU + fc2
    h = jnp.maximum(
        jnp.dot(flat, wf1_ref[...], preferred_element_type=jnp.float32)
        + bf1_ref[...], 0.0)
    out = jnp.dot(h.astype(jnp.bfloat16), wf2_ref[...],
                  preferred_element_type=jnp.float32) + bf2_ref[...]
    o_ref[...] = out.astype(o_ref.dtype)


# ---------------------------------------------------------------------------
# Wrapper: one-time input/weight re-layout (plain JAX) + pallas_call
# ---------------------------------------------------------------------------
def _conv1_im2col(x_nchw):
    """NCHW input -> (B*H1*W1, K1) bf16 im2col with pad=1 borders baked in."""
    xt = jnp.transpose(x_nchw, (0, 2, 3, 1)).astype(jnp.float32)  # (B, 32, 32, 3)
    xp = jnp.pad(xt, ((0, 0), (1, 1), (1, 1), (0, 0)))
    taps = [xp[:, kh:kh + H1, kw:kw + W1, :] for kh in range(3) for kw in range(3)]
    col = jnp.concatenate(taps, axis=-1).reshape(B * R1, 27)      # (2048, 27)
    col = jnp.pad(col, ((0, 0), (0, K1 - 27)))
    return col.astype(jnp.bfloat16)


def _conv1_w(w):
    """(C1, C0, 3, 3) -> (K1, C1) bf16, rows ordered (kh, kw, cin), zero-padded."""
    wr = jnp.transpose(w, (2, 3, 1, 0)).reshape(27, C1)
    return jnp.pad(wr, ((0, K1 - 27), (0, 0))).astype(jnp.bfloat16)


def _conv_w_kfold(w):
    """(Cout, Cin, 3, 3) -> (3, 3*Cin, Cout) bf16; dim1 = kw*Cin + cin, matching
    the [w-1 | w | w+1] lane blocks of the im2col-w activation buffers."""
    cout, cin = w.shape[0], w.shape[1]
    return jnp.transpose(w, (2, 3, 1, 0)).reshape(3, 3 * cin, cout).astype(jnp.bfloat16)


def _fc1_w_to_hwc(w):
    """PyTorch fc1 (128, 128*4*4) expects a (c, h, w) flatten; the in-kernel
    flatten is (h, w, c).  Returns (2048, 128) bf16 for x @ W."""
    w4 = w.reshape(128, C3, H3 // 2, W3 // 2)          # (out, c, h, w)
    w4 = jnp.transpose(w4, (2, 3, 1, 0))               # (h, w, c, out)
    return w4.reshape(NP3 * C3, 128).astype(jnp.bfloat16)


def cnn_cifar_forward(x_nchw, params):
    num_classes = params["fc2"][0].shape[0]

    w1, b1 = params["conv1"]
    w2, b2 = params["conv2"]
    w3, b3 = params["conv3"]
    fw1, fb1 = params["fc1"]
    fw2, fb2 = params["fc2"]

    args = (
        _conv1_im2col(x_nchw),
        _conv1_w(w1), b1.reshape(1, C1).astype(jnp.float32),
        _conv_w_kfold(w2), b2.reshape(1, C2).astype(jnp.float32),
        _conv_w_kfold(w3), b3.reshape(1, C3).astype(jnp.float32),
        _fc1_w_to_hwc(fw1), fb1.reshape(1, 128).astype(jnp.float32),
        fw2.T.astype(jnp.bfloat16), fb2.reshape(1, num_classes).astype(jnp.float32),
    )

    def full(shape):
        return pl.BlockSpec(shape, lambda i, _n=len(shape): (0,) * _n)

    in_specs = [
        full((B * R1, K1)),
        full((K1, C1)), full((1, C1)),
        full((3, 3 * C1, C2)), full((1, C2)),
        full((3, 3 * C2, C3)), full((1, C3)),
        full((NP3 * C3, 128)), full((1, 128)),
        full((128, num_classes)), full((1, num_classes)),
    ]

    return pl.pallas_call(
        _cnn_cifar_kernel,
        out_shape=jax.ShapeDtypeStruct((B, num_classes), jnp.float32),
        grid=(1,),
        in_specs=in_specs,
        out_specs=pl.BlockSpec((B, num_classes), lambda i: (0, 0)),
        scratch_shapes=[
            pltpu.VMEM((B, ROWS2, 3 * C1), jnp.bfloat16),        # layer-2 im2col-w (bf16)
            pltpu.VMEM((B, ROWS3, 3 * C2), jnp.float32),         # layer-3 im2col-w (tiny)
            pltpu.VMEM((B * (H1 // 2) * W1, C1), jnp.float32),   # pool staging 1
            pltpu.VMEM((B * (H2 // 2) * W2, C2), jnp.float32),   # pool staging 2
            pltpu.VMEM((B * (H3 // 2) * W3, C3), jnp.float32),   # pool staging 3
            pltpu.VMEM((B * NP3, C3), jnp.float32),              # flatten source
            pltpu.VMEM((B, NP3 * C3), jnp.float32),              # lane-contiguous flat
        ],
        compiler_params=pltpu.CompilerParams(
            dimension_semantics=("arbitrary",)),
    )(*args)


# ---------------------------------------------------------------------------
# Pure-JAX f32 reference (identical semantics to the PyTorch module)
# ---------------------------------------------------------------------------
def reference_forward(x_nchw, params):
    x = jnp.transpose(x_nchw, (0, 2, 3, 1))
    for name in ("conv1", "conv2", "conv3"):
        w_t, b = params[name]
        w_hwio = jnp.transpose(w_t, (2, 3, 1, 0))
        y = lax.conv_general_dilated(
            x, w_hwio, window_strides=(1, 1), padding="SAME",
            dimension_numbers=("NHWC", "HWIO", "NHWC")) + b
        y = jnp.maximum(y, 0.0)
        Bq, H, W, C = y.shape
        x = y.reshape(Bq, H // 2, 2, W // 2, 2, C).max(axis=(2, 4))
    # PyTorch flattens NCHW -> (B, C*H*W)
    feat = jnp.transpose(x, (0, 3, 1, 2)).reshape(x.shape[0], -1)
    fc1_w, fc1_b = params["fc1"]
    fc2_w, fc2_b = params["fc2"]
    h = jnp.maximum(feat @ fc1_w.T + fc1_b, 0.0)
    return h @ fc2_w.T + fc2_b


# ---------------------------------------------------------------------------
# Main
# ---------------------------------------------------------------------------
if __name__ == "__main__":
    num_classes = 10
    key = jax.random.PRNGKey(0)
    ks = jax.random.split(key, 11)

    x = jax.random.normal(ks[0], (B, 3, 32, 32), jnp.float32)

    def conv_init(kw, kb, cout, cin):
        fan_in = cin * 9
        w = jax.random.normal(kw, (cout, cin, 3, 3), jnp.float32) * (0.5 / jnp.sqrt(fan_in))
        b = jax.random.normal(kb, (cout,), jnp.float32) * 0.05
        return w, b

    def fc_init(kw, kb, dout, din):
        w = jax.random.normal(kw, (dout, din), jnp.float32) * (0.5 / jnp.sqrt(din))
        b = jax.random.normal(kb, (dout,), jnp.float32) * 0.05
        return w, b

    params = {
        "conv1": conv_init(ks[1], ks[2], 32, 3),
        "conv2": conv_init(ks[3], ks[4], 64, 32),
        "conv3": conv_init(ks[5], ks[6], 128, 64),
        "fc1": fc_init(ks[7], ks[8], 128, 128 * 4 * 4),
        "fc2": fc_init(ks[9], ks[10], num_classes, 128),
    }

    out = jax.jit(cnn_cifar_forward)(x, params)
    out = jax.block_until_ready(out)

    ref = reference_forward(x, params)
    max_err = float(jnp.max(jnp.abs(out - ref)))
    assert out.shape == (B, num_classes), out.shape
    # bf16 MXU operands (f32 accumulation) -> small tolerance vs f32 reference.
    assert max_err < 5e-2, f"max abs error {max_err}"

    print("KERNEL_OK")
</pallas_src>

<mosaic_0001>
module attributes {stable_mosaic.version = 11 : i64} {
  func.func @_cnn_cifar_kernel(%arg0: i32, %arg1: memref<2048x32xbf16, #tpu.memory_space<vmem>>, %arg2: memref<32x32xbf16, #tpu.memory_space<vmem>>, %arg3: memref<1x32xf32, #tpu.memory_space<vmem>>, %arg4: memref<3x96x64xbf16, #tpu.memory_space<vmem>>, %arg5: memref<1x64xf32, #tpu.memory_space<vmem>>, %arg6: memref<3x192x128xbf16, #tpu.memory_space<vmem>>, %arg7: memref<1x128xf32, #tpu.memory_space<vmem>>, %arg8: memref<2048x128xbf16, #tpu.memory_space<vmem>>, %arg9: memref<1x128xf32, #tpu.memory_space<vmem>>, %arg10: memref<128x10xbf16, #tpu.memory_space<vmem>>, %arg11: memref<1x10xf32, #tpu.memory_space<vmem>>, %arg12: memref<2x10xf32, #tpu.memory_space<vmem>>, %arg13: memref<2x288x96xbf16, #tpu.memory_space<vmem>>, %arg14: memref<2x80x192xf32, #tpu.memory_space<vmem>>, %arg15: memref<1024x32xf32, #tpu.memory_space<vmem>>, %arg16: memref<256x64xf32, #tpu.memory_space<vmem>>, %arg17: memref<64x128xf32, #tpu.memory_space<vmem>>, %arg18: memref<32x128xf32, #tpu.memory_space<vmem>>, %arg19: memref<2x2048xf32, #tpu.memory_space<vmem>>) attributes {dimension_semantics = [#tpu.dimension_semantics<arbitrary>], iteration_bounds = array<i64: 1>, scalar_prefetch = 0 : i64, scratch_operands = 7 : i64, tpu.core_type = #tpu.core_type<tc>, window_params = [{pipeline_mode = #tpu.pipeline_mode<synchronous>, transform_indices = @transform_0, window_bounds = array<i64: 2048, 32>}, {pipeline_mode = #tpu.pipeline_mode<synchronous>, transform_indices = @transform_1, window_bounds = array<i64: 32, 32>}, {pipeline_mode = #tpu.pipeline_mode<synchronous>, transform_indices = @transform_2, window_bounds = array<i64: 1, 32>}, {pipeline_mode = #tpu.pipeline_mode<synchronous>, transform_indices = @transform_3, window_bounds = array<i64: 3, 96, 64>}, {pipeline_mode = #tpu.pipeline_mode<synchronous>, transform_indices = @transform_4, window_bounds = array<i64: 1, 64>}, {pipeline_mode = #tpu.pipeline_mode<synchronous>, transform_indices = @transform_5, window_bounds = array<i64: 3, 192, 128>}, {pipeline_mode = #tpu.pipeline_mode<synchronous>, transform_indices = @transform_6, window_bounds = array<i64: 1, 128>}, {pipeline_mode = #tpu.pipeline_mode<synchronous>, transform_indices = @transform_7, window_bounds = array<i64: 2048, 128>}, {pipeline_mode = #tpu.pipeline_mode<synchronous>, transform_indices = @transform_8, window_bounds = array<i64: 1, 128>}, {pipeline_mode = #tpu.pipeline_mode<synchronous>, transform_indices = @transform_9, window_bounds = array<i64: 128, 10>}, {pipeline_mode = #tpu.pipeline_mode<synchronous>, transform_indices = @transform_10, window_bounds = array<i64: 1, 10>}, {pipeline_mode = #tpu.pipeline_mode<synchronous>, transform_indices = @transform_11, window_bounds = array<i64: 2, 10>}]} {
    %cst = arith.constant 0.000000e+00 : bf16
    %0 = vector.broadcast %cst : bf16 to vector<2x16x96xbf16>
    %c0 = arith.constant 0 : index
    %c0_0 = arith.constant 0 : index
    %c0_1 = arith.constant 0 : index
    %1 = vector.load %arg13[%c0, %c0_0, %c0_1] : memref<2x288x96xbf16, #tpu.memory_space<vmem>>, vector<2x16x96xbf16>
    tpu.vector_store %arg13[%c0, %c0_0, %c0_1], %0 {strides = array<i32>} : memref<2x288x96xbf16, #tpu.memory_space<vmem>>, vector<2x16x96xbf16>,
    %cst_2 = arith.constant 0.000000e+00 : bf16
    %2 = vector.broadcast %cst_2 : bf16 to vector<2x16x96xbf16>
    %c0_3 = arith.constant 0 : index
    %c272 = arith.constant 272 : index
    %c0_4 = arith.constant 0 : index
    %3 = vector.load %arg13[%c0_3, %c272, %c0_4] : memref<2x288x96xbf16, #tpu.memory_space<vmem>>, vector<2x16x96xbf16>
    tpu.vector_store %arg13[%c0_3, %c272, %c0_4], %2 {strides = array<i32>} : memref<2x288x96xbf16, #tpu.memory_space<vmem>>, vector<2x16x96xbf16>,
    %cst_5 = arith.constant 0.000000e+00 : f32
    %4 = vector.broadcast %cst_5 : f32 to vector<2x8x192xf32>
    %c0_6 = arith.constant 0 : index
    %c0_7 = arith.constant 0 : index
    %c0_8 = arith.constant 0 : index
    %5 = vector.load %arg14[%c0_6, %c0_7, %c0_8] : memref<2x80x192xf32, #tpu.memory_space<vmem>>, vector<2x8x192xf32>
    tpu.vector_store %arg14[%c0_6, %c0_7, %c0_8], %4 {strides = array<i32>} : memref<2x80x192xf32, #tpu.memory_space<vmem>>, vector<2x8x192xf32>,
    %cst_9 = arith.constant 0.000000e+00 : f32
    %6 = vector.broadcast %cst_9 : f32 to vector<2x8x192xf32>
    %c0_10 = arith.constant 0 : index
    %c72 = arith.constant 72 : index
    %c0_11 = arith.constant 0 : index
    %7 = vector.load %arg14[%c0_10, %c72, %c0_11] : memref<2x80x192xf32, #tpu.memory_space<vmem>>, vector<2x8x192xf32>
    tpu.vector_store %arg14[%c0_10, %c72, %c0_11], %6 {strides = array<i32>} : memref<2x80x192xf32, #tpu.memory_space<vmem>>, vector<2x8x192xf32>,
    %c0_12 = arith.constant 0 : index
    %c0_13 = arith.constant 0 : index
    %8 = vector.load %arg1[%c0_12, %c0_13] : memref<2048x32xbf16, #tpu.memory_space<vmem>>, vector<2048x32xbf16>
    %c0_14 = arith.constant 0 : index
    %c0_15 = arith.constant 0 : index
    %9 = vector.load %arg2[%c0_14, %c0_15] : memref<32x32xbf16, #tpu.memory_space<vmem>>, vector<32x32xbf16>
    %cst_16 = arith.constant dense<0.000000e+00> : vector<2048x32xf32>
    %10 = tpu.matmul %8, %9, %cst_16 {dimension_numbers = #tpu.dot_dimension_numbers<[1], [0], [0], [1], [0, 0, 1, 1], [], []>} : vector<2048x32xbf16>, vector<32x32xbf16>, vector<2048x32xf32> -> vector<2048x32xf32>
    %c0_17 = arith.constant 0 : index
    %c0_18 = arith.constant 0 : index
    %11 = vector.load %arg3[%c0_17, %c0_18] : memref<1x32xf32, #tpu.memory_space<vmem>>, vector<1x32xf32>
    %12 = vector.broadcast %11 : vector<1x32xf32> to vector<2048x32xf32>
    %13 = arith.addf %10, %12 : vector<2048x32xf32>
    %cst_19 = arith.constant 0.000000e+00 : f32
    %14 = vector.broadcast %cst_19 : f32 to vector<2048x32xf32>
    %15 = arith.maximumf %13, %14 : vector<2048x32xf32>
    %16 = vector.shape_cast %15 : vector<2048x32xf32> to vector<2x16x2x32x32xf32>
    %17 = vector.extract_strided_slice %16 {offsets = [0, 0, 0, 0, 0], sizes = [2, 16, 1, 32, 32], strides = [1, 1, 1, 1, 1]} : vector<2x16x2x32x32xf32> to vector<2x16x1x32x32xf32>
    %18 = vector.shape_cast %17 : vector<2x16x1x32x32xf32> to vector<2x16x32x32xf32>
    %19 = vector.extract_strided_slice %16 {offsets = [0, 0, 1, 0, 0], sizes = [2, 16, 1, 32, 32], strides = [1, 1, 1, 1, 1]} : vector<2x16x2x32x32xf32> to vector<2x16x1x32x32xf32>
    %20 = vector.shape_cast %19 : vector<2x16x1x32x32xf32> to vector<2x16x32x32xf32>
    %21 = arith.maximumf %18, %20 : vector<2x16x32x32xf32>
    %22 = vector.shape_cast %21 : vector<2x16x32x32xf32> to vector<1024x32xf32>
    %23 = vector.extract_strided_slice %22 {offsets = [1, 0], sizes = [1023, 32], strides = [1, 1]} : vector<1024x32xf32> to vector<1023x32xf32>
    %cst_20 = arith.constant 0.000000e+00 : f32
    %24 = vector.broadcast %cst_20 : f32 to vector<1x32xf32>
    %25 = tpu.concatenate %23, %24 in 0 : vector<1023x32xf32>, vector<1x32xf32> -> vector<1024x32xf32>
    %26 = arith.maximumf %22, %25 : vector<1024x32xf32>
    %c0_21 = arith.constant 0 : index
    %c0_22 = arith.constant 0 : index
    %27 = vector.load %arg15[%c0_21, %c0_22] : memref<1024x32xf32, #tpu.memory_space<vmem>>, vector<1024x32xf32>
    tpu.vector_store %arg15[%c0_21, %c0_22], %26 {strides = array<i32>} : memref<1024x32xf32, #tpu.memory_space<vmem>>, vector<1024x32xf32>,
    %c0_23 = arith.constant 0 : index
    %c0_24 = arith.constant 0 : index
    %28 = tpu.strided_load %arg15[%c0_23, %c0_24] {strides = array<i32: 2, 1>} : memref<1024x32xf32, #tpu.memory_space<vmem>>, vector<512x32xf32>
    %29 = tpu.iota {dimensions = array<i32: 0>} : vector<512x1xi32>
    %c15_i32 = arith.constant 15 : i32
    %30 = vector.broadcast %c15_i32 : i32 to vector<512x1xi32>
    %31 = arith.andi %29, %30 : vector<512x1xi32>
    %cst_25 = arith.constant 0.000000e+00 : f32
    %32 = vector.broadcast %cst_25 : f32 to vector<1x32xf32>
    %33 = vector.extract_strided_slice %28 {offsets = [0, 0], sizes = [511, 32], strides = [1, 1]} : vector<512x32xf32> to vector<511x32xf32>
    %34 = tpu.concatenate %32, %33 in 0 : vector<1x32xf32>, vector<511x32xf32> -> vector<512x32xf32>
    %35 = vector.extract_strided_slice %28 {offsets = [1, 0], sizes = [511, 32], strides = [1, 1]} : vector<512x32xf32> to vector<511x32xf32>
    %36 = tpu.concatenate %35, %32 in 0 : vector<511x32xf32>, vector<1x32xf32> -> vector<512x32xf32>
    %c0_i32 = arith.constant 0 : i32
    %37 = vector.broadcast %c0_i32 : i32 to vector<512x1xi32>
    %38 = arith.cmpi ne, %31, %37 : vector<512x1xi32>
    %cst_26 = arith.constant 0.000000e+00 : f32
    %39 = vector.shape_cast %38 : vector<512x1xi1> to vector<512x1xi1>
    %40 = vector.broadcast %39 : vector<512x1xi1> to vector<512x32xi1>
    %41 = vector.broadcast %cst_26 : f32 to vector<512x32xf32>
    %42 = arith.select %40, %34, %41 : vector<512x32xi1>, vector<512x32xf32>
    %c15_i32_27 = arith.constant 15 : i32
    %43 = vector.broadcast %c15_i32_27 : i32 to vector<512x1xi32>
    %44 = arith.cmpi ne, %31, %43 : vector<512x1xi32>
    %cst_28 = arith.constant 0.000000e+00 : f32
    %45 = vector.shape_cast %44 : vector<512x1xi1> to vector<512x1xi1>
    %46 = vector.broadcast %45 : vector<512x1xi1> to vector<512x32xi1>
    %47 = vector.broadcast %cst_28 : f32 to vector<512x32xf32>
    %48 = arith.select %46, %36, %47 : vector<512x32xi1>, vector<512x32xf32>
    %49 = vector.shape_cast %42 : vector<512x32xf32> to vector<2x256x32xf32>
    %50 = arith.truncf %49 : vector<2x256x32xf32> to vector<2x256x32xbf16>
    %c0_29 = arith.constant 0 : index
    %c16 = arith.constant 16 : index
    %c0_30 = arith.constant 0 : index
    %51 = vector.load %arg13[%c0_29, %c16, %c0_30] : memref<2x288x96xbf16, #tpu.memory_space<vmem>>, vector<2x256x32xbf16>
    tpu.vector_store %arg13[%c0_29, %c16, %c0_30], %50 {strides = array<i32>} : memref<2x288x96xbf16, #tpu.memory_space<vmem>>, vector<2x256x32xbf16>,
    %52 = vector.shape_cast %28 : vector<512x32xf32> to vector<2x256x32xf32>
    %53 = arith.truncf %52 : vector<2x256x32xf32> to vector<2x256x32xbf16>
    %c0_31 = arith.constant 0 : index
    %c16_32 = arith.constant 16 : index
    %c32 = arith.constant 32 : index
    %54 = vector.load %arg13[%c0_31, %c16_32, %c32] : memref<2x288x96xbf16, #tpu.memory_space<vmem>>, vector<2x256x32xbf16>
    tpu.vector_store %arg13[%c0_31, %c16_32, %c32], %53 {strides = array<i32>} : memref<2x288x96xbf16, #tpu.memory_space<vmem>>, vector<2x256x32xbf16>,
    %55 = vector.shape_cast %48 : vector<512x32xf32> to vector<2x256x32xf32>
    %56 = arith.truncf %55 : vector<2x256x32xf32> to vector<2x256x32xbf16>
    %c0_33 = arith.constant 0 : index
    %c16_34 = arith.constant 16 : index
    %c64 = arith.constant 64 : index
    %57 = vector.load %arg13[%c0_33, %c16_34, %c64] : memref<2x288x96xbf16, #tpu.memory_space<vmem>>, vector<2x256x32xbf16>
    tpu.vector_store %arg13[%c0_33, %c16_34, %c64], %56 {strides = array<i32>} : memref<2x288x96xbf16, #tpu.memory_space<vmem>>, vector<2x256x32xbf16>,
    %cst_35 = arith.constant 0.000000e+00 : f32
    %58 = vector.broadcast %cst_35 : f32 to vector<512x64xf32>
    %c0_36 = arith.constant 0 : index
    %c0_37 = arith.constant 0 : index
    %c0_38 = arith.constant 0 : index
    %59 = vector.load %arg13[%c0_36, %c0_37, %c0_38] : memref<2x288x96xbf16, #tpu.memory_space<vmem>>, vector<2x256x96xbf16>
    %60 = vector.shape_cast %59 : vector<2x256x96xbf16> to vector<512x96xbf16>
    %c0_39 = arith.constant 0 : index
    %c0_40 = arith.constant 0 : index
    %c0_41 = arith.constant 0 : index
    %61 = vector.load %arg4[%c0_39, %c0_40, %c0_41] : memref<3x96x64xbf16, #tpu.memory_space<vmem>>, vector<1x96x64xbf16>
    %62 = vector.shape_cast %61 : vector<1x96x64xbf16> to vector<96x64xbf16>
    %cst_42 = arith.constant dense<0.000000e+00> : vector<512x64xf32>
    %63 = tpu.matmul %60, %62, %cst_42 {dimension_numbers = #tpu.dot_dimension_numbers<[1], [0], [0], [1], [0, 0, 1, 1], [], []>} : vector<512x96xbf16>, vector<96x64xbf16>, vector<512x64xf32> -> vector<512x64xf32>
    %64 = arith.addf %58, %63 : vector<512x64xf32>
    %c0_43 = arith.constant 0 : index
    %c16_44 = arith.constant 16 : index
    %c0_45 = arith.constant 0 : index
    %65 = vector.load %arg13[%c0_43, %c16_44, %c0_45] : memref<2x288x96xbf16, #tpu.memory_space<vmem>>, vector<2x256x96xbf16>
    %66 = vector.shape_cast %65 : vector<2x256x96xbf16> to vector<512x96xbf16>
    %c1 = arith.constant 1 : index
    %c0_46 = arith.constant 0 : index
    %c0_47 = arith.constant 0 : index
    %67 = vector.load %arg4[%c1, %c0_46, %c0_47] : memref<3x96x64xbf16, #tpu.memory_space<vmem>>, vector<1x96x64xbf16>
    %68 = vector.shape_cast %67 : vector<1x96x64xbf16> to vector<96x64xbf16>
    %cst_48 = arith.constant dense<0.000000e+00> : vector<512x64xf32>
    %69 = tpu.matmul %66, %68, %cst_48 {dimension_numbers = #tpu.dot_dimension_numbers<[1], [0], [0], [1], [0, 0, 1, 1], [], []>} : vector<512x96xbf16>, vector<96x64xbf16>, vector<512x64xf32> -> vector<512x64xf32>
    %70 = arith.addf %64, %69 : vector<512x64xf32>
    %c0_49 = arith.constant 0 : index
    %c32_50 = arith.constant 32 : index
    %c0_51 = arith.constant 0 : index
    %71 = vector.load %arg13[%c0_49, %c32_50, %c0_51] : memref<2x288x96xbf16, #tpu.memory_space<vmem>>, vector<2x256x96xbf16>
    %72 = vector.shape_cast %71 : vector<2x256x96xbf16> to vector<512x96xbf16>
    %c2 = arith.constant 2 : index
    %c0_52 = arith.constant 0 : index
    %c0_53 = arith.constant 0 : index
    %73 = vector.load %arg4[%c2, %c0_52, %c0_53] : memref<3x96x64xbf16, #tpu.memory_space<vmem>>, vector<1x96x64xbf16>
    %74 = vector.shape_cast %73 : vector<1x96x64xbf16> to vector<96x64xbf16>
    %cst_54 = arith.constant dense<0.000000e+00> : vector<512x64xf32>
    %75 = tpu.matmul %72, %74, %cst_54 {dimension_numbers = #tpu.dot_dimension_numbers<[1], [0], [0], [1], [0, 0, 1, 1], [], []>} : vector<512x96xbf16>, vector<96x64xbf16>, vector<512x64xf32> -> vector<512x64xf32>
    %76 = arith.addf %70, %75 : vector<512x64xf32>
    %c0_55 = arith.constant 0 : index
    %c0_56 = arith.constant 0 : index
    %77 = vector.load %arg5[%c0_55, %c0_56] : memref<1x64xf32, #tpu.memory_space<vmem>>, vector<1x64xf32>
    %78 = vector.broadcast %77 : vector<1x64xf32> to vector<512x64xf32>
    %79 = arith.addf %76, %78 : vector<512x64xf32>
    %cst_57 = arith.constant 0.000000e+00 : f32
    %80 = vector.broadcast %cst_57 : f32 to vector<512x64xf32>
    %81 = arith.maximumf %79, %80 : vector<512x64xf32>
    %82 = vector.shape_cast %81 : vector<512x64xf32> to vector<2x8x2x16x64xf32>
    %83 = vector.extract_strided_slice %82 {offsets = [0, 0, 0, 0, 0], sizes = [2, 8, 1, 16, 64], strides = [1, 1, 1, 1, 1]} : vector<2x8x2x16x64xf32> to vector<2x8x1x16x64xf32>
    %84 = vector.shape_cast %83 : vector<2x8x1x16x64xf32> to vector<2x8x16x64xf32>
    %85 = vector.extract_strided_slice %82 {offsets = [0, 0, 1, 0, 0], sizes = [2, 8, 1, 16, 64], strides = [1, 1, 1, 1, 1]} : vector<2x8x2x16x64xf32> to vector<2x8x1x16x64xf32>
    %86 = vector.shape_cast %85 : vector<2x8x1x16x64xf32> to vector<2x8x16x64xf32>
    %87 = arith.maximumf %84, %86 : vector<2x8x16x64xf32>
    %88 = vector.shape_cast %87 : vector<2x8x16x64xf32> to vector<256x64xf32>
    %89 = vector.extract_strided_slice %88 {offsets = [1, 0], sizes = [255, 64], strides = [1, 1]} : vector<256x64xf32> to vector<255x64xf32>
    %cst_58 = arith.constant 0.000000e+00 : f32
    %90 = vector.broadcast %cst_58 : f32 to vector<1x64xf32>
    %91 = tpu.concatenate %89, %90 in 0 : vector<255x64xf32>, vector<1x64xf32> -> vector<256x64xf32>
    %92 = arith.maximumf %88, %91 : vector<256x64xf32>
    %c0_59 = arith.constant 0 : index
    %c0_60 = arith.constant 0 : index
    %93 = vector.load %arg16[%c0_59, %c0_60] : memref<256x64xf32, #tpu.memory_space<vmem>>, vector<256x64xf32>
    tpu.vector_store %arg16[%c0_59, %c0_60], %92 {strides = array<i32>} : memref<256x64xf32, #tpu.memory_space<vmem>>, vector<256x64xf32>,
    %c0_61 = arith.constant 0 : index
    %c0_62 = arith.constant 0 : index
    %94 = tpu.strided_load %arg16[%c0_61, %c0_62] {strides = array<i32: 2, 1>} : memref<256x64xf32, #tpu.memory_space<vmem>>, vector<128x64xf32>
    %95 = tpu.iota {dimensions = array<i32: 0>} : vector<128x1xi32>
    %c7_i32 = arith.constant 7 : i32
    %96 = vector.broadcast %c7_i32 : i32 to vector<128x1xi32>
    %97 = arith.andi %95, %96 : vector<128x1xi32>
    %cst_63 = arith.constant 0.000000e+00 : f32
    %98 = vector.broadcast %cst_63 : f32 to vector<1x64xf32>
    %99 = vector.extract_strided_slice %94 {offsets = [0, 0], sizes = [127, 64], strides = [1, 1]} : vector<128x64xf32> to vector<127x64xf32>
    %100 = tpu.concatenate %98, %99 in 0 : vector<1x64xf32>, vector<127x64xf32> -> vector<128x64xf32>
    %101 = vector.extract_strided_slice %94 {offsets = [1, 0], sizes = [127, 64], strides = [1, 1]} : vector<128x64xf32> to vector<127x64xf32>
    %102 = tpu.concatenate %101, %98 in 0 : vector<127x64xf32>, vector<1x64xf32> -> vector<128x64xf32>
    %c0_i32_64 = arith.constant 0 : i32
    %103 = vector.broadcast %c0_i32_64 : i32 to vector<128x1xi32>
    %104 = arith.cmpi ne, %97, %103 : vector<128x1xi32>
    %cst_65 = arith.constant 0.000000e+00 : f32
    %105 = vector.shape_cast %104 : vector<128x1xi1> to vector<128x1xi1>
    %106 = vector.broadcast %105 : vector<128x1xi1> to vector<128x64xi1>
    %107 = vector.broadcast %cst_65 : f32 to vector<128x64xf32>
    %108 = arith.select %106, %100, %107 : vector<128x64xi1>, vector<128x64xf32>
    %c7_i32_66 = arith.constant 7 : i32
    %109 = vector.broadcast %c7_i32_66 : i32 to vector<128x1xi32>
    %110 = arith.cmpi ne, %97, %109 : vector<128x1xi32>
    %cst_67 = arith.constant 0.000000e+00 : f32
    %111 = vector.shape_cast %110 : vector<128x1xi1> to vector<128x1xi1>
    %112 = vector.broadcast %111 : vector<128x1xi1> to vector<128x64xi1>
    %113 = vector.broadcast %cst_67 : f32 to vector<128x64xf32>
    %114 = arith.select %112, %102, %113 : vector<128x64xi1>, vector<128x64xf32>
    %115 = vector.shape_cast %108 : vector<128x64xf32> to vector<2x64x64xf32>
    %c0_68 = arith.constant 0 : index
    %c8 = arith.constant 8 : index
    %c0_69 = arith.constant 0 : index
    %116 = vector.load %arg14[%c0_68, %c8, %c0_69] : memref<2x80x192xf32, #tpu.memory_space<vmem>>, vector<2x64x64xf32>
    tpu.vector_store %arg14[%c0_68, %c8, %c0_69], %115 {strides = array<i32>} : memref<2x80x192xf32, #tpu.memory_space<vmem>>, vector<2x64x64xf32>,
    %117 = vector.shape_cast %94 : vector<128x64xf32> to vector<2x64x64xf32>
    %c0_70 = arith.constant 0 : index
    %c8_71 = arith.constant 8 : index
    %c64_72 = arith.constant 64 : index
    %118 = vector.load %arg14[%c0_70, %c8_71, %c64_72] : memref<2x80x192xf32, #tpu.memory_space<vmem>>, vector<2x64x64xf32>
    tpu.vector_store %arg14[%c0_70, %c8_71, %c64_72], %117 {strides = array<i32>} : memref<2x80x192xf32, #tpu.memory_space<vmem>>, vector<2x64x64xf32>,
    %119 = vector.shape_cast %114 : vector<128x64xf32> to vector<2x64x64xf32>
    %c0_73 = arith.constant 0 : index
    %c8_74 = arith.constant 8 : index
    %c128 = arith.constant 128 : index
    %120 = vector.load %arg14[%c0_73, %c8_74, %c128] : memref<2x80x192xf32, #tpu.memory_space<vmem>>, vector<2x64x64xf32>
    tpu.vector_store %arg14[%c0_73, %c8_74, %c128], %119 {strides = array<i32>} : memref<2x80x192xf32, #tpu.memory_space<vmem>>, vector<2x64x64xf32>,
    %cst_75 = arith.constant 0.000000e+00 : f32
    %121 = vector.broadcast %cst_75 : f32 to vector<128x128xf32>
    %c0_76 = arith.constant 0 : index
    %c0_77 = arith.constant 0 : index
    %c0_78 = arith.constant 0 : index
    %122 = vector.load %arg14[%c0_76, %c0_77, %c0_78] : memref<2x80x192xf32, #tpu.memory_space<vmem>>, vector<2x64x192xf32>
    %123 = vector.shape_cast %122 : vector<2x64x192xf32> to vector<128x192xf32>
    %124 = arith.truncf %123 : vector<128x192xf32> to vector<128x192xbf16>
    %c0_79 = arith.constant 0 : index
    %c0_80 = arith.constant 0 : index
    %c0_81 = arith.constant 0 : index
    %125 = vector.load %arg6[%c0_79, %c0_80, %c0_81] : memref<3x192x128xbf16, #tpu.memory_space<vmem>>, vector<1x192x128xbf16>
    %126 = vector.shape_cast %125 : vector<1x192x128xbf16> to vector<192x128xbf16>
    %cst_82 = arith.constant dense<0.000000e+00> : vector<128x128xf32>
    %127 = tpu.matmul %124, %126, %cst_82 {dimension_numbers = #tpu.dot_dimension_numbers<[1], [0], [0], [1], [0, 0, 1, 1], [], []>} : vector<128x192xbf16>, vector<192x128xbf16>, vector<128x128xf32> -> vector<128x128xf32>
    %128 = arith.addf %121, %127 : vector<128x128xf32>
    %c0_83 = arith.constant 0 : index
    %c8_84 = arith.constant 8 : index
    %c0_85 = arith.constant 0 : index
    %129 = vector.load %arg14[%c0_83, %c8_84, %c0_85] : memref<2x80x192xf32, #tpu.memory_space<vmem>>, vector<2x64x192xf32>
    %130 = vector.shape_cast %129 : vector<2x64x192xf32> to vector<128x192xf32>
    %131 = arith.truncf %130 : vector<128x192xf32> to vector<128x192xbf16>
    %c1_86 = arith.constant 1 : index
    %c0_87 = arith.constant 0 : index
    %c0_88 = arith.constant 0 : index
    %132 = vector.load %arg6[%c1_86, %c0_87, %c0_88] : memref<3x192x128xbf16, #tpu.memory_space<vmem>>, vector<1x192x128xbf16>
    %133 = vector.shape_cast %132 : vector<1x192x128xbf16> to vector<192x128xbf16>
    %cst_89 = arith.constant dense<0.000000e+00> : vector<128x128xf32>
    %134 = tpu.matmul %131, %133, %cst_89 {dimension_numbers = #tpu.dot_dimension_numbers<[1], [0], [0], [1], [0, 0, 1, 1], [], []>} : vector<128x192xbf16>, vector<192x128xbf16>, vector<128x128xf32> -> vector<128x128xf32>
    %135 = arith.addf %128, %134 : vector<128x128xf32>
    %c0_90 = arith.constant 0 : index
    %c16_91 = arith.constant 16 : index
    %c0_92 = arith.constant 0 : index
    %136 = vector.load %arg14[%c0_90, %c16_91, %c0_92] : memref<2x80x192xf32, #tpu.memory_space<vmem>>, vector<2x64x192xf32>
    %137 = vector.shape_cast %136 : vector<2x64x192xf32> to vector<128x192xf32>
    %138 = arith.truncf %137 : vector<128x192xf32> to vector<128x192xbf16>
    %c2_93 = arith.constant 2 : index
    %c0_94 = arith.constant 0 : index
    %c0_95 = arith.constant 0 : index
    %139 = vector.load %arg6[%c2_93, %c0_94, %c0_95] : memref<3x192x128xbf16, #tpu.memory_space<vmem>>, vector<1x192x128xbf16>
    %140 = vector.shape_cast %139 : vector<1x192x128xbf16> to vector<192x128xbf16>
    %cst_96 = arith.constant dense<0.000000e+00> : vector<128x128xf32>
    %141 = tpu.matmul %138, %140, %cst_96 {dimension_numbers = #tpu.dot_dimension_numbers<[1], [0], [0], [1], [0, 0, 1, 1], [], []>} : vector<128x192xbf16>, vector<192x128xbf16>, vector<128x128xf32> -> vector<128x128xf32>
    %142 = arith.addf %135, %141 : vector<128x128xf32>
    %c0_97 = arith.constant 0 : index
    %c0_98 = arith.constant 0 : index
    %143 = vector.load %arg7[%c0_97, %c0_98] : memref<1x128xf32, #tpu.memory_space<vmem>>, vector<1x128xf32>
    %144 = vector.broadcast %143 : vector<1x128xf32> to vector<128x128xf32>
    %145 = arith.addf %142, %144 : vector<128x128xf32>
    %cst_99 = arith.constant 0.000000e+00 : f32
    %146 = vector.broadcast %cst_99 : f32 to vector<128x128xf32>
    %147 = arith.maximumf %145, %146 : vector<128x128xf32>
    %148 = vector.shape_cast %147 : vector<128x128xf32> to vector<2x4x2x8x128xf32>
    %149 = vector.extract_strided_slice %148 {offsets = [0, 0, 0, 0, 0], sizes = [2, 4, 1, 8, 128], strides = [1, 1, 1, 1, 1]} : vector<2x4x2x8x128xf32> to vector<2x4x1x8x128xf32>
    %150 = vector.shape_cast %149 : vector<2x4x1x8x128xf32> to vector<2x4x8x128xf32>
    %151 = vector.extract_strided_slice %148 {offsets = [0, 0, 1, 0, 0], sizes = [2, 4, 1, 8, 128], strides = [1, 1, 1, 1, 1]} : vector<2x4x2x8x128xf32> to vector<2x4x1x8x128xf32>
    %152 = vector.shape_cast %151 : vector<2x4x1x8x128xf32> to vector<2x4x8x128xf32>
    %153 = arith.maximumf %150, %152 : vector<2x4x8x128xf32>
    %154 = vector.shape_cast %153 : vector<2x4x8x128xf32> to vector<64x128xf32>
    %155 = vector.extract_strided_slice %154 {offsets = [1, 0], sizes = [63, 128], strides = [1, 1]} : vector<64x128xf32> to vector<63x128xf32>
    %cst_100 = arith.constant 0.000000e+00 : f32
    %156 = vector.broadcast %cst_100 : f32 to vector<1x128xf32>
    %157 = tpu.concatenate %155, %156 in 0 : vector<63x128xf32>, vector<1x128xf32> -> vector<64x128xf32>
    %158 = arith.maximumf %154, %157 : vector<64x128xf32>
    %c0_101 = arith.constant 0 : index
    %c0_102 = arith.constant 0 : index
    %159 = vector.load %arg17[%c0_101, %c0_102] : memref<64x128xf32, #tpu.memory_space<vmem>>, vector<64x128xf32>
    tpu.vector_store %arg17[%c0_101, %c0_102], %158 {strides = array<i32>} : memref<64x128xf32, #tpu.memory_space<vmem>>, vector<64x128xf32>,
    %c0_103 = arith.constant 0 : index
    %c0_104 = arith.constant 0 : index
    %160 = tpu.strided_load %arg17[%c0_103, %c0_104] {strides = array<i32: 2, 1>} : memref<64x128xf32, #tpu.memory_space<vmem>>, vector<32x128xf32>
    %c0_105 = arith.constant 0 : index
    %c0_106 = arith.constant 0 : index
    %161 = vector.load %arg18[%c0_105, %c0_106] : memref<32x128xf32, #tpu.memory_space<vmem>>, vector<32x128xf32>
    tpu.vector_store %arg18[%c0_105, %c0_106], %160 {strides = array<i32>} : memref<32x128xf32, #tpu.memory_space<vmem>>, vector<32x128xf32>,
    %c0_107 = arith.constant 0 : index
    %c0_108 = arith.constant 0 : index
    %162 = tpu.strided_load %arg18[%c0_107, %c0_108] {strides = array<i32: 16, 1>} : memref<32x128xf32, #tpu.memory_space<vmem>>, vector<2x128xf32>
    %c0_109 = arith.constant 0 : index
    %c0_110 = arith.constant 0 : index
    %163 = vector.load %arg19[%c0_109, %c0_110] : memref<2x2048xf32, #tpu.memory_space<vmem>>, vector<2x128xf32>
    tpu.vector_store %arg19[%c0_109, %c0_110], %162 {strides = array<i32>} : memref<2x2048xf32, #tpu.memory_space<vmem>>, vector<2x128xf32>,
    %c1_111 = arith.constant 1 : index
    %c0_112 = arith.constant 0 : index
    %164 = tpu.strided_load %arg18[%c1_111, %c0_112] {strides = array<i32: 16, 1>} : memref<32x128xf32, #tpu.memory_space<vmem>>, vector<2x128xf32>
    %c0_113 = arith.constant 0 : index
    %c128_114 = arith.constant 128 : index
    %165 = vector.load %arg19[%c0_113, %c128_114] : memref<2x2048xf32, #tpu.memory_space<vmem>>, vector<2x128xf32>
    tpu.vector_store %arg19[%c0_113, %c128_114], %164 {strides = array<i32>} : memref<2x2048xf32, #tpu.memory_space<vmem>>, vector<2x128xf32>,
    %c2_115 = arith.constant 2 : index
    %c0_116 = arith.constant 0 : index
    %166 = tpu.strided_load %arg18[%c2_115, %c0_116] {strides = array<i32: 16, 1>} : memref<32x128xf32, #tpu.memory_space<vmem>>, vector<2x128xf32>
    %c0_117 = arith.constant 0 : index
    %c256 = arith.constant 256 : index
    %167 = vector.load %arg19[%c0_117, %c256] : memref<2x2048xf32, #tpu.memory_space<vmem>>, vector<2x128xf32>
    tpu.vector_store %arg19[%c0_117, %c256], %166 {strides = array<i32>} : memref<2x2048xf32, #tpu.memory_space<vmem>>, vector<2x128xf32>,
    %c3 = arith.constant 3 : index
    %c0_118 = arith.constant 0 : index
    %168 = tpu.strided_load %arg18[%c3, %c0_118] {strides = array<i32: 16, 1>} : memref<32x128xf32, #tpu.memory_space<vmem>>, vector<2x128xf32>
    %c0_119 = arith.constant 0 : index
    %c384 = arith.constant 384 : index
    %169 = vector.load %arg19[%c0_119, %c384] : memref<2x2048xf32, #tpu.memory_space<vmem>>, vector<2x128xf32>
    tpu.vector_store %arg19[%c0_119, %c384], %168 {strides = array<i32>} : memref<2x2048xf32, #tpu.memory_space<vmem>>, vector<2x128xf32>,
    %c4 = arith.constant 4 : index
    %c0_120 = arith.constant 0 : index
    %170 = tpu.strided_load %arg18[%c4, %c0_120] {strides = array<i32: 16, 1>} : memref<32x128xf32, #tpu.memory_space<vmem>>, vector<2x128xf32>
    %c0_121 = arith.constant 0 : index
    %c512 = arith.constant 512 : index
    %171 = vector.load %arg19[%c0_121, %c512] : memref<2x2048xf32, #tpu.memory_space<vmem>>, vector<2x128xf32>
    tpu.vector_store %arg19[%c0_121, %c512], %170 {strides = array<i32>} : memref<2x2048xf32, #tpu.memory_space<vmem>>, vector<2x128xf32>,
    %c5 = arith.constant 5 : index
    %c0_122 = arith.constant 0 : index
    %172 = tpu.strided_load %arg18[%c5, %c0_122] {strides = array<i32: 16, 1>} : memref<32x128xf32, #tpu.memory_space<vmem>>, vector<2x128xf32>
    %c0_123 = arith.constant 0 : index
    %c640 = arith.constant 640 : index
    %173 = vector.load %arg19[%c0_123, %c640] : memref<2x2048xf32, #tpu.memory_space<vmem>>, vector<2x128xf32>
    tpu.vector_store %arg19[%c0_123, %c640], %172 {strides = array<i32>} : memref<2x2048xf32, #tpu.memory_space<vmem>>, vector<2x128xf32>,
    %c6 = arith.constant 6 : index
    %c0_124 = arith.constant 0 : index
    %174 = tpu.strided_load %arg18[%c6, %c0_124] {strides = array<i32: 16, 1>} : memref<32x128xf32, #tpu.memory_space<vmem>>, vector<2x128xf32>
    %c0_125 = arith.constant 0 : index
    %c768 = arith.constant 768 : index
    %175 = vector.load %arg19[%c0_125, %c768] : memref<2x2048xf32, #tpu.memory_space<vmem>>, vector<2x128xf32>
    tpu.vector_store %arg19[%c0_125, %c768], %174 {strides = array<i32>} : memref<2x2048xf32, #tpu.memory_space<vmem>>, vector<2x128xf32>,
    %c7 = arith.constant 7 : index
    %c0_126 = arith.constant 0 : index
    %176 = tpu.strided_load %arg18[%c7, %c0_126] {strides = array<i32: 16, 1>} : memref<32x128xf32, #tpu.memory_space<vmem>>, vector<2x128xf32>
    %c0_127 = arith.constant 0 : index
    %c896 = arith.constant 896 : index
    %177 = vector.load %arg19[%c0_127, %c896] : memref<2x2048xf32, #tpu.memory_space<vmem>>, vector<2x128xf32>
    tpu.vector_store %arg19[%c0_127, %c896], %176 {strides = array<i32>} : memref<2x2048xf32, #tpu.memory_space<vmem>>, vector<2x128xf32>,
    %c8_128 = arith.constant 8 : index
    %c0_129 = arith.constant 0 : index
    %178 = tpu.strided_load %arg18[%c8_128, %c0_129] {strides = array<i32: 16, 1>} : memref<32x128xf32, #tpu.memory_space<vmem>>, vector<2x128xf32>
    %c0_130 = arith.constant 0 : index
    %c1024 = arith.constant 1024 : index
    %179 = vector.load %arg19[%c0_130, %c1024] : memref<2x2048xf32, #tpu.memory_space<vmem>>, vector<2x128xf32>
    tpu.vector_store %arg19[%c0_130, %c1024], %178 {strides = array<i32>} : memref<2x2048xf32, #tpu.memory_space<vmem>>, vector<2x128xf32>,
    %c9 = arith.constant 9 : index
    %c0_131 = arith.constant 0 : index
    %180 = tpu.strided_load %arg18[%c9, %c0_131] {strides = array<i32: 16, 1>} : memref<32x128xf32, #tpu.memory_space<vmem>>, vector<2x128xf32>
    %c0_132 = arith.constant 0 : index
    %c1152 = arith.constant 1152 : index
    %181 = vector.load %arg19[%c0_132, %c1152] : memref<2x2048xf32, #tpu.memory_space<vmem>>, vector<2x128xf32>
    tpu.vector_store %arg19[%c0_132, %c1152], %180 {strides = array<i32>} : memref<2x2048xf32, #tpu.memory_space<vmem>>, vector<2x128xf32>,
    %c10 = arith.constant 10 : index
    %c0_133 = arith.constant 0 : index
    %182 = tpu.strided_load %arg18[%c10, %c0_133] {strides = array<i32: 16, 1>} : memref<32x128xf32, #tpu.memory_space<vmem>>, vector<2x128xf32>
    %c0_134 = arith.constant 0 : index
    %c1280 = arith.constant 1280 : index
    %183 = vector.load %arg19[%c0_134, %c1280] : memref<2x2048xf32, #tpu.memory_space<vmem>>, vector<2x128xf32>
    tpu.vector_store %arg19[%c0_134, %c1280], %182 {strides = array<i32>} : memref<2x2048xf32, #tpu.memory_space<vmem>>, vector<2x128xf32>,
    %c11 = arith.constant 11 : index
    %c0_135 = arith.constant 0 : index
    %184 = tpu.strided_load %arg18[%c11, %c0_135] {strides = array<i32: 16, 1>} : memref<32x128xf32, #tpu.memory_space<vmem>>, vector<2x128xf32>
    %c0_136 = arith.constant 0 : index
    %c1408 = arith.constant 1408 : index
    %185 = vector.load %arg19[%c0_136, %c1408] : memref<2x2048xf32, #tpu.memory_space<vmem>>, vector<2x128xf32>
    tpu.vector_store %arg19[%c0_136, %c1408], %184 {strides = array<i32>} : memref<2x2048xf32, #tpu.memory_space<vmem>>, vector<2x128xf32>,
    %c12 = arith.constant 12 : index
    %c0_137 = arith.constant 0 : index
    %186 = tpu.strided_load %arg18[%c12, %c0_137] {strides = array<i32: 16, 1>} : memref<32x128xf32, #tpu.memory_space<vmem>>, vector<2x128xf32>
    %c0_138 = arith.constant 0 : index
    %c1536 = arith.constant 1536 : index
    %187 = vector.load %arg19[%c0_138, %c1536] : memref<2x2048xf32, #tpu.memory_space<vmem>>, vector<2x128xf32>
    tpu.vector_store %arg19[%c0_138, %c1536], %186 {strides = array<i32>} : memref<2x2048xf32, #tpu.memory_space<vmem>>, vector<2x128xf32>,
    %c13 = arith.constant 13 : index
    %c0_139 = arith.constant 0 : index
    %188 = tpu.strided_load %arg18[%c13, %c0_139] {strides = array<i32: 16, 1>} : memref<32x128xf32, #tpu.memory_space<vmem>>, vector<2x128xf32>
    %c0_140 = arith.constant 0 : index
    %c1664 = arith.constant 1664 : index
    %189 = vector.load %arg19[%c0_140, %c1664] : memref<2x2048xf32, #tpu.memory_space<vmem>>, vector<2x128xf32>
    tpu.vector_store %arg19[%c0_140, %c1664], %188 {strides = array<i32>} : memref<2x2048xf32, #tpu.memory_space<vmem>>, vector<2x128xf32>,
    %c14 = arith.constant 14 : index
    %c0_141 = arith.constant 0 : index
    %190 = tpu.strided_load %arg18[%c14, %c0_141] {strides = array<i32: 16, 1>} : memref<32x128xf32, #tpu.memory_space<vmem>>, vector<2x128xf32>
    %c0_142 = arith.constant 0 : index
    %c1792 = arith.constant 1792 : index
    %191 = vector.load %arg19[%c0_142, %c1792] : memref<2x2048xf32, #tpu.memory_space<vmem>>, vector<2x128xf32>
    tpu.vector_store %arg19[%c0_142, %c1792], %190 {strides = array<i32>} : memref<2x2048xf32, #tpu.memory_space<vmem>>, vector<2x128xf32>,
    %c15 = arith.constant 15 : index
    %c0_143 = arith.constant 0 : index
    %192 = tpu.strided_load %arg18[%c15, %c0_143] {strides = array<i32: 16, 1>} : memref<32x128xf32, #tpu.memory_space<vmem>>, vector<2x128xf32>
    %c0_144 = arith.constant 0 : index
    %c1920 = arith.constant 1920 : index
    %193 = vector.load %arg19[%c0_144, %c1920] : memref<2x2048xf32, #tpu.memory_space<vmem>>, vector<2x128xf32>
    tpu.vector_store %arg19[%c0_144, %c1920], %192 {strides = array<i32>} : memref<2x2048xf32, #tpu.memory_space<vmem>>, vector<2x128xf32>,
    %c0_145 = arith.constant 0 : index
    %c0_146 = arith.constant 0 : index
    %194 = vector.load %arg19[%c0_145, %c0_146] : memref<2x2048xf32, #tpu.memory_space<vmem>>, vector<2x2048xf32>
    %195 = arith.truncf %194 : vector<2x2048xf32> to vector<2x2048xbf16>
    %c0_147 = arith.constant 0 : index
    %c0_148 = arith.constant 0 : index
    %196 = vector.load %arg8[%c0_147, %c0_148] : memref<2048x128xbf16, #tpu.memory_space<vmem>>, vector<2048x128xbf16>
    %cst_149 = arith.constant dense<0.000000e+00> : vector<2x128xf32>
    %197 = tpu.matmul %195, %196, %cst_149 {dimension_numbers = #tpu.dot_dimension_numbers<[1], [0], [0], [1], [0, 0, 1, 1], [], []>} : vector<2x2048xbf16>, vector<2048x128xbf16>, vector<2x128xf32> -> vector<2x128xf32>
    %c0_150 = arith.constant 0 : index
    %c0_151 = arith.constant 0 : index
    %198 = vector.load %arg9[%c0_150, %c0_151] : memref<1x128xf32, #tpu.memory_space<vmem>>, vector<1x128xf32>
    %199 = vector.broadcast %198 : vector<1x128xf32> to vector<2x128xf32>
    %200 = arith.addf %197, %199 : vector<2x128xf32>
    %cst_152 = arith.constant 0.000000e+00 : f32
    %201 = vector.broadcast %cst_152 : f32 to vector<2x128xf32>
    %202 = arith.maximumf %200, %201 : vector<2x128xf32>
    %203 = arith.truncf %202 : vector<2x128xf32> to vector<2x128xbf16>
    %c0_153 = arith.constant 0 : index
    %c0_154 = arith.constant 0 : index
    %204 = vector.load %arg10[%c0_153, %c0_154] : memref<128x10xbf16, #tpu.memory_space<vmem>>, vector<128x10xbf16>
    %cst_155 = arith.constant dense<0.000000e+00> : vector<2x10xf32>
    %205 = tpu.matmul %203, %204, %cst_155 {dimension_numbers = #tpu.dot_dimension_numbers<[1], [0], [0], [1], [0, 0, 1, 1], [], []>} : vector<2x128xbf16>, vector<128x10xbf16>, vector<2x10xf32> -> vector<2x10xf32>
    %c0_156 = arith.constant 0 : index
    %c0_157 = arith.constant 0 : index
    %206 = vector.load %arg11[%c0_156, %c0_157] : memref<1x10xf32, #tpu.memory_space<vmem>>, vector<1x10xf32>
    %207 = vector.broadcast %206 : vector<1x10xf32> to vector<2x10xf32>
    %208 = arith.addf %205, %207 : vector<2x10xf32>
    %c0_158 = arith.constant 0 : index
    %c0_159 = arith.constant 0 : index
    %209 = vector.load %arg12[%c0_158, %c0_159] : memref<2x10xf32, #tpu.memory_space<vmem>>, vector<2x10xf32>
    tpu.vector_store %arg12[%c0_158, %c0_159], %208 {strides = array<i32>} : memref<2x10xf32, #tpu.memory_space<vmem>>, vector<2x10xf32>,
    return
  }
  func.func @transform_0(%arg0: i32) -> (i32, i32) {
    %c0_i32 = arith.constant 0 : i32
    %c0_i32_0 = arith.constant 0 : i32
    %c0_i32_1 = arith.constant 0 : i32
    return %c0_i32, %c0_i32_0 : i32, i32
  }
  func.func @transform_1(%arg0: i32) -> (i32, i32) {
    %c0_i32 = arith.constant 0 : i32
    %c0_i32_0 = arith.constant 0 : i32
    %c0_i32_1 = arith.constant 0 : i32
    return %c0_i32, %c0_i32_0 : i32, i32
  }
  func.func @transform_2(%arg0: i32) -> (i32, i32) {
    %c0_i32 = arith.constant 0 : i32
    %c0_i32_0 = arith.constant 0 : i32
    %c0_i32_1 = arith.constant 0 : i32
    return %c0_i32, %c0_i32_0 : i32, i32
  }
  func.func @transform_3(%arg0: i32) -> (i32, i32, i32) {
    %c0_i32 = arith.constant 0 : i32
    %c0_i32_0 = arith.constant 0 : i32
    %c0_i32_1 = arith.constant 0 : i32
    %c0_i32_2 = arith.constant 0 : i32
    return %c0_i32, %c0_i32_0, %c0_i32_1 : i32, i32, i32
  }
  func.func @transform_4(%arg0: i32) -> (i32, i32) {
    %c0_i32 = arith.constant 0 : i32
    %c0_i32_0 = arith.constant 0 : i32
    %c0_i32_1 = arith.constant 0 : i32
    return %c0_i32, %c0_i32_0 : i32, i32
  }
  func.func @transform_5(%arg0: i32) -> (i32, i32, i32) {
    %c0_i32 = arith.constant 0 : i32
    %c0_i32_0 = arith.constant 0 : i32
    %c0_i32_1 = arith.constant 0 : i32
    %c0_i32_2 = arith.constant 0 : i32
    return %c0_i32, %c0_i32_0, %c0_i32_1 : i32, i32, i32
  }
  func.func @transform_6(%arg0: i32) -> (i32, i32) {
    %c0_i32 = arith.constant 0 : i32
    %c0_i32_0 = arith.constant 0 : i32
    %c0_i32_1 = arith.constant 0 : i32
    return %c0_i32, %c0_i32_0 : i32, i32
  }
  func.func @transform_7(%arg0: i32) -> (i32, i32) {
    %c0_i32 = arith.constant 0 : i32
    %c0_i32_0 = arith.constant 0 : i32
    %c0_i32_1 = arith.constant 0 : i32
    return %c0_i32, %c0_i32_0 : i32, i32
  }
  func.func @transform_8(%arg0: i32) -> (i32, i32) {
    %c0_i32 = arith.constant 0 : i32
    %c0_i32_0 = arith.constant 0 : i32
    %c0_i32_1 = arith.constant 0 : i32
    return %c0_i32, %c0_i32_0 : i32, i32
  }
  func.func @transform_9(%arg0: i32) -> (i32, i32) {
    %c0_i32 = arith.constant 0 : i32
    %c0_i32_0 = arith.constant 0 : i32
    %c0_i32_1 = arith.constant 0 : i32
    return %c0_i32, %c0_i32_0 : i32, i32
  }
  func.func @transform_10(%arg0: i32) -> (i32, i32) {
    %c0_i32 = arith.constant 0 : i32
    %c0_i32_0 = arith.constant 0 : i32
    %c0_i32_1 = arith.constant 0 : i32
    return %c0_i32, %c0_i32_0 : i32, i32
  }
  func.func @transform_11(%arg0: i32) -> (i32, i32) {
    %c0_i32 = arith.constant 0 : i32
    %c0_i32_0 = arith.constant 0 : i32
    %c0_i32_1 = arith.constant 0 : i32
    return %c0_i32, %c0_i32_0 : i32, i32
  }
}

</mosaic_0001>

<bundles_post_ra>
// kernel: cnn_cifar_forward.1
= control target key start
LH: loop header
LB: loop body
LE: loop exit
PB: predicated region body
PF: predicated region fallthrough
CT: control target
= control target key end

     0   :  { %vm973_vm0 = vcmask 261120   ;;  %vm2927_vm1 = vcmask 1046528   ;;  %vm3888_vm2 = vcmask 1040384   ;;  %s11934_s21 = smov 32   ;;  %s11935_s29 = smov 64   ;;  %s16134_s0 = inlined_call_operand.vmem [shape: bf16[2048,32], index: 0, kind: input, shape index: {}]   ;;  %s16135_s1 = inlined_call_operand.vmem [shape: bf16[32,32], index: 1, kind: input, shape index: {}]   ;;  %s16136_s2 = inlined_call_operand.vmem [shape: f32[1,32], index: 2, kind: input, shape index: {}]   ;;  %s16137_s3 = inlined_call_operand.vmem [shape: bf16[3,96,64], index: 3, kind: input, shape index: {}]   ;;  %s16138_s4 = inlined_call_operand.vmem [shape: f32[1,64], index: 4, kind: input, shape index: {}]   ;;  %s16139_s5 = inlined_call_operand.vmem [shape: bf16[3,192,128], index: 5, kind: input, shape index: {}]   ;;  %s16140_s6 = inlined_call_operand.vmem [shape: f32[1,128], index: 6, kind: input, shape index: {}]   ;;  %s16141_s7 = inlined_call_operand.vmem [shape: bf16[2048,128], index: 7, kind: input, shape index: {}]   ;;  %s16142_s8 = inlined_call_operand.vmem [shape: f32[1,128], index: 8, kind: input, shape index: {}]   ;;  %s16143_s9 = inlined_call_operand.vmem [shape: bf16[128,10], index: 9, kind: input, shape index: {}]   ;;  %s16144_s10 = inlined_call_operand.vmem [shape: f32[1,10], index: 10, kind: input, shape index: {}]   ;;  %s16145_s11 = inlined_call_operand.hbm [shape: f32[2,10], index: 11, kind: output, shape index: {}]  }
   0x1   :  { %v11562_v0 = vld [vmem:[%s16135_s1] sm:$0xff]   ;;  %v11563_v1 = vld [vmem:[%s16135_s1 + $0x8] sm:$0xff]   ;;  %v11566_v4 = vld [vmem:[%s16134_s0 + $0x10] sm:$0xff]  }
   0x2   :  { %10919 = vmatprep.subr.bf16.mxu0 %v11562_v0  ;;  %v11564_v2 = vld [vmem:[%s16134_s0] sm:$0xff]   ;;  %v11565_v3 = vld [vmem:[%s16134_s0 + $0x8] sm:$0xff]   ;;  %v11567_v5 = vld [vmem:[%s16134_s0 + $0x18] sm:$0xff]  }
   0x3   :  { %10920 = vmatpush3.bf16.msra.mxu0 %v11562_v0  ;;  %10923 = vmatprep.mubr.msk.bf16.mxu0 %vm973_vm0, %v11564_v2  ;;  %v11568_v6 = vld [vmem:[%s16134_s0 + $0x20] sm:$0xff]   ;;  %v11569_v7 = vld [vmem:[%s16134_s0 + $0x28] sm:$0xff]   ;;  %v11570_v8 = vld [vmem:[%s16134_s0 + $0x30] sm:$0xff]  }
   0x4   :  { %10921 = vmatprep.subr.bf16.mxu0 %v11563_v1  ;;  %v11571_v9 = vld [vmem:[%s16134_s0 + $0x38] sm:$0xff]   ;;  %v11572_v10 = vld [vmem:[%s16134_s0 + $0x40] sm:$0xff]   ;;  %v11573_v11 = vld [vmem:[%s16134_s0 + $0x48] sm:$0xff]  }
   0x5   :  { %v11574_v12 = vld [vmem:[%s16134_s0 + $0x50] sm:$0xff]   ;;  %v11575_v13 = vld [vmem:[%s16134_s0 + $0x58] sm:$0xff]   ;;  %v11576_v14 = vld [vmem:[%s16134_s0 + $0x60] sm:$0xff]  }
   0x6   :  { %v11577_v15 = vld [vmem:[%s16134_s0 + $0x68] sm:$0xff]   ;;  %v11578_v16 = vld [vmem:[%s16134_s0 + $0x70] sm:$0xff]   ;;  %v11579_v17 = vld [vmem:[%s16134_s0 + $0x78] sm:$0xff]  }
   0x7   :  { %10922 = vmatpush3.bf16.msra.mxu0 %v11563_v1  ;;  %v11580_v18 = vld [vmem:[%s16134_s0 + $0x80] sm:$0xff]   ;;  %v11581_v19 = vld [vmem:[%s16134_s0 + $0x88] sm:$0xff]   ;;  %v11582_v20 = vld [vmem:[%s16134_s0 + $0x90] sm:$0xff]  }
   0x8   :  { %v11583_v21 = vld [vmem:[%s16134_s0 + $0x98] sm:$0xff]   ;;  %v11584_v22 = vld [vmem:[%s16134_s0 + $0xa0] sm:$0xff]   ;;  %v11585_v23 = vld [vmem:[%s16134_s0 + $0xa8] sm:$0xff]  }
   0x9   :  { %v11586_v24 = vld [vmem:[%s16134_s0 + $0xb0] sm:$0xff]   ;;  %v11587_v25 = vld [vmem:[%s16134_s0 + $0xb8] sm:$0xff]   ;;  %v11588_v26 = vld [vmem:[%s16134_s0 + $0xc0] sm:$0xff]  }
   0xa   :  { %10924 = vmatmul.mubr.msk.bf16.vlgmr.msra.gmra.mrb[0].mxu0 %vm973_vm0, %v11565_v3  ;;  %v11589_v27 = vld [vmem:[%s16134_s0 + $0xc8] sm:$0xff]   ;;  %v11590_v28 = vld [vmem:[%s16134_s0 + $0xd0] sm:$0xff]   ;;  %v11591_v29 = vld [vmem:[%s16134_s0 + $0xd8] sm:$0xff]  }
   0xb   :  { %10927 = vmatprep.mubr.msk.bf16.mxu0 %vm973_vm0, %v11566_v4  ;;  %v11592_v30 = vld [vmem:[%s16134_s0 + $0xe0] sm:$0xff]   ;;  %v11593_v31 = vld [vmem:[%s16134_s0 + $0xe8] sm:$0xff]   ;;  %v11594_v32 = vld [vmem:[%s16134_s0 + $0xf0] sm:$0xff]  }
   0xc   :  { %v11595_v33 = vld [vmem:[%s16134_s0 + $0xf8] sm:$0xff]   ;;  %v11596_v34 = vld [vmem:[%s16134_s0 + $0x100] sm:$0xff]   ;;  %v11597_v35 = vld [vmem:[%s16134_s0 + $0x108] sm:$0xff]  }
   0xd   :  { %v11598_v36 = vld [vmem:[%s16134_s0 + $0x110] sm:$0xff]   ;;  %v11599_v37 = vld [vmem:[%s16134_s0 + $0x118] sm:$0xff]   ;;  %v11600_v38 = vld [vmem:[%s16134_s0 + $0x120] sm:$0xff]  }
   0xe   :  { %v11601_v39 = vld [vmem:[%s16134_s0 + $0x128] sm:$0xff]   ;;  %v11602_v40 = vld [vmem:[%s16134_s0 + $0x130] sm:$0xff]   ;;  %v11603_v41 = vld [vmem:[%s16134_s0 + $0x138] sm:$0xff]  }
   0xf   :  { %v11604_v42 = vld [vmem:[%s16134_s0 + $0x140] sm:$0xff]   ;;  %v11605_v43 = vld [vmem:[%s16134_s0 + $0x148] sm:$0xff]   ;;  %v11606_v44 = vld [vmem:[%s16134_s0 + $0x150] sm:$0xff]  }
  0x10   :  { %v11607_v45 = vld [vmem:[%s16134_s0 + $0x158] sm:$0xff]   ;;  %v11608_v46 = vld [vmem:[%s16134_s0 + $0x160] sm:$0xff]   ;;  %v11609_v47 = vld [vmem:[%s16134_s0 + $0x168] sm:$0xff]  }
  0x11   :  { %v11610_v48 = vld [vmem:[%s16134_s0 + $0x170] sm:$0xff]   ;;  %v11611_v49 = vld [vmem:[%s16134_s0 + $0x178] sm:$0xff]   ;;  %v11612_v50 = vld [vmem:[%s16134_s0 + $0x180] sm:$0xff]  }
  0x12   :  { %10928 = vmatmul.mubr.msk.bf16.gmra.mrb[4].mxu0 %vm973_vm0, %v11567_v5  ;;  %v11613_v51 = vld [vmem:[%s16134_s0 + $0x188] sm:$0xff]   ;;  %v11614_v52 = vld [vmem:[%s16134_s0 + $0x190] sm:$0xff]   ;;  %v11615_v53 = vld [vmem:[%s16134_s0 + $0x198] sm:$0xff]  }
  0x13   :  { %10931 = vmatprep.mubr.msk.bf16.mxu0 %vm973_vm0, %v11568_v6  ;;  %v11616_v54 = vld [vmem:[%s16134_s0 + $0x1a0] sm:$0xff]   ;;  %v11617_v55 = vld [vmem:[%s16134_s0 + $0x1a8] sm:$0xff]   ;;  %v11618_v56 = vld [vmem:[%s16134_s0 + $0x1b0] sm:$0xff]  }
  0x14   :  { %v11619_v59 = vld [vmem:[%s16134_s0 + $0x1b8] sm:$0xff]   ;;  %v12233_v60 = vld [vmem:[%s16136_s2] ss:$0 sm:$0xff]  ;;  %v11621_v3 = vld [vmem:[%s16134_s0 + $0x1c8] sm:$0xff]  }
  0x15   :  { %v11620_v62 = vld [vmem:[%s16134_s0 + $0x1c0] sm:$0xff]  }
  0x1a   :  { %10932 = vmatmul.mubr.msk.bf16.gmra.mrb[8].mxu0 %vm973_vm0, %v11569_v7  ;;  %v11622_v7 = vld [vmem:[%s16134_s0 + $0x1d0] sm:$0xff]  }
  0x1b   :  { %10935 = vmatprep.mubr.msk.bf16.mxu0 %vm973_vm0, %v11570_v8 }
  0x22   :  { %10936 = vmatmul.mubr.msk.bf16.gmra.mrb[12].mxu0 %vm973_vm0, %v11571_v9 }
  0x23   :  { %10939 = vmatprep.mubr.msk.bf16.mxu0 %vm973_vm0, %v11572_v10 }
  0x2a   :  { %10940 = vmatmul.mubr.msk.bf16.gmra.mrb[16].mxu0 %vm973_vm0, %v11573_v11 }
  0x2b   :  { %10943 = vmatprep.mubr.msk.bf16.mxu0 %vm973_vm0, %v11574_v12 }
  0x32   :  { %10944 = vmatmul.mubr.msk.bf16.gmra.mrb[20].mxu0 %vm973_vm0, %v11575_v13 }
  0x33   :  { %10947 = vmatprep.mubr.msk.bf16.mxu0 %vm973_vm0, %v11576_v14 }
  0x3a   :  { %10948 = vmatmul.mubr.msk.bf16.gmra.mrb[24].mxu0 %vm973_vm0, %v11577_v15 }
  0x3b   :  { %10951 = vmatprep.mubr.msk.bf16.mxu0 %vm973_vm0, %v11578_v16 }
  0x42   :  { %10952 = vmatmul.mubr.msk.bf16.gmra.mrb[28].mxu0 %vm973_vm0, %v11579_v17 }
  0x43   :  { %10955 = vmatprep.mubr.msk.bf16.mxu0 %vm973_vm0, %v11580_v18 }
  0x4a   :  { %10956 = vmatmul.mubr.msk.bf16.gmra.mrb[32].mxu0 %vm973_vm0, %v11581_v19 }
  0x4b   :  { %10959 = vmatprep.mubr.msk.bf16.mxu0 %vm973_vm0, %v11582_v20 }
  0x52   :  { %10960 = vmatmul.mubr.msk.bf16.gmra.mrb[36].mxu0 %vm973_vm0, %v11583_v21 }
  0x53   :  { %10963 = vmatprep.mubr.msk.bf16.mxu0 %vm973_vm0, %v11584_v22 }
  0x5a   :  { %10964 = vmatmul.mubr.msk.bf16.gmra.mrb[40].mxu0 %vm973_vm0, %v11585_v23 }
  0x5b   :  { %10967 = vmatprep.mubr.msk.bf16.mxu0 %vm973_vm0, %v11586_v24 }
  0x62   :  { %10968 = vmatmul.mubr.msk.bf16.gmra.mrb[44].mxu0 %vm973_vm0, %v11587_v25 }
  0x63   :  { %10971 = vmatprep.mubr.msk.bf16.mxu0 %vm973_vm0, %v11588_v26 }
  0x6a   :  { %10972 = vmatmul.mubr.msk.bf16.gmra.mrb[48].mxu0 %vm973_vm0, %v11589_v27 }
  0x6b   :  { %10975 = vmatprep.mubr.msk.bf16.mxu0 %vm973_vm0, %v11590_v28  ;;  %v11623_v28 = vld [vmem:[%s16134_s0 + $0x1d8] sm:$0xff]  }
  0x72   :  { %10976 = vmatmul.mubr.msk.bf16.gmra.mrb[52].mxu0 %vm973_vm0, %v11591_v29 }
  0x73   :  { %10979 = vmatprep.mubr.msk.bf16.mxu0 %vm973_vm0, %v11592_v30 }
  0x7a   :  { %10980 = vmatmul.mubr.msk.bf16.gmra.mrb[56].mxu0 %vm973_vm0, %v11593_v31 }
  0x7b   :  { %10983 = vmatprep.mubr.msk.bf16.mxu0 %vm973_vm0, %v11594_v32 }
  0x82   :  { %10984 = vmatmul.mubr.msk.bf16.gmra.mrb[60].mxu0 %vm973_vm0, %v11595_v33 }
  0x83   :  { %10987 = vmatprep.mubr.msk.bf16.mxu0 %vm973_vm0, %v11596_v34  ;;  %v11624_v34 = vld [vmem:[%s16134_s0 + $0x1e0] sm:$0xff]  }
  0x8a   :  { %10988 = vmatmul.mubr.msk.bf16.gmra.mrb[64].mxu0 %vm973_vm0, %v11597_v35 }
  0x8b   :  { %10991 = vmatprep.mubr.msk.bf16.mxu0 %vm973_vm0, %v11598_v36 }
  0x92   :  { %10992 = vmatmul.mubr.msk.bf16.gmra.mrb[68].mxu0 %vm973_vm0, %v11599_v37 }
  0x93   :  { %10995 = vmatprep.mubr.msk.bf16.mxu0 %vm973_vm0, %v11600_v38 }
  0x9a   :  { %10996 = vmatmul.mubr.msk.bf16.gmra.mrb[72].mxu0 %vm973_vm0, %v11601_v39 }
  0x9b   :  { %10999 = vmatprep.mubr.msk.bf16.mxu0 %vm973_vm0, %v11602_v40  ;;  %v3695_v40 = vlaneseq }
  0xa2   :  { %11000 = vmatmul.mubr.msk.bf16.gmra.mrb[76].mxu0 %vm973_vm0, %v11603_v41 }
  0xa3   :  { %11003 = vmatprep.mubr.msk.bf16.mxu0 %vm973_vm0, %v11604_v42 }
  0xaa   :  { %11004 = vmatmul.mubr.msk.bf16.gmra.mrb[80].mxu0 %vm973_vm0, %v11605_v43 }
  0xab   :  { %11007 = vmatprep.mubr.msk.bf16.mxu0 %vm973_vm0, %v11606_v44  ;;  %v11625_v44 = vld [vmem:[%s16134_s0 + $0x1e8] sm:$0xff]  }
  0xb2   :  { %11008 = vmatmul.mubr.msk.bf16.gmra.mrb[84].mxu0 %vm973_vm0, %v11607_v45 }
  0xb3   :  { %11011 = vmatprep.mubr.msk.bf16.mxu0 %vm973_vm0, %v11608_v46 }
  0xba   :  { %11012 = vmatmul.mubr.msk.bf16.gmra.mrb[88].mxu0 %vm973_vm0, %v11609_v47  ;;  %v12278_v47 = vshrl.u32 %v3695_v40, 7 }
  0xbb   :  { %11015 = vmatprep.mubr.msk.bf16.mxu0 %vm973_vm0, %v11610_v48 }
  0xc2   :  { %11016 = vmatmul.mubr.msk.bf16.gmra.mrb[92].mxu0 %vm973_vm0, %v11611_v49 }
  0xc3   :  { %11019 = vmatprep.mubr.msk.bf16.mxu0 %vm973_vm0, %v11612_v50 }
  0xca   :  { %11020 = vmatmul.mubr.msk.bf16.gmra.mrb[96].mxu0 %vm973_vm0, %v11613_v51  ;;  %v11626_v51 = vld [vmem:[%s16134_s0 + $0x1f0] sm:$0xff]  }
  0xcb   :  { %11023 = vmatprep.mubr.msk.bf16.mxu0 %vm973_vm0, %v11614_v52 }
  0xd2   :  { %11024 = vmatmul.mubr.msk.bf16.gmra.mrb[100].mxu0 %vm973_vm0, %v11615_v53 }
  0xd3   :  { %11027 = vmatprep.mubr.msk.bf16.mxu0 %vm973_vm0, %v11616_v54 }
  0xda   :  { %11028 = vmatmul.mubr.msk.bf16.gmra.mrb[104].mxu0 %vm973_vm0, %v11617_v55 }
  0xdb   :  { %11031 = vmatprep.mubr.msk.bf16.mxu0 %vm973_vm0, %v11618_v56 }
  0xdd   :  { %v10925_v57 = vpop.f32.mrb[0].mxu0 }
  0xde   :  { %v1392_v58 = vpop.f32.mrb[1].mxu0  ;;  %v1401_v0 = vadd.f32 %v10925_v57, %v12233_v60 }
  0xdf   :  { %v10926_v61 = vpop.f32.mrb[2].mxu0  ;;  %v1393_v1 = vadd.f32 %v12233_v60, %v1392_v58 }
  0xe0   :  { %v1395_v63 = vpop.f32.mrb[3].mxu0  ;;  %v1404_v4 = vadd.f32 %v10926_v61, %v12233_v60  ;;  %v2417_v8 = vmax.f32 %v1401_v0, 0.0 }
  0xe1   :  { %v1396_v9 = vadd.f32 %v12233_v60, %v1395_v63  ;;  %v2415_v15 = vmax.f32 %v1393_v1, 0.0 }
  0xe2   :  { %11032 = vmatmul.mubr.msk.bf16.gmra.mrb[108].mxu0 %vm973_vm0, %v11619_v59  ;;  %v2418_v18 = vmax.f32 %v1404_v4, 0.0 }
  0xe3   :  { %11035 = vmatprep.mubr.msk.bf16.mxu0 %vm973_vm0, %v11620_v62  ;;  %v2416_v21 = vmax.f32 %v1396_v9, 0.0 }
  0xe5   :  { %v10929_v2 = vpop.f32.mrb[4].mxu0 }
  0xe6   :  { %v1417_v5 = vadd.f32 %v10929_v2, %v12233_v60  ;;  %v1408_v6 = vpop.f32.mrb[5].mxu0 }
  0xe7   :  { %v1409_v10 = vadd.f32 %v12233_v60, %v1408_v6  ;;  %v10930_v11 = vpop.f32.mrb[6].mxu0  ;;  %v12294_v6 = vadd.s32 8, %v12278_v47 }
  0xe8   :  { %v2421_v12 = vmax.f32 %v1417_v5, 0.0  ;;  %v1420_v13 = vadd.f32 %v10930_v11, %v12233_v60  ;;  %v1411_v14 = vpop.f32.mrb[7].mxu0 }
  0xe9   :  { %v2419_v16 = vmax.f32 %v1409_v10, 0.0  ;;  %v1412_v17 = vadd.f32 %v12233_v60, %v1411_v14  ;;  %v11627_v14 = vld [vmem:[%s16134_s0 + $0x1f8] sm:$0xff]  }
  0xea   :  { %v2673_v19 = vmax.f32 %v2417_v8, %v2421_v12  ;;  %v2422_v20 = vmax.f32 %v1420_v13, 0.0  ;;  %11036 = vmatmul.mubr.msk.bf16.gmra.mrb[112].mxu0 %vm973_vm0, %v11621_v3 }
  0xeb   :  { %v2671_v22 = vmax.f32 %v2415_v15, %v2419_v16  ;;  %v2420_v23 = vmax.f32 %v1412_v17, 0.0  ;;  %11039 = vmatprep.mubr.msk.bf16.mxu0 %vm973_vm0, %v11622_v7 }
  0xec   :  { %v12256_v24 = vmax.f32 %v2418_v18, %v2422_v20  ;;  %v2931_v25 = vrot.slane %v2673_v19, 1  ;;  %v11628_v18 = vld [vmem:[%s16134_s0 + $0x200] sm:$0xff]  }
  0xed   :  { %v2672_v26 = vmax.f32 %v2416_v21, %v2420_v23  ;;  %v10933_v27 = vpop.f32.mrb[8].mxu0  ;;  %v2928_v31 = vrot.slane %v2671_v22, 1  ;;  %v3761_v23 = vand.u32 15, %v12294_v6 }
  0xee   :  { %v2933_v29 = vrot.slane %v12256_v24, 1  ;;  %v1424_v30 = vpop.f32.mrb[9].mxu0  ;;  %v1433_v43 = vadd.f32 %v10933_v27, %v12233_v60 }
  0xef   :  { %v2929_v32 = vrot.slane %v2672_v26, 1  ;;  %v10934_v33 = vpop.f32.mrb[10].mxu0  ;;  %v1425_v45 = vadd.f32 %v12233_v60, %v1424_v30  ;;  %vm12336_vm4 = vcmp.ne.s32.totalorder %v3761_v23, 15 }
  0xf0   :  { %v2934_v35 = vsel %vm2927_vm1, %v2931_v25, %v2933_v29  ;;  %v1427_v36 = vpop.f32.mrb[11].mxu0  ;;  %v1436_v48 = vadd.f32 %v10934_v33, %v12233_v60  ;;  %v2425_v52 = vmax.f32 %v1433_v43, 0.0  ;;  %v12330_v33 = vadd.s32 16, %v12278_v47 }
  0xf1   :  { %v3314_v37 = vmax.f32 %v2673_v19, %v2934_v35  ;;  %v2930_v38 = vsel %vm2927_vm1, %v2928_v31, %v2929_v32  ;;  %v2932_v39 = vsel %vm2927_vm1, %v2929_v32, %v2931_v25  ;;  %v1428_v53 = vadd.f32 %v12233_v60, %v1427_v36  ;;  %v11629_v32 = vld [vmem:[%s16134_s0 + $0x208] sm:$0xff]   ;;  %v11630_v36 = vld [vmem:[%s16134_s0 + $0x210] sm:$0xff]  }
  0xf2   :  { %v3312_v41 = vmax.f32 %v2671_v22, %v2930_v38  ;;  %v3313_v42 = vmax.f32 %v2672_v26, %v2932_v39  ;;  %11040 = vmatmul.mubr.msk.bf16.gmra.mrb[116].mxu0 %vm973_vm0, %v11623_v28  ;;  %v2423_v59 = vmax.f32 %v1425_v45, 0.0  ;;  %v2426_v63 = vmax.f32 %v1436_v48, 0.0 }
  0xf3   :  { %3442 = vst.msk [vmem:[#allocation4 + $0x10] sm:$0xff] %vm973_vm0, %v3314_v37  ;;  %11043 = vmatprep.mubr.msk.bf16.mxu0 %vm973_vm0, %v11624_v34  ;;  %v2424_v2 = vmax.f32 %v1428_v53, 0.0  ;;  %v3760_v19 = vand.u32 15, %v12278_v47  ;;  %v12408_v37 = vadd.s32 24, %v12278_v47 }
  0xf4   :  { %3440 = vst.msk [vmem:[#allocation4] sm:$0xff] %vm973_vm0, %v3312_v41  ;;  %3441 = vst.msk [vmem:[#allocation4 + $0x8] sm:$0xff] %vm973_vm0, %v3313_v42  ;;  %v11660_v42 = vld [vmem:[%s16137_s3 + $0x30] sm:$0xff]  }
  0xf5   :  { %v10937_v46 = vpop.f32.mrb[12].mxu0  ;;  %vm12320_vm3 = vcmp.ne.s32.totalorder %v3760_v19, 0  ;;  %11179 = vmatprep.subr.bf16.mxu1 %v11660_v42 }
  0xf6   :  { %v1449_v49 = vadd.f32 %v10937_v46, %v12233_v60  ;;  %v1440_v50 = vpop.f32.mrb[13].mxu0  ;;  %11180 = vmatpush3.bf16.msra.mxu1 %v11660_v42 }
  0xf7   :  { %v1441_v54 = vadd.f32 %v12233_v60, %v1440_v50  ;;  %v10938_v55 = vpop.f32.mrb[14].mxu0 }
  0xf8   :  { %v2429_v56 = vmax.f32 %v1449_v49, 0.0  ;;  %v1452_v57 = vadd.f32 %v10938_v55, %v12233_v60  ;;  %v1443_v58 = vpop.f32.mrb[15].mxu0 }
  0xf9   :  { %v2427_v61 = vmax.f32 %v1441_v54, 0.0  ;;  %v1444_v62 = vadd.f32 %v12233_v60, %v1443_v58 }
  0xfa   :  { %v2677_v0 = vmax.f32 %v2425_v52, %v2429_v56  ;;  %v2430_v1 = vmax.f32 %v1452_v57, 0.0  ;;  %11044 = vmatmul.mubr.msk.bf16.gmra.mrb[120].mxu0 %vm973_vm0, %v11625_v44 }
  0xfb   :  { %v2675_v3 = vmax.f32 %v2423_v59, %v2427_v61  ;;  %v2428_v4 = vmax.f32 %v1444_v62, 0.0  ;;  %11047 = vmatprep.mubr.msk.bf16.mxu0 %vm973_vm0, %v11626_v51  ;;  %v12296_v10 = vld [vmem:[#allocation4] ss:$2 sm:$0xff]  ;;  %v11662_v59 = vld [vmem:[%s16137_s3 + $0x38] sm:$0xff]  }
  0xfc   :  { %v12291_v5 = vmax.f32 %v2426_v63, %v2430_v1  ;;  %v2939_v11 = vrot.slane %v2677_v0, 1  ;;  %v3889_v28 = vrot.slane %v12296_v10, 7  ;;  %11181 = vmatprep.subr.bf16.mxu1 %v11662_v59  ;;  %v4081_v23 = vrot.slane %v12296_v10, 1 }
  0xfd   :  { %v2935_v7 = vrot.slane %v2675_v3, 1  ;;  %v2676_v8 = vmax.f32 %v2424_v2, %v2428_v4  ;;  %v10941_v9 = vpop.f32.mrb[16].mxu0  ;;  %11182 = vmatpush3.bf16.msra.mxu1 %v11662_v59 }
  0xfe   :  { %v2941_v12 = vrot.slane %v12291_v5, 1  ;;  %v1456_v13 = vpop.f32.mrb[17].mxu0  ;;  %v4080_v38 = vsel %vm3888_vm2, 0.0, %v3889_v28 }
  0xff   :  { %v2936_v15 = vsel %vm2927_vm1, %v2933_v29, %v2935_v7  ;;  %v2937_v16 = vrot.slane %v2676_v8, 1  ;;  %v10942_v17 = vpop.f32.mrb[18].mxu0  ;;  %v1457_v34 = vadd.f32 %v12233_v60, %v1456_v13 }
 0x100   :  { %v3315_v20 = vmax.f32 %v12256_v24, %v2936_v15  ;;  %v2942_v21 = vsel %vm2927_vm1, %v2939_v11, %v2941_v12  ;;  %v1459_v22 = vpop.f32.mrb[19].mxu0  ;;  %v1465_v24 = vadd.f32 %v10941_v9, %v12233_v60  ;;  %v1468_v39 = vadd.f32 %v10942_v17, %v12233_v60 }
 0x101   :  { %v3318_v25 = vmax.f32 %v2677_v0, %v2942_v21  ;;  %v2938_v26 = vsel %vm2927_vm1, %v2935_v7, %v2937_v16  ;;  %v2940_v27 = vsel %vm2927_vm1, %v2937_v16, %v2939_v11  ;;  %v1460_v44 = vadd.f32 %v12233_v60, %v1459_v22  ;;  %v11631_v11 = vld [vmem:[%s16134_s0 + $0x218] sm:$0xff]  }
 0x102   :  { %3443 = vst.msk [vmem:[#allocation4 + $0x18] sm:$0xff] %vm973_vm0, %v3315_v20  ;;  %v3316_v29 = vmax.f32 %v2675_v3, %v2938_v26  ;;  %v3317_v30 = vmax.f32 %v2676_v8, %v2940_v27  ;;  %11048 = vmatmul.mubr.msk.bf16.gmra.mrb[124].mxu0 %vm973_vm0, %v11627_v14  ;;  %v2433_v43 = vmax.f32 %v1465_v24, 0.0  ;;  %v2431_v51 = vmax.f32 %v1457_v34, 0.0  ;;  %v11664_v20 = vld [vmem:[%s16137_s3 + $0x40] sm:$0xff]  }
 0x103   :  { %3446 = vst.msk [vmem:[#allocation4 + $0x30] sm:$0xff] %vm973_vm0, %v3318_v25  ;;  %11051 = vmatprep.mubr.msk.bf16.mxu0 %vm973_vm0, %v11628_v18  ;;  %v2434_v55 = vmax.f32 %v1468_v39, 0.0  ;;  %v2432_v61 = vmax.f32 %v1460_v44, 0.0  ;;  %v4465_v14 = vsel %vm12320_vm3, %v4080_v38, 0.0  ;;  %v11632_v26 = vld [vmem:[%s16134_s0 + $0x220] sm:$0xff]   ;;  %11183 = vmatprep.subr.bf16.mxu1 %v11664_v20  ;;  %v11666_v38 = vld [vmem:[%s16137_s3 + $0x48] sm:$0xff]  }
 0x104   :  { %3444 = vst.msk [vmem:[#allocation4 + $0x20] sm:$0xff] %vm973_vm0, %v3316_v29  ;;  %3445 = vst.msk [vmem:[#allocation4 + $0x28] sm:$0xff] %vm973_vm0, %v3317_v30  ;;  %11184 = vmatpush3.bf16.msra.mxu1 %v11664_v20  ;;  %v11633_v44 = vld [vmem:[%s16134_s0 + $0x228] sm:$0xff]  }
 0x105   :  { %v10945_v35 = vpop.f32.mrb[20].mxu0  ;;  %11185 = vmatprep.subr.bf16.mxu1 %v11666_v38 }
 0x106   :  { %v1481_v40 = vadd.f32 %v10945_v35, %v12233_v60  ;;  %v1472_v41 = vpop.f32.mrb[21].mxu0  ;;  %v3762_v35 = vand.u32 15, %v12330_v33 }
 0x107   :  { %v1473_v45 = vadd.f32 %v12233_v60, %v1472_v41  ;;  %v10946_v46 = vpop.f32.mrb[22].mxu0 }
 0x108   :  { %v2437_v48 = vmax.f32 %v1481_v40, 0.0  ;;  %v1484_v49 = vadd.f32 %v10946_v46, %v12233_v60  ;;  %v1475_v50 = vpop.f32.mrb[23].mxu0 }
 0x109   :  { %v2435_v52 = vmax.f32 %v1473_v45, 0.0  ;;  %v1476_v53 = vadd.f32 %v12233_v60, %v1475_v50  ;;  %v12350_v54 = vld [vmem:[#allocation4 + $0x10] ss:$2 sm:$0xff] }
 0x10a   :  { %v2681_v56 = vmax.f32 %v2433_v43, %v2437_v48  ;;  %v2438_v57 = vmax.f32 %v1484_v49, 0.0  ;;  %11052 = vmatmul.mubr.msk.bf16.gmra.mrb[128].mxu0 %vm973_vm0, %v11629_v32  ;;  %v3890_v58 = vrot.slane %v12350_v54, 7  ;;  %v4849_v0 = vpack.c.bf16 %v12350_v54, %v12296_v10 }
 0x10b   :  { %v2679_v62 = vmax.f32 %v2431_v51, %v2435_v52  ;;  %v2436_v63 = vmax.f32 %v1476_v53, 0.0  ;;  %11055 = vmatprep.mubr.msk.bf16.mxu0 %vm973_vm0, %v11630_v36  ;;  %v12360_v1 = vld [vmem:[#allocation4 + $0x20] ss:$2 sm:$0xff]  ;;  %v4082_v3 = vrot.slane %v12350_v54, 1 }
 0x10c   :  { %v12362_v2 = vmax.f32 %v2434_v55, %v2438_v57  ;;  %v4084_v4 = vrot.slane %v12360_v1, 1  ;;  %4913 = vrot.lane.b32.xlu0 %v4849_v0, %s11934_s21  ;;  %v3891_v13 = vsel %vm3888_vm2, %v3889_v28, %v3890_v58  ;;  %v2947_v15 = vrot.slane %v2681_v56, 1 }
 0x10d   :  { %v2943_v7 = vrot.slane %v2679_v62, 1  ;;  %v2680_v8 = vmax.f32 %v2432_v61, %v2436_v63  ;;  %v10949_v9 = vpop.f32.mrb[24].mxu0  ;;  %v4785_v19 = vpack.c.bf16 %v3891_v13, %v4465_v14  ;;  %v4083_v32 = vsel %vm2927_vm1, %v4081_v23, %v4082_v3 }
 0x10e   :  { %v2949_v16 = vrot.slane %v12362_v2, 1  ;;  %v1488_v17 = vpop.f32.mrb[25].mxu0  ;;  %v4085_v18 = vsel %vm2927_vm1, %v4082_v3, %v4084_v4  ;;  %v1497_v36 = vadd.f32 %v10949_v9, %v12233_v60  ;;  %v3892_v45 = vrot.slane %v12360_v1, 7 }
 0x10f   :  { %v2944_v21 = vsel %vm2927_vm1, %v2941_v12, %v2943_v7  ;;  %v2945_v22 = vrot.slane %v2680_v8, 1  ;;  %v10950_v25 = vpop.f32.mrb[26].mxu0  ;;  %v4722_v30 = vsel %vm12336_vm4, %v4085_v18, 0.0  ;;  %4817 = vst.msk [vmem:[#allocation2 + $0x8] sm:$0xff] %vm973_vm0, %v4785_v19  ;;  %v1489_v39 = vadd.f32 %v12233_v60, %v1488_v17 }
 0x110   :  { %v3319_v27 = vmax.f32 %v12291_v5, %v2944_v21  ;;  %v2950_v28 = vsel %vm2927_vm1, %v2947_v15, %v2949_v16  ;;  %v1491_v29 = vpop.f32.mrb[27].mxu0  ;;  %v5042_v34 = vpack.c.bf16 %v4722_v30, %v4083_v32  ;;  %v1500_v40 = vadd.f32 %v10950_v25, %v12233_v60 }
 0x111   :  { %v3322_v12 = vmax.f32 %v2681_v56, %v2950_v28  ;;  %v2946_v10 = vsel %vm2927_vm1, %v2943_v7, %v2945_v22  ;;  %v2948_v24 = vsel %vm2927_vm1, %v2945_v22, %v2947_v15 }
 0x112   :  { %3447 = vst.msk [vmem:[#allocation4 + $0x38] sm:$0xff] %vm973_vm0, %v3319_v27  ;;  %v3320_v5 = vmax.f32 %v2679_v62, %v2946_v10  ;;  %v3321_v31 = vmax.f32 %v2680_v8, %v2948_v24  ;;  %11056 = vmatmul.mubr.msk.bf16.gmra.mrb[132].mxu0 %vm973_vm0, %v11631_v11  ;;  %5106 = vrot.lane.b32.xlu1 %v5042_v34, %s11935_s29 }
 0x113   :  { %3450 = vst.msk [vmem:[#allocation4 + $0x50] sm:$0xff] %vm973_vm0, %v3322_v12  ;;  %11059 = vmatprep.mubr.msk.bf16.mxu0 %vm973_vm0, %v11632_v26 }
 0x114   :  { %3448 = vst.msk [vmem:[#allocation4 + $0x40] sm:$0xff] %vm973_vm0, %v3320_v5  ;;  %3449 = vst.msk [vmem:[#allocation4 + $0x48] sm:$0xff] %vm973_vm0, %v3321_v31 }
 0x115   :  { %v10953_v41 = vpop.f32.mrb[28].mxu0 }
 0x116   :  { %v1513_v42 = vadd.f32 %v10953_v41, %v12233_v60  ;;  %v1504_v43 = vpop.f32.mrb[29].mxu0 }
 0x117   :  { %16 = vsyncpa [#allocation10], 0  ;;  %v1492_v46 = vadd.f32 %v12233_v60, %v1491_v29  ;;  %v1505_v48 = vadd.f32 %v12233_v60, %v1504_v43  ;;  %v10954_v49 = vpop.f32.mrb[30].mxu0  ;;  %v11634_v50 = vld [vmem:[%s16134_s0 + $0x230] sm:$0xff]   ;;  %vm12426_vm5 = vcmp.ne.s32.totalorder %v3762_v35, 0  ;;  %11186 = vmatpush3.bf16.msra.mxu1 %v11666_v38  ;;  %v2441_v52 = vmax.f32 %v1497_v36, 0.0 }
 0x118   :  { %v2445_v53 = vmax.f32 %v1513_v42, 0.0  ;;  %v1516_v55 = vadd.f32 %v10954_v49, %v12233_v60  ;;  %v1507_v56 = vpop.f32.mrb[31].mxu0  ;;  %v3763_v57 = vand.u32 15, %v12408_v37  ;;  %v11668_v59 = vld [vmem:[%s16137_s3 + $0x50] sm:$0xff]   ;;  %v2439_v61 = vmax.f32 %v1489_v39, 0.0  ;;  %v11670_v21 = vld [vmem:[%s16137_s3 + $0x58] sm:$0xff]  }
 0x119   :  { %v2442_v62 = vmax.f32 %v1500_v40, 0.0  ;;  %v2443_v63 = vmax.f32 %v1505_v48, 0.0  ;;  %v1508_v0 = vadd.f32 %v12233_v60, %v1507_v56  ;;  %v12436_v3 = vld [vmem:[#allocation4 + $0x30] ss:$2 sm:$0xff]  ;;  %v3893_v11 = vsel %vm3888_vm2, %v3890_v58, %v3892_v45  ;;  %11187 = vmatprep.subr.bf16.mxu1 %v11668_v59  ;;  %v11636_v34 = vld [vmem:[%s16134_s0 + $0x240] sm:$0xff]   ;;  %s11940_s17 = smov [#allocation9]  }
 0x11a   :  { %v2685_v7 = vmax.f32 %v2441_v52, %v2445_v53  ;;  %v2446_v8 = vmax.f32 %v1516_v55, 0.0  ;;  %11060 = vmatmul.mubr.msk.bf16.gmra.mrb[136].mxu0 %vm973_vm0, %v11633_v44  ;;  %v3894_v9 = vrot.slane %v12436_v3, 7  ;;  %v2440_v13 = vmax.f32 %v1492_v46, 0.0  ;;  %v11635_v12 = vld [vmem:[%s16134_s0 + $0x238] sm:$0xff]   ;;  %v11637_v53 = vld [vmem:[%s16134_s0 + $0x248] sm:$0xff]  }
 0x11b   :  { %v2683_v14 = vmax.f32 %v2439_v61, %v2443_v63  ;;  %v2444_v15 = vmax.f32 %v1508_v0, 0.0  ;;  %v4850_v17 = vpack.c.bf16 %v12436_v3, %v12360_v1  ;;  %11063 = vmatprep.mubr.msk.bf16.mxu0 %vm973_vm0, %v11634_v50  ;;  %v12446_v18 = vld [vmem:[#allocation4 + $0x40] ss:$2 sm:$0xff]  ;;  %11188 = vmatpush3.bf16.msra.mxu1 %v11668_v59  ;;  %v4086_v20 = vrot.slane %v12436_v3, 1  ;;  %v11638_v61 = vld [vmem:[%s16134_s0 + $0x250] sm:$0xff]  }
 0x11c   :  { %v12448_v19 = vmax.f32 %v2442_v62, %v2446_v8  ;;  %v4088_v54 = vrot.slane %v12446_v18, 1  ;;  %vm12452_vm6 = vcmp.ne.s32.totalorder %v3763_v57, 15  ;;  %v3895_v26 = vsel %vm3888_vm2, %v3892_v45, %v3894_v9  ;;  %11189 = vmatprep.subr.bf16.mxu1 %v11670_v21 }
 0x11d   :  { %v2951_v22 = vrot.slane %v2683_v14, 1  ;;  %v2684_v23 = vmax.f32 %v2440_v13, %v2444_v15  ;;  %4915 = vrot.lane.b32.xlu0 %v4850_v17, %s11934_s21  ;;  %v10957_v25 = vpop.f32.mrb[32].mxu0  ;;  %v4467_v27 = vsel %vm12426_vm5, %v3893_v11, 0.0  ;;  %v2955_v28 = vrot.slane %v2685_v7, 1 }
 0x11e   :  { %v2957_v29 = vrot.slane %v12448_v19, 1  ;;  %v1520_v30 = vpop.f32.mrb[33].mxu0  ;;  %v4089_v10 = vsel %vm2927_vm1, %v4086_v20, %v4088_v54  ;;  %v4786_v24 = vpack.c.bf16 %v3895_v26, %v4467_v27  ;;  %v12479_v35 = vadd.s32 32, %v12278_v47 }
 0x11f   :  { %v2952_v5 = vsel %vm2927_vm1, %v2949_v16, %v2951_v22  ;;  %v2953_v31 = vrot.slane %v2684_v23, 1  ;;  %v10958_v32 = vpop.f32.mrb[34].mxu0  ;;  %11190 = vmatpush3.bf16.msra.mxu1 %v11670_v21  ;;  %v4724_v16 = vsel %vm12452_vm6, %v4089_v10, 0.0  ;;  %v1529_v48 = vadd.f32 %v10957_v25, %v12233_v60 }
 0x120   :  { %v3323_v36 = vmax.f32 %v12362_v2, %v2952_v5  ;;  %v2958_v38 = vsel %vm2927_vm1, %v2955_v28, %v2957_v29  ;;  %v1523_v39 = vpop.f32.mrb[35].mxu0  ;;  %4818 = vst.msk [vmem:[#allocation2 + $0x10] sm:$0xff] %vm973_vm0, %v4786_v24  ;;  %v4087_v2 = vsel %vm2927_vm1, %v4084_v4, %v4086_v20  ;;  %v3764_v46 = vand.u32 15, %v12479_v35 }
 0x121   :  { %v3326_v40 = vmax.f32 %v2685_v7, %v2958_v38  ;;  %v2954_v41 = vsel %vm2927_vm1, %v2951_v22, %v2953_v31  ;;  %v2956_v42 = vsel %vm2927_vm1, %v2953_v31, %v2955_v28  ;;  %v5043_v45 = vpack.c.bf16 %v4724_v16, %v4087_v2  ;;  %v11639_v16 = vld [vmem:[%s16134_s0 + $0x258] sm:$0xff]   ;;  %v11640_v2 = vld [vmem:[%s16134_s0 + $0x260] sm:$0xff]  }
 0x122   :  { %3451 = vst.msk [vmem:[#allocation4 + $0x58] sm:$0xff] %vm973_vm0, %v3323_v36  ;;  %v3324_v43 = vmax.f32 %v2683_v14, %v2954_v41  ;;  %v3325_v44 = vmax.f32 %v2684_v23, %v2956_v42  ;;  %11064 = vmatmul.mubr.msk.bf16.gmra.mrb[140].mxu0 %vm973_vm0, %v11635_v12  ;;  %v12502_v49 = vadd.s32 40, %v12278_v47  ;;  %v1521_v1 = vadd.f32 %v12233_v60, %v1520_v30 }
 0x123   :  { %3454 = vst.msk [vmem:[#allocation4 + $0x70] sm:$0xff] %vm973_vm0, %v3326_v40  ;;  %11067 = vmatprep.mubr.msk.bf16.mxu0 %vm973_vm0, %v11636_v34  ;;  %v1532_v4 = vadd.f32 %v10958_v32, %v12233_v60  ;;  %5108 = vrot.lane.b32.xlu1 %v5043_v45, %s11935_s29  ;;  %v3896_v55 = vrot.slane %v12446_v18, 7  ;;  %v1524_v56 = vadd.f32 %v12233_v60, %v1523_v39  ;;  %vm12517_vm7 = vcmp.ne.s32.totalorder %v3764_v46, 0 }
 0x124   :  { %3452 = vst.msk [vmem:[#allocation4 + $0x60] sm:$0xff] %vm973_vm0, %v3324_v43  ;;  %3453 = vst.msk [vmem:[#allocation4 + $0x68] sm:$0xff] %vm973_vm0, %v3325_v44  ;;  %v2449_v63 = vmax.f32 %v1529_v48, 0.0  ;;  %v3765_v11 = vand.u32 15, %v12502_v49  ;;  %v2447_v13 = vmax.f32 %v1521_v1, 0.0  ;;  %v12564_v45 = vadd.s32 48, %v12278_v47 }
 0x125   :  { %v10961_v50 = vpop.f32.mrb[36].mxu0  ;;  %v2450_v14 = vmax.f32 %v1532_v4, 0.0  ;;  %v3897_v23 = vsel %vm3888_vm2, %v3894_v9, %v3896_v55  ;;  %v2448_v25 = vmax.f32 %v1524_v56, 0.0  ;;  %vm5009_vm4 = vcmask 523520  }
 0x126   :  { %v1545_v51 = vadd.f32 %v10961_v50, %v12233_v60  ;;  %v1536_v52 = vpop.f32.mrb[37].mxu0  ;;  %vm12540_vm8 = vcmp.ne.s32.totalorder %v3765_v11, 15  ;;  %v4469_v34 = vsel %vm12517_vm7, %v3897_v23, 0.0  ;;  %v3766_v56 = vand.u32 15, %v12564_v45 }
 0x127   :  { %v1537_v57 = vadd.f32 %v12233_v60, %v1536_v52  ;;  %v10962_v59 = vpop.f32.mrb[38].mxu0  ;;  %vm5202_vm7 = vcmask 785920  }
 0x128   :  { %v2453_v0 = vmax.f32 %v1545_v51, 0.0  ;;  %v1548_v7 = vadd.f32 %v10962_v59, %v12233_v60  ;;  %v1539_v8 = vpop.f32.mrb[39].mxu0  ;;  %v12587_v59 = vadd.s32 56, %v12278_v47  ;;  %vm12602_vm9 = vcmp.ne.s32.totalorder %v3766_v56, 0 }
 0x129   :  { %v2451_v15 = vmax.f32 %v1537_v57, 0.0  ;;  %v1540_v17 = vadd.f32 %v12233_v60, %v1539_v8  ;;  %v12524_v20 = vld [vmem:[#allocation4 + $0x50] ss:$2 sm:$0xff]  ;;  %v12649_v56 = vadd.s32 64, %v12278_v47 }
 0x12a   :  { %v2689_v58 = vmax.f32 %v2449_v63, %v2453_v0  ;;  %v2454_v21 = vmax.f32 %v1548_v7, 0.0  ;;  %11068 = vmatmul.mubr.msk.bf16.gmra.mrb[144].mxu0 %vm973_vm0, %v11637_v53  ;;  %v3898_v22 = vrot.slane %v12524_v20, 7  ;;  %v4851_v28 = vpack.c.bf16 %v12524_v20, %v12446_v18  ;;  %v11641_v0 = vld [vmem:[%s16134_s0 + $0x268] sm:$0xff]  }
 0x12b   :  { %v2687_v26 = vmax.f32 %v2447_v13, %v2451_v15  ;;  %v2452_v27 = vmax.f32 %v1540_v17, 0.0  ;;  %11071 = vmatprep.mubr.msk.bf16.mxu0 %vm973_vm0, %v11638_v61  ;;  %v12534_v30 = vld [vmem:[#allocation4 + $0x60] ss:$2 sm:$0xff]  ;;  %v4090_v10 = vrot.slane %v12524_v20, 1 }
 0x12c   :  { %v12536_v12 = vmax.f32 %v2450_v14, %v2454_v21  ;;  %v4092_v24 = vrot.slane %v12534_v30, 1  ;;  %4917 = vrot.lane.b32.xlu0 %v4851_v28, %s11934_s21  ;;  %v3899_v32 = vsel %vm3888_vm2, %v3896_v55, %v3898_v22  ;;  %v2963_v36 = vrot.slane %v2689_v58, 1  ;;  %v11642_v14 = vld [vmem:[%s16134_s0 + $0x270] sm:$0xff]  }
 0x12d   :  { %v2959_v9 = vrot.slane %v2687_v26, 1  ;;  %v2688_v5 = vmax.f32 %v2448_v25, %v2452_v27  ;;  %v10965_v31 = vpop.f32.mrb[40].mxu0  ;;  %v4787_v41 = vpack.c.bf16 %v3899_v32, %v4469_v34  ;;  %v3900_v7 = vrot.slane %v12534_v30, 7 }
 0x12e   :  { %v2965_v38 = vrot.slane %v12536_v12, 1  ;;  %v1552_v39 = vpop.f32.mrb[41].mxu0  ;;  %v4093_v40 = vsel %vm2927_vm1, %v4090_v10, %v4092_v24  ;;  %v1561_v57 = vadd.f32 %v10965_v31, %v12233_v60  ;;  %v3767_v25 = vand.u32 15, %v12587_v59 }
 0x12f   :  { %v2960_v42 = vsel %vm2927_vm1, %v2957_v29, %v2959_v9  ;;  %v2961_v43 = vrot.slane %v2688_v5, 1  ;;  %v10966_v44 = vpop.f32.mrb[42].mxu0  ;;  %v4726_v4 = vsel %vm12540_vm8, %v4093_v40, 0.0  ;;  %4819 = vst.msk [vmem:[#allocation2 + $0x18] sm:$0xff] %vm973_vm0, %v4787_v41  ;;  %v1553_v18 = vadd.f32 %v12233_v60, %v1552_v39 }
 0x130   :  { %v3327_v46 = vmax.f32 %v12448_v19, %v2960_v42  ;;  %v2966_v48 = vsel %vm2927_vm1, %v2963_v36, %v2965_v38  ;;  %v1555_v1 = vpop.f32.mrb[43].mxu0  ;;  %v4091_v19 = vsel %vm2927_vm1, %v4088_v54, %v4090_v10  ;;  %v1564_v54 = vadd.f32 %v10966_v44, %v12233_v60 }
 0x131   :  { %v3330_v29 = vmax.f32 %v2689_v58, %v2966_v48  ;;  %v2962_v50 = vsel %vm2927_vm1, %v2959_v9, %v2961_v43  ;;  %v2964_v51 = vsel %vm2927_vm1, %v2961_v43, %v2963_v36  ;;  %v5044_v55 = vpack.c.bf16 %v4726_v4, %v4091_v19 }
 0x132   :  { %3455 = vst.msk [vmem:[#allocation4 + $0x78] sm:$0xff] %vm973_vm0, %v3327_v46  ;;  %v3328_v52 = vmax.f32 %v2687_v26, %v2962_v50  ;;  %v3329_v53 = vmax.f32 %v2688_v5, %v2964_v51  ;;  %11072 = vmatmul.mubr.msk.bf16.gmra.mrb[148].mxu0 %vm973_vm0, %v11639_v16  ;;  %v1556_v8 = vadd.f32 %v12233_v60, %v1555_v1  ;;  %v2457_v17 = vmax.f32 %v1561_v57, 0.0 }
 0x133   :  { %3458 = vst.msk [vmem:[#allocation4 + $0x90] sm:$0xff] %vm973_vm0, %v3330_v29  ;;  %11075 = vmatprep.mubr.msk.bf16.mxu0 %vm973_vm0, %v11640_v2  ;;  %5110 = vrot.lane.b32.xlu0 %v5044_v55, %s11935_s29  ;;  %v2455_v26 = vmax.f32 %v1553_v18, 0.0  ;;  %v2458_v27 = vmax.f32 %v1564_v54, 0.0  ;;  %v3901_v32 = vsel %vm3888_vm2, %v3898_v22, %v3900_v7  ;;  %vm12625_vm10 = vcmp.ne.s32.totalorder %v3767_v25, 15  ;;  %v11643_v29 = vld [vmem:[%s16134_s0 + $0x278] sm:$0xff]   ;;  %v11644_v55 = vld [vmem:[%s16134_s0 + $0x280] sm:$0xff]  }
 0x134   :  { %3456 = vst.msk [vmem:[#allocation4 + $0x80] sm:$0xff] %vm973_vm0, %v3328_v52  ;;  %3457 = vst.msk [vmem:[#allocation4 + $0x88] sm:$0xff] %vm973_vm0, %v3329_v53  ;;  %v2456_v34 = vmax.f32 %v1556_v8, 0.0  ;;  %v4471_v46 = vsel %vm12602_vm9, %v3901_v32, 0.0  ;;  %vm40_vm8 = vcmask 785408  }
 0x135   :  { %v10969_v61 = vpop.f32.mrb[44].mxu0 }
 0x136   :  { %v1577_v62 = vadd.f32 %v10969_v61, %v12233_v60  ;;  %v1568_v63 = vpop.f32.mrb[45].mxu0 }
 0x137   :  { %v1569_v11 = vadd.f32 %v12233_v60, %v1568_v63  ;;  %v10970_v13 = vpop.f32.mrb[46].mxu0 }
 0x138   :  { %v2461_v58 = vmax.f32 %v1577_v62, 0.0  ;;  %v1580_v21 = vadd.f32 %v10970_v13, %v12233_v60  ;;  %v1571_v23 = vpop.f32.mrb[47].mxu0  ;;  %v12673_v13 = vld [vmem:[%s16136_s2] ss:$0 sm:$0xff] }
 0x139   :  { %v2459_v28 = vmax.f32 %v1569_v11, 0.0  ;;  %v1572_v10 = vadd.f32 %v12233_v60, %v1571_v23  ;;  %v12609_v3 = vld [vmem:[#allocation4 + $0x70] ss:$2 sm:$0xff]  ;;  %v3768_v11 = vand.u32 15, %v12649_v56  ;;  %v11645_v23 = vld [vmem:[%s16134_s0 + $0x288] sm:$0xff]  }
 0x13a   :  { %v2693_v9 = vmax.f32 %v2457_v17, %v2461_v58  ;;  %v2462_v5 = vmax.f32 %v1580_v21, 0.0  ;;  %11076 = vmatmul.mubr.msk.bf16.gmra.mrb[152].mxu0 %vm973_vm0, %v11641_v0  ;;  %v3902_v31 = vrot.slane %v12609_v3, 7  ;;  %v4852_v16 = vpack.c.bf16 %v12609_v3, %v12534_v30 }
 0x13b   :  { %v2691_v36 = vmax.f32 %v2455_v26, %v2459_v28  ;;  %v2460_v39 = vmax.f32 %v1572_v10, 0.0  ;;  %11079 = vmatprep.mubr.msk.bf16.mxu0 %vm973_vm0, %v11642_v14  ;;  %v12619_v60 = vld [vmem:[#allocation4 + $0x80] ss:$2 sm:$0xff]  ;;  %v4094_v41 = vrot.slane %v12609_v3, 1  ;;  %v11646_v10 = vld [vmem:[%s16134_s0 + $0x290] sm:$0xff]   ;;  %vm12692_vm11 = vcmp.ne.s32.totalorder %v3768_v11, 0 }
 0x13c   :  { %v12621_v40 = vmax.f32 %v2458_v27, %v2462_v5  ;;  %v4096_v42 = vrot.slane %v12619_v60, 1  ;;  %4919 = vrot.lane.b32.xlu1 %v4852_v16, %s11934_s21  ;;  %v3903_v2 = vsel %vm3888_vm2, %v3900_v7, %v3902_v31  ;;  %v2971_v48 = vrot.slane %v2693_v9, 1 }
 0x13d   :  { %v2967_v22 = vrot.slane %v2691_v36, 1  ;;  %v2692_v43 = vmax.f32 %v2456_v34, %v2460_v39  ;;  %v10973_v44 = vpop.f32.mrb[48].mxu0  ;;  %v4788_v51 = vpack.c.bf16 %v3903_v2, %v4471_v46  ;;  %v3904_v25 = vrot.slane %v12619_v60, 7 }
 0x13e   :  { %v2973_v1 = vrot.slane %v12621_v40, 1  ;;  %v1584_v4 = vpop.f32.mrb[49].mxu0  ;;  %v4097_v50 = vsel %vm2927_vm1, %v4094_v41, %v4096_v42  ;;  %v1593_v30 = vadd.f32 %v12673_v13, %v10973_v44 }
 0x13f   :  { %v2968_v52 = vsel %vm2927_vm1, %v2965_v38, %v2967_v22  ;;  %v2969_v53 = vrot.slane %v2692_v43, 1  ;;  %v10974_v19 = vpop.f32.mrb[50].mxu0  ;;  %v4728_v61 = vsel %vm12625_vm10, %v4097_v50, 0.0  ;;  %4820 = vst.msk [vmem:[#allocation2 + $0x20] sm:$0xff] %vm973_vm0, %v4788_v51  ;;  %v1585_v14 = vadd.f32 %v12673_v13, %v1584_v4 }
 0x140   :  { %v3331_v57 = vmax.f32 %v12536_v12, %v2968_v52  ;;  %v2974_v18 = vsel %vm2927_vm1, %v2971_v48, %v2973_v1  ;;  %v1587_v54 = vpop.f32.mrb[51].mxu0  ;;  %v4095_v12 = vsel %vm2927_vm1, %v4092_v24, %v4094_v41  ;;  %v12677_v24 = vadd.s32 72, %v12278_v47 }
 0x141   :  { %v3334_v38 = vmax.f32 %v2693_v9, %v2974_v18  ;;  %v2970_v62 = vsel %vm2927_vm1, %v2967_v22, %v2969_v53  ;;  %v2972_v63 = vsel %vm2927_vm1, %v2969_v53, %v2971_v48  ;;  %v5045_v8 = vpack.c.bf16 %v4728_v61, %v4095_v12 }
 0x142   :  { %3459 = vst.msk [vmem:[#allocation4 + $0x98] sm:$0xff] %vm973_vm0, %v3331_v57  ;;  %v3332_v0 = vmax.f32 %v2691_v36, %v2970_v62  ;;  %v3333_v7 = vmax.f32 %v2692_v43, %v2972_v63  ;;  %11080 = vmatmul.mubr.msk.bf16.gmra.mrb[156].mxu0 %vm973_vm0, %v11643_v29  ;;  %v1596_v15 = vadd.f32 %v12673_v13, %v10974_v19  ;;  %v2465_v5 = vmax.f32 %v1593_v30, 0.0 }
 0x143   :  { %3462 = vst.msk [vmem:[#allocation4 + $0xb0] sm:$0xff] %vm973_vm0, %v3334_v38  ;;  %11083 = vmatprep.mubr.msk.bf16.mxu0 %vm973_vm0, %v11644_v55  ;;  %5112 = vrot.lane.b32.xlu1 %v5045_v8, %s11935_s29  ;;  %v1588_v26 = vadd.f32 %v12673_v13, %v1587_v54  ;;  %v3769_v39 = vand.u32 15, %v12677_v24  ;;  %v2463_v16 = vmax.f32 %v1585_v14, 0.0  ;;  %v3905_v48 = vsel %vm3888_vm2, %v3902_v31, %v3904_v25  ;;  %v11648_v14 = vld [vmem:[%s16134_s0 + $0x2a0] sm:$0xff]  }
 0x144   :  { %3460 = vst.msk [vmem:[#allocation4 + $0xa0] sm:$0xff] %vm973_vm0, %v3332_v0  ;;  %3461 = vst.msk [vmem:[#allocation4 + $0xa8] sm:$0xff] %vm973_vm0, %v3333_v7  ;;  %v2466_v41 = vmax.f32 %v1596_v15, 0.0  ;;  %v4473_v61 = vsel %vm12692_vm11, %v3905_v48, 0.0  ;;  %v11647_v0 = vld [vmem:[%s16134_s0 + $0x298] sm:$0xff]   ;;  %v12739_v15 = vadd.s32 80, %v12278_v47 }
 0x145   :  { %v10977_v17 = vpop.f32.mrb[52].mxu0  ;;  %v2464_v4 = vmax.f32 %v1588_v26, 0.0  ;;  %vm12715_vm12 = vcmp.ne.s32.totalorder %v3769_v39, 15 }
 0x146   :  { %v1609_v58 = vadd.f32 %v12673_v13, %v10977_v17  ;;  %v1600_v21 = vpop.f32.mrb[53].mxu0  ;;  %v3770_v9 = vand.u32 15, %v12739_v15 }
 0x147   :  { %v1601_v27 = vadd.f32 %v12673_v13, %v1600_v21  ;;  %v10978_v28 = vpop.f32.mrb[54].mxu0 }
 0x148   :  { %v2469_v32 = vmax.f32 %v1609_v58, 0.0  ;;  %v1612_v34 = vadd.f32 %v12673_v13, %v10978_v28  ;;  %v1603_v36 = vpop.f32.mrb[55].mxu0  ;;  %vm12777_vm13 = vcmp.ne.s32.totalorder %v3770_v9, 0 }
 0x149   :  { %v2467_v20 = vmax.f32 %v1601_v27, 0.0  ;;  %v1604_v22 = vadd.f32 %v12673_v13, %v1603_v36  ;;  %v12699_v43 = vld [vmem:[#allocation4 + $0x90] ss:$2 sm:$0xff] }
 0x14a   :  { %v2697_v44 = vmax.f32 %v2465_v5, %v2469_v32  ;;  %v2470_v2 = vmax.f32 %v1612_v34, 0.0  ;;  %11084 = vmatmul.mubr.msk.bf16.gmra.mrb[160].mxu0 %vm973_vm0, %v11645_v23  ;;  %v3906_v46 = vrot.slane %v12699_v43, 7  ;;  %v4853_v51 = vpack.c.bf16 %v12699_v43, %v12619_v60 }
 0x14b   :  { %v2695_v29 = vmax.f32 %v2463_v16, %v2467_v20  ;;  %v2468_v50 = vmax.f32 %v1604_v22, 0.0  ;;  %11087 = vmatprep.mubr.msk.bf16.mxu0 %vm973_vm0, %v11646_v10  ;;  %v12709_v52 = vld [vmem:[#allocation4 + $0xa0] ss:$2 sm:$0xff]  ;;  %v4098_v19 = vrot.slane %v12699_v43, 1  ;;  %v12762_v32 = vadd.s32 88, %v12278_v47 }
 0x14c   :  { %v12711_v53 = vmax.f32 %v2466_v41, %v2470_v2  ;;  %v4100_v55 = vrot.slane %v12709_v52, 1  ;;  %4921 = vrot.lane.b32.xlu0 %v4853_v51, %s11934_s21  ;;  %v3907_v54 = vsel %vm3888_vm2, %v3904_v25, %v3906_v46  ;;  %v2979_v38 = vrot.slane %v2697_v44, 1  ;;  %v11649_v16 = vld [vmem:[%s16134_s0 + $0x2a8] sm:$0xff]   ;;  %v11650_v2 = vld [vmem:[%s16134_s0 + $0x2b0] sm:$0xff]  }
 0x14d   :  { %v2975_v31 = vrot.slane %v2695_v29, 1  ;;  %v2696_v57 = vmax.f32 %v2464_v4, %v2468_v50  ;;  %v10981_v18 = vpop.f32.mrb[56].mxu0  ;;  %v4789_v12 = vpack.c.bf16 %v3907_v54, %v4473_v61  ;;  %v3908_v41 = vrot.slane %v12709_v52, 7 }
 0x14e   :  { %v2981_v62 = vrot.slane %v12711_v53, 1  ;;  %v1616_v63 = vpop.f32.mrb[57].mxu0  ;;  %v4101_v7 = vsel %vm2927_vm1, %v4098_v19, %v4100_v55  ;;  %v1625_v5 = vadd.f32 %v12673_v13, %v10981_v18 }
 0x14f   :  { %v2976_v8 = vsel %vm2927_vm1, %v2973_v1, %v2975_v31  ;;  %v2977_v11 = vrot.slane %v2696_v57, 1  ;;  %v10982_v30 = vpop.f32.mrb[58].mxu0  ;;  %v4730_v23 = vsel %vm12715_vm12, %v4101_v7, 0.0  ;;  %4821 = vst.msk [vmem:[#allocation2 + $0x28] sm:$0xff] %vm973_vm0, %v4789_v12  ;;  %v1617_v60 = vadd.f32 %v12673_v13, %v1616_v63 }
 0x150   :  { %v3335_v17 = vmax.f32 %v12621_v40, %v2976_v8  ;;  %v2982_v58 = vsel %vm2927_vm1, %v2979_v38, %v2981_v62  ;;  %v1619_v21 = vpop.f32.mrb[59].mxu0  ;;  %v4099_v40 = vsel %vm2927_vm1, %v4096_v42, %v4098_v19  ;;  %v1628_v42 = vadd.f32 %v12673_v13, %v10982_v30 }
 0x151   :  { %v3338_v1 = vmax.f32 %v2697_v44, %v2982_v58  ;;  %v2978_v25 = vsel %vm2927_vm1, %v2975_v31, %v2977_v11  ;;  %v2980_v26 = vsel %vm2927_vm1, %v2977_v11, %v2979_v38  ;;  %v5046_v10 = vpack.c.bf16 %v4730_v23, %v4099_v40  ;;  %v11651_v40 = vld [vmem:[%s16134_s0 + $0x2b8] sm:$0xff]  }
 0x152   :  { %3463 = vst.msk [vmem:[#allocation4 + $0xb8] sm:$0xff] %vm973_vm0, %v3335_v17  ;;  %v3336_v27 = vmax.f32 %v2695_v29, %v2978_v25  ;;  %v3337_v28 = vmax.f32 %v2696_v57, %v2980_v26  ;;  %11088 = vmatmul.mubr.msk.bf16.gmra.mrb[164].mxu0 %vm973_vm0, %v11647_v0  ;;  %v1620_v20 = vadd.f32 %v12673_v13, %v1619_v21  ;;  %v2473_v4 = vmax.f32 %v1625_v5, 0.0 }
 0x153   :  { %3466 = vst.msk [vmem:[#allocation4 + $0xd0] sm:$0xff] %vm973_vm0, %v3338_v1  ;;  %11091 = vmatprep.mubr.msk.bf16.mxu0 %vm973_vm0, %v11648_v14  ;;  %5114 = vrot.lane.b32.xlu0 %v5046_v10, %s11935_s29  ;;  %v3771_v19 = vand.u32 15, %v12762_v32  ;;  %v2471_v3 = vmax.f32 %v1617_v60, 0.0  ;;  %v2474_v31 = vmax.f32 %v1628_v42, 0.0  ;;  %v3909_v0 = vsel %vm3888_vm2, %v3906_v46, %v3908_v41 }
 0x154   :  { %3464 = vst.msk [vmem:[#allocation4 + $0xc0] sm:$0xff] %vm973_vm0, %v3336_v27  ;;  %3465 = vst.msk [vmem:[#allocation4 + $0xc8] sm:$0xff] %vm973_vm0, %v3337_v28  ;;  %v2472_v7 = vmax.f32 %v1620_v20, 0.0  ;;  %v4475_v25 = vsel %vm12777_vm13, %v3909_v0, 0.0 }
 0x155   :  { %v10985_v34 = vpop.f32.mrb[60].mxu0  ;;  %vm12800_vm14 = vcmp.ne.s32.totalorder %v3771_v19, 15 }
 0x156   :  { %v1641_v36 = vadd.f32 %v12673_v13, %v10985_v34  ;;  %v1632_v39 = vpop.f32.mrb[61].mxu0  ;;  %v11652_v34 = vld [vmem:[%s16134_s0 + $0x2c0] sm:$0xff]  }
 0x157   :  { %v1633_v22 = vadd.f32 %v12673_v13, %v1632_v39  ;;  %v10986_v44 = vpop.f32.mrb[62].mxu0 }
 0x158   :  { %v2477_v29 = vmax.f32 %v1641_v36, 0.0  ;;  %v1644_v50 = vadd.f32 %v12673_v13, %v10986_v44  ;;  %v1635_v51 = vpop.f32.mrb[63].mxu0  ;;  %v12824_v36 = vadd.s32 96, %v12278_v47 }
 0x159   :  { %v2475_v57 = vmax.f32 %v1633_v22, 0.0  ;;  %v1636_v18 = vadd.f32 %v12673_v13, %v1635_v51  ;;  %v12784_v54 = vld [vmem:[#allocation4 + $0xb0] ss:$2 sm:$0xff]  ;;  %v12847_v51 = vadd.s32 104, %v12278_v47 }
 0x15a   :  { %v2701_v61 = vmax.f32 %v2473_v4, %v2477_v29  ;;  %v2478_v38 = vmax.f32 %v1644_v50, 0.0  ;;  %11092 = vmatmul.mubr.msk.bf16.gmra.mrb[168].mxu0 %vm973_vm0, %v11649_v16  ;;  %v3910_v63 = vrot.slane %v12784_v54, 7  ;;  %v4854_v11 = vpack.c.bf16 %v12784_v54, %v12709_v52 }
 0x15b   :  { %v2699_v12 = vmax.f32 %v2471_v3, %v2475_v57  ;;  %v2476_v8 = vmax.f32 %v1636_v18, 0.0  ;;  %11095 = vmatprep.mubr.msk.bf16.mxu0 %vm973_vm0, %v11650_v2  ;;  %v12794_v30 = vld [vmem:[#allocation4 + $0xc0] ss:$2 sm:$0xff]  ;;  %v4102_v17 = vrot.slane %v12784_v54, 1  ;;  %v3772_v29 = vand.u32 15, %v12824_v36 }
 0x15c   :  { %v12796_v14 = vmax.f32 %v2474_v31, %v2478_v38  ;;  %v4104_v58 = vrot.slane %v12794_v30, 1  ;;  %4923 = vrot.lane.b32.xlu1 %v4854_v11, %s11934_s21  ;;  %v3911_v1 = vsel %vm3888_vm2, %v3908_v41, %v3910_v63  ;;  %v2987_v26 = vrot.slane %v2701_v61, 1  ;;  %v11653_v57 = vld [vmem:[%s16134_s0 + $0x2c8] sm:$0xff]  }
 0x15d   :  { %v2983_v46 = vrot.slane %v2699_v12, 1  ;;  %v2700_v21 = vmax.f32 %v2472_v7, %v2476_v8  ;;  %v10989_v23 = vpop.f32.mrb[64].mxu0  ;;  %v4790_v9 = vpack.c.bf16 %v3911_v1, %v4475_v25  ;;  %v3912_v18 = vrot.slane %v12794_v30, 7  ;;  %v11654_v7 = vld [vmem:[%s16134_s0 + $0x2d0] sm:$0xff]  }
 0x15e   :  { %v2989_v27 = vrot.slane %v12796_v14, 1  ;;  %v1648_v28 = vpop.f32.mrb[65].mxu0  ;;  %v4105_v10 = vsel %vm2927_vm1, %v4102_v17, %v4104_v58  ;;  %v1657_v50 = vadd.f32 %v12673_v13, %v10989_v23  ;;  %vm12862_vm15 = vcmp.ne.s32.totalorder %v3772_v29, 0  ;;  %v11655_v29 = vld [vmem:[%s16134_s0 + $0x2d8] sm:$0xff]  }
 0x15f   :  { %v2984_v5 = vsel %vm2927_vm1, %v2981_v62, %v2983_v46  ;;  %v2985_v60 = vrot.slane %v2700_v21, 1  ;;  %v10990_v42 = vpop.f32.mrb[66].mxu0  ;;  %v4732_v20 = vsel %vm12800_vm14, %v4105_v10, 0.0  ;;  %4822 = vst.msk [vmem:[#allocation2 + $0x30] sm:$0xff] %vm973_vm0, %v4790_v9  ;;  %v1649_v52 = vadd.f32 %v12673_v13, %v1648_v28 }
 0x160   :  { %v3339_v39 = vmax.f32 %v12711_v53, %v2984_v5  ;;  %v2990_v16 = vsel %vm2927_vm1, %v2987_v26, %v2989_v27  ;;  %v1651_v41 = vpop.f32.mrb[67].mxu0  ;;  %v4103_v53 = vsel %vm2927_vm1, %v4100_v55, %v4102_v17  ;;  %v1660_v55 = vadd.f32 %v12673_v13, %v10990_v42 }
 0x161   :  { %v3342_v62 = vmax.f32 %v2701_v61, %v2990_v16  ;;  %v2986_v22 = vsel %vm2927_vm1, %v2983_v46, %v2985_v60  ;;  %v2988_v44 = vsel %vm2927_vm1, %v2985_v60, %v2987_v26  ;;  %v5047_v4 = vpack.c.bf16 %v4732_v20, %v4103_v53 }
 0x162   :  { %3467 = vst.msk [vmem:[#allocation4 + $0xd8] sm:$0xff] %vm973_vm0, %v3339_v39  ;;  %v3340_v2 = vmax.f32 %v2699_v12, %v2986_v22  ;;  %v3341_v48 = vmax.f32 %v2700_v21, %v2988_v44  ;;  %11096 = vmatmul.mubr.msk.bf16.gmra.mrb[172].mxu0 %vm973_vm0, %v11651_v40  ;;  %v1652_v61 = vadd.f32 %v12673_v13, %v1651_v41  ;;  %v2481_v8 = vmax.f32 %v1657_v50, 0.0 }
 0x163   :  { %3470 = vst.msk [vmem:[#allocation4 + $0xf0] sm:$0xff] %vm973_vm0, %v3342_v62  ;;  %11099 = vmatprep.mubr.msk.bf16.mxu0 %vm973_vm0, %v11652_v34  ;;  %5116 = vrot.lane.b32.xlu1 %v5047_v4, %s11935_s29  ;;  %v3773_v46 = vand.u32 15, %v12847_v51  ;;  %v2479_v21 = vmax.f32 %v1649_v52, 0.0  ;;  %v2482_v23 = vmax.f32 %v1660_v55, 0.0  ;;  %v3913_v9 = vsel %vm3888_vm2, %v3910_v63, %v3912_v18 }
 0x164   :  { %3468 = vst.msk [vmem:[#allocation4 + $0xe0] sm:$0xff] %vm973_vm0, %v3340_v2  ;;  %3469 = vst.msk [vmem:[#allocation4 + $0xe8] sm:$0xff] %vm973_vm0, %v3341_v48  ;;  %v2480_v5 = vmax.f32 %v1652_v61, 0.0  ;;  %v4477_v2 = vsel %vm12862_vm15, %v3913_v9, 0.0 }
 0x165   :  { %v10993_v19 = vpop.f32.mrb[68].mxu0  ;;  %vm12885_vm3 = vcmp.ne.s32.totalorder %v3773_v46, 15 }
 0x166   :  { %v1673_v3 = vadd.f32 %v12673_v13, %v10993_v19  ;;  %v1664_v31 = vpop.f32.mrb[69].mxu0 }
 0x167   :  { %v1665_v38 = vadd.f32 %v12673_v13, %v1664_v31  ;;  %v10994_v0 = vpop.f32.mrb[70].mxu0  ;;  %v11656_v31 = vld [vmem:[%s16134_s0 + $0x2e0] sm:$0xff]  }
 0x168   :  { %v2485_v11 = vmax.f32 %v1673_v3, 0.0  ;;  %v1676_v17 = vadd.f32 %v12673_v13, %v10994_v0  ;;  %v1667_v43 = vpop.f32.mrb[71].mxu0 }
 0x169   :  { %v2483_v1 = vmax.f32 %v1665_v38, 0.0  ;;  %v1668_v25 = vadd.f32 %v12673_v13, %v1667_v43  ;;  %v12869_v26 = vld [vmem:[#allocation4 + $0xd0] ss:$2 sm:$0xff] }
 0x16a   :  { %v2705_v28 = vmax.f32 %v2481_v8, %v2485_v11  ;;  %v2486_v40 = vmax.f32 %v1676_v17, 0.0  ;;  %11100 = vmatmul.mubr.msk.bf16.gmra.mrb[176].mxu0 %vm973_vm0, %v11653_v57  ;;  %v3914_v10 = vrot.slane %v12869_v26, 7  ;;  %v4855_v34 = vpack.c.bf16 %v12869_v26, %v12794_v30 }
 0x16b   :  { %v2703_v60 = vmax.f32 %v2479_v21, %v2483_v1  ;;  %v2484_v42 = vmax.f32 %v1668_v25, 0.0  ;;  %11103 = vmatprep.mubr.msk.bf16.mxu0 %vm973_vm0, %v11654_v7  ;;  %v12879_v39 = vld [vmem:[#allocation4 + $0xe0] ss:$2 sm:$0xff]  ;;  %v4106_v41 = vrot.slane %v12869_v26, 1  ;;  %v12909_v57 = vadd.s32 112, %v12278_v47 }
 0x16c   :  { %v12881_v16 = vmax.f32 %v2482_v23, %v2486_v40  ;;  %v4108_v20 = vrot.slane %v12879_v39, 1  ;;  %4925 = vrot.lane.b32.xlu0 %v4855_v34, %s11934_s21  ;;  %v3915_v44 = vsel %vm3888_vm2, %v3912_v18, %v3914_v10  ;;  %v2995_v48 = vrot.slane %v2705_v28, 1 }
 0x16d   :  { %v2991_v63 = vrot.slane %v2703_v60, 1  ;;  %v2704_v62 = vmax.f32 %v2480_v5, %v2484_v42  ;;  %v10997_v22 = vpop.f32.mrb[72].mxu0  ;;  %v4791_v52 = vpack.c.bf16 %v3915_v44, %v4477_v2  ;;  %v3774_v43 = vand.u32 15, %v12909_v57  ;;  %v11658_v42 = vld [vmem:[%s16134_s0 + $0x2f0] sm:$0xff]  }
 0x16e   :  { %v2997_v53 = vrot.slane %v12881_v16, 1  ;;  %v1680_v4 = vpop.f32.mrb[73].mxu0  ;;  %v4109_v50 = vsel %vm2927_vm1, %v4106_v41, %v4108_v20  ;;  %v1689_v46 = vadd.f32 %v12673_v13, %v10997_v22  ;;  %v12932_v21 = vadd.s32 120, %v12278_v47 }
 0x16f   :  { %v2992_v55 = vsel %vm2927_vm1, %v2989_v27, %v2991_v63  ;;  %v2993_v19 = vrot.slane %v2704_v62, 1  ;;  %v10998_v3 = vpop.f32.mrb[74].mxu0  ;;  %v4734_v0 = vsel %vm12885_vm3, %v4109_v50, 0.0  ;;  %4823 = vst.msk [vmem:[#allocation2 + $0x38] sm:$0xff] %vm973_vm0, %v4791_v52  ;;  %v1681_v30 = vadd.f32 %v12673_v13, %v1680_v4 }
 0x170   :  { %v3343_v18 = vmax.f32 %v12796_v14, %v2992_v55  ;;  %v2998_v61 = vsel %vm2927_vm1, %v2995_v48, %v2997_v53  ;;  %v1683_v38 = vpop.f32.mrb[75].mxu0  ;;  %v4107_v14 = vsel %vm2927_vm1, %v4104_v58, %v4106_v41  ;;  %v1692_v58 = vadd.f32 %v12673_v13, %v10998_v3 }
 0x171   :  { %v3346_v27 = vmax.f32 %v2705_v28, %v2998_v61  ;;  %v2994_v7 = vsel %vm2927_vm1, %v2991_v63, %v2993_v19  ;;  %v2996_v12 = vsel %vm2927_vm1, %v2993_v19, %v2995_v48  ;;  %v5048_v17 = vpack.c.bf16 %v4734_v0, %v4107_v14  ;;  %v11657_v28 = vld [vmem:[%s16134_s0 + $0x2e8] sm:$0xff]  }
 0x172   :  { %3471 = vst.msk [vmem:[#allocation4 + $0xf8] sm:$0xff] %vm973_vm0, %v3343_v18  ;;  %v3344_v8 = vmax.f32 %v2703_v60, %v2994_v7  ;;  %v3345_v11 = vmax.f32 %v2704_v62, %v2996_v12  ;;  %11104 = vmatmul.mubr.msk.bf16.gmra.mrb[180].mxu0 %vm973_vm0, %v11655_v29  ;;  %v3916_v40 = vrot.slane %v12879_v39, 7  ;;  %v1684_v9 = vadd.f32 %v12673_v13, %v1683_v38 }
 0x173   :  { %3474 = vst.msk [vmem:[#allocation4 + $0x110] sm:$0xff] %vm973_vm0, %v3346_v27  ;;  %11107 = vmatprep.mubr.msk.bf16.mxu0 %vm973_vm0, %v11656_v31  ;;  %5118 = vrot.lane.b32.xlu0 %v5048_v17, %s11935_s29  ;;  %vm12947_vm5 = vcmp.ne.s32.totalorder %v3774_v43, 0  ;;  %v2489_v41 = vmax.f32 %v1689_v46, 0.0  ;;  %v3775_v22 = vand.u32 15, %v12932_v21  ;;  %v2487_v44 = vmax.f32 %v1681_v30, 0.0  ;;  %v11659_v30 = vld [vmem:[%s16134_s0 + $0x2f8] sm:$0xff]  }
 0x174   :  { %3472 = vst.msk [vmem:[#allocation4 + $0x100] sm:$0xff] %vm973_vm0, %v3344_v8  ;;  %3473 = vst.msk [vmem:[#allocation4 + $0x108] sm:$0xff] %vm973_vm0, %v3345_v11  ;;  %v2490_v2 = vmax.f32 %v1692_v58, 0.0  ;;  %v3917_v19 = vsel %vm3888_vm2, %v3914_v10, %v3916_v40  ;;  %v2488_v3 = vmax.f32 %v1684_v9, 0.0  ;;  %v11661_v9 = vld [vmem:[%s16134_s0 + $0x300] sm:$0xff]  }
 0x175   :  { %v11001_v23 = vpop.f32.mrb[76].mxu0  ;;  %vm12970_vm6 = vcmp.ne.s32.totalorder %v3775_v22, 15  ;;  %v4479_v14 = vsel %vm12947_vm5, %v3917_v19, 0.0 }
 0x176   :  { %v1705_v1 = vadd.f32 %v12673_v13, %v11001_v23  ;;  %v1696_v25 = vpop.f32.mrb[77].mxu0 }
 0x177   :  { %v1697_v5 = vadd.f32 %v12673_v13, %v1696_v25  ;;  %v11002_v60 = vpop.f32.mrb[78].mxu0 }
 0x178   :  { %v2493_v54 = vmax.f32 %v1705_v1, 0.0  ;;  %v1708_v63 = vadd.f32 %v12673_v13, %v11002_v60  ;;  %v1699_v62 = vpop.f32.mrb[79].mxu0 }
 0x179   :  { %v2491_v48 = vmax.f32 %v1697_v5, 0.0  ;;  %v1700_v4 = vadd.f32 %v12673_v13, %v1699_v62  ;;  %v12954_v29 = vld [vmem:[#allocation4 + $0xf0] ss:$2 sm:$0xff]  ;;  %v3712_v5 = vadd.s32 128, %v12278_v47 }
 0x17a   :  { %v2709_v50 = vmax.f32 %v2489_v41, %v2493_v54  ;;  %v2494_v52 = vmax.f32 %v1708_v63, 0.0  ;;  %11108 = vmatmul.mubr.msk.bf16.gmra.mrb[184].mxu0 %vm973_vm0, %v11657_v28  ;;  %v3918_v55 = vrot.slane %v12954_v29, 7  ;;  %v4856_v61 = vpack.c.bf16 %v12954_v29, %v12879_v39 }
 0x17b   :  { %v2707_v31 = vmax.f32 %v2487_v44, %v2491_v48  ;;  %v2492_v18 = vmax.f32 %v1700_v4, 0.0  ;;  %11111 = vmatprep.mubr.msk.bf16.mxu0 %vm973_vm0, %v11658_v42  ;;  %v12964_v38 = vld [vmem:[#allocation4 + $0x100] ss:$2 sm:$0xff]  ;;  %v4110_v27 = vrot.slane %v12954_v29, 1  ;;  %v3713_v4 = vadd.s32 136, %v12278_v47 }
 0x17c   :  { %v12966_v0 = vmax.f32 %v2490_v2, %v2494_v52  ;;  %v4112_v7 = vrot.slane %v12964_v38, 1  ;;  %4927 = vrot.lane.b32.xlu1 %v4856_v61, %s11934_s21  ;;  %v3919_v11 = vsel %vm3888_vm2, %v3916_v40, %v3918_v55  ;;  %v3003_v17 = vrot.slane %v2709_v50, 1 }
 0x17d   :  { %v2999_v10 = vrot.slane %v2707_v31, 1  ;;  %v2708_v12 = vmax.f32 %v2488_v3, %v2492_v18  ;;  %v11005_v8 = vpop.f32.mrb[80].mxu0  ;;  %v4792_v23 = vpack.c.bf16 %v3919_v11, %v4479_v14  ;;  %v4111_v22 = vsel %vm2927_vm1, %v4108_v20, %v4110_v27  ;;  %v11663_v3 = vld [vmem:[%s16134_s0 + $0x308] sm:$0xff]  }
 0x17e   :  { %v3005_v43 = vrot.slane %v12966_v0, 1  ;;  %v1712_v46 = vpop.f32.mrb[81].mxu0  ;;  %v4113_v58 = vsel %vm2927_vm1, %v4110_v27, %v4112_v7  ;;  %v4914_v28 = vpop.permute.xlu0 %4913  ;;  %v3776_v2 = vand.u32 15, %v3712_v5  ;;  %v1721_v48 = vadd.f32 %v12673_v13, %v11005_v8 }
 0x17f   :  { %v3000_v1 = vsel %vm2927_vm1, %v2997_v53, %v2999_v10  ;;  %v3001_v25 = vrot.slane %v2708_v12, 1  ;;  %v11006_v40 = vpop.f32.mrb[82].mxu0  ;;  %5010 = vst.msk [vmem:[#allocation2 + $0x8] sm:$0xff] %vm5009_vm4, %v4914_v28  ;;  %v4736_v53 = vsel %vm12970_vm6, %v4113_v58, 0.0 }
 0x180   :  { %v3347_v60 = vmax.f32 %v12881_v16, %v3000_v1  ;;  %v3006_v42 = vsel %vm2927_vm1, %v3003_v17, %v3005_v43  ;;  %v1715_v34 = vpop.f32.mrb[83].mxu0  ;;  %4824 = vst.msk [vmem:[#allocation2 + $0x40] sm:$0xff] %vm973_vm0, %v4792_v23  ;;  %v5049_v44 = vpack.c.bf16 %v4736_v53, %v4111_v22  ;;  %v1724_v39 = vadd.f32 %v12673_v13, %v11006_v40 }
 0x181   :  { %v3350_v41 = vmax.f32 %v2709_v50, %v3006_v42  ;;  %v3002_v54 = vsel %vm2927_vm1, %v2999_v10, %v3001_v25  ;;  %v3004_v63 = vsel %vm2927_vm1, %v3001_v25, %v3003_v17  ;;  %v1713_v50 = vadd.f32 %v12673_v13, %v1712_v46  ;;  %v11665_v10 = vld [vmem:[%s16134_s0 + $0x310] sm:$0xff]  }
 0x182   :  { %3475 = vst.msk [vmem:[#allocation4 + $0x118] sm:$0xff] %vm973_vm0, %v3347_v60  ;;  %v3348_v16 = vmax.f32 %v2707_v31, %v3002_v54  ;;  %v3349_v62 = vmax.f32 %v2708_v12, %v3004_v63  ;;  %11112 = vmatmul.mubr.msk.bf16.gmra.mrb[188].mxu0 %vm973_vm0, %v11659_v30  ;;  %5120 = vrot.lane.b32.xlu1 %v5049_v44, %s11935_s29  ;;  %v3920_v31 = vrot.slane %v12964_v38, 7  ;;  %vm13028_vm9 = vcmp.ne.s32.totalorder %v3776_v2, 0 }
 0x183   :  { %3478 = vst.msk [vmem:[#allocation4 + $0x130] sm:$0xff] %vm973_vm0, %v3350_v41  ;;  %11115 = vmatprep.mubr.msk.bf16.mxu0 %vm973_vm0, %v11661_v9  ;;  %v1716_v18 = vadd.f32 %v12673_v13, %v1715_v34  ;;  %v2497_v8 = vmax.f32 %v1721_v48, 0.0  ;;  %v3777_v46 = vand.u32 15, %v3713_v4  ;;  %v2495_v30 = vmax.f32 %v1713_v50, 0.0 }
 0x184   :  { %3476 = vst.msk [vmem:[#allocation4 + $0x120] sm:$0xff] %vm973_vm0, %v3348_v16  ;;  %3477 = vst.msk [vmem:[#allocation4 + $0x128] sm:$0xff] %vm973_vm0, %v3349_v62  ;;  %v5107_v61 = vpop.permute.xlu1 %5106  ;;  %v2498_v58 = vmax.f32 %v1724_v39, 0.0  ;;  %v3921_v5 = vsel %vm3888_vm2, %v3918_v55, %v3920_v31  ;;  %v11667_v39 = vld [vmem:[%s16134_s0 + $0x318] sm:$0xff]  }
 0x185   :  { %v11009_v20 = vpop.f32.mrb[84].mxu0  ;;  %5203 = vst.msk [vmem:[#allocation2 + $0x8] sm:$0xff] %vm5202_vm7, %v5107_v61  ;;  %v2496_v60 = vmax.f32 %v1716_v18, 0.0  ;;  %vm13051_vm10 = vcmp.ne.s32.totalorder %v3777_v46, 15  ;;  %v4481_v2 = vsel %vm13028_vm9, %v3921_v5, 0.0 }
 0x186   :  { %v1737_v52 = vadd.f32 %v12673_v13, %v11009_v20  ;;  %v1728_v19 = vpop.f32.mrb[85].mxu0 }
 0x187   :  { %v1729_v27 = vadd.f32 %v12673_v13, %v1728_v19  ;;  %v11010_v26 = vpop.f32.mrb[86].mxu0 }
 0x188   :  { %v2501_v11 = vmax.f32 %v1737_v52, 0.0  ;;  %v1740_v14 = vadd.f32 %v12673_v13, %v11010_v26  ;;  %v1731_v17 = vpop.f32.mrb[87].mxu0  ;;  %v3714_v26 = vadd.s32 144, %v12278_v47 }
 0x189   :  { %v2499_v23 = vmax.f32 %v1729_v27, 0.0  ;;  %v1732_v1 = vadd.f32 %v12673_v13, %v1731_v17  ;;  %v13035_v25 = vld [vmem:[#allocation4 + $0x110] ss:$2 sm:$0xff]  ;;  %v11669_v27 = vld [vmem:[%s16134_s0 + $0x320] sm:$0xff]  }
 0x18a   :  { %v2713_v28 = vmax.f32 %v2497_v8, %v2501_v11  ;;  %v2502_v40 = vmax.f32 %v1740_v14, 0.0  ;;  %11116 = vmatmul.mubr.msk.bf16.gmra.mrb[192].mxu0 %vm973_vm0, %v11663_v3  ;;  %v3922_v9 = vrot.slane %v13035_v25, 7  ;;  %v4857_v53 = vpack.c.bf16 %v13035_v25, %v12964_v38 }
 0x18b   :  { %v2711_v42 = vmax.f32 %v2495_v30, %v2499_v23  ;;  %v2500_v34 = vmax.f32 %v1732_v1, 0.0  ;;  %11119 = vmatprep.mubr.msk.bf16.mxu0 %vm973_vm0, %v11665_v10  ;;  %v13045_v41 = vld [vmem:[#allocation4 + $0x120] ss:$2 sm:$0xff]  ;;  %v4114_v63 = vrot.slane %v13035_v25, 1  ;;  %v3778_v23 = vand.u32 15, %v3714_v26 }
 0x18c   :  { %v13047_v54 = vmax.f32 %v2498_v58, %v2502_v40  ;;  %v4116_v16 = vrot.slane %v13045_v41, 1  ;;  %4929 = vrot.lane.b32.xlu0 %v4857_v53, %s11934_s21  ;;  %v3923_v44 = vsel %vm3888_vm2, %v3920_v31, %v3922_v9  ;;  %v3011_v48 = vrot.slane %v2713_v28, 1  ;;  %v5236_v31 = vld [vmem:[#allocation2 + $0x8] sm:$0xff] }
 0x18d   :  { %v3007_v55 = vrot.slane %v2711_v42, 1  ;;  %v2712_v62 = vmax.f32 %v2496_v60, %v2500_v34  ;;  %v11013_v22 = vpop.f32.mrb[88].mxu0  ;;  %v4793_v52 = vpack.c.bf16 %v3923_v44, %v4481_v2  ;;  %11191 = vmatprep.mubr.msk.bf16.mxu1 %vm40_vm8, %v5236_v31  ;;  %v4115_v30 = vsel %vm2927_vm1, %v4112_v7, %v4114_v63 }
 0x18e   :  { %v3013_v4 = vrot.slane %v13047_v54, 1  ;;  %v1744_v50 = vpop.f32.mrb[89].mxu0  ;;  %v4117_v20 = vsel %vm2927_vm1, %v4114_v63, %v4116_v16  ;;  %v1753_v1 = vadd.f32 %v12673_v13, %v11013_v22  ;;  %v3924_v34 = vrot.slane %v13045_v41, 7 }
 0x18f   :  { %v3008_v19 = vsel %vm2927_vm1, %v3005_v43, %v3007_v55  ;;  %v3009_v3 = vrot.slane %v2712_v62, 1  ;;  %v4916_v18 = vpop.permute.xlu0 %4915  ;;  %v11014_v61 = vpop.f32.mrb[90].mxu0  ;;  %v4738_v8 = vsel %vm13051_vm10, %v4117_v20, 0.0  ;;  %4825 = vst.msk [vmem:[#allocation2 + $0x48] sm:$0xff] %vm973_vm0, %v4793_v52  ;;  %v1745_v40 = vadd.f32 %v12673_v13, %v1744_v50 }
 0x190   :  { %v3351_v10 = vmax.f32 %v12966_v0, %v3008_v19  ;;  %v3014_v12 = vsel %vm2927_vm1, %v3011_v48, %v3013_v4  ;;  %5011 = vst.msk [vmem:[#allocation2 + $0x10] sm:$0xff] %vm5009_vm4, %v4916_v18  ;;  %v1747_v43 = vpop.f32.mrb[91].mxu0  ;;  %v5050_v58 = vpack.c.bf16 %v4738_v8, %v4115_v30  ;;  %v1756_v38 = vadd.f32 %v12673_v13, %v11014_v61 }
 0x191   :  { %v3354_v11 = vmax.f32 %v2713_v28, %v3014_v12  ;;  %v3010_v14 = vsel %vm2927_vm1, %v3007_v55, %v3009_v3  ;;  %v3012_v17 = vsel %vm2927_vm1, %v3009_v3, %v3011_v48  ;;  %v3715_v28 = vadd.s32 152, %v12278_v47 }
 0x192   :  { %3479 = vst.msk [vmem:[#allocation4 + $0x138] sm:$0xff] %vm973_vm0, %v3351_v10  ;;  %v3352_v0 = vmax.f32 %v2711_v42, %v3010_v14  ;;  %v3353_v46 = vmax.f32 %v2712_v62, %v3012_v17  ;;  %11120 = vmatmul.mubr.msk.bf16.gmra.mrb[196].mxu0 %vm973_vm0, %v11667_v39  ;;  %5122 = vrot.lane.b32.xlu0 %v5050_v58, %s11935_s29  ;;  %v11671_v42 = vld [vmem:[%s16134_s0 + $0x328] sm:$0xff]   ;;  %v11672_v62 = vld [vmem:[%s16134_s0 + $0x330] sm:$0xff]   ;;  %vm13110_vm11 = vcmp.ne.s32.totalorder %v3778_v23, 0  ;;  %v2505_v44 = vmax.f32 %v1753_v1, 0.0 }
 0x193   :  { %3482 = vst.msk [vmem:[#allocation4 + $0x150] sm:$0xff] %vm973_vm0, %v3354_v11  ;;  %11123 = vmatprep.mubr.msk.bf16.mxu0 %vm973_vm0, %v11669_v27  ;;  %v1748_v53 = vadd.f32 %v12673_v13, %v1747_v43  ;;  %v3779_v39 = vand.u32 15, %v3715_v28  ;;  %v2503_v20 = vmax.f32 %v1745_v40, 0.0  ;;  %v2506_v52 = vmax.f32 %v1756_v38, 0.0  ;;  %v11673_v38 = vld [vmem:[%s16134_s0 + $0x338] sm:$0xff]  }
 0x194   :  { %3480 = vst.msk [vmem:[#allocation4 + $0x140] sm:$0xff] %vm973_vm0, %v3352_v0  ;;  %3481 = vst.msk [vmem:[#allocation4 + $0x148] sm:$0xff] %vm973_vm0, %v3353_v46  ;;  %v3925_v26 = vsel %vm3888_vm2, %v3922_v9, %v3924_v34 }
 0x195   :  { %v11017_v7 = vpop.f32.mrb[92].mxu0  ;;  %v5109_v63 = vpop.permute.xlu1 %5108  ;;  %v2504_v10 = vmax.f32 %v1748_v53, 0.0  ;;  %vm13133_vm12 = vcmp.ne.s32.totalorder %v3779_v39, 15  ;;  %v4483_v23 = vsel %vm13110_vm11, %v3925_v26, 0.0 }
 0x196   :  { %v1769_v5 = vadd.f32 %v12673_v13, %v11017_v7  ;;  %v1760_v60 = vpop.f32.mrb[93].mxu0  ;;  %5204 = vst.msk [vmem:[#allocation2 + $0x10] sm:$0xff] %vm5202_vm7, %v5109_v63 }
 0x197   :  { %v1761_v29 = vadd.f32 %v12673_v13, %v1760_v60  ;;  %v11018_v55 = vpop.f32.mrb[94].mxu0 }
 0x198   :  { %v2509_v2 = vmax.f32 %v1769_v5, 0.0  ;;  %v1772_v48 = vadd.f32 %v12673_v13, %v11018_v55  ;;  %v1763_v50 = vpop.f32.mrb[95].mxu0  ;;  %v3716_v55 = vadd.s32 160, %v12278_v47 }
 0x199   :  { %v2507_v19 = vmax.f32 %v1761_v29, 0.0  ;;  %v1764_v3 = vadd.f32 %v12673_v13, %v1763_v50  ;;  %v13117_v31 = vld [vmem:[#allocation4 + $0x130] ss:$2 sm:$0xff]  ;;  %v11674_v29 = vld [vmem:[%s16134_s0 + $0x340] sm:$0xff]  }
 0x19a   :  { %v2717_v18 = vmax.f32 %v2505_v44, %v2509_v2  ;;  %v2510_v61 = vmax.f32 %v1772_v48, 0.0  ;;  %11124 = vmatmul.mubr.msk.bf16.gmra.mrb[200].mxu0 %vm973_vm0, %v11671_v42  ;;  %v3926_v27 = vrot.slane %v13117_v31, 7  ;;  %v4858_v8 = vpack.c.bf16 %v13117_v31, %v13045_v41 }
 0x19b   :  { %v2715_v12 = vmax.f32 %v2503_v20, %v2507_v19  ;;  %v2508_v43 = vmax.f32 %v1764_v3, 0.0  ;;  %11127 = vmatprep.mubr.msk.bf16.mxu0 %vm973_vm0, %v11672_v62  ;;  %v13127_v11 = vld [vmem:[#allocation4 + $0x140] ss:$2 sm:$0xff]  ;;  %v4118_v17 = vrot.slane %v13117_v31, 1  ;;  %v3780_v19 = vand.u32 15, %v3716_v55 }
 0x19c   :  { %v13129_v14 = vmax.f32 %v2506_v52, %v2510_v61  ;;  %v4120_v0 = vrot.slane %v13127_v11, 1  ;;  %4931 = vrot.lane.b32.xlu1 %v4858_v8, %s11934_s21  ;;  %v3927_v58 = vsel %vm3888_vm2, %v3924_v34, %v3926_v27  ;;  %v3019_v1 = vrot.slane %v2717_v18, 1 }
 0x19d   :  { %v3015_v9 = vrot.slane %v2715_v12, 1  ;;  %v2716_v46 = vmax.f32 %v2504_v10, %v2508_v43  ;;  %v11021_v30 = vpop.f32.mrb[96].mxu0  ;;  %v4794_v5 = vpack.c.bf16 %v3927_v58, %v4483_v23  ;;  %v5237_v34 = vld [vmem:[#allocation2 + $0x10] sm:$0xff]  ;;  %v4119_v20 = vsel %vm2927_vm1, %v4116_v16, %v4118_v17 }
 0x19e   :  { %v3021_v28 = vrot.slane %v13129_v14, 1  ;;  %v1776_v40 = vpop.f32.mrb[97].mxu0  ;;  %v4121_v7 = vsel %vm2927_vm1, %v4118_v17, %v4120_v0  ;;  %v4918_v53 = vpop.permute.xlu0 %4917  ;;  %11192 = vmatmul.mubr.msk.bf16.vlgmr.msra.gmra.mrb[0].mxu1 %vm40_vm8, %v5237_v34  ;;  %v1785_v3 = vadd.f32 %v12673_v13, %v11021_v30  ;;  %v3928_v43 = vrot.slane %v13127_v11, 7 }
 0x19f   :  { %v3016_v60 = vsel %vm2927_vm1, %v3013_v4, %v3015_v9  ;;  %v3017_v42 = vrot.slane %v2716_v46, 1  ;;  %v11022_v63 = vpop.f32.mrb[98].mxu0  ;;  %5012 = vst.msk [vmem:[#allocation2 + $0x18] sm:$0xff] %vm5009_vm4, %v4918_v53  ;;  %v4740_v44 = vsel %vm13133_vm12, %v4121_v7, 0.0  ;;  %v1777_v61 = vadd.f32 %v12673_v13, %v1776_v40 }
 0x1a0   :  { %v3355_v62 = vmax.f32 %v13047_v54, %v3016_v60  ;;  %v3022_v22 = vsel %vm2927_vm1, %v3019_v1, %v3021_v28  ;;  %v1779_v4 = vpop.f32.mrb[99].mxu0  ;;  %4826 = vst.msk [vmem:[#allocation2 + $0x50] sm:$0xff] %vm973_vm0, %v4794_v5  ;;  %v5051_v52 = vpack.c.bf16 %v4740_v44, %v4119_v20  ;;  %v1788_v41 = vadd.f32 %v12673_v13, %v11022_v63 }
 0x1a1   :  { %v3358_v2 = vmax.f32 %v2717_v18, %v3022_v22  ;;  %v3018_v48 = vsel %vm2927_vm1, %v3015_v9, %v3017_v42  ;;  %v3020_v50 = vsel %vm2927_vm1, %v3017_v42, %v3019_v1  ;;  %v3717_v18 = vadd.s32 168, %v12278_v47 }
 0x1a2   :  { %3483 = vst.msk [vmem:[#allocation4 + $0x158] sm:$0xff] %vm973_vm0, %v3355_v62  ;;  %v3356_v54 = vmax.f32 %v2715_v12, %v3018_v48  ;;  %v3357_v39 = vmax.f32 %v2716_v46, %v3020_v50  ;;  %11128 = vmatmul.mubr.msk.bf16.gmra.mrb[204].mxu0 %vm973_vm0, %v11673_v38  ;;  %5124 = vrot.lane.b32.xlu1 %v5051_v52, %s11935_s29  ;;  %v11675_v12 = vld [vmem:[%s16134_s0 + $0x348] sm:$0xff]   ;;  %v11676_v46 = vld [vmem:[%s16134_s0 + $0x350] sm:$0xff]   ;;  %vm13192_vm13 = vcmp.ne.s32.totalorder %v3780_v19, 0  ;;  %v2513_v58 = vmax.f32 %v1785_v3, 0.0 }
 0x1a3   :  { %3486 = vst.msk [vmem:[#allocation4 + $0x170] sm:$0xff] %vm973_vm0, %v3358_v2  ;;  %11131 = vmatprep.mubr.msk.bf16.mxu0 %vm973_vm0, %v11674_v29  ;;  %v1780_v8 = vadd.f32 %v12673_v13, %v1779_v4  ;;  %v3781_v38 = vand.u32 15, %v3717_v18  ;;  %v2511_v7 = vmax.f32 %v1777_v61, 0.0  ;;  %v2514_v5 = vmax.f32 %v1788_v41, 0.0  ;;  %v11677_v61 = vld [vmem:[%s16134_s0 + $0x358] sm:$0xff]  }
 0x1a4   :  { %3484 = vst.msk [vmem:[#allocation4 + $0x160] sm:$0xff] %vm973_vm0, %v3356_v54  ;;  %3485 = vst.msk [vmem:[#allocation4 + $0x168] sm:$0xff] %vm973_vm0, %v3357_v39  ;;  %v3929_v55 = vsel %vm3888_vm2, %v3926_v27, %v3928_v43 }
 0x1a5   :  { %v11025_v16 = vpop.f32.mrb[100].mxu0  ;;  %v5111_v17 = vpop.permute.xlu0 %5110  ;;  %v2512_v62 = vmax.f32 %v1780_v8, 0.0  ;;  %vm13215_vm14 = vcmp.ne.s32.totalorder %v3781_v38, 15  ;;  %v4485_v52 = vsel %vm13192_vm13, %v3929_v55, 0.0 }
 0x1a6   :  { %v1801_v26 = vadd.f32 %v12673_v13, %v11025_v16  ;;  %v1792_v10 = vpop.f32.mrb[101].mxu0  ;;  %5205 = vst.msk [vmem:[#allocation2 + $0x18] sm:$0xff] %vm5202_vm7, %v5111_v17  ;;  %v11678_v17 = vld [vmem:[%s16134_s0 + $0x360] sm:$0xff]  }
 0x1a7   :  { %v1793_v25 = vadd.f32 %v12673_v13, %v1792_v10  ;;  %v11026_v9 = vpop.f32.mrb[102].mxu0 }
 0x1a8   :  { %v2517_v23 = vmax.f32 %v1801_v26, 0.0  ;;  %v1804_v1 = vadd.f32 %v12673_v13, %v11026_v9  ;;  %v1795_v40 = vpop.f32.mrb[103].mxu0 }
 0x1a9   :  { %v2515_v60 = vmax.f32 %v1793_v25, 0.0  ;;  %v1796_v42 = vadd.f32 %v12673_v13, %v1795_v40  ;;  %v13199_v34 = vld [vmem:[#allocation4 + $0x150] ss:$2 sm:$0xff]  ;;  %v3718_v25 = vadd.s32 176, %v12278_v47 }
 0x1aa   :  { %v2721_v53 = vmax.f32 %v2513_v58, %v2517_v23  ;;  %v2518_v63 = vmax.f32 %v1804_v1, 0.0  ;;  %11132 = vmatmul.mubr.msk.bf16.gmra.mrb[208].mxu0 %vm973_vm0, %v11675_v12  ;;  %v3930_v29 = vrot.slane %v13199_v34, 7  ;;  %v4859_v44 = vpack.c.bf16 %v13199_v34, %v13127_v11 }
 0x1ab   :  { %v2719_v22 = vmax.f32 %v2511_v7, %v2515_v60  ;;  %v2516_v4 = vmax.f32 %v1796_v42, 0.0  ;;  %11135 = vmatprep.mubr.msk.bf16.mxu0 %vm973_vm0, %v11676_v46  ;;  %v13209_v13 = vld [vmem:[#allocation4 + $0x160] ss:$2 sm:$0xff]  ;;  %v4122_v48 = vrot.slane %v13199_v34, 1  ;;  %v3719_v11 = vadd.s32 184, %v12278_v47 }
 0x1ac   :  { %v13211_v2 = vmax.f32 %v2514_v5, %v2518_v63  ;;  %v4124_v50 = vrot.slane %v13209_v13, 1  ;;  %4933 = vrot.lane.b32.xlu0 %v4859_v44, %s11934_s21  ;;  %v3931_v20 = vsel %vm3888_vm2, %v3928_v43, %v3930_v29  ;;  %v3027_v19 = vrot.slane %v2721_v53, 1  ;;  %v13262_v60 = vld [vmem:[%s16136_s2] ss:$0 sm:$0xff] }
 0x1ad   :  { %v3023_v27 = vrot.slane %v2719_v22, 1  ;;  %v2720_v54 = vmax.f32 %v2512_v62, %v2516_v4  ;;  %v11029_v39 = vpop.f32.mrb[104].mxu0  ;;  %v4795_v16 = vpack.c.bf16 %v3931_v20, %v4485_v52  ;;  %v5238_v12 = vld [vmem:[#allocation2 + $0x18] sm:$0xff]  ;;  %v4123_v38 = vsel %vm2927_vm1, %v4120_v0, %v4122_v48 }
 0x1ae   :  { %v3029_v3 = vrot.slane %v13211_v2, 1  ;;  %v1808_v18 = vpop.f32.mrb[105].mxu0  ;;  %v4125_v41 = vsel %vm2927_vm1, %v4122_v48, %v4124_v50  ;;  %v4920_v43 = vpop.permute.xlu1 %4919  ;;  %11195 = vmatprep.mubr.msk.bf16.mxu1 %vm40_vm8, %v5238_v12  ;;  %v3782_v5 = vand.u32 15, %v3718_v25  ;;  %v1817_v42 = vadd.f32 %v13262_v60, %v11029_v39 }
 0x1af   :  { %v3024_v26 = vsel %vm2927_vm1, %v3021_v28, %v3023_v27  ;;  %v3025_v10 = vrot.slane %v2720_v54, 1  ;;  %v11030_v8 = vpop.f32.mrb[106].mxu0  ;;  %5013 = vst.msk [vmem:[#allocation2 + $0x20] sm:$0xff] %vm5009_vm4, %v4920_v43  ;;  %v4742_v30 = vsel %vm13215_vm14, %v4125_v41, 0.0  ;;  %v1809_v0 = vadd.f32 %v13262_v60, %v1808_v18 }
 0x1b0   :  { %v3359_v9 = vmax.f32 %v13129_v14, %v3024_v26  ;;  %v3030_v46 = vsel %vm2927_vm1, %v3027_v19, %v3029_v3  ;;  %v1811_v28 = vpop.f32.mrb[107].mxu0  ;;  %4827 = vst.msk [vmem:[#allocation2 + $0x58] sm:$0xff] %vm973_vm0, %v4795_v16  ;;  %v5052_v7 = vpack.c.bf16 %v4742_v30, %v4123_v38  ;;  %v3932_v4 = vrot.slane %v13209_v13, 7 }
 0x1b1   :  { %v3362_v58 = vmax.f32 %v2721_v53, %v3030_v46  ;;  %v3026_v23 = vsel %vm2927_vm1, %v3023_v27, %v3025_v10  ;;  %v3028_v1 = vsel %vm2927_vm1, %v3025_v10, %v3027_v19  ;;  %v1820_v53 = vadd.f32 %v13262_v60, %v11030_v8 }
 0x1b2   :  { %3487 = vst.msk [vmem:[#allocation4 + $0x178] sm:$0xff] %vm973_vm0, %v3359_v9  ;;  %v3360_v14 = vmax.f32 %v2719_v22, %v3026_v23  ;;  %v3361_v40 = vmax.f32 %v2720_v54, %v3028_v1  ;;  %11136 = vmatmul.mubr.msk.bf16.gmra.mrb[212].mxu0 %vm973_vm0, %v11677_v61  ;;  %5126 = vrot.lane.b32.xlu0 %v5052_v7, %s11935_s29  ;;  %v11679_v22 = vld [vmem:[%s16134_s0 + $0x368] sm:$0xff]   ;;  %v11680_v54 = vld [vmem:[%s16134_s0 + $0x370] sm:$0xff]   ;;  %vm13279_vm15 = vcmp.ne.s32.totalorder %v3782_v5, 0  ;;  %v2521_v20 = vmax.f32 %v1817_v42, 0.0 }
 0x1b3   :  { %3490 = vst.msk [vmem:[#allocation4 + $0x190] sm:$0xff] %vm973_vm0, %v3362_v58  ;;  %11139 = vmatprep.mubr.msk.bf16.mxu0 %vm973_vm0, %v11678_v17  ;;  %v1812_v44 = vadd.f32 %v13262_v60, %v1811_v28  ;;  %v3783_v61 = vand.u32 15, %v3719_v11  ;;  %v2519_v41 = vmax.f32 %v1809_v0, 0.0  ;;  %v2522_v16 = vmax.f32 %v1820_v53, 0.0  ;;  %v11681_v53 = vld [vmem:[%s16134_s0 + $0x378] sm:$0xff]  }
 0x1b4   :  { %3488 = vst.msk [vmem:[#allocation4 + $0x180] sm:$0xff] %vm973_vm0, %v3360_v14  ;;  %3489 = vst.msk [vmem:[#allocation4 + $0x188] sm:$0xff] %vm973_vm0, %v3361_v40  ;;  %v3933_v25 = vsel %vm3888_vm2, %v3930_v29, %v3932_v4 }
 0x1b5   :  { %v11033_v63 = vpop.f32.mrb[108].mxu0  ;;  %v5113_v48 = vpop.permute.xlu1 %5112  ;;  %v2520_v9 = vmax.f32 %v1812_v44, 0.0  ;;  %vm13302_vm3 = vcmp.ne.s32.totalorder %v3783_v61, 15  ;;  %v4487_v5 = vsel %vm13279_vm15, %v3933_v25, 0.0 }
 0x1b6   :  { %v1833_v55 = vadd.f32 %v13262_v60, %v11033_v63  ;;  %v1824_v62 = vpop.f32.mrb[109].mxu0  ;;  %5206 = vst.msk [vmem:[#allocation2 + $0x20] sm:$0xff] %vm5202_vm7, %v5113_v48 }
 0x1b7   :  { %v1825_v31 = vadd.f32 %v13262_v60, %v1824_v62  ;;  %v11034_v27 = vpop.f32.mrb[110].mxu0 }
 0x1b8   :  { %v2525_v52 = vmax.f32 %v1833_v55, 0.0  ;;  %v1836_v19 = vadd.f32 %v13262_v60, %v11034_v27  ;;  %v1827_v18 = vpop.f32.mrb[111].mxu0  ;;  %v3720_v27 = vadd.s32 192, %v12278_v47 }
 0x1b9   :  { %v2523_v26 = vmax.f32 %v1825_v31, 0.0  ;;  %v1828_v10 = vadd.f32 %v13262_v60, %v1827_v18  ;;  %v13286_v12 = vld [vmem:[#allocation4 + $0x170] ss:$2 sm:$0xff]  ;;  %v11682_v31 = vld [vmem:[%s16134_s0 + $0x380] sm:$0xff]  }
 0x1ba   :  { %v2725_v43 = vmax.f32 %v2521_v20, %v2525_v52  ;;  %v2526_v8 = vmax.f32 %v1836_v19, 0.0  ;;  %11140 = vmatmul.mubr.msk.bf16.gmra.mrb[216].mxu0 %vm973_vm0, %v11679_v22  ;;  %v3934_v17 = vrot.slane %v13286_v12, 7  ;;  %v4860_v30 = vpack.c.bf16 %v13286_v12, %v13209_v13 }
 0x1bb   :  { %v2723_v46 = vmax.f32 %v2519_v41, %v2523_v26  ;;  %v2524_v28 = vmax.f32 %v1828_v10, 0.0  ;;  %11143 = vmatprep.mubr.msk.bf16.mxu0 %vm973_vm0, %v11680_v54  ;;  %v13296_v58 = vld [vmem:[#allocation4 + $0x180] ss:$2 sm:$0xff]  ;;  %v4126_v1 = vrot.slane %v13286_v12, 1  ;;  %v3784_v26 = vand.u32 15, %v3720_v27 }
 0x1bc   :  { %v13298_v23 = vmax.f32 %v2522_v16, %v2526_v8  ;;  %v4128_v14 = vrot.slane %v13296_v58, 1  ;;  %4935 = vrot.lane.b32.xlu1 %v4860_v30, %s11934_s21  ;;  %v3935_v7 = vsel %vm3888_vm2, %v3932_v4, %v3934_v17  ;;  %v3035_v42 = vrot.slane %v2725_v43, 1 }
 0x1bd   :  { %v3031_v29 = vrot.slane %v2723_v46, 1  ;;  %v2724_v40 = vmax.f32 %v2520_v9, %v2524_v28  ;;  %v11037_v38 = vpop.f32.mrb[112].mxu0  ;;  %v4796_v55 = vpack.c.bf16 %v3935_v7, %v4487_v5  ;;  %v5239_v4 = vld [vmem:[#allocation2 + $0x20] sm:$0xff]  ;;  %v4127_v41 = vsel %vm2927_vm1, %v4124_v50, %v4126_v1 }
 0x1be   :  { %v3037_v11 = vrot.slane %v13298_v23, 1  ;;  %v1840_v0 = vpop.f32.mrb[113].mxu0  ;;  %v4129_v63 = vsel %vm2927_vm1, %v4126_v1, %v4128_v14  ;;  %v4922_v44 = vpop.permute.xlu0 %4921  ;;  %11196 = vmatmul.mubr.msk.bf16.gmra.mrb[4].mxu1 %vm40_vm8, %v5239_v4  ;;  %v1849_v10 = vadd.f32 %v13262_v60, %v11037_v38  ;;  %v3936_v28 = vrot.slane %v13296_v58, 7 }
 0x1bf   :  { %v3032_v62 = vsel %vm2927_vm1, %v3029_v3, %v3031_v29  ;;  %v3033_v22 = vrot.slane %v2724_v40, 1  ;;  %v11038_v48 = vpop.f32.mrb[114].mxu0  ;;  %5014 = vst.msk [vmem:[#allocation2 + $0x28] sm:$0xff] %vm5009_vm4, %v4922_v44  ;;  %v4744_v20 = vsel %vm13302_vm3, %v4129_v63, 0.0  ;;  %v1841_v8 = vadd.f32 %v13262_v60, %v1840_v0 }
 0x1c0   :  { %v3363_v54 = vmax.f32 %v13211_v2, %v3032_v62  ;;  %v3038_v39 = vsel %vm2927_vm1, %v3035_v42, %v3037_v11  ;;  %v1843_v3 = vpop.f32.mrb[115].mxu0  ;;  %4828 = vst.msk [vmem:[#allocation2 + $0x60] sm:$0xff] %vm973_vm0, %v4796_v55  ;;  %v5053_v16 = vpack.c.bf16 %v4744_v20, %v4127_v41  ;;  %v1852_v13 = vadd.f32 %v13262_v60, %v11038_v48 }
 0x1c1   :  { %v3366_v52 = vmax.f32 %v2725_v43, %v3038_v39  ;;  %v3034_v19 = vsel %vm2927_vm1, %v3031_v29, %v3033_v22  ;;  %v3036_v18 = vsel %vm2927_vm1, %v3033_v22, %v3035_v42  ;;  %v3721_v43 = vadd.s32 200, %v12278_v47 }
 0x1c2   :  { %3491 = vst.msk [vmem:[#allocation4 + $0x198] sm:$0xff] %vm973_vm0, %v3363_v54  ;;  %v3364_v2 = vmax.f32 %v2723_v46, %v3034_v19  ;;  %v3365_v61 = vmax.f32 %v2724_v40, %v3036_v18  ;;  %11144 = vmatmul.mubr.msk.bf16.gmra.mrb[220].mxu0 %vm973_vm0, %v11681_v53  ;;  %5128 = vrot.lane.b32.xlu1 %v5053_v16, %s11935_s29  ;;  %v11683_v46 = vld [vmem:[%s16134_s0 + $0x388] sm:$0xff]   ;;  %v11684_v40 = vld [vmem:[%s16134_s0 + $0x390] sm:$0xff]   ;;  %vm13361_vm5 = vcmp.ne.s32.totalorder %v3784_v26, 0  ;;  %v2529_v7 = vmax.f32 %v1849_v10, 0.0 }
 0x1c3   :  { %3494 = vst.msk [vmem:[#allocation4 + $0x1b0] sm:$0xff] %vm973_vm0, %v3366_v52  ;;  %11147 = vmatprep.mubr.msk.bf16.mxu0 %vm973_vm0, %v11682_v31  ;;  %v1844_v30 = vadd.f32 %v13262_v60, %v1843_v3  ;;  %v3785_v53 = vand.u32 15, %v3721_v43  ;;  %v2527_v63 = vmax.f32 %v1841_v8, 0.0  ;;  %v2530_v55 = vmax.f32 %v1852_v13, 0.0  ;;  %v11685_v13 = vld [vmem:[%s16134_s0 + $0x398] sm:$0xff]  }
 0x1c4   :  { %3492 = vst.msk [vmem:[#allocation4 + $0x1a0] sm:$0xff] %vm973_vm0, %v3364_v2  ;;  %3493 = vst.msk [vmem:[#allocation4 + $0x1a8] sm:$0xff] %vm973_vm0, %v3365_v61  ;;  %v3937_v27 = vsel %vm3888_vm2, %v3934_v17, %v3936_v28 }
 0x1c5   :  { %v11041_v50 = vpop.f32.mrb[116].mxu0  ;;  %v5115_v1 = vpop.permute.xlu0 %5114  ;;  %v2528_v54 = vmax.f32 %v1844_v30, 0.0  ;;  %vm13384_vm6 = vcmp.ne.s32.totalorder %v3785_v53, 15  ;;  %v4489_v26 = vsel %vm13361_vm5, %v3937_v27, 0.0 }
 0x1c6   :  { %v1865_v25 = vadd.f32 %v13262_v60, %v11041_v50  ;;  %v1856_v9 = vpop.f32.mrb[117].mxu0  ;;  %5207 = vst.msk [vmem:[#allocation2 + $0x28] sm:$0xff] %vm5202_vm7, %v5115_v1 }
 0x1c7   :  { %v1857_v34 = vadd.f32 %v13262_v60, %v1856_v9  ;;  %v11042_v29 = vpop.f32.mrb[118].mxu0 }
 0x1c8   :  { %v2533_v5 = vmax.f32 %v1865_v25, 0.0  ;;  %v1868_v42 = vadd.f32 %v13262_v60, %v11042_v29  ;;  %v1859_v0 = vpop.f32.mrb[119].mxu0  ;;  %v3722_v29 = vadd.s32 208, %v12278_v47 }
 0x1c9   :  { %v2531_v62 = vmax.f32 %v1857_v34, 0.0  ;;  %v1860_v22 = vadd.f32 %v13262_v60, %v1859_v0  ;;  %v13368_v4 = vld [vmem:[#allocation4 + $0x190] ss:$2 sm:$0xff]  ;;  %v11686_v34 = vld [vmem:[%s16134_s0 + $0x3a0] sm:$0xff]  }
 0x1ca   :  { %v2729_v44 = vmax.f32 %v2529_v7, %v2533_v5  ;;  %v2534_v48 = vmax.f32 %v1868_v42, 0.0  ;;  %11148 = vmatmul.mubr.msk.bf16.gmra.mrb[224].mxu0 %vm973_vm0, %v11683_v46  ;;  %v3938_v31 = vrot.slane %v13368_v4, 7  ;;  %v4861_v20 = vpack.c.bf16 %v13368_v4, %v13296_v58 }
 0x1cb   :  { %v2727_v39 = vmax.f32 %v2527_v63, %v2531_v62  ;;  %v2532_v3 = vmax.f32 %v1860_v22, 0.0  ;;  %11151 = vmatprep.mubr.msk.bf16.mxu0 %vm973_vm0, %v11684_v40  ;;  %v13378_v52 = vld [vmem:[#allocation4 + $0x1a0] ss:$2 sm:$0xff]  ;;  %v4130_v18 = vrot.slane %v13368_v4, 1  ;;  %v3786_v62 = vand.u32 15, %v3722_v29 }
 0x1cc   :  { %v13380_v19 = vmax.f32 %v2530_v55, %v2534_v48  ;;  %v4132_v2 = vrot.slane %v13378_v52, 1  ;;  %4937 = vrot.lane.b32.xlu0 %v4861_v20, %s11934_s21  ;;  %v3939_v16 = vsel %vm3888_vm2, %v3936_v28, %v3938_v31  ;;  %v3043_v10 = vrot.slane %v2729_v44, 1 }
 0x1cd   :  { %v3039_v17 = vrot.slane %v2727_v39, 1  ;;  %v2728_v61 = vmax.f32 %v2528_v54, %v2532_v3  ;;  %v11045_v41 = vpop.f32.mrb[120].mxu0  ;;  %v4797_v25 = vpack.c.bf16 %v3939_v16, %v4489_v26  ;;  %v5240_v28 = vld [vmem:[#allocation2 + $0x28] sm:$0xff]  ;;  %v4131_v63 = vsel %vm2927_vm1, %v4128_v14, %v4130_v18 }
 0x1ce   :  { %v3045_v43 = vrot.slane %v13380_v19, 1  ;;  %v1872_v8 = vpop.f32.mrb[121].mxu0  ;;  %v4133_v50 = vsel %vm2927_vm1, %v4130_v18, %v4132_v2  ;;  %v4924_v30 = vpop.permute.xlu1 %4923  ;;  %11199 = vmatprep.mubr.msk.bf16.mxu1 %vm40_vm8, %v5240_v28  ;;  %v1881_v22 = vadd.f32 %v13262_v60, %v11045_v41  ;;  %v3940_v3 = vrot.slane %v13378_v52, 7 }
 0x1cf   :  { %v3040_v9 = vsel %vm2927_vm1, %v3037_v11, %v3039_v17  ;;  %v3041_v46 = vrot.slane %v2728_v61, 1  ;;  %v11046_v1 = vpop.f32.mrb[122].mxu0  ;;  %5015 = vst.msk [vmem:[#allocation2 + $0x30] sm:$0xff] %vm5009_vm4, %v4924_v30  ;;  %v4746_v7 = vsel %vm13384_vm6, %v4133_v50, 0.0  ;;  %v1873_v48 = vadd.f32 %v13262_v60, %v1872_v8 }
 0x1d0   :  { %v3367_v40 = vmax.f32 %v13298_v23, %v3040_v9  ;;  %v3046_v38 = vsel %vm2927_vm1, %v3043_v10, %v3045_v43  ;;  %v1875_v11 = vpop.f32.mrb[123].mxu0  ;;  %4829 = vst.msk [vmem:[#allocation2 + $0x68] sm:$0xff] %vm973_vm0, %v4797_v25  ;;  %v5054_v55 = vpack.c.bf16 %v4746_v7, %v4131_v63  ;;  %v1884_v58 = vadd.f32 %v13262_v60, %v11046_v1 }
 0x1d1   :  { %v3370_v5 = vmax.f32 %v2729_v44, %v3046_v38  ;;  %v3042_v42 = vsel %vm2927_vm1, %v3039_v17, %v3041_v46  ;;  %v3044_v0 = vsel %vm2927_vm1, %v3041_v46, %v3043_v10  ;;  %v3723_v44 = vadd.s32 216, %v12278_v47 }
 0x1d2   :  { %3495 = vst.msk [vmem:[#allocation4 + $0x1b8] sm:$0xff] %vm973_vm0, %v3367_v40  ;;  %v3368_v23 = vmax.f32 %v2727_v39, %v3042_v42  ;;  %v3369_v53 = vmax.f32 %v2728_v61, %v3044_v0  ;;  %11152 = vmatmul.mubr.msk.bf16.gmra.mrb[228].mxu0 %vm973_vm0, %v11685_v13  ;;  %5130 = vrot.lane.b32.xlu0 %v5054_v55, %s11935_s29  ;;  %v11687_v39 = vld [vmem:[%s16134_s0 + $0x3a8] sm:$0xff]   ;;  %v11688_v61 = vld [vmem:[%s16134_s0 + $0x3b0] sm:$0xff]   ;;  %vm13443_vm9 = vcmp.ne.s32.totalorder %v3786_v62, 0  ;;  %v2537_v16 = vmax.f32 %v1881_v22, 0.0 }
 0x1d3   :  { %3498 = vst.msk [vmem:[#allocation4 + $0x1d0] sm:$0xff] %vm973_vm0, %v3370_v5  ;;  %11155 = vmatprep.mubr.msk.bf16.mxu0 %vm973_vm0, %v11686_v34  ;;  %v1876_v20 = vadd.f32 %v13262_v60, %v1875_v11  ;;  %v3787_v13 = vand.u32 15, %v3723_v44  ;;  %v2535_v50 = vmax.f32 %v1873_v48, 0.0  ;;  %v2538_v25 = vmax.f32 %v1884_v58, 0.0  ;;  %v11689_v58 = vld [vmem:[%s16134_s0 + $0x3b8] sm:$0xff]  }
 0x1d4   :  { %3496 = vst.msk [vmem:[#allocation4 + $0x1c0] sm:$0xff] %vm973_vm0, %v3368_v23  ;;  %3497 = vst.msk [vmem:[#allocation4 + $0x1c8] sm:$0xff] %vm973_vm0, %v3369_v53  ;;  %v3941_v29 = vsel %vm3888_vm2, %v3938_v31, %v3940_v3 }
 0x1d5   :  { %v11049_v14 = vpop.f32.mrb[124].mxu0  ;;  %v5117_v18 = vpop.permute.xlu1 %5116  ;;  %v2536_v40 = vmax.f32 %v1876_v20, 0.0  ;;  %vm13466_vm10 = vcmp.ne.s32.totalorder %v3787_v13, 15  ;;  %v4491_v62 = vsel %vm13443_vm9, %v3941_v29, 0.0 }
 0x1d6   :  { %v1897_v27 = vadd.f32 %v13262_v60, %v11049_v14  ;;  %v1888_v54 = vpop.f32.mrb[125].mxu0  ;;  %5208 = vst.msk [vmem:[#allocation2 + $0x30] sm:$0xff] %vm5202_vm7, %v5117_v18 }
 0x1d7   :  { %v1889_v12 = vadd.f32 %v13262_v60, %v1888_v54  ;;  %v11050_v17 = vpop.f32.mrb[126].mxu0 }
 0x1d8   :  { %v2541_v26 = vmax.f32 %v1897_v27, 0.0  ;;  %v1900_v10 = vadd.f32 %v13262_v60, %v11050_v17  ;;  %v1891_v8 = vpop.f32.mrb[127].mxu0  ;;  %v3724_v17 = vadd.s32 224, %v12278_v47 }
 0x1d9   :  { %v2539_v9 = vmax.f32 %v1889_v12, 0.0  ;;  %v1892_v46 = vadd.f32 %v13262_v60, %v1891_v8  ;;  %v13450_v28 = vld [vmem:[#allocation4 + $0x1b0] ss:$2 sm:$0xff]  ;;  %v11690_v12 = vld [vmem:[%s16134_s0 + $0x3c0] sm:$0xff]  }
 0x1da   :  { %v2733_v30 = vmax.f32 %v2537_v16, %v2541_v26  ;;  %v2542_v1 = vmax.f32 %v1900_v10, 0.0  ;;  %11156 = vmatmul.mubr.msk.bf16.gmra.mrb[232].mxu0 %vm973_vm0, %v11687_v39  ;;  %v3942_v34 = vrot.slane %v13450_v28, 7  ;;  %v4862_v7 = vpack.c.bf16 %v13450_v28, %v13378_v52 }
 0x1db   :  { %v2731_v38 = vmax.f32 %v2535_v50, %v2539_v9  ;;  %v2540_v11 = vmax.f32 %v1892_v46, 0.0  ;;  %11159 = vmatprep.mubr.msk.bf16.mxu0 %vm973_vm0, %v11688_v61  ;;  %v13460_v5 = vld [vmem:[#allocation4 + $0x1c0] ss:$2 sm:$0xff]  ;;  %v4134_v0 = vrot.slane %v13450_v28, 1  ;;  %v3788_v9 = vand.u32 15, %v3724_v17 }
 0x1dc   :  { %v13462_v42 = vmax.f32 %v2538_v25, %v2542_v1  ;;  %v4136_v23 = vrot.slane %v13460_v5, 1  ;;  %4939 = vrot.lane.b32.xlu1 %v4862_v7, %s11934_s21  ;;  %v3943_v55 = vsel %vm3888_vm2, %v3940_v3, %v3942_v34  ;;  %v3051_v22 = vrot.slane %v2733_v30, 1 }
 0x1dd   :  { %v3047_v31 = vrot.slane %v2731_v38, 1  ;;  %v2732_v53 = vmax.f32 %v2536_v40, %v2540_v11  ;;  %v11053_v63 = vpop.f32.mrb[128].mxu0  ;;  %v4798_v27 = vpack.c.bf16 %v3943_v55, %v4491_v62  ;;  %v5241_v3 = vld [vmem:[#allocation2 + $0x30] sm:$0xff]  ;;  %v4135_v50 = vsel %vm2927_vm1, %v4132_v2, %v4134_v0 }
 0x1de   :  { %v3053_v44 = vrot.slane %v13462_v42, 1  ;;  %v1904_v48 = vpop.f32.mrb[129].mxu0  ;;  %v4137_v14 = vsel %vm2927_vm1, %v4134_v0, %v4136_v23  ;;  %v4926_v20 = vpop.permute.xlu0 %4925  ;;  %11200 = vmatmul.mubr.msk.bf16.gmra.mrb[8].mxu1 %vm40_vm8, %v5241_v3  ;;  %v1913_v46 = vadd.f32 %v13262_v60, %v11053_v63  ;;  %v3944_v11 = vrot.slane %v13460_v5, 7 }
 0x1df   :  { %v3048_v54 = vsel %vm2927_vm1, %v3045_v43, %v3047_v31  ;;  %v3049_v39 = vrot.slane %v2732_v53, 1  ;;  %v11054_v18 = vpop.f32.mrb[130].mxu0  ;;  %5016 = vst.msk [vmem:[#allocation2 + $0x38] sm:$0xff] %vm5009_vm4, %v4926_v20  ;;  %v4748_v16 = vsel %vm13466_vm10, %v4137_v14, 0.0  ;;  %v1905_v1 = vadd.f32 %v13262_v60, %v1904_v48 }
 0x1e0   :  { %v3371_v61 = vmax.f32 %v13380_v19, %v3048_v54  ;;  %v3054_v41 = vsel %vm2927_vm1, %v3051_v22, %v3053_v44  ;;  %v1907_v43 = vpop.f32.mrb[131].mxu0  ;;  %4830 = vst.msk [vmem:[#allocation2 + $0x70] sm:$0xff] %vm973_vm0, %v4798_v27  ;;  %v5055_v25 = vpack.c.bf16 %v4748_v16, %v4135_v50  ;;  %v1916_v52 = vadd.f32 %v13262_v60, %v11054_v18 }
 0x1e1   :  { %v3374_v26 = vmax.f32 %v2733_v30, %v3054_v41  ;;  %v3050_v10 = vsel %vm2927_vm1, %v3047_v31, %v3049_v39  ;;  %v3052_v8 = vsel %vm2927_vm1, %v3049_v39, %v3051_v22  ;;  %v3725_v30 = vadd.s32 232, %v12278_v47 }
 0x1e2   :  { %3499 = vst.msk [vmem:[#allocation4 + $0x1d8] sm:$0xff] %vm973_vm0, %v3371_v61  ;;  %v3372_v19 = vmax.f32 %v2731_v38, %v3050_v10  ;;  %v3373_v13 = vmax.f32 %v2732_v53, %v3052_v8  ;;  %11160 = vmatmul.mubr.msk.bf16.gmra.mrb[236].mxu0 %vm973_vm0, %v11689_v58  ;;  %5132 = vrot.lane.b32.xlu1 %v5055_v25, %s11935_s29  ;;  %v11691_v38 = vld [vmem:[%s16134_s0 + $0x3c8] sm:$0xff]   ;;  %v11692_v53 = vld [vmem:[%s16134_s0 + $0x3d0] sm:$0xff]   ;;  %vm13525_vm11 = vcmp.ne.s32.totalorder %v3788_v9, 0  ;;  %v2545_v55 = vmax.f32 %v1913_v46, 0.0 }
 0x1e3   :  { %3502 = vst.msk [vmem:[#allocation4 + $0x1f0] sm:$0xff] %vm973_vm0, %v3374_v26  ;;  %11163 = vmatprep.mubr.msk.bf16.mxu0 %vm973_vm0, %v11690_v12  ;;  %v1908_v7 = vadd.f32 %v13262_v60, %v1907_v43  ;;  %v3789_v58 = vand.u32 15, %v3725_v30  ;;  %v2543_v14 = vmax.f32 %v1905_v1, 0.0  ;;  %v2546_v27 = vmax.f32 %v1916_v52, 0.0  ;;  %v11693_v52 = vld [vmem:[%s16134_s0 + $0x3d8] sm:$0xff]  }
 0x1e4   :  { %3500 = vst.msk [vmem:[#allocation4 + $0x1e0] sm:$0xff] %vm973_vm0, %v3372_v19  ;;  %3501 = vst.msk [vmem:[#allocation4 + $0x1e8] sm:$0xff] %vm973_vm0, %v3373_v13  ;;  %v3945_v17 = vsel %vm3888_vm2, %v3942_v34, %v3944_v11 }
 0x1e5   :  { %v11057_v2 = vpop.f32.mrb[132].mxu0  ;;  %v5119_v0 = vpop.permute.xlu0 %5118  ;;  %v2544_v61 = vmax.f32 %v1908_v7, 0.0  ;;  %vm13548_vm12 = vcmp.ne.s32.totalorder %v3789_v58, 15  ;;  %v4493_v9 = vsel %vm13525_vm11, %v3945_v17, 0.0 }
 0x1e6   :  { %v1929_v29 = vadd.f32 %v13262_v60, %v11057_v2  ;;  %v1920_v40 = vpop.f32.mrb[133].mxu0  ;;  %5209 = vst.msk [vmem:[#allocation2 + $0x38] sm:$0xff] %vm5202_vm7, %v5119_v0 }
 0x1e7   :  { %v1921_v4 = vadd.f32 %v13262_v60, %v1920_v40  ;;  %v11058_v31 = vpop.f32.mrb[134].mxu0 }
 0x1e8   :  { %v2549_v62 = vmax.f32 %v1929_v29, 0.0  ;;  %v1932_v22 = vadd.f32 %v13262_v60, %v11058_v31  ;;  %v1923_v48 = vpop.f32.mrb[135].mxu0  ;;  %v3726_v31 = vadd.s32 240, %v12278_v47 }
 0x1e9   :  { %v2547_v54 = vmax.f32 %v1921_v4, 0.0  ;;  %v1924_v39 = vadd.f32 %v13262_v60, %v1923_v48  ;;  %v13532_v3 = vld [vmem:[#allocation4 + $0x1d0] ss:$2 sm:$0xff]  ;;  %v11694_v4 = vld [vmem:[%s16134_s0 + $0x3e0] sm:$0xff]  }
 0x1ea   :  { %v2737_v20 = vmax.f32 %v2545_v55, %v2549_v62  ;;  %v2550_v18 = vmax.f32 %v1932_v22, 0.0  ;;  %11164 = vmatmul.mubr.msk.bf16.gmra.mrb[240].mxu0 %vm973_vm0, %v11691_v38  ;;  %v3946_v12 = vrot.slane %v13532_v3, 7  ;;  %v4863_v16 = vpack.c.bf16 %v13532_v3, %v13460_v5 }
 0x1eb   :  { %v2735_v41 = vmax.f32 %v2543_v14, %v2547_v54  ;;  %v2548_v43 = vmax.f32 %v1924_v39, 0.0  ;;  %11167 = vmatprep.mubr.msk.bf16.mxu0 %vm973_vm0, %v11692_v53  ;;  %v13542_v26 = vld [vmem:[#allocation4 + $0x1e0] ss:$2 sm:$0xff]  ;;  %v4138_v8 = vrot.slane %v13532_v3, 1  ;;  %v3790_v54 = vand.u32 15, %v3726_v31 }
 0x1ec   :  { %v13544_v10 = vmax.f32 %v2546_v27, %v2550_v18  ;;  %v4140_v19 = vrot.slane %v13542_v26, 1  ;;  %4941 = vrot.lane.b32.xlu0 %v4863_v16, %s11934_s21  ;;  %v3947_v25 = vsel %vm3888_vm2, %v3944_v11, %v3946_v12  ;;  %v3059_v46 = vrot.slane %v2737_v20, 1 }
 0x1ed   :  { %v3055_v34 = vrot.slane %v2735_v41, 1  ;;  %v2736_v13 = vmax.f32 %v2544_v61, %v2548_v43  ;;  %v11061_v50 = vpop.f32.mrb[136].mxu0  ;;  %v4799_v29 = vpack.c.bf16 %v3947_v25, %v4493_v9  ;;  %v5242_v11 = vld [vmem:[#allocation2 + $0x38] sm:$0xff]  ;;  %v4139_v14 = vsel %vm2927_vm1, %v4136_v23, %v4138_v8 }
 0x1ee   :  { %v3061_v30 = vrot.slane %v13544_v10, 1  ;;  %v1936_v1 = vpop.f32.mrb[137].mxu0  ;;  %v4141_v2 = vsel %vm2927_vm1, %v4138_v8, %v4140_v19  ;;  %v4928_v7 = vpop.permute.xlu1 %4927  ;;  %11203 = vmatprep.mubr.msk.bf16.mxu1 %vm40_vm8, %v5242_v11  ;;  %v1945_v39 = vadd.f32 %v13262_v60, %v11061_v50  ;;  %v3948_v43 = vrot.slane %v13542_v26, 7 }
 0x1ef   :  { %v3056_v40 = vsel %vm2927_vm1, %v3053_v44, %v3055_v34  ;;  %v3057_v38 = vrot.slane %v2736_v13, 1  ;;  %v11062_v0 = vpop.f32.mrb[138].mxu0  ;;  %5017 = vst.msk [vmem:[#allocation2 + $0x40] sm:$0xff] %vm5009_vm4, %v4928_v7  ;;  %v4750_v55 = vsel %vm13548_vm12, %v4141_v2, 0.0  ;;  %v1937_v18 = vadd.f32 %v13262_v60, %v1936_v1 }
 0x1f0   :  { %v3375_v53 = vmax.f32 %v13462_v42, %v3056_v40  ;;  %v3062_v63 = vsel %vm2927_vm1, %v3059_v46, %v3061_v30  ;;  %v1939_v44 = vpop.f32.mrb[139].mxu0  ;;  %4831 = vst.msk [vmem:[#allocation2 + $0x78] sm:$0xff] %vm973_vm0, %v4799_v29  ;;  %v5056_v27 = vpack.c.bf16 %v4750_v55, %v4139_v14  ;;  %v1948_v5 = vadd.f32 %v13262_v60, %v11062_v0 }
 0x1f1   :  { %v3378_v62 = vmax.f32 %v2737_v20, %v3062_v63  ;;  %v3058_v22 = vsel %vm2927_vm1, %v3055_v34, %v3057_v38  ;;  %v3060_v48 = vsel %vm2927_vm1, %v3057_v38, %v3059_v46  ;;  %v3727_v20 = vadd.s32 248, %v12278_v47 }
 0x1f2   :  { %3503 = vst.msk [vmem:[#allocation4 + $0x1f8] sm:$0xff] %vm973_vm0, %v3375_v53  ;;  %v3376_v42 = vmax.f32 %v2735_v41, %v3058_v22  ;;  %v3377_v58 = vmax.f32 %v2736_v13, %v3060_v48  ;;  %11168 = vmatmul.mubr.msk.bf16.gmra.mrb[244].mxu0 %vm973_vm0, %v11693_v52  ;;  %5134 = vrot.lane.b32.xlu0 %v5056_v27, %s11935_s29  ;;  %v11695_v41 = vld [vmem:[%s16134_s0 + $0x3e8] sm:$0xff]   ;;  %v11696_v13 = vld [vmem:[%s16134_s0 + $0x3f0] sm:$0xff]   ;;  %vm13607_vm13 = vcmp.ne.s32.totalorder %v3790_v54, 0  ;;  %v2553_v25 = vmax.f32 %v1945_v39, 0.0 }
 0x1f3   :  { %3506 = vst.msk [vmem:[#allocation4 + $0x210] sm:$0xff] %vm973_vm0, %v3378_v62  ;;  %11171 = vmatprep.mubr.msk.bf16.mxu0 %vm973_vm0, %v11694_v4  ;;  %v1940_v16 = vadd.f32 %v13262_v60, %v1939_v44  ;;  %v3791_v52 = vand.u32 15, %v3727_v20  ;;  %v2551_v2 = vmax.f32 %v1937_v18, 0.0  ;;  %v2554_v29 = vmax.f32 %v1948_v5, 0.0  ;;  %v11697_v5 = vld [vmem:[%s16134_s0 + $0x3f8] sm:$0xff]  }
 0x1f4   :  { %3504 = vst.msk [vmem:[#allocation4 + $0x200] sm:$0xff] %vm973_vm0, %v3376_v42  ;;  %3505 = vst.msk [vmem:[#allocation4 + $0x208] sm:$0xff] %vm973_vm0, %v3377_v58  ;;  %v5121_v8 = vpop.permute.xlu1 %5120  ;;  %v3949_v31 = vsel %vm3888_vm2, %v3946_v12, %v3948_v43 }
 0x1f5   :  { %v11065_v23 = vpop.f32.mrb[140].mxu0  ;;  %5210 = vst.msk [vmem:[#allocation2 + $0x40] sm:$0xff] %vm5202_vm7, %v5121_v8  ;;  %v2552_v53 = vmax.f32 %v1940_v16, 0.0  ;;  %vm13630_vm14 = vcmp.ne.s32.totalorder %v3791_v52, 15  ;;  %v4495_v54 = vsel %vm13607_vm13, %v3949_v31, 0.0 }
 0x1f6   :  { %v1961_v17 = vadd.f32 %v13262_v60, %v11065_v23  ;;  %v1952_v61 = vpop.f32.mrb[141].mxu0 }
 0x1f7   :  { %v1953_v28 = vadd.f32 %v13262_v60, %v1952_v61  ;;  %v11066_v34 = vpop.f32.mrb[142].mxu0 }
 0x1f8   :  { %v2557_v9 = vmax.f32 %v1961_v17, 0.0  ;;  %v1964_v46 = vadd.f32 %v13262_v60, %v11066_v34  ;;  %v1955_v1 = vpop.f32.mrb[143].mxu0 }
 0x1f9   :  { %v2555_v40 = vmax.f32 %v1953_v28, 0.0  ;;  %v1956_v38 = vadd.f32 %v13262_v60, %v1955_v1  ;;  %v13614_v11 = vld [vmem:[#allocation4 + $0x1f0] ss:$2 sm:$0xff]  ;;  %v3728_v28 = vadd.s32 256, %v12278_v47 }
 0x1fa   :  { %v2741_v7 = vmax.f32 %v2553_v25, %v2557_v9  ;;  %v2558_v0 = vmax.f32 %v1964_v46, 0.0  ;;  %11172 = vmatmul.mubr.msk.bf16.gmra.mrb[248].mxu0 %vm973_vm0, %v11695_v41  ;;  %v3950_v4 = vrot.slane %v13614_v11, 7  ;;  %v4864_v55 = vpack.c.bf16 %v13614_v11, %v13542_v26 }
 0x1fb   :  { %v2739_v63 = vmax.f32 %v2551_v2, %v2555_v40  ;;  %v2556_v44 = vmax.f32 %v1956_v38, 0.0  ;;  %11175 = vmatprep.mubr.msk.bf16.mxu0 %vm973_vm0, %v11696_v13  ;;  %v13624_v62 = vld [vmem:[#allocation4 + $0x200] ss:$2 sm:$0xff]  ;;  %v4142_v48 = vrot.slane %v13614_v11, 1  ;;  %v3729_v38 = vadd.s32 264, %v12278_v47 }
 0x1fc   :  { %v13626_v22 = vmax.f32 %v2554_v29, %v2558_v0  ;;  %v4144_v42 = vrot.slane %v13624_v62, 1  ;;  %4943 = vrot.lane.b32.xlu1 %v4864_v55, %s11934_s21  ;;  %v3951_v27 = vsel %vm3888_vm2, %v3948_v43, %v3950_v4  ;;  %v3067_v39 = vrot.slane %v2741_v7, 1  ;;  %v5243_v43 = vld [vmem:[#allocation2 + $0x40] sm:$0xff] }
 0x1fd   :  { %v3063_v12 = vrot.slane %v2739_v63, 1  ;;  %v2740_v58 = vmax.f32 %v2552_v53, %v2556_v44  ;;  %v11069_v14 = vpop.f32.mrb[144].mxu0  ;;  %v4800_v17 = vpack.c.bf16 %v3951_v27, %v4495_v54  ;;  %11204 = vmatmul.mubr.msk.bf16.gmra.mrb[12].mxu1 %vm40_vm8, %v5243_v43  ;;  %v4143_v52 = vsel %vm2927_vm1, %v4140_v19, %v4142_v48 }
 0x1fe   :  { %v3069_v20 = vrot.slane %v13626_v22, 1  ;;  %v1968_v18 = vpop.f32.mrb[145].mxu0  ;;  %v4145_v23 = vsel %vm2927_vm1, %v4142_v48, %v4144_v42  ;;  %v4930_v16 = vpop.permute.xlu0 %4929  ;;  %v3792_v29 = vand.u32 15, %v3728_v28  ;;  %v1977_v40 = vadd.f32 %v13262_v60, %v11069_v14 }
 0x1ff   :  { %v3064_v61 = vsel %vm2927_vm1, %v3061_v30, %v3063_v12  ;;  %v3065_v41 = vrot.slane %v2740_v58, 1  ;;  %v11070_v8 = vpop.f32.mrb[146].mxu0  ;;  %5018 = vst.msk [vmem:[#allocation2 + $0x48] sm:$0xff] %vm5009_vm4, %v4930_v16  ;;  %v4752_v30 = vsel %vm13630_vm14, %v4145_v23, 0.0  ;;  %v3952_v53 = vrot.slane %v13624_v62, 7 }
 0x200   :  { %v3379_v34 = vmax.f32 %v13544_v10, %v3064_v61  ;;  %v3070_v13 = vsel %vm2927_vm1, %v3067_v39, %v3069_v20  ;;  %v1971_v50 = vpop.f32.mrb[147].mxu0  ;;  %4832 = vst.msk [vmem:[#allocation2 + $0x80] sm:$0xff] %vm973_vm0, %v4800_v17  ;;  %v5057_v2 = vpack.c.bf16 %v4752_v30, %v4143_v52  ;;  %v1980_v0 = vadd.f32 %v13262_v60, %v11070_v8 }
 0x201   :  { %v3382_v25 = vmax.f32 %v2741_v7, %v3070_v13  ;;  %v3066_v9 = vsel %vm2927_vm1, %v3063_v12, %v3065_v41  ;;  %v3068_v46 = vsel %vm2927_vm1, %v3065_v41, %v3067_v39  ;;  %v1969_v7 = vadd.f32 %v13262_v60, %v1968_v18 }
 0x202   :  { %3507 = vst.msk [vmem:[#allocation4 + $0x218] sm:$0xff] %vm973_vm0, %v3379_v34  ;;  %v3380_v10 = vmax.f32 %v2739_v63, %v3066_v9  ;;  %v3381_v1 = vmax.f32 %v2740_v58, %v3068_v46  ;;  %11176 = vmatmul.mubr.msk.bf16.gmra.mrb[252].mxu0 %vm973_vm0, %v11697_v5  ;;  %5136 = vrot.lane.b32.xlu1 %v5057_v2, %s11935_s29  ;;  %vm13679_vm15 = vcmp.ne.s32.totalorder %v3792_v29, 0  ;;  %v2561_v12 = vmax.f32 %v1977_v40, 0.0 }
 0x203   :  { %3510 = vst.msk [vmem:[#allocation4 + $0x230] sm:$0xff] %vm973_vm0, %v3382_v25  ;;  %v1972_v63 = vadd.f32 %v13262_v60, %v1971_v50  ;;  %v3793_v54 = vand.u32 15, %v3729_v38  ;;  %v2559_v39 = vmax.f32 %v1969_v7, 0.0  ;;  %v2562_v18 = vmax.f32 %v1980_v0, 0.0 }
 0x204   :  { %3508 = vst.msk [vmem:[#allocation4 + $0x220] sm:$0xff] %vm973_vm0, %v3380_v10  ;;  %3509 = vst.msk [vmem:[#allocation4 + $0x228] sm:$0xff] %vm973_vm0, %v3381_v1  ;;  %v5123_v44 = vpop.permute.xlu0 %5122  ;;  %v3953_v16 = vsel %vm3888_vm2, %v3950_v4, %v3952_v53 }
 0x205   :  { %v11073_v26 = vpop.f32.mrb[148].mxu0  ;;  %5211 = vst.msk [vmem:[#allocation2 + $0x48] sm:$0xff] %vm5202_vm7, %v5123_v44  ;;  %v2560_v8 = vmax.f32 %v1972_v63, 0.0  ;;  %vm13700_vm3 = vcmp.ne.s32.totalorder %v3793_v54, 15  ;;  %v4497_v52 = vsel %vm13679_vm15, %v3953_v16, 0.0  ;;  %v3730_v63 = vadd.s32 272, %v12278_v47 }
 0x206   :  { %v1993_v19 = vadd.f32 %v13262_v60, %v11073_v26  ;;  %v1984_v31 = vpop.f32.mrb[149].mxu0 }
 0x207   :  { %v1985_v55 = vadd.f32 %v13262_v60, %v1984_v31  ;;  %v11074_v48 = vpop.f32.mrb[150].mxu0 }
 0x208   :  { %v2565_v58 = vmax.f32 %v1993_v19, 0.0  ;;  %v1996_v14 = vadd.f32 %v13262_v60, %v11074_v48  ;;  %v1987_v27 = vpop.f32.mrb[151].mxu0 }
 0x209   :  { %v2563_v5 = vmax.f32 %v1985_v55, 0.0  ;;  %v1988_v23 = vadd.f32 %v13262_v60, %v1987_v27  ;;  %v13686_v17 = vld [vmem:[#allocation4 + $0x210] ss:$2 sm:$0xff] }
 0x20a   :  { %v2745_v61 = vmax.f32 %v2561_v12, %v2565_v58  ;;  %v2566_v41 = vmax.f32 %v1996_v14, 0.0  ;;  %v3954_v43 = vrot.slane %v13686_v17, 7  ;;  %v4865_v13 = vpack.c.bf16 %v13686_v17, %v13624_v62 }
 0x20b   :  { %v2743_v28 = vmax.f32 %v2559_v39, %v2563_v5  ;;  %v2564_v34 = vmax.f32 %v1988_v23, 0.0  ;;  %v13694_v50 = vld [vmem:[#allocation4 + $0x220] ss:$2 sm:$0xff]  ;;  %v4146_v25 = vrot.slane %v13686_v17, 1  ;;  %v3794_v39 = vand.u32 15, %v3730_v63 }
 0x20c   :  { %v13696_v30 = vmax.f32 %v2562_v18, %v2566_v41  ;;  %v4148_v9 = vrot.slane %v13694_v50, 1  ;;  %4945 = vrot.lane.b32.xlu0 %v4865_v13, %s11934_s21  ;;  %v3955_v1 = vsel %vm3888_vm2, %v3952_v53, %v3954_v43  ;;  %v3075_v2 = vrot.slane %v2745_v61, 1  ;;  %v5244_v19 = vld [vmem:[#allocation2 + $0x48] sm:$0xff] }
 0x20d   :  { %v3071_v11 = vrot.slane %v2743_v28, 1  ;;  %v2744_v4 = vmax.f32 %v2560_v8, %v2564_v34  ;;  %v11077_v10 = vpop.f32.mrb[152].mxu0  ;;  %v4801_v7 = vpack.c.bf16 %v3955_v1, %v4497_v52  ;;  %11207 = vmatprep.mubr.msk.bf16.mxu1 %vm40_vm8, %v5244_v19  ;;  %v4147_v27 = vsel %vm2927_vm1, %v4144_v42, %v4146_v25 }
 0x20e   :  { %v3077_v29 = vrot.slane %v13696_v30, 1  ;;  %v2000_v40 = vpop.f32.mrb[153].mxu0  ;;  %v4149_v38 = vsel %vm2927_vm1, %v4146_v25, %v4148_v9  ;;  %v4932_v31 = vpop.permute.xlu1 %4931  ;;  %v2009_v18 = vadd.f32 %v13262_v60, %v11077_v10  ;;  %v3731_v5 = vadd.s32 280, %v12278_v47 }
 0x20f   :  { %v3072_v0 = vsel %vm2927_vm1, %v3069_v20, %v3071_v11  ;;  %v3073_v26 = vrot.slane %v2744_v4, 1  ;;  %v11078_v53 = vpop.f32.mrb[154].mxu0  ;;  %5019 = vst.msk [vmem:[#allocation2 + $0x50] sm:$0xff] %vm5009_vm4, %v4932_v31  ;;  %v4754_v20 = vsel %vm13700_vm3, %v4149_v38, 0.0  ;;  %v2001_v23 = vadd.f32 %v13262_v60, %v2000_v40 }
 0x210   :  { %v3383_v44 = vmax.f32 %v13626_v22, %v3072_v0  ;;  %v3078_v55 = vsel %vm2927_vm1, %v3075_v2, %v3077_v29  ;;  %v2003_v48 = vpop.f32.mrb[155].mxu0  ;;  %4833 = vst.msk [vmem:[#allocation2 + $0x98] sm:$0xff] %vm973_vm0, %v4801_v7  ;;  %v5058_v54 = vpack.c.bf16 %v4754_v20, %v4147_v27  ;;  %v3956_v16 = vrot.slane %v13694_v50, 7 }
 0x211   :  { %v3386_v3 = vmax.f32 %v2745_v61, %v3078_v55  ;;  %v3074_v12 = vsel %vm2927_vm1, %v3071_v11, %v3073_v26  ;;  %v3076_v58 = vsel %vm2927_vm1, %v3073_v26, %v3075_v2  ;;  %v2012_v61 = vadd.f32 %v13262_v60, %v11078_v53 }
 0x212   :  { %3511 = vst.msk [vmem:[#allocation4 + $0x238] sm:$0xff] %vm973_vm0, %v3383_v44  ;;  %v3384_v22 = vmax.f32 %v2743_v28, %v3074_v12  ;;  %v3385_v14 = vmax.f32 %v2744_v4, %v3076_v58  ;;  %5138 = vrot.lane.b32.xlu0 %v5058_v54, %s11935_s29  ;;  %v2004_v8 = vadd.f32 %v13262_v60, %v2003_v48  ;;  %vm13745_vm5 = vcmp.ne.s32.totalorder %v3794_v39, 0 }
 0x213   :  { %3514 = vst.msk [vmem:[#allocation4 + $0x250] sm:$0xff] %vm973_vm0, %v3386_v3  ;;  %v2569_v46 = vmax.f32 %v2009_v18, 0.0  ;;  %v3795_v1 = vand.u32 15, %v3731_v5  ;;  %v2567_v52 = vmax.f32 %v2001_v23, 0.0  ;;  %v2570_v2 = vmax.f32 %v2012_v61, 0.0 }
 0x214   :  { %3512 = vst.msk [vmem:[#allocation4 + $0x240] sm:$0xff] %vm973_vm0, %v3384_v22  ;;  %3513 = vst.msk [vmem:[#allocation4 + $0x248] sm:$0xff] %vm973_vm0, %v3385_v14  ;;  %v5125_v28 = vpop.permute.xlu1 %5124  ;;  %v3957_v31 = vsel %vm3888_vm2, %v3954_v43, %v3956_v16  ;;  %v2568_v53 = vmax.f32 %v2004_v8, 0.0 }
 0x215   :  { %v11081_v62 = vpop.f32.mrb[156].mxu0  ;;  %5212 = vst.msk [vmem:[#allocation2 + $0x50] sm:$0xff] %vm5202_vm7, %v5125_v28  ;;  %vm13766_vm6 = vcmp.ne.s32.totalorder %v3795_v1, 15  ;;  %v4499_v14 = vsel %vm13745_vm5, %v3957_v31, 0.0 }
 0x216   :  { %v2025_v42 = vadd.f32 %v13262_v60, %v11081_v62  ;;  %v2016_v41 = vpop.f32.mrb[157].mxu0 }
 0x217   :  { %v2017_v34 = vadd.f32 %v13262_v60, %v2016_v41  ;;  %v11082_v13 = vpop.f32.mrb[158].mxu0 }
 0x218   :  { %v2573_v11 = vmax.f32 %v2025_v42, 0.0  ;;  %v2028_v4 = vadd.f32 %v13262_v60, %v11082_v13  ;;  %v2019_v10 = vpop.f32.mrb[159].mxu0 }
 0x219   :  { %v2571_v40 = vmax.f32 %v2017_v34, 0.0  ;;  %v2020_v38 = vadd.f32 %v13262_v60, %v2019_v10  ;;  %v13752_v7 = vld [vmem:[#allocation4 + $0x230] ss:$2 sm:$0xff] }
 0x21a   :  { %v2749_v0 = vmax.f32 %v2569_v46, %v2573_v11  ;;  %v2574_v26 = vmax.f32 %v2028_v4, 0.0  ;;  %v3958_v19 = vrot.slane %v13752_v7, 7  ;;  %v4866_v55 = vpack.c.bf16 %v13752_v7, %v13694_v50 }
 0x21b   :  { %v2747_v63 = vmax.f32 %v2567_v52, %v2571_v40  ;;  %v2572_v44 = vmax.f32 %v2020_v38, 0.0  ;;  %v13760_v48 = vld [vmem:[#allocation4 + $0x240] ss:$2 sm:$0xff]  ;;  %v4150_v60 = vrot.slane %v13752_v7, 1  ;;  %v3733_v40 = vadd.s32 296, %v12278_v47 }
 0x21c   :  { %v13762_v20 = vmax.f32 %v2570_v2, %v2574_v26  ;;  %v4152_v3 = vrot.slane %v13760_v48, 1  ;;  %4947 = vrot.lane.b32.xlu1 %v4866_v55, %s11934_s21  ;;  %v3959_v22 = vsel %vm3888_vm2, %v3956_v16, %v3958_v19  ;;  %v3083_v27 = vrot.slane %v2749_v0, 1  ;;  %v5245_v62 = vld [vmem:[#allocation2 + $0x50] sm:$0xff]  ;;  %v13805_v52 = vld [vmem:[%s16136_s2] ss:$0 sm:$0xff] }
 0x21d   :  { %v3079_v17 = vrot.slane %v2747_v63, 1  ;;  %v2748_v43 = vmax.f32 %v2568_v53, %v2572_v44  ;;  %v11085_v58 = vpop.f32.mrb[160].mxu0  ;;  %v4802_v5 = vpack.c.bf16 %v3959_v22, %v4499_v14  ;;  %v3732_v16 = vadd.s32 288, %v12278_v47  ;;  %11208 = vmatmul.mubr.msk.bf16.gmra.mrb[16].mxu1 %vm40_vm8, %v5245_v62 }
 0x21e   :  { %v3085_v54 = vrot.slane %v13762_v20, 1  ;;  %v2032_v39 = vpop.f32.mrb[161].mxu0  ;;  %v4153_v18 = vsel %vm2927_vm1, %v4150_v60, %v4152_v3  ;;  %v4934_v42 = vpop.permute.xlu0 %4933  ;;  %v4151_v4 = vsel %vm2927_vm1, %v4148_v9, %v4150_v60  ;;  %v2041_v2 = vadd.f32 %v13805_v52, %v11085_v58 }
 0x21f   :  { %v3080_v23 = vsel %vm2927_vm1, %v3077_v29, %v3079_v17  ;;  %v3081_v61 = vrot.slane %v2748_v43, 1  ;;  %v11086_v41 = vpop.f32.mrb[162].mxu0  ;;  %5020 = vst.msk [vmem:[#allocation2 + $0x58] sm:$0xff] %vm5009_vm4, %v4934_v42  ;;  %v4756_v29 = vsel %vm13766_vm6, %v4153_v18, 0.0  ;;  %v3796_v1 = vand.u32 15, %v3732_v16 }
 0x220   :  { %v3387_v8 = vmax.f32 %v13696_v30, %v3080_v23  ;;  %v3086_v28 = vsel %vm2927_vm1, %v3083_v27, %v3085_v54  ;;  %v2035_v34 = vpop.f32.mrb[163].mxu0  ;;  %4834 = vst.msk [vmem:[#allocation2 + $0xa0] sm:$0xff] %vm973_vm0, %v4802_v5  ;;  %v5059_v10 = vpack.c.bf16 %v4756_v29, %v4151_v4  ;;  %v2033_v50 = vadd.f32 %v13805_v52, %v2032_v39 }
 0x221   :  { %v3390_v13 = vmax.f32 %v2749_v0, %v3086_v28  ;;  %v3082_v25 = vsel %vm2927_vm1, %v3079_v17, %v3081_v61  ;;  %v3084_v46 = vsel %vm2927_vm1, %v3081_v61, %v3083_v27  ;;  %v2044_v9 = vadd.f32 %v13805_v52, %v11086_v41 }
 0x222   :  { %3515 = vst.msk [vmem:[#allocation4 + $0x258] sm:$0xff] %vm973_vm0, %v3387_v8  ;;  %v3388_v30 = vmax.f32 %v2747_v63, %v3082_v25  ;;  %v3389_v11 = vmax.f32 %v2748_v43, %v3084_v46  ;;  %5140 = vrot.lane.b32.xlu1 %v5059_v10, %s11935_s29  ;;  %v3960_v31 = vrot.slane %v13760_v48, 7  ;;  %v2036_v53 = vadd.f32 %v13805_v52, %v2035_v34 }
 0x223   :  { %3518 = vst.msk [vmem:[#allocation4 + $0x270] sm:$0xff] %vm973_vm0, %v3390_v13  ;;  %vm13816_vm9 = vcmp.ne.s32.totalorder %v3796_v1, 0  ;;  %v2577_v12 = vmax.f32 %v2041_v2, 0.0  ;;  %v3797_v22 = vand.u32 15, %v3733_v40  ;;  %v2575_v14 = vmax.f32 %v2033_v50, 0.0 }
 0x224   :  { %3516 = vst.msk [vmem:[#allocation4 + $0x260] sm:$0xff] %vm973_vm0, %v3388_v30  ;;  %3517 = vst.msk [vmem:[#allocation4 + $0x268] sm:$0xff] %vm973_vm0, %v3389_v11  ;;  %v5127_v63 = vpop.permute.xlu0 %5126  ;;  %v2578_v27 = vmax.f32 %v2044_v9, 0.0  ;;  %v3961_v42 = vsel %vm3888_vm2, %v3958_v19, %v3960_v31  ;;  %v2576_v41 = vmax.f32 %v2036_v53, 0.0  ;;  %v3734_v53 = vadd.s32 304, %v12278_v47 }
 0x225   :  { %v11089_v38 = vpop.f32.mrb[164].mxu0  ;;  %5213 = vst.msk [vmem:[#allocation2 + $0x58] sm:$0xff] %vm5202_vm7, %v5127_v63  ;;  %vm13837_vm10 = vcmp.ne.s32.totalorder %v3797_v22, 15  ;;  %v4501_v4 = vsel %vm13816_vm9, %v3961_v42, 0.0 }
 0x226   :  { %v2057_v0 = vadd.f32 %v13805_v52, %v11089_v38  ;;  %v2048_v26 = vpop.f32.mrb[165].mxu0 }
 0x227   :  { %v2049_v44 = vadd.f32 %v13805_v52, %v2048_v26  ;;  %v11090_v55 = vpop.f32.mrb[166].mxu0 }
 0x228   :  { %v2581_v17 = vmax.f32 %v2057_v0, 0.0  ;;  %v2060_v43 = vadd.f32 %v13805_v52, %v11090_v55  ;;  %v2051_v58 = vpop.f32.mrb[167].mxu0 }
 0x229   :  { %v2579_v39 = vmax.f32 %v2049_v44, 0.0  ;;  %v2052_v18 = vadd.f32 %v13805_v52, %v2051_v58  ;;  %v13823_v5 = vld [vmem:[#allocation4 + $0x250] ss:$2 sm:$0xff] }
 0x22a   :  { %v2753_v23 = vmax.f32 %v2577_v12, %v2581_v17  ;;  %v2582_v61 = vmax.f32 %v2060_v43, 0.0  ;;  %v3962_v62 = vrot.slane %v13823_v5, 7  ;;  %v4867_v28 = vpack.c.bf16 %v13823_v5, %v13760_v48 }
 0x22b   :  { %v2751_v16 = vmax.f32 %v2575_v14, %v2579_v39  ;;  %v2580_v8 = vmax.f32 %v2052_v18, 0.0  ;;  %v13831_v34 = vld [vmem:[#allocation4 + $0x260] ss:$2 sm:$0xff]  ;;  %v4154_v13 = vrot.slane %v13823_v5, 1  ;;  %v3798_v14 = vand.u32 15, %v3734_v53 }
 0x22c   :  { %v13833_v29 = vmax.f32 %v2578_v27, %v2582_v61  ;;  %v4156_v25 = vrot.slane %v13831_v34, 1  ;;  %4949 = vrot.lane.b32.xlu0 %v4867_v28, %s11934_s21  ;;  %v3963_v11 = vsel %vm3888_vm2, %v3960_v31, %v3962_v62  ;;  %v3091_v10 = vrot.slane %v2753_v23, 1  ;;  %v5246_v0 = vld [vmem:[#allocation2 + $0x58] sm:$0xff] }
 0x22d   :  { %v3087_v7 = vrot.slane %v2751_v16, 1  ;;  %v2752_v19 = vmax.f32 %v2576_v41, %v2580_v8  ;;  %v11093_v30 = vpop.f32.mrb[168].mxu0  ;;  %v4803_v50 = vpack.c.bf16 %v3963_v11, %v4501_v4  ;;  %11211 = vmatprep.mubr.msk.bf16.mxu1 %vm40_vm8, %v5246_v0  ;;  %v4155_v58 = vsel %vm2927_vm1, %v4152_v3, %v4154_v13 }
 0x22e   :  { %v3093_v1 = vrot.slane %v13833_v29, 1  ;;  %v2064_v2 = vpop.f32.mrb[169].mxu0  ;;  %v4157_v40 = vsel %vm2927_vm1, %v4154_v13, %v4156_v25  ;;  %v4936_v26 = vpop.permute.xlu1 %4935  ;;  %v2073_v27 = vadd.f32 %v13805_v52, %v11093_v30  ;;  %v3735_v39 = vadd.s32 312, %v12278_v47 }
 0x22f   :  { %v3088_v9 = vsel %vm2927_vm1, %v3085_v54, %v3087_v7  ;;  %v3089_v38 = vrot.slane %v2752_v19, 1  ;;  %v11094_v31 = vpop.f32.mrb[170].mxu0  ;;  %5021 = vst.msk [vmem:[#allocation2 + $0x60] sm:$0xff] %vm5009_vm4, %v4936_v26  ;;  %v4758_v54 = vsel %vm13837_vm10, %v4157_v40, 0.0  ;;  %v2065_v18 = vadd.f32 %v13805_v52, %v2064_v2 }
 0x230   :  { %v3391_v63 = vmax.f32 %v13762_v20, %v3088_v9  ;;  %v3094_v44 = vsel %vm2927_vm1, %v3091_v10, %v3093_v1  ;;  %v2067_v55 = vpop.f32.mrb[171].mxu0  ;;  %4835 = vst.msk [vmem:[#allocation2 + $0xa8] sm:$0xff] %vm973_vm0, %v4803_v50  ;;  %v5060_v22 = vpack.c.bf16 %v4758_v54, %v4155_v58  ;;  %v3964_v42 = vrot.slane %v13831_v34, 7 }
 0x231   :  { %v3394_v60 = vmax.f32 %v2753_v23, %v3094_v44  ;;  %v3090_v12 = vsel %vm2927_vm1, %v3087_v7, %v3089_v38  ;;  %v3092_v17 = vsel %vm2927_vm1, %v3089_v38, %v3091_v10  ;;  %v2076_v23 = vadd.f32 %v13805_v52, %v11094_v31 }
 0x232   :  { %3519 = vst.msk [vmem:[#allocation4 + $0x278] sm:$0xff] %vm973_vm0, %v3391_v63  ;;  %v3392_v20 = vmax.f32 %v2751_v16, %v3090_v12  ;;  %v3393_v43 = vmax.f32 %v2752_v19, %v3092_v17  ;;  %5142 = vrot.lane.b32.xlu0 %v5060_v22, %s11935_s29  ;;  %v2068_v41 = vadd.f32 %v13805_v52, %v2067_v55  ;;  %vm13882_vm11 = vcmp.ne.s32.totalorder %v3798_v14, 0 }
 0x233   :  { %3522 = vst.msk [vmem:[#allocation4 + $0x290] sm:$0xff] %vm973_vm0, %v3394_v60  ;;  %v2585_v46 = vmax.f32 %v2073_v27, 0.0  ;;  %v3799_v11 = vand.u32 15, %v3735_v39  ;;  %v2583_v4 = vmax.f32 %v2065_v18, 0.0  ;;  %v2586_v10 = vmax.f32 %v2076_v23, 0.0 }
 0x234   :  { %3520 = vst.msk [vmem:[#allocation4 + $0x280] sm:$0xff] %vm973_vm0, %v3392_v20  ;;  %3521 = vst.msk [vmem:[#allocation4 + $0x288] sm:$0xff] %vm973_vm0, %v3393_v43  ;;  %v5129_v16 = vpop.permute.xlu1 %5128  ;;  %v3965_v26 = vsel %vm3888_vm2, %v3962_v62, %v3964_v42  ;;  %v2584_v31 = vmax.f32 %v2068_v41, 0.0  ;;  %v3736_v41 = vadd.s32 320, %v12278_v47 }
 0x235   :  { %v11097_v48 = vpop.f32.mrb[172].mxu0  ;;  %5214 = vst.msk [vmem:[#allocation2 + $0x60] sm:$0xff] %vm5202_vm7, %v5129_v16  ;;  %vm13903_vm12 = vcmp.ne.s32.totalorder %v3799_v11, 15  ;;  %v4503_v58 = vsel %vm13882_vm11, %v3965_v26, 0.0 }
 0x236   :  { %v2089_v3 = vadd.f32 %v13805_v52, %v11097_v48  ;;  %v2080_v61 = vpop.f32.mrb[173].mxu0 }
 0x237   :  { %v2081_v8 = vadd.f32 %v13805_v52, %v2080_v61  ;;  %v11098_v28 = vpop.f32.mrb[174].mxu0 }
 0x238   :  { %v2589_v7 = vmax.f32 %v2089_v3, 0.0  ;;  %v2092_v19 = vadd.f32 %v13805_v52, %v11098_v28  ;;  %v2083_v30 = vpop.f32.mrb[175].mxu0 }
 0x239   :  { %v2587_v2 = vmax.f32 %v2081_v8, 0.0  ;;  %v2084_v40 = vadd.f32 %v13805_v52, %v2083_v30  ;;  %v13889_v50 = vld [vmem:[#allocation4 + $0x270] ss:$2 sm:$0xff] }
 0x23a   :  { %v2757_v9 = vmax.f32 %v2585_v46, %v2589_v7  ;;  %v2590_v38 = vmax.f32 %v2092_v19, 0.0  ;;  %v3966_v0 = vrot.slane %v13889_v50, 7  ;;  %v4868_v44 = vpack.c.bf16 %v13889_v50, %v13831_v34 }
 0x23b   :  { %v2755_v53 = vmax.f32 %v2583_v4, %v2587_v2  ;;  %v2588_v63 = vmax.f32 %v2084_v40, 0.0  ;;  %v13897_v55 = vld [vmem:[#allocation4 + $0x280] ss:$2 sm:$0xff]  ;;  %v4158_v60 = vrot.slane %v13889_v50, 1  ;;  %v3800_v4 = vand.u32 15, %v3736_v41 }
 0x23c   :  { %v13899_v54 = vmax.f32 %v2586_v10, %v2590_v38  ;;  %v4160_v12 = vrot.slane %v13897_v55, 1  ;;  %4951 = vrot.lane.b32.xlu1 %v4868_v44, %s11934_s21  ;;  %v3967_v43 = vsel %vm3888_vm2, %v3964_v42, %v3966_v0  ;;  %v3099_v22 = vrot.slane %v2757_v9, 1  ;;  %v5247_v3 = vld [vmem:[#allocation2 + $0x60] sm:$0xff] }
 0x23d   :  { %v3095_v5 = vrot.slane %v2755_v53, 1  ;;  %v2756_v62 = vmax.f32 %v2584_v31, %v2588_v63  ;;  %v11101_v20 = vpop.f32.mrb[176].mxu0  ;;  %v4804_v18 = vpack.c.bf16 %v3967_v43, %v4503_v58  ;;  %11212 = vmatmul.mubr.msk.bf16.gmra.mrb[20].mxu1 %vm40_vm8, %v5247_v3  ;;  %v4159_v30 = vsel %vm2927_vm1, %v4156_v25, %v4158_v60 }
 0x23e   :  { %v3101_v14 = vrot.slane %v13899_v54, 1  ;;  %v2096_v27 = vpop.f32.mrb[177].mxu0  ;;  %v4161_v39 = vsel %vm2927_vm1, %v4158_v60, %v4160_v12  ;;  %v4938_v61 = vpop.permute.xlu0 %4937  ;;  %v2105_v10 = vadd.f32 %v13805_v52, %v11101_v20  ;;  %v3737_v2 = vadd.s32 328, %v12278_v47 }
 0x23f   :  { %v3096_v23 = vsel %vm2927_vm1, %v3093_v1, %v3095_v5  ;;  %v3097_v48 = vrot.slane %v2756_v62, 1  ;;  %v11102_v42 = vpop.f32.mrb[178].mxu0  ;;  %5022 = vst.msk [vmem:[#allocation2 + $0x68] sm:$0xff] %vm5009_vm4, %v4938_v61  ;;  %v4760_v1 = vsel %vm13903_vm12, %v4161_v39, 0.0  ;;  %v2097_v40 = vadd.f32 %v13805_v52, %v2096_v27 }
 0x240   :  { %v3395_v16 = vmax.f32 %v13833_v29, %v3096_v23  ;;  %v3102_v8 = vsel %vm2927_vm1, %v3099_v22, %v3101_v14  ;;  %v2099_v28 = vpop.f32.mrb[179].mxu0  ;;  %4836 = vst.msk [vmem:[#allocation2 + $0xb0] sm:$0xff] %vm973_vm0, %v4804_v18  ;;  %v5061_v11 = vpack.c.bf16 %v4760_v1, %v4159_v30  ;;  %v3968_v26 = vrot.slane %v13897_v55, 7 }
 0x241   :  { %v3398_v13 = vmax.f32 %v2757_v9, %v3102_v8  ;;  %v3098_v46 = vsel %vm2927_vm1, %v3095_v5, %v3097_v48  ;;  %v3100_v7 = vsel %vm2927_vm1, %v3097_v48, %v3099_v22  ;;  %v2108_v9 = vadd.f32 %v13805_v52, %v11102_v42 }
 0x242   :  { %3523 = vst.msk [vmem:[#allocation4 + $0x298] sm:$0xff] %vm973_vm0, %v3395_v16  ;;  %v3396_v29 = vmax.f32 %v2755_v53, %v3098_v46  ;;  %v3397_v19 = vmax.f32 %v2756_v62, %v3100_v7  ;;  %5144 = vrot.lane.b32.xlu1 %v5061_v11, %s11935_s29  ;;  %v2100_v31 = vadd.f32 %v13805_v52, %v2099_v28  ;;  %vm13948_vm13 = vcmp.ne.s32.totalorder %v3800_v4, 0 }
 0x243   :  { %3526 = vst.msk [vmem:[#allocation4 + $0x2b0] sm:$0xff] %vm973_vm0, %v3398_v13  ;;  %v2593_v17 = vmax.f32 %v2105_v10, 0.0  ;;  %v3801_v43 = vand.u32 15, %v3737_v2  ;;  %v2591_v58 = vmax.f32 %v2097_v40, 0.0  ;;  %v2594_v22 = vmax.f32 %v2108_v9, 0.0 }
 0x244   :  { %3524 = vst.msk [vmem:[#allocation4 + $0x2a0] sm:$0xff] %vm973_vm0, %v3396_v29  ;;  %3525 = vst.msk [vmem:[#allocation4 + $0x2a8] sm:$0xff] %vm973_vm0, %v3397_v19  ;;  %v5131_v53 = vpop.permute.xlu0 %5130  ;;  %v3969_v61 = vsel %vm3888_vm2, %v3966_v0, %v3968_v26  ;;  %v2592_v42 = vmax.f32 %v2100_v31, 0.0  ;;  %v3738_v31 = vadd.s32 336, %v12278_v47 }
 0x245   :  { %v11105_v34 = vpop.f32.mrb[180].mxu0  ;;  %5215 = vst.msk [vmem:[#allocation2 + $0x68] sm:$0xff] %vm5202_vm7, %v5131_v53  ;;  %vm13969_vm14 = vcmp.ne.s32.totalorder %v3801_v43, 15  ;;  %v4505_v30 = vsel %vm13948_vm13, %v3969_v61, 0.0 }
 0x246   :  { %v2121_v25 = vadd.f32 %v13805_v52, %v11105_v34  ;;  %v2112_v38 = vpop.f32.mrb[181].mxu0 }
 0x247   :  { %v2113_v63 = vadd.f32 %v13805_v52, %v2112_v38  ;;  %v11106_v44 = vpop.f32.mrb[182].mxu0 }
 0x248   :  { %v2597_v5 = vmax.f32 %v2121_v25, 0.0  ;;  %v2124_v62 = vadd.f32 %v13805_v52, %v11106_v44  ;;  %v2115_v20 = vpop.f32.mrb[183].mxu0 }
 0x249   :  { %v2595_v27 = vmax.f32 %v2113_v63, 0.0  ;;  %v2116_v39 = vadd.f32 %v13805_v52, %v2115_v20  ;;  %v13955_v18 = vld [vmem:[#allocation4 + $0x290] ss:$2 sm:$0xff] }
 0x24a   :  { %v2761_v23 = vmax.f32 %v2593_v17, %v2597_v5  ;;  %v2598_v48 = vmax.f32 %v2124_v62, 0.0  ;;  %v3970_v3 = vrot.slane %v13955_v18, 7  ;;  %v4869_v8 = vpack.c.bf16 %v13955_v18, %v13897_v55 }
 0x24b   :  { %v2759_v41 = vmax.f32 %v2591_v58, %v2595_v27  ;;  %v2596_v16 = vmax.f32 %v2116_v39, 0.0  ;;  %v13963_v28 = vld [vmem:[#allocation4 + $0x2a0] ss:$2 sm:$0xff]  ;;  %v4162_v13 = vrot.slane %v13955_v18, 1  ;;  %v3802_v58 = vand.u32 15, %v3738_v31 }
 0x24c   :  { %v13965_v1 = vmax.f32 %v2594_v22, %v2598_v48  ;;  %v4164_v46 = vrot.slane %v13963_v28, 1  ;;  %4953 = vrot.lane.b32.xlu0 %v4869_v8, %s11934_s21  ;;  %v3971_v19 = vsel %vm3888_vm2, %v3968_v26, %v3970_v3  ;;  %v3107_v11 = vrot.slane %v2761_v23, 1  ;;  %v5248_v25 = vld [vmem:[#allocation2 + $0x68] sm:$0xff] }
 0x24d   :  { %v3103_v50 = vrot.slane %v2759_v41, 1  ;;  %v2760_v0 = vmax.f32 %v2592_v42, %v2596_v16  ;;  %v11109_v29 = vpop.f32.mrb[184].mxu0  ;;  %v4805_v40 = vpack.c.bf16 %v3971_v19, %v4505_v30  ;;  %11215 = vmatprep.mubr.msk.bf16.mxu1 %vm40_vm8, %v5248_v25  ;;  %v4163_v20 = vsel %vm2927_vm1, %v4160_v12, %v4162_v13 }
 0x24e   :  { %v3109_v4 = vrot.slane %v13965_v1, 1  ;;  %v2128_v10 = vpop.f32.mrb[185].mxu0  ;;  %v4165_v2 = vsel %vm2927_vm1, %v4162_v13, %v4164_v46  ;;  %v4940_v38 = vpop.permute.xlu1 %4939  ;;  %v2137_v22 = vadd.f32 %v13805_v52, %v11109_v29  ;;  %v3739_v27 = vadd.s32 344, %v12278_v47 }
 0x24f   :  { %v3104_v9 = vsel %vm2927_vm1, %v3101_v14, %v3103_v50  ;;  %v3105_v34 = vrot.slane %v2760_v0, 1  ;;  %v11110_v26 = vpop.f32.mrb[186].mxu0  ;;  %5023 = vst.msk [vmem:[#allocation2 + $0x70] sm:$0xff] %vm5009_vm4, %v4940_v38  ;;  %v4762_v14 = vsel %vm13969_vm14, %v4165_v2, 0.0  ;;  %v2129_v39 = vadd.f32 %v13805_v52, %v2128_v10 }
 0x250   :  { %v3399_v53 = vmax.f32 %v13899_v54, %v3104_v9  ;;  %v3110_v63 = vsel %vm2927_vm1, %v3107_v11, %v3109_v4  ;;  %v2131_v44 = vpop.f32.mrb[187].mxu0  ;;  %4837 = vst.msk [vmem:[#allocation2 + $0xb8] sm:$0xff] %vm973_vm0, %v4805_v40  ;;  %v5062_v43 = vpack.c.bf16 %v4762_v14, %v4163_v20  ;;  %v3972_v61 = vrot.slane %v13963_v28, 7 }
 0x251   :  { %v3402_v60 = vmax.f32 %v2761_v23, %v3110_v63  ;;  %v3106_v17 = vsel %vm2927_vm1, %v3103_v50, %v3105_v34  ;;  %v3108_v5 = vsel %vm2927_vm1, %v3105_v34, %v3107_v11  ;;  %v2140_v23 = vadd.f32 %v13805_v52, %v11110_v26 }
 0x252   :  { %3527 = vst.msk [vmem:[#allocation4 + $0x2b8] sm:$0xff] %vm973_vm0, %v3399_v53  ;;  %v3400_v54 = vmax.f32 %v2759_v41, %v3106_v17  ;;  %v3401_v62 = vmax.f32 %v2760_v0, %v3108_v5  ;;  %5146 = vrot.lane.b32.xlu0 %v5062_v43, %s11935_s29  ;;  %v2132_v42 = vadd.f32 %v13805_v52, %v2131_v44  ;;  %vm14014_vm15 = vcmp.ne.s32.totalorder %v3802_v58, 0 }
 0x253   :  { %3530 = vst.msk [vmem:[#allocation4 + $0x2d0] sm:$0xff] %vm973_vm0, %v3402_v60  ;;  %v2601_v7 = vmax.f32 %v2137_v22, 0.0  ;;  %v3803_v19 = vand.u32 15, %v3739_v27  ;;  %v2599_v30 = vmax.f32 %v2129_v39, 0.0  ;;  %v2602_v11 = vmax.f32 %v2140_v23, 0.0 }
 0x254   :  { %3528 = vst.msk [vmem:[#allocation4 + $0x2c0] sm:$0xff] %vm973_vm0, %v3400_v54  ;;  %3529 = vst.msk [vmem:[#allocation4 + $0x2c8] sm:$0xff] %vm973_vm0, %v3401_v62  ;;  %v5133_v41 = vpop.permute.xlu1 %5132  ;;  %v3973_v38 = vsel %vm3888_vm2, %v3970_v3, %v3972_v61  ;;  %v2600_v26 = vmax.f32 %v2132_v42, 0.0  ;;  %v3740_v42 = vadd.s32 352, %v12278_v47 }
 0x255   :  { %v11113_v55 = vpop.f32.mrb[188].mxu0  ;;  %5216 = vst.msk [vmem:[#allocation2 + $0x70] sm:$0xff] %vm5202_vm7, %v5133_v41  ;;  %vm14035_vm3 = vcmp.ne.s32.totalorder %v3803_v19, 15  ;;  %v4507_v20 = vsel %vm14014_vm15, %v3973_v38, 0.0 }
 0x256   :  { %v2153_v12 = vadd.f32 %v13805_v52, %v11113_v55  ;;  %v2144_v48 = vpop.f32.mrb[189].mxu0 }
 0x257   :  { %v2145_v16 = vadd.f32 %v13805_v52, %v2144_v48  ;;  %v11114_v8 = vpop.f32.mrb[190].mxu0 }
 0x258   :  { %v2605_v50 = vmax.f32 %v2153_v12, 0.0  ;;  %v2156_v0 = vadd.f32 %v13805_v52, %v11114_v8  ;;  %v2147_v29 = vpop.f32.mrb[191].mxu0 }
 0x259   :  { %v2603_v10 = vmax.f32 %v2145_v16, 0.0  ;;  %v2148_v2 = vadd.f32 %v13805_v52, %v2147_v29  ;;  %v14021_v40 = vld [vmem:[#allocation4 + $0x2b0] ss:$2 sm:$0xff] }
 0x25a   :  { %v2765_v9 = vmax.f32 %v2601_v7, %v2605_v50  ;;  %v2606_v34 = vmax.f32 %v2156_v0, 0.0  ;;  %v3974_v25 = vrot.slane %v14021_v40, 7  ;;  %v4870_v63 = vpack.c.bf16 %v14021_v40, %v13963_v28 }
 0x25b   :  { %v2763_v31 = vmax.f32 %v2599_v30, %v2603_v10  ;;  %v2604_v53 = vmax.f32 %v2148_v2, 0.0  ;;  %v14029_v44 = vld [vmem:[#allocation4 + $0x2c0] ss:$2 sm:$0xff]  ;;  %v4166_v60 = vrot.slane %v14021_v40, 1  ;;  %v3804_v30 = vand.u32 15, %v3740_v42 }
 0x25c   :  { %v14031_v14 = vmax.f32 %v2602_v11, %v2606_v34  ;;  %v4168_v17 = vrot.slane %v14029_v44, 1  ;;  %4955 = vrot.lane.b32.xlu1 %v4870_v63, %s11934_s21  ;;  %v3975_v62 = vsel %vm3888_vm2, %v3972_v61, %v3974_v25  ;;  %v3115_v43 = vrot.slane %v2765_v9, 1  ;;  %v5249_v12 = vld [vmem:[#allocation2 + $0x70] sm:$0xff] }
 0x25d   :  { %v3111_v18 = vrot.slane %v2763_v31, 1  ;;  %v2764_v3 = vmax.f32 %v2600_v26, %v2604_v53  ;;  %v11117_v54 = vpop.f32.mrb[192].mxu0  ;;  %v4806_v39 = vpack.c.bf16 %v3975_v62, %v4507_v20  ;;  %11216 = vmatmul.mubr.msk.bf16.gmra.mrb[24].mxu1 %vm40_vm8, %v5249_v12  ;;  %v4167_v29 = vsel %vm2927_vm1, %v4164_v46, %v4166_v60 }
 0x25e   :  { %v3117_v58 = vrot.slane %v14031_v14, 1  ;;  %v2160_v22 = vpop.f32.mrb[193].mxu0  ;;  %v4169_v27 = vsel %vm2927_vm1, %v4166_v60, %v4168_v17  ;;  %v4942_v48 = vpop.permute.xlu0 %4941  ;;  %v2169_v11 = vadd.f32 %v13805_v52, %v11117_v54  ;;  %v3741_v10 = vadd.s32 360, %v12278_v47 }
 0x25f   :  { %v3112_v23 = vsel %vm2927_vm1, %v3109_v4, %v3111_v18  ;;  %v3113_v55 = vrot.slane %v2764_v3, 1  ;;  %v11118_v61 = vpop.f32.mrb[194].mxu0  ;;  %5024 = vst.msk [vmem:[#allocation2 + $0x78] sm:$0xff] %vm5009_vm4, %v4942_v48  ;;  %v4764_v4 = vsel %vm14035_vm3, %v4169_v27, 0.0  ;;  %v2161_v2 = vadd.f32 %v13805_v52, %v2160_v22 }
 0x260   :  { %v3403_v41 = vmax.f32 %v13965_v1, %v3112_v23  ;;  %v3118_v16 = vsel %vm2927_vm1, %v3115_v43, %v3117_v58  ;;  %v2163_v8 = vpop.f32.mrb[195].mxu0  ;;  %4838 = vst.msk [vmem:[#allocation2 + $0xc0] sm:$0xff] %vm973_vm0, %v4806_v39  ;;  %v5063_v19 = vpack.c.bf16 %v4764_v4, %v4167_v29  ;;  %v3976_v38 = vrot.slane %v14029_v44, 7 }
 0x261   :  { %v3406_v13 = vmax.f32 %v2765_v9, %v3118_v16  ;;  %v3114_v7 = vsel %vm2927_vm1, %v3111_v18, %v3113_v55  ;;  %v3116_v50 = vsel %vm2927_vm1, %v3113_v55, %v3115_v43  ;;  %v2172_v9 = vadd.f32 %v13805_v52, %v11118_v61 }
 0x262   :  { %3531 = vst.msk [vmem:[#allocation4 + $0x2d8] sm:$0xff] %vm973_vm0, %v3403_v41  ;;  %v3404_v1 = vmax.f32 %v2763_v31, %v3114_v7  ;;  %v3405_v0 = vmax.f32 %v2764_v3, %v3116_v50  ;;  %5148 = vrot.lane.b32.xlu1 %v5063_v19, %s11935_s29  ;;  %v2164_v26 = vadd.f32 %v13805_v52, %v2163_v8  ;;  %vm14080_vm5 = vcmp.ne.s32.totalorder %v3804_v30, 0 }
 0x263   :  { %3534 = vst.msk [vmem:[#allocation4 + $0x2f0] sm:$0xff] %vm973_vm0, %v3406_v13  ;;  %v2609_v5 = vmax.f32 %v2169_v11, 0.0  ;;  %v3805_v62 = vand.u32 15, %v3741_v10  ;;  %v2607_v20 = vmax.f32 %v2161_v2, 0.0  ;;  %v2610_v43 = vmax.f32 %v2172_v9, 0.0 }
 0x264   :  { %3532 = vst.msk [vmem:[#allocation4 + $0x2e0] sm:$0xff] %vm973_vm0, %v3404_v1  ;;  %3533 = vst.msk [vmem:[#allocation4 + $0x2e8] sm:$0xff] %vm973_vm0, %v3405_v0  ;;  %v5135_v31 = vpop.permute.xlu0 %5134  ;;  %v3977_v48 = vsel %vm3888_vm2, %v3974_v25, %v3976_v38  ;;  %v2608_v61 = vmax.f32 %v2164_v26, 0.0  ;;  %v3742_v26 = vadd.s32 368, %v12278_v47 }
 0x265   :  { %v11121_v28 = vpop.f32.mrb[196].mxu0  ;;  %5217 = vst.msk [vmem:[#allocation2 + $0x78] sm:$0xff] %vm5202_vm7, %v5135_v31  ;;  %vm14101_vm6 = vcmp.ne.s32.totalorder %v3805_v62, 15  ;;  %v4509_v29 = vsel %vm14080_vm5, %v3977_v48, 0.0 }
 0x266   :  { %v2185_v46 = vadd.f32 %v13805_v52, %v11121_v28  ;;  %v2176_v34 = vpop.f32.mrb[197].mxu0 }
 0x267   :  { %v2177_v53 = vadd.f32 %v13805_v52, %v2176_v34  ;;  %v11122_v63 = vpop.f32.mrb[198].mxu0 }
 0x268   :  { %v2613_v18 = vmax.f32 %v2185_v46, 0.0  ;;  %v2188_v3 = vadd.f32 %v13805_v52, %v11122_v63  ;;  %v2179_v54 = vpop.f32.mrb[199].mxu0 }
 0x269   :  { %v2611_v22 = vmax.f32 %v2177_v53, 0.0  ;;  %v2180_v27 = vadd.f32 %v13805_v52, %v2179_v54  ;;  %v14087_v39 = vld [vmem:[#allocation4 + $0x2d0] ss:$2 sm:$0xff] }
 0x26a   :  { %v2769_v23 = vmax.f32 %v2609_v5, %v2613_v18  ;;  %v2614_v55 = vmax.f32 %v2188_v3, 0.0  ;;  %v3978_v12 = vrot.slane %v14087_v39, 7  ;;  %v4871_v16 = vpack.c.bf16 %v14087_v39, %v14029_v44 }
 0x26b   :  { %v2767_v42 = vmax.f32 %v2607_v20, %v2611_v22  ;;  %v2612_v41 = vmax.f32 %v2180_v27, 0.0  ;;  %v14095_v8 = vld [vmem:[#allocation4 + $0x2e0] ss:$2 sm:$0xff]  ;;  %v4170_v13 = vrot.slane %v14087_v39, 1  ;;  %v3806_v20 = vand.u32 15, %v3742_v26 }
 0x26c   :  { %v14097_v4 = vmax.f32 %v2610_v43, %v2614_v55  ;;  %v4172_v7 = vrot.slane %v14095_v8, 1  ;;  %4957 = vrot.lane.b32.xlu0 %v4871_v16, %s11934_s21  ;;  %v3979_v0 = vsel %vm3888_vm2, %v3976_v38, %v3978_v12  ;;  %v3123_v19 = vrot.slane %v2769_v23, 1  ;;  %v5250_v46 = vld [vmem:[#allocation2 + $0x78] sm:$0xff] }
 0x26d   :  { %v3119_v40 = vrot.slane %v2767_v42, 1  ;;  %v2768_v25 = vmax.f32 %v2608_v61, %v2612_v41  ;;  %v11125_v1 = vpop.f32.mrb[200].mxu0  ;;  %v4807_v2 = vpack.c.bf16 %v3979_v0, %v4509_v29  ;;  %11219 = vmatprep.mubr.msk.bf16.mxu1 %vm40_vm8, %v5250_v46  ;;  %v4171_v54 = vsel %vm2927_vm1, %v4168_v17, %v4170_v13  ;;  %v11698_v29 = vld [vmem:[%s16137_s3] sm:$0xff]  }
 0x26e   :  { %v3125_v30 = vrot.slane %v14097_v4, 1  ;;  %v2192_v11 = vpop.f32.mrb[201].mxu0  ;;  %v4173_v10 = vsel %vm2927_vm1, %v4170_v13, %v4172_v7  ;;  %v4944_v34 = vpop.permute.xlu1 %4943  ;;  %v2201_v43 = vadd.f32 %v13805_v52, %v11125_v1  ;;  %v3743_v22 = vadd.s32 376, %v12278_v47  ;;  %11255 = vmatprep.subr.bf16.mxu1 %v11698_v29 }
 0x26f   :  { %v3120_v9 = vsel %vm2927_vm1, %v3117_v58, %v3119_v40  ;;  %v3121_v28 = vrot.slane %v2768_v25, 1  ;;  %v11126_v38 = vpop.f32.mrb[202].mxu0  ;;  %5025 = vst.msk [vmem:[#allocation2 + $0x80] sm:$0xff] %vm5009_vm4, %v4944_v34  ;;  %v4766_v58 = vsel %vm14101_vm6, %v4173_v10, 0.0  ;;  %v2193_v27 = vadd.f32 %v13805_v52, %v2192_v11  ;;  %11256 = vmatpush3.bf16.msra.mxu1 %v11698_v29 }
 0x270   :  { %v3407_v31 = vmax.f32 %v14031_v14, %v3120_v9  ;;  %v3126_v53 = vsel %vm2927_vm1, %v3123_v19, %v3125_v30  ;;  %v2195_v63 = vpop.f32.mrb[203].mxu0  ;;  %4839 = vst.msk [vmem:[#allocation2 + $0xc8] sm:$0xff] %vm973_vm0, %v4807_v2  ;;  %v5064_v62 = vpack.c.bf16 %v4766_v58, %v4171_v54  ;;  %v3980_v48 = vrot.slane %v14095_v8, 7 }
 0x271   :  { %v3410_v60 = vmax.f32 %v2769_v23, %v3126_v53  ;;  %v3122_v5 = vsel %vm2927_vm1, %v3119_v40, %v3121_v28  ;;  %v3124_v18 = vsel %vm2927_vm1, %v3121_v28, %v3123_v19  ;;  %v2204_v23 = vadd.f32 %v13805_v52, %v11126_v38 }
 0x272   :  { %3535 = vst.msk [vmem:[#allocation4 + $0x2f8] sm:$0xff] %vm973_vm0, %v3407_v31  ;;  %v3408_v14 = vmax.f32 %v2767_v42, %v3122_v5  ;;  %v3409_v3 = vmax.f32 %v2768_v25, %v3124_v18  ;;  %5150 = vrot.lane.b32.xlu0 %v5064_v62, %s11935_s29  ;;  %v2196_v61 = vadd.f32 %v13805_v52, %v2195_v63  ;;  %vm14146_vm9 = vcmp.ne.s32.totalorder %v3806_v20, 0 }
 0x273   :  { %3538 = vst.msk [vmem:[#allocation4 + $0x310] sm:$0xff] %vm973_vm0, %v3410_v60  ;;  %v2617_v50 = vmax.f32 %v2201_v43, 0.0  ;;  %v3807_v0 = vand.u32 15, %v3743_v22  ;;  %v2615_v19 = vmax.f32 %v2193_v27, 0.0  ;;  %v2618_v11 = vmax.f32 %v2204_v23, 0.0 }
 0x274   :  { %3536 = vst.msk [vmem:[#allocation4 + $0x300] sm:$0xff] %vm973_vm0, %v3408_v14  ;;  %3537 = vst.msk [vmem:[#allocation4 + $0x308] sm:$0xff] %vm973_vm0, %v3409_v3  ;;  %v5137_v42 = vpop.permute.xlu1 %5136  ;;  %v3981_v38 = vsel %vm3888_vm2, %v3978_v12, %v3980_v48  ;;  %v2616_v26 = vmax.f32 %v2196_v61, 0.0 }
 0x275   :  { %v11129_v44 = vpop.f32.mrb[204].mxu0  ;;  %5218 = vst.msk [vmem:[#allocation2 + $0x80] sm:$0xff] %vm5202_vm7, %v5137_v42  ;;  %vm14170_vm10 = vcmp.ne.s32.totalorder %v3807_v0, 15  ;;  %v4511_v62 = vsel %vm14146_vm9, %v3981_v38, 0.0  ;;  %v3744_v42 = vadd.s32 384, %v12278_v47 }
 0x276   :  { %v2217_v17 = vadd.f32 %v13805_v52, %v11129_v44  ;;  %v2208_v55 = vpop.f32.mrb[205].mxu0 }
 0x277   :  { %v2209_v41 = vadd.f32 %v13805_v52, %v2208_v55  ;;  %v11130_v16 = vpop.f32.mrb[206].mxu0 }
 0x278   :  { %v2621_v40 = vmax.f32 %v2217_v17, 0.0  ;;  %v2220_v25 = vadd.f32 %v13805_v52, %v11130_v16  ;;  %v2211_v1 = vpop.f32.mrb[207].mxu0 }
 0x279   :  { %v2619_v10 = vmax.f32 %v2209_v41, 0.0  ;;  %v2212_v2 = vadd.f32 %v13805_v52, %v2211_v1  ;;  %v14156_v9 = vld [vmem:[#allocation4 + $0x2f0] ss:$2 sm:$0xff] }
 0x27a   :  { %v2773_v28 = vmax.f32 %v2617_v50, %v2621_v40  ;;  %v2622_v46 = vmax.f32 %v2220_v25, 0.0  ;;  %v3982_v34 = vrot.slane %v14156_v9, 7  ;;  %v4872_v63 = vpack.c.bf16 %v14156_v9, %v14095_v8 }
 0x27b   :  { %v2771_v31 = vmax.f32 %v2615_v19, %v2619_v10  ;;  %v2620_v53 = vmax.f32 %v2212_v2, 0.0  ;;  %v14164_v58 = vld [vmem:[#allocation4 + $0x300] ss:$2 sm:$0xff]  ;;  %v4174_v5 = vrot.slane %v14156_v9, 1  ;;  %v3808_v19 = vand.u32 15, %v3744_v42 }
 0x27c   :  { %v14166_v60 = vmax.f32 %v2618_v11, %v2622_v46  ;;  %v4176_v18 = vrot.slane %v14164_v58, 1  ;;  %4959 = vrot.lane.b32.xlu1 %v4872_v63, %s11934_s21  ;;  %v3983_v54 = vsel %vm3888_vm2, %v3980_v48, %v3982_v34  ;;  %v3131_v20 = vrot.slane %v2773_v28, 1  ;;  %v5279_v55 = vld [vmem:[#allocation2 + $0x80] sm:$0xff] }
 0x27d   :  { %v3127_v12 = vrot.slane %v2771_v31, 1  ;;  %v2772_v14 = vmax.f32 %v2616_v26, %v2620_v53  ;;  %v11133_v3 = vpop.f32.mrb[208].mxu0  ;;  %v4808_v23 = vpack.c.bf16 %v3983_v54, %v4511_v62  ;;  %11220 = vmatmul.mubr.msk.bf16.gmra.mrb[28].mxu1 %vm40_vm8, %v5279_v55  ;;  %v4175_v0 = vsel %vm2927_vm1, %v4172_v7, %v4174_v5  ;;  %v11699_v62 = vld [vmem:[%s16137_s3 + $0x8] sm:$0xff]  }
 0x27e   :  { %v3133_v43 = vrot.slane %v14166_v60, 1  ;;  %v2224_v22 = vpop.f32.mrb[209].mxu0  ;;  %v4177_v27 = vsel %vm2927_vm1, %v4174_v5, %v4176_v18  ;;  %v4946_v61 = vpop.permute.xlu0 %4945  ;;  %v2233_v11 = vadd.f32 %v13805_v52, %v11133_v3  ;;  %v3745_v10 = vadd.s32 392, %v12278_v47  ;;  %11257 = vmatprep.subr.bf16.mxu1 %v11699_v62 }
 0x27f   :  { %v3128_v44 = vsel %vm2927_vm1, %v3125_v30, %v3127_v12  ;;  %v3129_v17 = vrot.slane %v2772_v14, 1  ;;  %v11134_v48 = vpop.f32.mrb[210].mxu0  ;;  %5026 = vst.msk [vmem:[#allocation2 + $0x98] sm:$0xff] %vm5009_vm4, %v4946_v61  ;;  %v4768_v30 = vsel %vm14170_vm10, %v4177_v27, 0.0  ;;  %v2225_v2 = vadd.f32 %v13805_v52, %v2224_v22  ;;  %11258 = vmatpush3.bf16.msra.mxu1 %v11699_v62 }
 0x280   :  { %v3411_v41 = vmax.f32 %v14097_v4, %v3128_v44  ;;  %v3134_v16 = vsel %vm2927_vm1, %v3131_v20, %v3133_v43  ;;  %v2227_v13 = vpop.f32.mrb[211].mxu0  ;;  %4840 = vst.msk [vmem:[#allocation2 + $0xd0] sm:$0xff] %vm973_vm0, %v4808_v23  ;;  %v5065_v29 = vpack.c.bf16 %v4768_v30, %v4175_v0  ;;  %v3984_v38 = vrot.slane %v14164_v58, 7 }
 0x281   :  { %v3414_v50 = vmax.f32 %v2773_v28, %v3134_v16  ;;  %v3130_v40 = vsel %vm2927_vm1, %v3127_v12, %v3129_v17  ;;  %v3132_v25 = vsel %vm2927_vm1, %v3129_v17, %v3131_v20  ;;  %v2236_v28 = vadd.f32 %v13805_v52, %v11134_v48 }
 0x282   :  { %3539 = vst.msk [vmem:[#allocation4 + $0x318] sm:$0xff] %vm973_vm0, %v3411_v41  ;;  %v3412_v4 = vmax.f32 %v2771_v31, %v3130_v40  ;;  %v3413_v1 = vmax.f32 %v2772_v14, %v3132_v25  ;;  %5152 = vrot.lane.b32.xlu1 %v5065_v29, %s11935_s29  ;;  %v2228_v26 = vadd.f32 %v13805_v52, %v2227_v13  ;;  %vm14215_vm11 = vcmp.ne.s32.totalorder %v3808_v19, 0 }
 0x283   :  { %3542 = vst.msk [vmem:[#allocation4 + $0x330] sm:$0xff] %vm973_vm0, %v3414_v50  ;;  %v2625_v39 = vmax.f32 %v2233_v11, 0.0  ;;  %v3809_v54 = vand.u32 15, %v3745_v10  ;;  %v2623_v20 = vmax.f32 %v2225_v2, 0.0  ;;  %v2626_v22 = vmax.f32 %v2236_v28, 0.0 }
 0x284   :  { %3540 = vst.msk [vmem:[#allocation4 + $0x320] sm:$0xff] %vm973_vm0, %v3412_v4  ;;  %3541 = vst.msk [vmem:[#allocation4 + $0x328] sm:$0xff] %vm973_vm0, %v3413_v1  ;;  %v5139_v31 = vpop.permute.xlu0 %5138  ;;  %v3985_v48 = vsel %vm3888_vm2, %v3982_v34, %v3984_v38  ;;  %v2624_v42 = vmax.f32 %v2228_v26, 0.0  ;;  %v3746_v26 = vadd.s32 400, %v12278_v47 }
 0x285   :  { %v11137_v8 = vpop.f32.mrb[212].mxu0  ;;  %5219 = vst.msk [vmem:[#allocation2 + $0x98] sm:$0xff] %vm5202_vm7, %v5139_v31  ;;  %vm14239_vm12 = vcmp.ne.s32.totalorder %v3809_v54, 15  ;;  %v4513_v0 = vsel %vm14215_vm11, %v3985_v48, 0.0 }
 0x286   :  { %v2249_v7 = vadd.f32 %v13805_v52, %v11137_v8  ;;  %v2240_v46 = vpop.f32.mrb[213].mxu0  ;;  %v3810_v62 = vand.u32 15, %v3746_v26 }
 0x287   :  { %v2241_v53 = vadd.f32 %v13805_v52, %v2240_v46  ;;  %v11138_v63 = vpop.f32.mrb[214].mxu0 }
 0x288   :  { %v2629_v12 = vmax.f32 %v2249_v7, 0.0  ;;  %v2252_v14 = vadd.f32 %v13805_v52, %v11138_v63  ;;  %v2243_v3 = vpop.f32.mrb[215].mxu0  ;;  %vm14289_vm13 = vcmp.ne.s32.totalorder %v3810_v62, 0 }
 0x289   :  { %v2627_v27 = vmax.f32 %v2241_v53, 0.0  ;;  %v2244_v23 = vadd.f32 %v13805_v52, %v2243_v3  ;;  %v14225_v44 = vld [vmem:[#allocation4 + $0x310] ss:$2 sm:$0xff] }
 0x28a   :  { %v2777_v17 = vmax.f32 %v2625_v39, %v2629_v12  ;;  %v2630_v55 = vmax.f32 %v2252_v14, 0.0  ;;  %v3986_v61 = vrot.slane %v14225_v44, 7  ;;  %v4873_v13 = vpack.c.bf16 %v14225_v44, %v14164_v58 }
 0x28b   :  { %v2775_v41 = vmax.f32 %v2623_v20, %v2627_v27  ;;  %v2628_v16 = vmax.f32 %v2244_v23, 0.0  ;;  %v14233_v30 = vld [vmem:[#allocation4 + $0x320] ss:$2 sm:$0xff]  ;;  %v4178_v50 = vrot.slane %v14225_v44, 1  ;;  %v3747_v27 = vadd.s32 408, %v12278_v47 }
 0x28c   :  { %v14235_v52 = vmax.f32 %v2626_v22, %v2630_v55  ;;  %v4180_v40 = vrot.slane %v14233_v30, 1  ;;  %4961 = vrot.lane.b32.xlu0 %v4873_v13, %s11934_s21  ;;  %v3987_v1 = vsel %vm3888_vm2, %v3984_v38, %v3986_v61  ;;  %v3139_v29 = vrot.slane %v2777_v17, 1  ;;  %v5252_v7 = vld [vmem:[#allocation2 + $0x98] sm:$0xff]  ;;  %v14278_v20 = vld [vmem:[%s16136_s2] ss:$0 sm:$0xff]  ;;  %s9837_s2 = sshll.u32 %s11940_s17, 4  ;;  %s9838_s2 = int_to_ptr.vmem [resolvable:$true] %s9837_s2 }
 0x28d   :  { %v3135_v34 = vrot.slane %v2775_v41, 1  ;;  %v2776_v25 = vmax.f32 %v2624_v42, %v2628_v16  ;;  %v11141_v4 = vpop.f32.mrb[216].mxu0  ;;  %v4809_v2 = vpack.c.bf16 %v3987_v1, %v4513_v0  ;;  %11223 = vmatprep.mubr.msk.bf16.mxu1 %vm40_vm8, %v5252_v7  ;;  %v4179_v3 = vsel %vm2927_vm1, %v4176_v18, %v4178_v50  ;;  %s11910_s18 = scalar_lea.vmem %s9838_s2, 32  ;;  %p11915_p1 = scmp.lt.s32.totalorder %s9838_s2, %s9838_s2 }
 0x28e   :  { %v3141_v19 = vrot.slane %v14235_v52, 1  ;;  %v2256_v11 = vpop.f32.mrb[217].mxu0  ;;  %v4181_v10 = vsel %vm2927_vm1, %v4178_v50, %v4180_v40  ;;  %v4948_v46 = vpop.permute.xlu1 %4947  ;;  %v2265_v22 = vadd.f32 %v14278_v20, %v11141_v4  ;;  %v3988_v48 = vrot.slane %v14233_v30, 7  ;;  %v11700_v50 = vld [vmem:[%s16137_s3 + $0x10] sm:$0xff]   ;;  %p11911_p0 = scmp.ne.s32.totalorder %s9838_s2, %s11910_s18  ;;  %p11916_p2 = scmp.lt.s32.totalorder %s11910_s18, %s11910_s18 }
 0x28f   :  { %v3136_v28 = vsel %vm2927_vm1, %v3133_v43, %v3135_v34  ;;  %v3137_v8 = vrot.slane %v2776_v25, 1  ;;  %v11142_v38 = vpop.f32.mrb[218].mxu0  ;;  %5027 = vst.msk [vmem:[#allocation2 + $0xa0] sm:$0xff] %vm5009_vm4, %v4948_v46  ;;  %v4770_v43 = vsel %vm14239_vm12, %v4181_v10, 0.0  ;;  %v2257_v58 = vadd.f32 %v14278_v20, %v2256_v11  ;;  %11259 = vmatprep.subr.bf16.mxu1 %v11700_v50 }
 0x290   :  { %v3415_v31 = vmax.f32 %v14166_v60, %v3136_v28  ;;  %v3142_v53 = vsel %vm2927_vm1, %v3139_v29, %v3141_v19  ;;  %v2259_v63 = vpop.f32.mrb[219].mxu0  ;;  %4841 = vst.msk [vmem:[#allocation2 + $0xd8] sm:$0xff] %vm973_vm0, %v4809_v2  ;;  %v5066_v54 = vpack.c.bf16 %v4770_v43, %v4179_v3  ;;  %v2268_v18 = vadd.f32 %v14278_v20, %v11142_v38  ;;  %p11917_p3 = por %p11916_p2, %p11915_p1 }
 0x291   :  { %v3418_v5 = vmax.f32 %v2777_v17, %v3142_v53  ;;  %v3138_v39 = vsel %vm2927_vm1, %v3135_v34, %v3137_v8  ;;  %v3140_v12 = vsel %vm2927_vm1, %v3137_v8, %v3139_v29  ;;  %v2260_v42 = vadd.f32 %v14278_v20, %v2259_v63  ;;  %11260 = vmatpush3.bf16.msra.mxu1 %v11700_v50 }
 0x292   :  { %3543 = vst.msk [vmem:[#allocation4 + $0x338] sm:$0xff] %vm973_vm0, %v3415_v31  ;;  %v3416_v60 = vmax.f32 %v2775_v41, %v3138_v39  ;;  %v3417_v14 = vmax.f32 %v2776_v25, %v3140_v12  ;;  %5154 = vrot.lane.b32.xlu0 %v5066_v54, %s11935_s29  ;;  %v2633_v9 = vmax.f32 %v2265_v22, 0.0  ;;  %v3811_v1 = vand.u32 15, %v3747_v27  ;;  %p11918_p4 = pnand %p11917_p3, %p11911_p0 }
 0x293   :  { %3546 = vst.msk [vmem:[#allocation4 + $0x350] sm:$0xff] %vm973_vm0, %v3418_v5  ;;  %v2631_v0 = vmax.f32 %v2257_v58, 0.0  ;;  %v2634_v29 = vmax.f32 %v2268_v18, 0.0  ;;  %v3989_v46 = vsel %vm3888_vm2, %v3986_v61, %v3988_v48  ;;  %v2632_v38 = vmax.f32 %v2260_v42, 0.0 }
 0x294   :  { %3544 = vst.msk [vmem:[#allocation4 + $0x340] sm:$0xff] %vm973_vm0, %v3416_v60  ;;  %3545 = vst.msk [vmem:[#allocation4 + $0x348] sm:$0xff] %vm973_vm0, %v3417_v14  ;;  %v5141_v41 = vpop.permute.xlu1 %5140  ;;  %vm14310_vm14 = vcmp.ne.s32.totalorder %v3811_v1, 15  ;;  %v4515_v3 = vsel %vm14289_vm13, %v3989_v46, 0.0  ;;  %v3748_v42 = vadd.s32 416, %v12278_v47 }
 0x295   :  { %v11145_v23 = vpop.f32.mrb[220].mxu0  ;;  %5220 = vst.msk [vmem:[#allocation2 + $0xa0] sm:$0xff] %vm5202_vm7, %v5141_v41 }
 0x296   :  { %v2281_v17 = vadd.f32 %v14278_v20, %v11145_v23  ;;  %v2272_v55 = vpop.f32.mrb[221].mxu0 }
 0x297   :  { %v2273_v16 = vadd.f32 %v14278_v20, %v2272_v55  ;;  %v11146_v13 = vpop.f32.mrb[222].mxu0 }
 0x298   :  { %v2637_v34 = vmax.f32 %v2281_v17, 0.0  ;;  %v2284_v25 = vadd.f32 %v14278_v20, %v11146_v13  ;;  %v2275_v4 = vpop.f32.mrb[223].mxu0 }
 0x299   :  { %v2635_v11 = vmax.f32 %v2273_v16, 0.0  ;;  %v2276_v10 = vadd.f32 %v14278_v20, %v2275_v4  ;;  %v14296_v2 = vld [vmem:[#allocation4 + $0x330] ss:$2 sm:$0xff] }
 0x29a   :  { %v2781_v28 = vmax.f32 %v2633_v9, %v2637_v34  ;;  %v2638_v8 = vmax.f32 %v2284_v25, 0.0  ;;  %v3990_v7 = vrot.slane %v14296_v2, 7  ;;  %v4874_v53 = vpack.c.bf16 %v14296_v2, %v14233_v30 }
 0x29b   :  { %v2779_v26 = vmax.f32 %v2631_v0, %v2635_v11  ;;  %v2636_v31 = vmax.f32 %v2276_v10, 0.0  ;;  %v14304_v63 = vld [vmem:[#allocation4 + $0x340] ss:$2 sm:$0xff]  ;;  %v4182_v5 = vrot.slane %v14296_v2, 1  ;;  %v3749_v10 = vadd.s32 424, %v12278_v47 }
 0x29c   :  { %v14306_v43 = vmax.f32 %v2634_v29, %v2638_v8  ;;  %v4184_v39 = vrot.slane %v14304_v63, 1  ;;  %4963 = vrot.lane.b32.xlu1 %v4874_v53, %s11934_s21  ;;  %v3991_v14 = vsel %vm3888_vm2, %v3988_v48, %v3990_v7  ;;  %v3147_v54 = vrot.slane %v2781_v28, 1  ;;  %v14327_v17 = vld [vmem:[#allocation2 + $0xa0] sm:$0xff] }
 0x29d   :  { %v3143_v44 = vrot.slane %v2779_v26, 1  ;;  %v2780_v61 = vmax.f32 %v2632_v38, %v2636_v31  ;;  %v11149_v60 = vpop.f32.mrb[224].mxu0  ;;  %v4810_v58 = vpack.c.bf16 %v3991_v14, %v4515_v3  ;;  %11224 = vmatmul.mubr.msk.bf16.gmra.mrb[32].mxu1 %vm40_vm8, %v14327_v17  ;;  %v4183_v1 = vsel %vm2927_vm1, %v4180_v40, %v4182_v5 }
 0x29e   :  { %v3149_v62 = vrot.slane %v14306_v43, 1  ;;  %v2288_v22 = vpop.f32.mrb[225].mxu0  ;;  %v4185_v27 = vsel %vm2927_vm1, %v4182_v5, %v4184_v39  ;;  %v4950_v55 = vpop.permute.xlu0 %4949  ;;  %v3812_v29 = vand.u32 15, %v3748_v42  ;;  %v2297_v11 = vadd.f32 %v14278_v20, %v11149_v60 }
 0x29f   :  { %v3144_v18 = vsel %vm2927_vm1, %v3141_v19, %v3143_v44  ;;  %v3145_v23 = vrot.slane %v2780_v61, 1  ;;  %v11150_v48 = vpop.f32.mrb[226].mxu0  ;;  %5028 = vst.msk [vmem:[#allocation2 + $0xa8] sm:$0xff] %vm5009_vm4, %v4950_v55  ;;  %v4772_v19 = vsel %vm14310_vm14, %v4185_v27, 0.0  ;;  %v3992_v38 = vrot.slane %v14304_v63, 7 }
 0x2a0   :  { %v3419_v41 = vmax.f32 %v14235_v52, %v3144_v18  ;;  %v3150_v16 = vsel %vm2927_vm1, %v3147_v54, %v3149_v62  ;;  %v2291_v13 = vpop.f32.mrb[227].mxu0  ;;  %4842 = vst.msk [vmem:[#allocation2 + $0xe0] sm:$0xff] %vm973_vm0, %v4810_v58  ;;  %v5067_v0 = vpack.c.bf16 %v4772_v19, %v4183_v1  ;;  %v2300_v30 = vadd.f32 %v14278_v20, %v11150_v48 }
 0x2a1   :  { %v3422_v52 = vmax.f32 %v2781_v28, %v3150_v16  ;;  %v3146_v9 = vsel %vm2927_vm1, %v3143_v44, %v3145_v23  ;;  %v3148_v34 = vsel %vm2927_vm1, %v3145_v23, %v3147_v54  ;;  %v2289_v28 = vadd.f32 %v14278_v20, %v2288_v22 }
 0x2a2   :  { %3547 = vst.msk [vmem:[#allocation4 + $0x358] sm:$0xff] %vm973_vm0, %v3419_v41  ;;  %v3420_v25 = vmax.f32 %v2779_v26, %v3146_v9  ;;  %v3421_v4 = vmax.f32 %v2780_v61, %v3148_v34  ;;  %5156 = vrot.lane.b32.xlu1 %v5067_v0, %s11935_s29  ;;  %v2292_v26 = vadd.f32 %v14278_v20, %v2291_v13  ;;  %vm14361_vm15 = vcmp.ne.s32.totalorder %v3812_v29, 0 }
 0x2a3   :  { %3550 = vst.msk [vmem:[#allocation4 + $0x370] sm:$0xff] %vm973_vm0, %v3422_v52  ;;  %v2641_v44 = vmax.f32 %v2297_v11, 0.0  ;;  %v3813_v3 = vand.u32 15, %v3749_v10  ;;  %v2639_v54 = vmax.f32 %v2289_v28, 0.0  ;;  %v2642_v22 = vmax.f32 %v2300_v30, 0.0 }
 0x2a4   :  { %3548 = vst.msk [vmem:[#allocation4 + $0x360] sm:$0xff] %vm973_vm0, %v3420_v25  ;;  %3549 = vst.msk [vmem:[#allocation4 + $0x368] sm:$0xff] %vm973_vm0, %v3421_v4  ;;  %v5143_v31 = vpop.permute.xlu0 %5142  ;;  %v3993_v42 = vsel %vm3888_vm2, %v3990_v7, %v3992_v38  ;;  %v2640_v41 = vmax.f32 %v2292_v26, 0.0 }
 0x2a5   :  { %v11153_v40 = vpop.f32.mrb[228].mxu0  ;;  %5221 = vst.msk [vmem:[#allocation2 + $0xa8] sm:$0xff] %vm5202_vm7, %v5143_v31  ;;  %vm14382_vm3 = vcmp.ne.s32.totalorder %v3813_v3, 15  ;;  %v4517_v0 = vsel %vm14361_vm15, %v3993_v42, 0.0  ;;  %v3750_v31 = vadd.s32 432, %v12278_v47 }
 0x2a6   :  { %v2313_v8 = vadd.f32 %v14278_v20, %v11153_v40  ;;  %v2304_v46 = vpop.f32.mrb[229].mxu0 }
 0x2a7   :  { %v2305_v53 = vadd.f32 %v14278_v20, %v2304_v46  ;;  %v11154_v5 = vpop.f32.mrb[230].mxu0 }
 0x2a8   :  { %v2645_v61 = vmax.f32 %v2313_v8, 0.0  ;;  %v2316_v60 = vadd.f32 %v14278_v20, %v11154_v5  ;;  %v2307_v14 = vpop.f32.mrb[231].mxu0 }
 0x2a9   :  { %v2643_v27 = vmax.f32 %v2305_v53, 0.0  ;;  %v2308_v58 = vadd.f32 %v14278_v20, %v2307_v14  ;;  %v14368_v18 = vld [vmem:[#allocation4 + $0x350] ss:$2 sm:$0xff] }
 0x2aa   :  { %v2785_v23 = vmax.f32 %v2641_v44, %v2645_v61  ;;  %v2646_v55 = vmax.f32 %v2316_v60, 0.0  ;;  %v3994_v48 = vrot.slane %v14368_v18, 7  ;;  %v4875_v19 = vpack.c.bf16 %v14368_v18, %v14304_v63 }
 0x2ab   :  { %v2783_v16 = vmax.f32 %v2639_v54, %v2643_v27  ;;  %v2644_v13 = vmax.f32 %v2308_v58, 0.0  ;;  %v14376_v50 = vld [vmem:[#allocation4 + $0x360] ss:$2 sm:$0xff]  ;;  %v4186_v9 = vrot.slane %v14368_v18, 1  ;;  %v3751_v58 = vadd.s32 440, %v12278_v47 }
 0x2ac   :  { %v14378_v52 = vmax.f32 %v2642_v22, %v2646_v55  ;;  %v4188_v34 = vrot.slane %v14376_v50, 1  ;;  %4965 = vrot.lane.b32.xlu0 %v4875_v19, %s11934_s21  ;;  %v3995_v1 = vsel %vm3888_vm2, %v3992_v38, %v3994_v48  ;;  %v3155_v29 = vrot.slane %v2785_v23, 1  ;;  %v14399_v46 = vld [vmem:[#allocation2 + $0xa8] sm:$0xff] }
 0x2ad   :  { %v3151_v2 = vrot.slane %v2783_v16, 1  ;;  %v2784_v7 = vmax.f32 %v2640_v41, %v2644_v13  ;;  %v11157_v4 = vpop.f32.mrb[232].mxu0  ;;  %v4811_v30 = vpack.c.bf16 %v3995_v1, %v4517_v0  ;;  %11227 = vmatprep.mubr.msk.bf16.mxu1 %vm40_vm8, %v14399_v46  ;;  %v4187_v3 = vsel %vm2927_vm1, %v4184_v39, %v4186_v9 }
 0x2ae   :  { %v3157_v11 = vrot.slane %v14378_v52, 1  ;;  %v2320_v10 = vpop.f32.mrb[233].mxu0  ;;  %v4189_v28 = vsel %vm2927_vm1, %v4186_v9, %v4188_v34  ;;  %v4952_v38 = vpop.permute.xlu1 %4951  ;;  %v3814_v22 = vand.u32 15, %v3750_v31  ;;  %v2329_v27 = vadd.f32 %v14278_v20, %v11157_v4 }
 0x2af   :  { %v3152_v40 = vsel %vm2927_vm1, %v3149_v62, %v3151_v2  ;;  %v3153_v8 = vrot.slane %v2784_v7, 1  ;;  %v11158_v26 = vpop.f32.mrb[234].mxu0  ;;  %5029 = vst.msk [vmem:[#allocation2 + $0xb0] sm:$0xff] %vm5009_vm4, %v4952_v38  ;;  %v4774_v62 = vsel %vm14382_vm3, %v4189_v28, 0.0  ;;  %v3996_v41 = vrot.slane %v14376_v50, 7 }
 0x2b0   :  { %v3423_v53 = vmax.f32 %v14306_v43, %v3152_v40  ;;  %v3158_v5 = vsel %vm2927_vm1, %v3155_v29, %v3157_v11  ;;  %v2323_v12 = vpop.f32.mrb[235].mxu0  ;;  %4843 = vst.msk [vmem:[#allocation2 + $0xe8] sm:$0xff] %vm973_vm0, %v4811_v30  ;;  %v5068_v54 = vpack.c.bf16 %v4774_v62, %v4187_v3  ;;  %v2332_v55 = vadd.f32 %v14278_v20, %v11158_v26 }
 0x2b1   :  { %v3426_v44 = vmax.f32 %v2785_v23, %v3158_v5  ;;  %v3154_v61 = vsel %vm2927_vm1, %v3151_v2, %v3153_v8  ;;  %v3156_v43 = vsel %vm2927_vm1, %v3153_v8, %v3155_v29  ;;  %v2321_v23 = vadd.f32 %v14278_v20, %v2320_v10  ;;  %v11701_v29 = vld [vmem:[%s16137_s3 + $0x18] sm:$0xff]  }
 0x2b2   :  { %3551 = vst.msk [vmem:[#allocation4 + $0x378] sm:$0xff] %vm973_vm0, %v3423_v53  ;;  %v3424_v60 = vmax.f32 %v2783_v16, %v3154_v61  ;;  %v3425_v14 = vmax.f32 %v2784_v7, %v3156_v43  ;;  %5158 = vrot.lane.b32.xlu0 %v5068_v54, %s11935_s29  ;;  %v2324_v16 = vadd.f32 %v14278_v20, %v2323_v12  ;;  %vm14430_vm5 = vcmp.ne.s32.totalorder %v3814_v22, 0 }
 0x2b3   :  { %3554 = vst.msk [vmem:[#allocation4 + $0x390] sm:$0xff] %vm973_vm0, %v3426_v44  ;;  %v2649_v2 = vmax.f32 %v2329_v27, 0.0  ;;  %v3815_v0 = vand.u32 15, %v3751_v58  ;;  %v2647_v10 = vmax.f32 %v2321_v23, 0.0  ;;  %v2650_v28 = vmax.f32 %v2332_v55, 0.0  ;;  %11261 = vmatprep.subr.bf16.mxu1 %v11701_v29 }
 0x2b4   :  { %3552 = vst.msk [vmem:[#allocation4 + $0x380] sm:$0xff] %vm973_vm0, %v3424_v60  ;;  %3553 = vst.msk [vmem:[#allocation4 + $0x388] sm:$0xff] %vm973_vm0, %v3425_v14  ;;  %v5145_v13 = vpop.permute.xlu1 %5144  ;;  %v3997_v53 = vsel %vm3888_vm2, %v3994_v48, %v3996_v41  ;;  %v2648_v5 = vmax.f32 %v2324_v16, 0.0  ;;  %11262 = vmatpush3.bf16.msra.mxu1 %v11701_v29 }
 0x2b5   :  { %v11161_v63 = vpop.f32.mrb[236].mxu0  ;;  %5222 = vst.msk [vmem:[#allocation2 + $0xb0] sm:$0xff] %vm5202_vm7, %v5145_v13  ;;  %vm14454_vm6 = vcmp.ne.s32.totalorder %v3815_v0, 15  ;;  %v4519_v27 = vsel %vm14430_vm5, %v3997_v53, 0.0 }
 0x2b6   :  { %v2345_v39 = vadd.f32 %v14278_v20, %v11161_v63  ;;  %v2336_v42 = vpop.f32.mrb[237].mxu0 }
 0x2b7   :  { %v2337_v19 = vadd.f32 %v14278_v20, %v2336_v42  ;;  %v11162_v9 = vpop.f32.mrb[238].mxu0 }
 0x2b8   :  { %v2653_v7 = vmax.f32 %v2345_v39, 0.0  ;;  %v2348_v4 = vadd.f32 %v14278_v20, %v11162_v9  ;;  %v2339_v1 = vpop.f32.mrb[239].mxu0  ;;  %v3752_v9 = vadd.s32 448, %v12278_v47 }
 0x2b9   :  { %v2651_v30 = vmax.f32 %v2337_v19, 0.0  ;;  %v2340_v40 = vadd.f32 %v14278_v20, %v2339_v1  ;;  %v14440_v8 = vld [vmem:[#allocation4 + $0x370] ss:$2 sm:$0xff] }
 0x2ba   :  { %v2789_v38 = vmax.f32 %v2649_v2, %v2653_v7  ;;  %v2654_v26 = vmax.f32 %v2348_v4, 0.0  ;;  %v3998_v31 = vrot.slane %v14440_v8, 7  ;;  %v4876_v44 = vpack.c.bf16 %v14440_v8, %v14376_v50 }
 0x2bb   :  { %v2787_v12 = vmax.f32 %v2647_v10, %v2651_v30  ;;  %v2652_v62 = vmax.f32 %v2340_v40, 0.0  ;;  %v14448_v61 = vld [vmem:[#allocation4 + $0x380] ss:$2 sm:$0xff]  ;;  %v4190_v60 = vrot.slane %v14440_v8, 1  ;;  %v3816_v30 = vand.u32 15, %v3752_v9 }
 0x2bc   :  { %v14450_v43 = vmax.f32 %v2650_v28, %v2654_v26  ;;  %v4192_v14 = vrot.slane %v14448_v61, 1  ;;  %4967 = vrot.lane.b32.xlu1 %v4876_v44, %s11934_s21  ;;  %v3999_v22 = vsel %vm3888_vm2, %v3996_v41, %v3998_v31  ;;  %v3163_v58 = vrot.slane %v2789_v38, 1  ;;  %v14471_v13 = vld [vmem:[#allocation2 + $0xb0] sm:$0xff] }
 0x2bd   :  { %v3159_v48 = vrot.slane %v2787_v12, 1  ;;  %v2788_v3 = vmax.f32 %v2648_v5, %v2652_v62  ;;  %v11165_v54 = vpop.f32.mrb[240].mxu0  ;;  %v4812_v39 = vpack.c.bf16 %v3999_v22, %v4519_v27  ;;  %11228 = vmatmul.mubr.msk.bf16.gmra.mrb[36].mxu1 %vm40_vm8, %v14471_v13  ;;  %v4191_v10 = vsel %vm2927_vm1, %v4188_v34, %v4190_v60 }
 0x2be   :  { %v3165_v23 = vrot.slane %v14450_v43, 1  ;;  %v2352_v55 = vpop.f32.mrb[241].mxu0  ;;  %v4193_v63 = vsel %vm2927_vm1, %v4190_v60, %v4192_v14  ;;  %v4954_v41 = vpop.permute.xlu0 %4953  ;;  %v2361_v40 = vadd.f32 %v14278_v20, %v11165_v54  ;;  %vm14502_vm9 = vcmp.ne.s32.totalorder %v3816_v30, 0 }
 0x2bf   :  { %v3160_v42 = vsel %vm2927_vm1, %v3157_v11, %v3159_v48  ;;  %v3161_v16 = vrot.slane %v2788_v3, 1  ;;  %v11166_v19 = vpop.f32.mrb[242].mxu0  ;;  %5030 = vst.msk [vmem:[#allocation2 + $0xb8] sm:$0xff] %vm5009_vm4, %v4954_v41  ;;  %v4776_v11 = vsel %vm14454_vm6, %v4193_v63, 0.0  ;;  %v2353_v26 = vadd.f32 %v14278_v20, %v2352_v55  ;;  %v11702_v55 = vld [vmem:[%s16137_s3 + $0x20] sm:$0xff]  }
 0x2c0   :  { %v3427_v25 = vmax.f32 %v14378_v52, %v3160_v42  ;;  %v3166_v2 = vsel %vm2927_vm1, %v3163_v58, %v3165_v23  ;;  %v2355_v7 = vpop.f32.mrb[243].mxu0  ;;  %4844 = vst.msk [vmem:[#allocation2 + $0xf0] sm:$0xff] %vm973_vm0, %v4812_v39  ;;  %v5069_v28 = vpack.c.bf16 %v4776_v11, %v4191_v10  ;;  %v2364_v53 = vadd.f32 %v14278_v20, %v11166_v19 }
 0x2c1   :  { %v3430_v4 = vmax.f32 %v2789_v38, %v3166_v2  ;;  %v3162_v1 = vsel %vm2927_vm1, %v3159_v48, %v3161_v16  ;;  %v3164_v52 = vsel %vm2927_vm1, %v3161_v16, %v3163_v58  ;;  %v3753_v38 = vadd.s32 456, %v12278_v47  ;;  %11263 = vmatprep.subr.bf16.mxu1 %v11702_v55 }
 0x2c2   :  { %3555 = vst.msk [vmem:[#allocation4 + $0x398] sm:$0xff] %vm973_vm0, %v3427_v25  ;;  %v3428_v0 = vmax.f32 %v2787_v12, %v3162_v1  ;;  %v3429_v29 = vmax.f32 %v2788_v3, %v3164_v52  ;;  %5160 = vrot.lane.b32.xlu1 %v5069_v28, %s11935_s29  ;;  %v4000_v12 = vrot.slane %v14448_v61, 7  ;;  %v2356_v62 = vadd.f32 %v14278_v20, %v2355_v7 }
 0x2c3   :  { %3558 = vst.msk [vmem:[#allocation4 + $0x3b0] sm:$0xff] %vm973_vm0, %v3430_v4  ;;  %v2657_v3 = vmax.f32 %v2361_v40, 0.0  ;;  %v3817_v58 = vand.u32 15, %v3753_v38  ;;  %v2655_v63 = vmax.f32 %v2353_v26, 0.0  ;;  %v2658_v39 = vmax.f32 %v2364_v53, 0.0  ;;  %11264 = vmatpush3.bf16.msra.mxu1 %v11702_v55 }
 0x2c4   :  { %3556 = vst.msk [vmem:[#allocation4 + $0x3a0] sm:$0xff] %vm973_vm0, %v3428_v0  ;;  %3557 = vst.msk [vmem:[#allocation4 + $0x3a8] sm:$0xff] %vm973_vm0, %v3429_v29  ;;  %v5147_v44 = vpop.permute.xlu0 %5146  ;;  %v4001_v2 = vsel %vm3888_vm2, %v3998_v31, %v4000_v12  ;;  %v2656_v7 = vmax.f32 %v2356_v62, 0.0  ;;  %v3754_v48 = vadd.s32 464, %v12278_v47 }
 0x2c5   :  { %v11169_v50 = vpop.f32.mrb[244].mxu0  ;;  %5223 = vst.msk [vmem:[#allocation2 + $0xb8] sm:$0xff] %vm5202_vm7, %v5147_v44  ;;  %vm14526_vm10 = vcmp.ne.s32.totalorder %v3817_v58, 15  ;;  %v4521_v38 = vsel %vm14502_vm9, %v4001_v2, 0.0 }
 0x2c6   :  { %v2377_v34 = vadd.f32 %v14278_v20, %v11169_v50  ;;  %v2368_v5 = vpop.f32.mrb[245].mxu0 }
 0x2c7   :  { %v2369_v60 = vadd.f32 %v14278_v20, %v2368_v5  ;;  %v11170_v18 = vpop.f32.mrb[246].mxu0 }
 0x2c8   :  { %v2661_v54 = vmax.f32 %v2377_v34, 0.0  ;;  %v2380_v22 = vadd.f32 %v14278_v20, %v11170_v18  ;;  %v2371_v27 = vpop.f32.mrb[247].mxu0 }
 0x2c9   :  { %v2659_v42 = vmax.f32 %v2369_v60, 0.0  ;;  %v2372_v16 = vadd.f32 %v14278_v20, %v2371_v27  ;;  %v14512_v41 = vld [vmem:[#allocation4 + $0x390] ss:$2 sm:$0xff] }
 0x2ca   :  { %v2793_v19 = vmax.f32 %v2657_v3, %v2661_v54  ;;  %v2662_v9 = vmax.f32 %v2380_v22, 0.0  ;;  %v4002_v25 = vrot.slane %v14512_v41, 7  ;;  %v4877_v1 = vpack.c.bf16 %v14512_v41, %v14448_v61 }
 0x2cb   :  { %v2791_v11 = vmax.f32 %v2655_v63, %v2659_v42  ;;  %v2660_v4 = vmax.f32 %v2372_v16, 0.0  ;;  %v14520_v52 = vld [vmem:[#allocation4 + $0x3a0] ss:$2 sm:$0xff]  ;;  %v4194_v29 = vrot.slane %v14512_v41, 1  ;;  %v3755_v16 = vadd.s32 472, %v12278_v47 }
 0x2cc   :  { %v14522_v0 = vmax.f32 %v2658_v39, %v2662_v9  ;;  %v4196_v10 = vrot.slane %v14520_v52, 1  ;;  %4969 = vrot.lane.b32.xlu0 %v4877_v1, %s11934_s21  ;;  %v4003_v40 = vsel %vm3888_vm2, %v4000_v12, %v4002_v25  ;;  %v3171_v26 = vrot.slane %v2793_v19, 1  ;;  %v14543_v60 = vld [vmem:[#allocation2 + $0xb8] sm:$0xff] }
 0x2cd   :  { %v3167_v31 = vrot.slane %v2791_v11, 1  ;;  %v2792_v28 = vmax.f32 %v2656_v7, %v2660_v4  ;;  %v11173_v30 = vpop.f32.mrb[248].mxu0  ;;  %v4813_v5 = vpack.c.bf16 %v4003_v40, %v4521_v38  ;;  %11231 = vmatprep.mubr.msk.bf16.mxu1 %vm40_vm8, %v14543_v60  ;;  %v4195_v39 = vsel %vm2927_vm1, %v4192_v14, %v4194_v29 }
 0x2ce   :  { %v3173_v53 = vrot.slane %v14522_v0, 1  ;;  %v2384_v50 = vpop.f32.mrb[249].mxu0  ;;  %v4197_v34 = vsel %vm2927_vm1, %v4194_v29, %v4196_v10  ;;  %v4956_v12 = vpop.permute.xlu1 %4955  ;;  %v3818_v9 = vand.u32 15, %v3754_v48  ;;  %v4004_v14 = vrot.slane %v14520_v52, 7 }
 0x2cf   :  { %v3168_v62 = vsel %vm2927_vm1, %v3165_v23, %v3167_v31  ;;  %v3169_v44 = vrot.slane %v2792_v28, 1  ;;  %v11174_v18 = vpop.f32.mrb[250].mxu0  ;;  %5031 = vst.msk [vmem:[#allocation2 + $0xc0] sm:$0xff] %vm5009_vm4, %v4956_v12  ;;  %v4778_v23 = vsel %vm14526_vm10, %v4197_v34, 0.0  ;;  %v2385_v2 = vadd.f32 %v14278_v20, %v2384_v50 }
 0x2d0   :  { %v3431_v3 = vmax.f32 %v14450_v43, %v3168_v62  ;;  %v3174_v54 = vsel %vm2927_vm1, %v3171_v26, %v3173_v53  ;;  %v2387_v22 = vpop.f32.mrb[251].mxu0  ;;  %4845 = vst.msk [vmem:[#allocation2 + $0xf8] sm:$0xff] %vm973_vm0, %v4813_v5  ;;  %v5070_v42 = vpack.c.bf16 %v4778_v23, %v4195_v39  ;;  %v2396_v7 = vadd.f32 %v14278_v20, %v11174_v18 }
 0x2d1   :  { %v3434_v27 = vmax.f32 %v2793_v19, %v3174_v54  ;;  %v3170_v58 = vsel %vm2927_vm1, %v3167_v31, %v3169_v44  ;;  %v3172_v43 = vsel %vm2927_vm1, %v3169_v44, %v3171_v26  ;;  %v2393_v19 = vadd.f32 %v14278_v20, %v11173_v30 }
 0x2d2   :  { %3559 = vst.msk [vmem:[#allocation4 + $0x3b8] sm:$0xff] %vm973_vm0, %v3431_v3  ;;  %v3432_v55 = vmax.f32 %v2791_v11, %v3170_v58  ;;  %v3433_v63 = vmax.f32 %v2792_v28, %v3172_v43  ;;  %5162 = vrot.lane.b32.xlu0 %v5070_v42, %s11935_s29  ;;  %v2388_v11 = vadd.f32 %v14278_v20, %v2387_v22  ;;  %v3819_v28 = vand.u32 15, %v3755_v16 }
 0x2d3   :  { %3562 = vst.msk [vmem:[#allocation4 + $0x3d0] sm:$0xff] %vm973_vm0, %v3434_v27  ;;  %vm14574_vm11 = vcmp.ne.s32.totalorder %v3818_v9, 0  ;;  %v2665_v40 = vmax.f32 %v2393_v19, 0.0  ;;  %v2663_v38 = vmax.f32 %v2385_v2, 0.0  ;;  %v2666_v5 = vmax.f32 %v2396_v7, 0.0 }
 0x2d4   :  { %3560 = vst.msk [vmem:[#allocation4 + $0x3c0] sm:$0xff] %vm973_vm0, %v3432_v55  ;;  %3561 = vst.msk [vmem:[#allocation4 + $0x3c8] sm:$0xff] %vm973_vm0, %v3433_v63  ;;  %v5149_v29 = vpop.permute.xlu1 %5148  ;;  %v4005_v18 = vsel %vm3888_vm2, %v4002_v25, %v4004_v14  ;;  %v2664_v48 = vmax.f32 %v2388_v11, 0.0  ;;  %vm14593_vm12 = vcmp.ne.s32.totalorder %v3819_v28, 15  ;;  %v3756_v25 = vadd.s32 480, %v12278_v47 }
 0x2d5   :  { %v11177_v61 = vpop.f32.mrb[252].mxu0  ;;  %5224 = vst.msk [vmem:[#allocation2 + $0xc0] sm:$0xff] %vm5202_vm7, %v5149_v29  ;;  %v4523_v9 = vsel %vm14574_vm11, %v4005_v18, 0.0 }
 0x2d6   :  { %v2409_v4 = vadd.f32 %v14278_v20, %v11177_v61  ;;  %v2400_v1 = vpop.f32.mrb[253].mxu0 }
 0x2d7   :  { %v2401_v8 = vadd.f32 %v14278_v20, %v2400_v1  ;;  %v11178_v31 = vpop.f32.mrb[254].mxu0 }
 0x2d8   :  { %v2669_v26 = vmax.f32 %v2409_v4, 0.0  ;;  %v2412_v50 = vadd.f32 %v14278_v20, %v11178_v31  ;;  %v2403_v34 = vpop.f32.mrb[255].mxu0 }
 0x2d9   :  { %v2667_v62 = vmax.f32 %v2401_v8, 0.0  ;;  %v2404_v44 = vadd.f32 %v14278_v20, %v2403_v34  ;;  %v14581_v12 = vld [vmem:[#allocation4 + $0x3b0] ss:$2 sm:$0xff]  ;;  %v3757_v34 = vadd.s32 488, %v12278_v47 }
 0x2da   :  { %v2797_v3 = vmax.f32 %v2665_v40, %v2669_v26  ;;  %v2670_v54 = vmax.f32 %v2412_v50, 0.0  ;;  %v4006_v22 = vrot.slane %v14581_v12, 7  ;;  %v4198_v58 = vrot.slane %v14581_v12, 1 }
 0x2db   :  { %v2795_v23 = vmax.f32 %v2663_v38, %v2667_v62  ;;  %v2668_v27 = vmax.f32 %v2404_v44, 0.0  ;;  %v4878_v43 = vpack.c.bf16 %v14581_v12, %v14520_v52  ;;  %v14590_v55 = vld [vmem:[#allocation4 + $0x3c0] ss:$2 sm:$0xff]  ;;  %v3758_v62 = vadd.s32 496, %v12278_v47 }
 0x2dc   :  { %v2798_v20 = vmax.f32 %v2666_v5, %v2670_v54  ;;  %v4200_v63 = vrot.slane %v14590_v55, 1  ;;  %v4007_v16 = vsel %vm3888_vm2, %v4004_v14, %v4006_v22  ;;  %v3179_v19 = vrot.slane %v2797_v3, 1  ;;  %v14610_v1 = vld [vmem:[#allocation2 + $0xc0] sm:$0xff] }
 0x2dd   :  { %v3175_v39 = vrot.slane %v2795_v23, 1  ;;  %v2796_v42 = vmax.f32 %v2664_v48, %v2668_v27  ;;  %4971 = vrot.lane.b32.xlu1 %v4878_v43, %s11934_s21  ;;  %v4814_v61 = vpack.c.bf16 %v4007_v16, %v4523_v9  ;;  %v4199_v14 = vsel %vm2927_vm1, %v4196_v10, %v4198_v58  ;;  %11232 = vmatmul.mubr.msk.bf16.gmra.mrb[40].mxu1 %vm40_vm8, %v14610_v1 }
 0x2de   :  { %v3181_v2 = vrot.slane %v2798_v20, 1  ;;  %v4201_v7 = vsel %vm2927_vm1, %v4198_v58, %v4200_v63  ;;  %v4958_v29 = vpop.permute.xlu0 %4957  ;;  %v3759_v5 = vadd.s32 504, %v12278_v47  ;;  %v3820_v44 = vand.u32 15, %v3756_v25 }
 0x2df   :  { %v3176_v11 = vsel %vm2927_vm1, %v3173_v53, %v3175_v39  ;;  %v3177_v4 = vrot.slane %v2796_v42, 1  ;;  %v4780_v8 = vsel %vm14593_vm12, %v4201_v7, 0.0  ;;  %5032 = vst.msk [vmem:[#allocation2 + $0xc8] sm:$0xff] %vm5009_vm4, %v4958_v29  ;;  %v4008_v18 = vrot.slane %v14590_v55, 7 }
 0x2e0   :  { %v3435_v31 = vmax.f32 %v14522_v0, %v3176_v11  ;;  %v3182_v28 = vsel %vm2927_vm1, %v3179_v19, %v3181_v2  ;;  %v3311_v30 = vsel %vm2927_vm1, %v3181_v2, 0.0  ;;  %v5071_v53 = vpack.c.bf16 %v4780_v8, %v4199_v14  ;;  %4846 = vst.msk [vmem:[#allocation2 + $0x100] sm:$0xff] %vm973_vm0, %v4814_v61  ;;  %v11703_v0 = vld [vmem:[%s16137_s3 + $0x28] sm:$0xff]  }
 0x2e1   :  { %v3438_v52 = vmax.f32 %v2797_v3, %v3182_v28  ;;  %v3439_v40 = vmax.f32 %v2798_v20, %v3311_v30  ;;  %v3178_v10 = vsel %vm2927_vm1, %v3175_v39, %v3177_v4  ;;  %v3180_v38 = vsel %vm2927_vm1, %v3177_v4, %v3179_v19  ;;  %11265 = vmatprep.subr.bf16.mxu1 %v11703_v0 }
 0x2e2   :  { %3563 = vst.msk [vmem:[#allocation4 + $0x3d8] sm:$0xff] %vm973_vm0, %v3435_v31  ;;  %v3436_v26 = vmax.f32 %v2795_v23, %v3178_v10  ;;  %v3437_v50 = vmax.f32 %v2796_v42, %v3180_v38  ;;  %5164 = vrot.lane.b32.xlu1 %v5071_v53, %s11935_s29  ;;  %11266 = vmatpush3.bf16.msra.mxu1 %v11703_v0  ;;  %v3821_v3 = vand.u32 15, %v3757_v34  ;;  %v3823_v54 = vand.u32 15, %v3759_v5  ;;  %v14682_v38 = vld [vmem:[%s16137_s3 + $0x60] sm:$0xff]  }
 0x2e3   :  { %3566 = vst.msk [vmem:[#allocation4 + $0x3f0] sm:$0xff] %vm973_vm0, %v3438_v52  ;;  %3567 = vst.msk [vmem:[#allocation4 + $0x3f8] sm:$0xff] %vm973_vm0, %v3439_v40  ;;  %v3822_v23 = vand.u32 15, %v3758_v62  ;;  %vm14640_vm13 = vcmp.ne.s32.totalorder %v3820_v44, 0  ;;  %v4009_v25 = vsel %vm3888_vm2, %v4006_v22, %v4008_v18  ;;  %v11936_v34 = vmov 0   ;;  %11331 = vmatprep.subr.bf16.mxu1 %v14682_v38 }
 0x2e4   :  { %3564 = vst.msk [vmem:[#allocation4 + $0x3e0] sm:$0xff] %vm973_vm0, %v3436_v26  ;;  %3565 = vst.msk [vmem:[#allocation4 + $0x3e8] sm:$0xff] %vm973_vm0, %v3437_v50  ;;  %v5151_v48 = vpop.permute.xlu0 %5150  ;;  %vm14648_vm14 = vcmp.ne.s32.totalorder %v3821_v3, 15  ;;  %vm14652_vm15 = vcmp.ne.s32.totalorder %v3823_v54, 15  ;;  %v4525_v14 = vsel %vm14640_vm13, %v4009_v25, 0.0  ;;  %7991 = vmatprep.subr.bf16.mxu0 %v11936_v34 }
 0x2e5   :  { %5225 = vst.msk [vmem:[#allocation2 + $0xc8] sm:$0xff] %vm5202_vm7, %v5151_v48  ;;  %vm14657_vm3 = vcmp.ne.s32.totalorder %v3822_v23, 0 }
 0x2e6   :  { %41 = vst.msk [vmem:[#allocation2] sm:$0xff] %vm40_vm8, %v11936_v34  ;;  %42 = vst.msk [vmem:[#allocation2 + $0x90] sm:$0xff] %vm40_vm8, %v11936_v34 }
 0x2e7   :  { %43 = vst.msk [vmem:[#allocation2 + $0x88] sm:$0xff] %vm40_vm8, %v11936_v34  ;;  %44 = vst.msk [vmem:[#allocation2 + $0x118] sm:$0xff] %vm40_vm8, %v11936_v34 }
 0x2e9   :  { %v3690_v27 = vld [vmem:[#allocation4 + $0x3d0] ss:$2 sm:$0xff] }
 0x2ea   :  { %v4010_v43 = vrot.slane %v3690_v27, 7  ;;  %v4202_v20 = vrot.slane %v3690_v27, 1  ;;  %v4879_v41 = vpack.c.bf16 %v3690_v27, %v14590_v55  ;;  %v3694_v39 = vld [vmem:[#allocation4 + $0x3f0] ss:$2 sm:$0xff] }
 0x2eb   :  { %v3692_v42 = vld [vmem:[#allocation4 + $0x3e0] ss:$2 sm:$0xff]  ;;  %v4014_v16 = vrot.slane %v3694_v39, 7  ;;  %v4206_v19 = vrot.slane %v3694_v39, 1 }
 0x2ec   :  { %4973 = vrot.lane.b32.xlu0 %v4879_v41, %s11934_s21  ;;  %v4012_v7 = vrot.slane %v3692_v42, 7  ;;  %v4204_v61 = vrot.slane %v3692_v42, 1  ;;  %v4880_v11 = vpack.c.bf16 %v3694_v39, %v3692_v42  ;;  %v4203_v22 = vsel %vm2927_vm1, %v4200_v63, %v4202_v20  ;;  %v14673_v55 = vld [vmem:[#allocation2 + $0xc8] sm:$0xff] }
 0x2ed   :  { %v4272_v4 = vsel %vm2927_vm1, %v4206_v19, 0.0  ;;  %v4011_v29 = vsel %vm3888_vm2, %v4008_v18, %v4010_v43  ;;  %11235 = vmatprep.mubr.msk.bf16.mxu1 %vm40_vm8, %v14673_v55 }
 0x2ee   :  { %4975 = vrot.lane.b32.xlu1 %v4880_v11, %s11934_s21  ;;  %v4205_v8 = vsel %vm2927_vm1, %v4202_v20, %v4204_v61  ;;  %v4207_v31 = vsel %vm2927_vm1, %v4204_v61, %v4206_v19  ;;  %v4784_v28 = vsel %vm14652_vm15, %v4272_v4, 0.0  ;;  %v4815_v30 = vpack.c.bf16 %v4011_v29, %v4525_v14  ;;  %v4960_v63 = vpop.permute.xlu1 %4959  ;;  %v11709_v61 = vld [vmem:[%s16139_s5 + $0xc0] sm:$0xff]  }
 0x2ef   :  { %v4782_v53 = vsel %vm14648_vm14, %v4205_v8, 0.0  ;;  %v5073_v52 = vpack.c.bf16 %v4784_v28, %v4207_v31  ;;  %v4013_v40 = vsel %vm3888_vm2, %v4010_v43, %v4012_v7  ;;  %v4015_v10 = vsel %vm3888_vm2, %v4012_v7, %v4014_v16  ;;  %5033 = vst.msk [vmem:[#allocation2 + $0xd0] sm:$0xff] %vm5009_vm4, %v4960_v63  ;;  %7992 = vmatpush1.bf16.msra.mxu0 %v11709_v61  ;;  %v5235_v14 = vld [vmem:[#allocation2] sm:$0xff]  ;;  %v11705_v8 = vld [vmem:[%s16137_s3 + $0x68] sm:$0xff]   ;;  %v11891_v28 = vld [vmem:[#allocation2 + $0x10] sm:$0xff] }
 0x2f0   :  { %v5072_v0 = vpack.c.bf16 %v4782_v53, %v4203_v22  ;;  %4847 = vst.msk [vmem:[#allocation2 + $0x108] sm:$0xff] %vm973_vm0, %v4815_v30  ;;  %v4527_v26 = vsel %vm14657_vm3, %v4013_v40, 0.0  ;;  %7993 = vmatprep.subr.bf16.mxu0 %v11936_v34  ;;  %v11890_v31 = vld [vmem:[#allocation2 + $0x8] sm:$0xff]  ;;  %v11706_v30 = vld [vmem:[%s16137_s3 + $0x70] sm:$0xff]   ;;  %v11707_v63 = vld [vmem:[%s16137_s3 + $0x78] sm:$0xff]  }
 0x2f1   :  { %v4816_v50 = vpack.c.bf16 %v4015_v10, %v4527_v26  ;;  %v11892_v53 = vld [vmem:[#allocation2 + $0x18] sm:$0xff]  ;;  %v11708_v40 = vld [vmem:[%s16137_s3 + $0x80] sm:$0xff]   ;;  %v11710_v10 = vld [vmem:[%s16137_s3 + $0x88] sm:$0xff]  }
 0x2f2   :  { %5166 = vrot.lane.b32.xlu0 %v5072_v0, %s11935_s29  ;;  %5168 = vrot.lane.b32.xlu1 %v5073_v52, %s11935_s29  ;;  %v11893_v52 = vld [vmem:[#allocation2 + $0x20] sm:$0xff]  ;;  %v11895_v0 = vld [vmem:[#allocation2 + $0x30] sm:$0xff]  ;;  %v11711_v26 = vld [vmem:[%s16139_s5 + $0xc8] sm:$0xff]  }
 0x2f3   :  { %4848 = vst.msk [vmem:[#allocation2 + $0x110] sm:$0xff] %vm973_vm0, %v4816_v50  ;;  %7994 = vmatpush1.bf16.msra.mxu0 %v11711_v26  ;;  %v11896_v50 = vld [vmem:[#allocation2 + $0x38] sm:$0xff]  ;;  %v6048_v61 = vld [vmem:[#allocation2 + $0x20] sm:$0xff]  ;;  %vm46_vm0 = vcmask 523264  }
 0x2f4   :  { %v5153_v5 = vpop.permute.xlu1 %5152  ;;  %7995 = vmatprep.subr.bf16.mxu0 %v11936_v34 }
 0x2f5   :  { %5226 = vst.msk [vmem:[#allocation2 + $0xd0] sm:$0xff] %vm5202_vm7, %v5153_v5  ;;  %v11897_v5 = vld [vmem:[#allocation2 + $0x40] sm:$0xff] }
 0x2fc   :  { %v14704_v62 = vld [vmem:[#allocation2 + $0xd0] sm:$0xff] }
 0x2fd   :  { %11236 = vmatmul.mubr.msk.bf16.gmra.mrb[44].mxu1 %vm40_vm8, %v14704_v62 }
 0x2fe   :  { %v4962_v44 = vpop.permute.xlu0 %4961 }
 0x2ff   :  { %5034 = vst.msk [vmem:[#allocation2 + $0xd8] sm:$0xff] %vm5009_vm4, %v4962_v44  ;;  %v11898_v44 = vld [vmem:[#allocation2 + $0x48] sm:$0xff] }
 0x304   :  { %v5155_v18 = vpop.permute.xlu0 %5154 }
 0x305   :  { %5227 = vst.msk [vmem:[#allocation2 + $0xd8] sm:$0xff] %vm5202_vm7, %v5155_v18  ;;  %v11899_v18 = vld [vmem:[#allocation2 + $0x50] sm:$0xff] }
 0x30c   :  { %v14710_v48 = vld [vmem:[#allocation2 + $0xd8] sm:$0xff] }
 0x30d   :  { %11239 = vmatprep.mubr.msk.bf16.mxu1 %vm40_vm8, %v14710_v48 }
 0x30e   :  { %v4964_v3 = vpop.permute.xlu1 %4963 }
 0x30f   :  { %5035 = vst.msk [vmem:[#allocation2 + $0xe0] sm:$0xff] %vm5009_vm4, %v4964_v3  ;;  %v11900_v3 = vld [vmem:[#allocation2 + $0x58] sm:$0xff] }
 0x314   :  { %v5157_v54 = vpop.permute.xlu1 %5156 }
 0x315   :  { %5228 = vst.msk [vmem:[#allocation2 + $0xe0] sm:$0xff] %vm5202_vm7, %v5157_v54  ;;  %v11901_v54 = vld [vmem:[#allocation2 + $0x60] sm:$0xff] }
 0x31c   :  { %v14716_v23 = vld [vmem:[#allocation2 + $0xe0] sm:$0xff] }
 0x31d   :  { %11240 = vmatmul.mubr.msk.bf16.gmra.mrb[48].mxu1 %vm40_vm8, %v14716_v23 }
 0x31e   :  { %v4966_v27 = vpop.permute.xlu0 %4965 }
 0x31f   :  { %5036 = vst.msk [vmem:[#allocation2 + $0xe8] sm:$0xff] %vm5009_vm4, %v4966_v27  ;;  %v11902_v27 = vld [vmem:[#allocation2 + $0x68] sm:$0xff] }
 0x324   :  { %v5159_v58 = vpop.permute.xlu0 %5158 }
 0x325   :  { %5229 = vst.msk [vmem:[#allocation2 + $0xe8] sm:$0xff] %vm5202_vm7, %v5159_v58  ;;  %v11903_v58 = vld [vmem:[#allocation2 + $0x70] sm:$0xff] }
 0x32c   :  { %v14722_v43 = vld [vmem:[#allocation2 + $0xe8] sm:$0xff] }
 0x32d   :  { %11243 = vmatprep.mubr.msk.bf16.mxu1 %vm40_vm8, %v14722_v43 }
 0x32e   :  { %v4968_v20 = vpop.permute.xlu1 %4967 }
 0x32f   :  { %5037 = vst.msk [vmem:[#allocation2 + $0xf0] sm:$0xff] %vm5009_vm4, %v4968_v20  ;;  %v5251_v20 = vld [vmem:[#allocation2 + $0x90] sm:$0xff] }
 0x334   :  { %v5161_v41 = vpop.permute.xlu1 %5160 }
 0x335   :  { %5230 = vst.msk [vmem:[#allocation2 + $0xf0] sm:$0xff] %vm5202_vm7, %v5161_v41  ;;  %v11904_v41 = vld [vmem:[#allocation2 + $0x78] sm:$0xff] }
 0x33c   :  { %v14728_v39 = vld [vmem:[#allocation2 + $0xf0] sm:$0xff] }
 0x33d   :  { %11244 = vmatmul.mubr.msk.bf16.gmra.mrb[52].mxu1 %vm40_vm8, %v14728_v39 }
 0x33e   :  { %v4970_v25 = vpop.permute.xlu0 %4969 }
 0x33f   :  { %5038 = vst.msk [vmem:[#allocation2 + $0xf8] sm:$0xff] %vm5009_vm4, %v4970_v25  ;;  %v11712_v25 = vld [vmem:[%s16139_s5 + $0xd0] sm:$0xff]  }
 0x340   :  { %7996 = vmatpush1.bf16.msra.mxu0 %v11712_v25 }
 0x341   :  { %7997 = vmatprep.subr.bf16.mxu0 %v11936_v34 }
 0x344   :  { %v5163_v42 = vpop.permute.xlu0 %5162 }
 0x345   :  { %5231 = vst.msk [vmem:[#allocation2 + $0xf8] sm:$0xff] %vm5202_vm7, %v5163_v42  ;;  %v11905_v42 = vld [vmem:[#allocation2 + $0x98] sm:$0xff] }
 0x34c   :  { %v14734_v16 = vld [vmem:[#allocation2 + $0xf8] sm:$0xff] }
 0x34d   :  { %11247 = vmatprep.mubr.msk.bf16.mxu1 %vm40_vm8, %v14734_v16 }
 0x34f   :  { %v4972_v9 = vpop.permute.xlu1 %4971 }
 0x350   :  { %5039 = vst.msk [vmem:[#allocation2 + $0x100] sm:$0xff] %vm5009_vm4, %v4972_v9  ;;  %v11714_v9 = vld [vmem:[%s16139_s5 + $0xe0] sm:$0xff]  }
 0x354   :  { %v5165_v19 = vpop.permute.xlu1 %5164 }
 0x355   :  { %5232 = vst.msk [vmem:[#allocation2 + $0x100] sm:$0xff] %vm5202_vm7, %v5165_v19  ;;  %v11715_v19 = vld [vmem:[%s16139_s5 + $0xe8] sm:$0xff]  }
 0x35c   :  { %v14740_v2 = vld [vmem:[#allocation2 + $0x100] sm:$0xff] }
 0x35d   :  { %11248 = vmatmul.mubr.msk.bf16.gmra.mrb[56].mxu1 %vm40_vm8, %v14740_v2 }
 0x35e   :  { %v4974_v7 = vpop.permute.xlu0 %4973 }
 0x35f   :  { %5040 = vst.msk [vmem:[#allocation2 + $0x108] sm:$0xff] %vm5009_vm4, %v4974_v7  ;;  %v6047_v7 = vld [vmem:[#allocation2 + $0x18] sm:$0xff] }
 0x360   :  { %v4976_v11 = vpop.permute.xlu1 %4975 }
 0x361   :  { %5041 = vst.msk [vmem:[#allocation2 + $0x110] sm:$0xff] %vm5009_vm4, %v4976_v11  ;;  %v6049_v11 = vld [vmem:[#allocation2 + $0x28] sm:$0xff] }
 0x364   :  { %v5167_v12 = vpop.permute.xlu0 %5166  ;;  %v5169_v22 = vpop.permute.xlu1 %5168 }
 0x365   :  { %5233 = vst.msk [vmem:[#allocation2 + $0x108] sm:$0xff] %vm5202_vm7, %v5167_v12  ;;  %5234 = vst.msk [vmem:[#allocation2 + $0x110] sm:$0xff] %vm5202_vm7, %v5169_v22  ;;  %v6050_v12 = vld [vmem:[#allocation2 + $0x30] sm:$0xff]  ;;  %v6051_v22 = vld [vmem:[#allocation2 + $0x38] sm:$0xff] }
 0x36c   :  { %v14752_v4 = vld [vmem:[#allocation2 + $0x108] sm:$0xff]  ;;  %v14754_v29 = vld [vmem:[#allocation2 + $0x110] sm:$0xff] }
 0x36d   :  { %11251 = vmatprep.mubr.msk.bf16.mxu1 %vm40_vm8, %v14752_v4 }
 0x36e   :  { %11252 = vmatmul.mubr.msk.bf16.gmra.mrb[60].mxu1 %vm40_vm8, %v14754_v29 }
 0x36f   :  { %11267 = vmatprep.mubr.msk.bf16.mxu1 %vm40_vm8, %v5235_v14  ;;  %v6052_v14 = vld [vmem:[#allocation2 + $0x40] sm:$0xff] }
 0x376   :  { %11268 = vmatmul.mubr.msk.bf16.vlgmr.msra.gmra.mrb[0].mxu1 %vm40_vm8, %v11890_v31  ;;  %v6054_v31 = vld [vmem:[#allocation2 + $0x50] sm:$0xff] }
 0x377   :  { %11332 = vmatpush3.bf16.msra.mxu1 %v14682_v38  ;;  %11271 = vmatprep.mubr.msk.bf16.mxu1 %vm40_vm8, %v11891_v28  ;;  %v11894_v38 = vld [vmem:[#allocation2 + $0x28] sm:$0xff]  ;;  %v6055_v28 = vld [vmem:[#allocation2 + $0x58] sm:$0xff] }
 0x378   :  { %11333 = vmatprep.subr.bf16.mxu1 %v11705_v8 }
 0x37b   :  { %11334 = vmatpush3.bf16.msra.mxu1 %v11705_v8  ;;  %v6053_v8 = vld [vmem:[#allocation2 + $0x48] sm:$0xff] }
 0x37c   :  { %11335 = vmatprep.subr.bf16.mxu1 %v11706_v30 }
 0x37e   :  { %11272 = vmatmul.mubr.msk.bf16.gmra.mrb[4].mxu1 %vm40_vm8, %v11892_v53  ;;  %v6058_v53 = vld [vmem:[#allocation2 + $0x70] sm:$0xff] }
 0x37f   :  { %11275 = vmatprep.mubr.msk.bf16.mxu1 %vm40_vm8, %v11893_v52  ;;  %11336 = vmatpush3.bf16.msra.mxu1 %v11706_v30  ;;  %v6056_v30 = vld [vmem:[#allocation2 + $0x60] sm:$0xff]  ;;  %v6059_v52 = vld [vmem:[#allocation2 + $0x78] sm:$0xff] }
 0x380   :  { %11337 = vmatprep.subr.bf16.mxu1 %v11707_v63 }
 0x383   :  { %11338 = vmatpush3.bf16.msra.mxu1 %v11707_v63  ;;  %v6057_v63 = vld [vmem:[#allocation2 + $0x68] sm:$0xff] }
 0x384   :  { %11339 = vmatprep.subr.bf16.mxu1 %v11708_v40 }
 0x386   :  { %11276 = vmatmul.mubr.msk.bf16.gmra.mrb[8].mxu1 %vm40_vm8, %v11894_v38  ;;  %v6062_v38 = vld [vmem:[#allocation2 + $0xa0] sm:$0xff] }
 0x387   :  { %11279 = vmatprep.mubr.msk.bf16.mxu1 %vm40_vm8, %v11895_v0  ;;  %11340 = vmatpush3.bf16.msra.mxu1 %v11708_v40  ;;  %v6060_v40 = vld [vmem:[#allocation2 + $0x80] sm:$0xff]  ;;  %v6063_v0 = vld [vmem:[#allocation2 + $0xa8] sm:$0xff] }
 0x388   :  { %11341 = vmatprep.subr.bf16.mxu1 %v11710_v10 }
 0x38b   :  { %11342 = vmatpush3.bf16.msra.mxu1 %v11710_v10  ;;  %v6061_v10 = vld [vmem:[#allocation2 + $0x88] sm:$0xff] }
 0x38c   :  { %7532 = vmatprep.subr.bf16.mxu1 %v11936_v34 }
 0x38e   :  { %11280 = vmatmul.mubr.msk.bf16.gmra.mrb[12].mxu1 %vm40_vm8, %v11896_v50 }
 0x38f   :  { %11283 = vmatprep.mubr.msk.bf16.mxu1 %vm40_vm8, %v11897_v5 }
 0x396   :  { %11284 = vmatmul.mubr.msk.bf16.gmra.mrb[16].mxu1 %vm40_vm8, %v11898_v44 }
 0x397   :  { %11287 = vmatprep.mubr.msk.bf16.mxu1 %vm40_vm8, %v11899_v18 }
 0x39e   :  { %11288 = vmatmul.mubr.msk.bf16.gmra.mrb[20].mxu1 %vm40_vm8, %v11900_v3 }
 0x39f   :  { %11291 = vmatprep.mubr.msk.bf16.mxu1 %vm40_vm8, %v11901_v54 }
 0x3a6   :  { %11292 = vmatmul.mubr.msk.bf16.gmra.mrb[24].mxu1 %vm40_vm8, %v11902_v27 }
 0x3a7   :  { %11295 = vmatprep.mubr.msk.bf16.mxu1 %vm40_vm8, %v11903_v58 }
 0x3ae   :  { %11296 = vmatmul.mubr.msk.bf16.gmra.mrb[28].mxu1 %vm40_vm8, %v11904_v41  ;;  %v11723_v41 = vld [vmem:[%s16139_s5 + $0x80] sm:$0xff]  }
 0x3af   :  { %11299 = vmatprep.mubr.msk.bf16.mxu1 %vm40_vm8, %v5251_v20 }
 0x3b6   :  { %11300 = vmatmul.mubr.msk.bf16.gmra.mrb[32].mxu1 %vm40_vm8, %v11905_v42 }
 0x3b7   :  { %11303 = vmatprep.mubr.msk.bf16.mxu1 %vm40_vm8, %v14327_v17  ;;  %v11713_v17 = vld [vmem:[%s16139_s5 + $0xd8] sm:$0xff]  }
 0x3b8   :  { %7998 = vmatpush1.bf16.msra.mxu0 %v11713_v17 }
 0x3b9   :  { %7999 = vmatprep.subr.bf16.mxu0 %v11936_v34 }
 0x3bc   :  { %8000 = vmatpush1.bf16.msra.mxu0 %v11714_v9  ;;  %v11724_v9 = vld [vmem:[%s16139_s5 + $0x88] sm:$0xff]  }
 0x3bd   :  { %8001 = vmatprep.subr.bf16.mxu0 %v11936_v34 }
 0x3be   :  { %11304 = vmatmul.mubr.msk.bf16.gmra.mrb[36].mxu1 %vm40_vm8, %v14399_v46  ;;  %v6046_v46 = vld [vmem:[#allocation2 + $0x10] sm:$0xff] }
 0x3bf   :  { %11307 = vmatprep.mubr.msk.bf16.mxu1 %vm40_vm8, %v14471_v13 }
 0x3c0   :  { %8002 = vmatpush1.bf16.msra.mxu0 %v11715_v19 }
 0x3c1   :  { %8003 = vmatprep.subr.bf16.mxu0 %v11936_v34 }
 0x3c6   :  { %11308 = vmatmul.mubr.msk.bf16.gmra.mrb[40].mxu1 %vm40_vm8, %v14543_v60 }
 0x3c7   :  { %11311 = vmatprep.mubr.msk.bf16.mxu1 %vm40_vm8, %v14610_v1 }
 0x3ce   :  { %11312 = vmatmul.mubr.msk.bf16.gmra.mrb[44].mxu1 %vm40_vm8, %v14673_v55 }
 0x3cf   :  { %11315 = vmatprep.mubr.msk.bf16.mxu1 %vm40_vm8, %v14704_v62 }
 0x3d6   :  { %11316 = vmatmul.mubr.msk.bf16.gmra.mrb[48].mxu1 %vm40_vm8, %v14710_v48 }
 0x3d7   :  { %11319 = vmatprep.mubr.msk.bf16.mxu1 %vm40_vm8, %v14716_v23 }
 0x3de   :  { %11320 = vmatmul.mubr.msk.bf16.gmra.mrb[52].mxu1 %vm40_vm8, %v14722_v43 }
 0x3df   :  { %11323 = vmatprep.mubr.msk.bf16.mxu1 %vm40_vm8, %v14728_v39 }
 0x3e6   :  { %11324 = vmatmul.mubr.msk.bf16.gmra.mrb[56].mxu1 %vm40_vm8, %v14734_v16 }
 0x3e7   :  { %11327 = vmatprep.mubr.msk.bf16.mxu1 %vm40_vm8, %v14740_v2 }
 0x3ee   :  { %11328 = vmatmul.mubr.msk.bf16.gmra.mrb[60].mxu1 %vm40_vm8, %v14752_v4 }
 0x3ef   :  { %11343 = vmatprep.mubr.msk.bf16.mxu1 %vm40_vm8, %v6046_v46 }
 0x3f6   :  { %11344 = vmatmul.mubr.msk.bf16.vlgmr.msra.gmra.mrb[0].mxu1 %vm40_vm8, %v6047_v7 }
 0x3f7   :  { %11347 = vmatprep.mubr.msk.bf16.mxu1 %vm40_vm8, %v6048_v61 }
 0x3fe   :  { %11348 = vmatmul.mubr.msk.bf16.gmra.mrb[4].mxu1 %vm40_vm8, %v6049_v11 }
 0x3ff   :  { %11351 = vmatprep.mubr.msk.bf16.mxu1 %vm40_vm8, %v6050_v12 }
 0x406   :  { %11352 = vmatmul.mubr.msk.bf16.gmra.mrb[8].mxu1 %vm40_vm8, %v6051_v22 }
 0x407   :  { %11355 = vmatprep.mubr.msk.bf16.mxu1 %vm40_vm8, %v6052_v14 }
 0x40e   :  { %11356 = vmatmul.mubr.msk.bf16.gmra.mrb[12].mxu1 %vm40_vm8, %v6053_v8 }
 0x40f   :  { %11359 = vmatprep.mubr.msk.bf16.mxu1 %vm40_vm8, %v6054_v31 }
 0x416   :  { %11360 = vmatmul.mubr.msk.bf16.gmra.mrb[16].mxu1 %vm40_vm8, %v6055_v28 }
 0x417   :  { %11363 = vmatprep.mubr.msk.bf16.mxu1 %vm40_vm8, %v6056_v30  ;;  %v11725_v30 = vld [vmem:[%s16139_s5 + $0x90] sm:$0xff]  }
 0x41e   :  { %11364 = vmatmul.mubr.msk.bf16.gmra.mrb[20].mxu1 %vm40_vm8, %v6057_v63 }
 0x41f   :  { %11367 = vmatprep.mubr.msk.bf16.mxu1 %vm40_vm8, %v6058_v53 }
 0x426   :  { %11368 = vmatmul.mubr.msk.bf16.gmra.mrb[24].mxu1 %vm40_vm8, %v6059_v52 }
 0x427   :  { %11371 = vmatprep.mubr.msk.bf16.mxu1 %vm40_vm8, %v6060_v40 }
 0x42e   :  { %11372 = vmatmul.mubr.msk.bf16.gmra.mrb[28].mxu1 %vm40_vm8, %v6061_v10 }
 0x42f   :  { %11375 = vmatprep.mubr.msk.bf16.mxu1 %vm40_vm8, %v6062_v38 }
 0x436   :  { %11376 = vmatmul.mubr.msk.bf16.gmra.mrb[32].mxu1 %vm40_vm8, %v6063_v0 }
 0x437   :  { %11379 = vmatprep.mubr.msk.bf16.mxu1 %vm40_vm8, %v14471_v13  ;;  %v11716_v13 = vld [vmem:[%s16139_s5 + $0xf0] sm:$0xff]  }
 0x438   :  { %8004 = vmatpush1.bf16.msra.mxu0 %v11716_v13 }
 0x439   :  { %8005 = vmatprep.subr.bf16.mxu0 %v11936_v34 }
 0x43e   :  { %11380 = vmatmul.mubr.msk.bf16.gmra.mrb[36].mxu1 %vm40_vm8, %v14543_v60  ;;  %v6077_v60 = vld [vmem:[#allocation2 + $0x118] sm:$0xff] }
 0x43f   :  { %11383 = vmatprep.mubr.msk.bf16.mxu1 %vm40_vm8, %v14610_v1  ;;  %v11937_v1 = vmov 0.0  }
 0x440   :  { %51 = vst.msk [vmem:[#allocation3 + $0x98] sm:$0xff] %vm46_vm0, %v11937_v1  ;;  %45 = vst [vmem:[#allocation3] sm:$0xff] %v11937_v1 }
 0x441   :  { %47 = vst.msk [vmem:[#allocation3 + $0x8] sm:$0xff] %vm46_vm0, %v11937_v1  ;;  %49 = vst.msk [vmem:[#allocation3 + $0xa8] sm:$0xff] %vm46_vm0, %v11937_v1 }
 0x442   :  { %53 = vst.msk [vmem:[#allocation3 + $0x138] sm:$0xff] %vm46_vm0, %v11937_v1  ;;  %v11726_v1 = vld [vmem:[%s16139_s5 + $0x98] sm:$0xff]  }
 0x446   :  { %11384 = vmatmul.mubr.msk.bf16.gmra.mrb[40].mxu1 %vm40_vm8, %v14673_v55  ;;  %v11717_v55 = vld [vmem:[%s16139_s5 + $0xf8] sm:$0xff]  }
 0x447   :  { %11387 = vmatprep.mubr.msk.bf16.mxu1 %vm40_vm8, %v14704_v62  ;;  %8006 = vmatpush1.bf16.msra.mxu0 %v11717_v55  ;;  %v11718_v62 = vld [vmem:[%s16139_s5 + $0x60] sm:$0xff]  }
 0x448   :  { %8007 = vmatprep.subr.bf16.mxu0 %v11936_v34  ;;  %7533 = vmatpush1.bf16.msra.mxu1 %v11718_v62 }
 0x449   :  { %7534 = vmatprep.subr.bf16.mxu1 %v11936_v34 }
 0x44e   :  { %11388 = vmatmul.mubr.msk.bf16.gmra.mrb[44].mxu1 %vm40_vm8, %v14710_v48  ;;  %v11719_v48 = vld [vmem:[%s16139_s5 + $0x68] sm:$0xff]  }
 0x44f   :  { %11391 = vmatprep.mubr.msk.bf16.mxu1 %vm40_vm8, %v14716_v23  ;;  %7535 = vmatpush1.bf16.msra.mxu1 %v11719_v48  ;;  %v11720_v23 = vld [vmem:[%s16139_s5 + $0x70] sm:$0xff]  }
 0x450   :  { %7536 = vmatprep.subr.bf16.mxu1 %v11936_v34 }
 0x453   :  { %7537 = vmatpush1.bf16.msra.mxu1 %v11720_v23 }
 0x454   :  { %7538 = vmatprep.subr.bf16.mxu1 %v11936_v34 }
 0x456   :  { %11392 = vmatmul.mubr.msk.bf16.gmra.mrb[48].mxu1 %vm40_vm8, %v14722_v43  ;;  %v11721_v43 = vld [vmem:[%s16139_s5 + $0x100] sm:$0xff]  }
 0x457   :  { %11395 = vmatprep.mubr.msk.bf16.mxu1 %vm40_vm8, %v14728_v39  ;;  %8008 = vmatpush1.bf16.msra.mxu0 %v11721_v43  ;;  %v14919_v39 = vld [vmem:[%s16138_s4] ss:$0 sm:$0xff] }
 0x458   :  { %8009 = vmatprep.subr.bf16.mxu0 %v11936_v34 }
 0x45e   :  { %11396 = vmatmul.mubr.msk.bf16.gmra.mrb[52].mxu1 %vm40_vm8, %v14734_v16  ;;  %v11722_v16 = vld [vmem:[%s16139_s5 + $0x78] sm:$0xff]  }
 0x45f   :  { %11399 = vmatprep.mubr.msk.bf16.mxu1 %vm40_vm8, %v14740_v2  ;;  %7539 = vmatpush1.bf16.msra.mxu1 %v11722_v16 }
 0x460   :  { %7540 = vmatprep.subr.bf16.mxu1 %v11936_v34 }
 0x463   :  { %7541 = vmatpush1.bf16.msra.mxu1 %v11723_v41 }
 0x464   :  { %7542 = vmatprep.subr.bf16.mxu1 %v11936_v34 }
 0x466   :  { %11400 = vmatmul.mubr.msk.bf16.gmra.mrb[56].mxu1 %vm40_vm8, %v14752_v4 }
 0x467   :  { %11403 = vmatprep.mubr.msk.bf16.mxu1 %vm40_vm8, %v14754_v29  ;;  %7543 = vmatpush1.bf16.msra.mxu1 %v11724_v9 }
 0x468   :  { %7544 = vmatprep.subr.bf16.mxu1 %v11936_v34 }
 0x46b   :  { %7545 = vmatpush1.bf16.msra.mxu1 %v11725_v30 }
 0x46c   :  { %7546 = vmatprep.subr.bf16.mxu1 %v11936_v34 }
 0x46e   :  { %11404 = vmatmul.mubr.msk.bf16.gmra.mrb[60].mxu1 %vm40_vm8, %v6077_v60 }
 0x46f   :  { %7547 = vmatpush1.bf16.msra.mxu1 %v11726_v1 }
 0x470   :  { %7548 = vmatprep.subr.bf16.mxu1 %v11936_v34 }
 0x4c9   :  { %v11345_v2 = vpop.f32.mrb[0].mxu1 }
 0x4ca   :  { %v6585_v4 = vadd.f32 %v11345_v2, %v14919_v39  ;;  %v6257_v29 = vpop.f32.mrb[1].mxu1 }
 0x4cb   :  { %v6583_v26 = vadd.f32 %v14919_v39, %v6257_v29  ;;  %v11346_v50 = vpop.f32.mrb[2].mxu1  ;;  %v11728_v29 = vld [vmem:[%s16139_s5 + $0x108] sm:$0xff]  }
 0x4cc   :  { %v6649_v5 = vmax.f32 %v6585_v4, 0.0  ;;  %v6586_v44 = vadd.f32 %v11346_v50, %v14919_v39  ;;  %v6260_v18 = vpop.f32.mrb[3].mxu1  ;;  %8010 = vmatpush1.bf16.msra.mxu0 %v11728_v29 }
 0x4cd   :  { %v6647_v3 = vmax.f32 %v6583_v26, 0.0  ;;  %v6584_v54 = vadd.f32 %v14919_v39, %v6260_v18  ;;  %8011 = vmatprep.subr.bf16.mxu0 %v11936_v34 }
 0x4ce   :  { %v6650_v27 = vmax.f32 %v6586_v44, 0.0  ;;  %v11727_v44 = vld [vmem:[%s16139_s5 + $0xa0] sm:$0xff]  }
 0x4cf   :  { %v6711_v58 = vmax.f32 %v6647_v3, %v6649_v5  ;;  %v6648_v20 = vmax.f32 %v6584_v54, 0.0  ;;  %7549 = vmatpush1.bf16.msra.mxu1 %v11727_v44 }
 0x4d0   :  { %7550 = vmatprep.subr.bf16.mxu1 %v11936_v34 }
 0x4d1   :  { %v6712_v25 = vmax.f32 %v6648_v20, %v6650_v27  ;;  %v11349_v42 = vpop.f32.mrb[4].mxu1  ;;  %v6775_v19 = vrot.slane %v6711_v58, 1 }
 0x4d2   :  { %v6589_v17 = vadd.f32 %v11349_v42, %v14919_v39  ;;  %v6273_v46 = vpop.f32.mrb[5].mxu1 }
 0x4d3   :  { %v6776_v7 = vrot.slane %v6712_v25, 1  ;;  %v6587_v61 = vadd.f32 %v14919_v39, %v6273_v46  ;;  %v11350_v11 = vpop.f32.mrb[6].mxu1  ;;  %v6966_v46 = vand.u32 7, %v12278_v47 }
 0x4d4   :  { %v6653_v12 = vmax.f32 %v6589_v17, 0.0  ;;  %v6590_v22 = vadd.f32 %v11350_v11, %v14919_v39  ;;  %v6276_v14 = vpop.f32.mrb[7].mxu1 }
 0x4d5   :  { %v6777_v8 = vsel %vm2927_vm1, %v6775_v19, %v6776_v7  ;;  %v6651_v31 = vmax.f32 %v6587_v61, 0.0  ;;  %v6588_v28 = vadd.f32 %v14919_v39, %v6276_v14  ;;  %vm14979_vm4 = vcmp.ne.s32.totalorder %v6966_v46, 0 }
 0x4d6   :  { %v6871_v63 = vmax.f32 %v6711_v58, %v6777_v8  ;;  %v6654_v53 = vmax.f32 %v6590_v22, 0.0  ;;  %vm15003_vm7 = vcmp.ne.s32.totalorder %v6966_v46, 7 }
 0x4d7   :  { %v6713_v52 = vmax.f32 %v6651_v31, %v6653_v12  ;;  %v6652_v40 = vmax.f32 %v6588_v28, 0.0 }
 0x4d8   :  { %6903 = vst.msk [vmem:[#allocation5] sm:$0xff] %vm46_vm0, %v6871_v63 }
 0x4d9   :  { %v6778_v10 = vrot.slane %v6713_v52, 1  ;;  %v6714_v38 = vmax.f32 %v6652_v40, %v6654_v53  ;;  %v11353_v0 = vpop.f32.mrb[8].mxu1 }
 0x4da   :  { %v6593_v13 = vadd.f32 %v11353_v0, %v14919_v39  ;;  %v6289_v60 = vpop.f32.mrb[9].mxu1  ;;  %v11730_v0 = vld [vmem:[%s16139_s5 + $0xb0] sm:$0xff]  }
 0x4db   :  { %v6779_v55 = vsel %vm2927_vm1, %v6776_v7, %v6778_v10  ;;  %v6780_v62 = vrot.slane %v6714_v38, 1  ;;  %v6591_v48 = vadd.f32 %v14919_v39, %v6289_v60  ;;  %v11354_v23 = vpop.f32.mrb[10].mxu1 }
 0x4dc   :  { %v6872_v43 = vmax.f32 %v6712_v25, %v6779_v55  ;;  %v6657_v16 = vmax.f32 %v6593_v13, 0.0  ;;  %v6594_v2 = vadd.f32 %v11354_v23, %v14919_v39  ;;  %v6292_v4 = vpop.f32.mrb[11].mxu1  ;;  %v11729_v25 = vld [vmem:[%s16139_s5 + $0xa8] sm:$0xff]   ;;  %v6967_v13 = vand.u32 7, %v12294_v6  ;;  %v11731_v23 = vld [vmem:[%s16139_s5 + $0xb8] sm:$0xff]  }
 0x4dd   :  { %v6781_v26 = vsel %vm2927_vm1, %v6778_v10, %v6780_v62  ;;  %v6655_v50 = vmax.f32 %v6591_v48, 0.0  ;;  %v6592_v5 = vadd.f32 %v14919_v39, %v6292_v4  ;;  %7551 = vmatpush1.bf16.msra.mxu1 %v11729_v25 }
 0x4de   :  { %6904 = vst.msk [vmem:[#allocation5 + $0x8] sm:$0xff] %vm46_vm0, %v6872_v43  ;;  %v6873_v18 = vmax.f32 %v6713_v52, %v6781_v26  ;;  %v6658_v3 = vmax.f32 %v6594_v2, 0.0  ;;  %7552 = vmatprep.subr.bf16.mxu1 %v11936_v34  ;;  %vm15008_vm8 = vcmp.ne.s32.totalorder %v6967_v13, 0  ;;  %vm15037_vm5 = vcmp.ne.s32.totalorder %v6967_v13, 7 }
 0x4df   :  { %v6715_v54 = vmax.f32 %v6655_v50, %v6657_v16  ;;  %v6656_v27 = vmax.f32 %v6592_v5, 0.0 }
 0x4e0   :  { %6905 = vst.msk [vmem:[#allocation5 + $0x10] sm:$0xff] %vm46_vm0, %v6873_v18 }
 0x4e1   :  { %v6782_v58 = vrot.slane %v6715_v54, 1  ;;  %v6716_v20 = vmax.f32 %v6656_v27, %v6658_v3  ;;  %v11357_v41 = vpop.f32.mrb[12].mxu1  ;;  %7553 = vmatpush1.bf16.msra.mxu1 %v11730_v0 }
 0x4e2   :  { %v6597_v42 = vadd.f32 %v11357_v41, %v14919_v39  ;;  %v6305_v17 = vpop.f32.mrb[13].mxu1  ;;  %7554 = vmatprep.subr.bf16.mxu1 %v11936_v34 }
 0x4e3   :  { %v6783_v9 = vsel %vm2927_vm1, %v6780_v62, %v6782_v58  ;;  %v6784_v19 = vrot.slane %v6716_v20, 1  ;;  %v6595_v7 = vadd.f32 %v14919_v39, %v6305_v17  ;;  %v11358_v61 = vpop.f32.mrb[14].mxu1 }
 0x4e4   :  { %v6874_v11 = vmax.f32 %v6714_v38, %v6783_v9  ;;  %v6661_v12 = vmax.f32 %v6597_v42, 0.0  ;;  %v6598_v22 = vadd.f32 %v11358_v61, %v14919_v39  ;;  %v6308_v14 = vpop.f32.mrb[15].mxu1 }
 0x4e5   :  { %v6785_v8 = vsel %vm2927_vm1, %v6782_v58, %v6784_v19  ;;  %v6659_v31 = vmax.f32 %v6595_v7, 0.0  ;;  %v6596_v28 = vadd.f32 %v14919_v39, %v6308_v14  ;;  %v6935_v30 = vld [vmem:[#allocation5] ss:$2 sm:$0xff]  ;;  %7555 = vmatpush1.bf16.msra.mxu1 %v11731_v23  ;;  %v11732_v7 = vld [vmem:[%s16139_s5 + $0x110] sm:$0xff]  }
 0x4e6   :  { %6906 = vst.msk [vmem:[#allocation5 + $0x18] sm:$0xff] %vm46_vm0, %v6874_v11  ;;  %v6875_v63 = vmax.f32 %v6715_v54, %v6785_v8  ;;  %v6662_v53 = vmax.f32 %v6598_v22, 0.0  ;;  %7238 = vrot.lane.b32.xlu0 %v6935_v30, %s11935_s29  ;;  %v6998_v52 = vrot.slane %v6935_v30, 7  ;;  %v7046_v27 = vrot.slane %v6935_v30, 1  ;;  %7725 = vmatprep.subr.bf16.mxu1 %v11936_v34  ;;  %v11733_v30 = vld [vmem:[%s16139_s5 + $0x118] sm:$0xff]  }
 0x4e7   :  { %v6717_v10 = vmax.f32 %v6659_v31, %v6661_v12  ;;  %v6660_v38 = vmax.f32 %v6596_v28, 0.0  ;;  %v6968_v11 = vand.u32 7, %v12330_v33  ;;  %8012 = vmatpush1.bf16.msra.mxu0 %v11732_v7 }
 0x4e8   :  { %6907 = vst.msk [vmem:[#allocation5 + $0x20] sm:$0xff] %vm46_vm0, %v6875_v63  ;;  %v7045_v60 = vsel %vm3888_vm2, 0.0, %v6998_v52  ;;  %8013 = vmatprep.subr.bf16.mxu0 %v11936_v34 }
 0x4e9   :  { %v6786_v1 = vrot.slane %v6717_v10, 1  ;;  %v14990_v55 = vmax.f32 %v6660_v38, %v6662_v53  ;;  %v11361_v62 = vpop.f32.mrb[16].mxu1  ;;  %v7142_v48 = vsel %vm14979_vm4, %v7045_v60, 0.0  ;;  %vm15045_vm6 = vcmp.ne.s32.totalorder %v6968_v11, 0 }
 0x4ea   :  { %v6601_v43 = vadd.f32 %v11361_v62, %v14919_v39  ;;  %v6321_v16 = vpop.f32.mrb[17].mxu1  ;;  %7222 = vst.msk [vmem:[#allocation3 + $0x10] sm:$0xff] %vm46_vm0, %v7142_v48  ;;  %vm15065_vm9 = vcmp.ne.s32.totalorder %v6968_v11, 7 }
 0x4eb   :  { %v6787_v6 = vsel %vm2927_vm1, %v6784_v19, %v6786_v1  ;;  %v6788_v2 = vrot.slane %v14990_v55, 1  ;;  %v6599_v4 = vadd.f32 %v14919_v39, %v6321_v16  ;;  %v11362_v29 = vpop.f32.mrb[18].mxu1  ;;  %8014 = vmatpush1.bf16.msra.mxu0 %v11733_v30 }
 0x4ec   :  { %v6876_v50 = vmax.f32 %v6716_v20, %v6787_v6  ;;  %v6665_v5 = vmax.f32 %v6601_v43, 0.0  ;;  %v6602_v44 = vadd.f32 %v11362_v29, %v14919_v39  ;;  %v6324_v18 = vpop.f32.mrb[19].mxu1 }
 0x4ed   :  { %v6789_v54 = vsel %vm2927_vm1, %v6786_v1, %v6788_v2  ;;  %v6663_v58 = vmax.f32 %v6599_v4, 0.0  ;;  %v6600_v41 = vadd.f32 %v14919_v39, %v6324_v18  ;;  %v6937_v25 = vld [vmem:[#allocation5 + $0x10] ss:$2 sm:$0xff] }
 0x4ee   :  { %6908 = vst.msk [vmem:[#allocation5 + $0x28] sm:$0xff] %vm46_vm0, %v6876_v50  ;;  %v6877_v42 = vmax.f32 %v6717_v10, %v6789_v54  ;;  %v6666_v20 = vmax.f32 %v6602_v44, 0.0  ;;  %7240 = vrot.lane.b32.xlu1 %v6937_v25, %s11935_s29  ;;  %v6999_v17 = vrot.slane %v6937_v25, 7  ;;  %v7047_v46 = vrot.slane %v6937_v25, 1 }
 0x4ef   :  { %v6719_v9 = vmax.f32 %v6663_v58, %v6665_v5  ;;  %v6664_v19 = vmax.f32 %v6600_v41, 0.0  ;;  %v6969_v50 = vand.u32 7, %v12408_v37 }
 0x4f0   :  { %6909 = vst.msk [vmem:[#allocation5 + $0x30] sm:$0xff] %vm46_vm0, %v6877_v42  ;;  %v7048_v61 = vsel %vm2927_vm1, %v7046_v27, %v7047_v46  ;;  %v7000_v12 = vsel %vm3888_vm2, %v6998_v52, %v6999_v17 }
 0x4f1   :  { %v6790_v22 = vrot.slane %v6719_v9, 1  ;;  %v6720_v14 = vmax.f32 %v6664_v19, %v6666_v20  ;;  %v7206_v8 = vsel %vm15003_vm7, %v7048_v61, 0.0  ;;  %v11365_v31 = vpop.f32.mrb[20].mxu1  ;;  %v7143_v28 = vsel %vm15008_vm8, %v7000_v12, 0.0 }
 0x4f2   :  { %7303 = vst.msk [vmem:[#allocation3 + $0x18] sm:$0xff] %vm46_vm0, %v7206_v8  ;;  %v6605_v33 = vadd.f32 %v11365_v31, %v14919_v39  ;;  %v6337_v63 = vpop.f32.mrb[21].mxu1  ;;  %7223 = vst.msk [vmem:[#allocation3 + $0x20] sm:$0xff] %vm46_vm0, %v7143_v28  ;;  %vm15071_vm10 = vcmp.ne.s32.totalorder %v6969_v50, 0  ;;  %vm15095_vm11 = vcmp.ne.s32.totalorder %v6969_v50, 7 }
 0x4f3   :  { %v6791_v53 = vsel %vm2927_vm1, %v6788_v2, %v6790_v22  ;;  %v6792_v52 = vrot.slane %v6720_v14, 1  ;;  %v6603_v40 = vadd.f32 %v14919_v39, %v6337_v63  ;;  %v11366_v10 = vpop.f32.mrb[22].mxu1 }
 0x4f4   :  { %v6878_v0 = vmax.f32 %v14990_v55, %v6791_v53  ;;  %v6669_v60 = vmax.f32 %v6605_v33, 0.0  ;;  %v6606_v1 = vadd.f32 %v11366_v10, %v14919_v39  ;;  %v6340_v62 = vpop.f32.mrb[23].mxu1 }
 0x4f5   :  { %v6793_v48 = vsel %vm2927_vm1, %v6790_v22, %v6792_v52  ;;  %v6667_v23 = vmax.f32 %v6603_v40, 0.0  ;;  %v6604_v43 = vadd.f32 %v14919_v39, %v6340_v62  ;;  %v6939_v16 = vld [vmem:[#allocation5 + $0x20] ss:$2 sm:$0xff]  ;;  %v6970_v40 = vand.u32 7, %v12479_v35 }
 0x4f6   :  { %6910 = vst.msk [vmem:[#allocation5 + $0x38] sm:$0xff] %vm46_vm0, %v6878_v0  ;;  %v6879_v13 = vmax.f32 %v6719_v9, %v6793_v48  ;;  %v6670_v2 = vmax.f32 %v6606_v1, 0.0  ;;  %7242 = vrot.lane.b32.xlu0 %v6939_v16, %s11935_s29  ;;  %v7001_v55 = vrot.slane %v6939_v16, 7  ;;  %v7049_v4 = vrot.slane %v6939_v16, 1 }
 0x4f7   :  { %v6721_v29 = vmax.f32 %v6667_v23, %v6669_v60  ;;  %v6668_v26 = vmax.f32 %v6604_v43, 0.0  ;;  %vm15101_vm12 = vcmp.ne.s32.totalorder %v6970_v40, 0  ;;  %vm15129_vm13 = vcmp.ne.s32.totalorder %v6970_v40, 7 }
 0x4f8   :  { %6911 = vst.msk [vmem:[#allocation5 + $0x40] sm:$0xff] %vm46_vm0, %v6879_v13  ;;  %v7050_v5 = vsel %vm2927_vm1, %v7047_v46, %v7049_v4  ;;  %v7002_v44 = vsel %vm3888_vm2, %v6999_v17, %v7001_v55 }
 0x4f9   :  { %v6794_v18 = vrot.slane %v6721_v29, 1  ;;  %v6722_v3 = vmax.f32 %v6668_v26, %v6670_v2  ;;  %v7207_v54 = vsel %vm15037_vm5, %v7050_v5, 0.0  ;;  %v11369_v27 = vpop.f32.mrb[24].mxu1  ;;  %v7144_v58 = vsel %vm15045_vm6, %v7002_v44, 0.0  ;;  %v7322_v62 = vld [vmem:[#allocation3 + $0x18] sm:$0xff] }
 0x4fa   :  { %7304 = vst.msk [vmem:[#allocation3 + $0x28] sm:$0xff] %vm46_vm0, %v7207_v54  ;;  %v6609_v41 = vadd.f32 %v11369_v27, %v14919_v39  ;;  %v6353_v37 = vpop.f32.mrb[25].mxu1  ;;  %7224 = vst.msk [vmem:[#allocation3 + $0x30] sm:$0xff] %vm46_vm0, %v7144_v58 }
 0x4fb   :  { %v6795_v25 = vsel %vm2927_vm1, %v6792_v52, %v6794_v18  ;;  %v6796_v42 = vrot.slane %v6722_v3, 1  ;;  %v6607_v20 = vadd.f32 %v14919_v39, %v6353_v37  ;;  %v11370_v17 = vpop.f32.mrb[26].mxu1 }
 0x4fc   :  { %v6880_v46 = vmax.f32 %v6720_v14, %v6795_v25  ;;  %v6673_v9 = vmax.f32 %v6609_v41, 0.0  ;;  %v6610_v19 = vadd.f32 %v11370_v17, %v14919_v39  ;;  %v6356_v7 = vpop.f32.mrb[27].mxu1  ;;  %v6971_v17 = vand.u32 7, %v12502_v49 }
 0x4fd   :  { %v6797_v12 = vsel %vm2927_vm1, %v6794_v18, %v6796_v42  ;;  %v6671_v22 = vmax.f32 %v6607_v20, 0.0  ;;  %v6608_v8 = vadd.f32 %v14919_v39, %v6356_v7  ;;  %v6941_v31 = vld [vmem:[#allocation5 + $0x30] ss:$2 sm:$0xff] }
 0x4fe   :  { %6912 = vst.msk [vmem:[#allocation5 + $0x48] sm:$0xff] %vm46_vm0, %v6880_v46  ;;  %v6881_v14 = vmax.f32 %v6721_v29, %v6797_v12  ;;  %v6674_v30 = vmax.f32 %v6610_v19, 0.0  ;;  %7244 = vrot.lane.b32.xlu1 %v6941_v31, %s11935_s29  ;;  %v7003_v11 = vrot.slane %v6941_v31, 7  ;;  %v7051_v33 = vrot.slane %v6941_v31, 1 }
 0x4ff   :  { %v6723_v63 = vmax.f32 %v6671_v22, %v6673_v9  ;;  %v6672_v53 = vmax.f32 %v6608_v8, 0.0  ;;  %vm15135_vm14 = vcmp.ne.s32.totalorder %v6971_v17, 0  ;;  %vm15155_vm15 = vcmp.ne.s32.totalorder %v6971_v17, 7 }
 0x500   :  { %6913 = vst.msk [vmem:[#allocation5 + $0x50] sm:$0xff] %vm46_vm0, %v6881_v14  ;;  %v7052_v52 = vsel %vm2927_vm1, %v7049_v4, %v7051_v33  ;;  %v7004_v10 = vsel %vm3888_vm2, %v7001_v55, %v7003_v11 }
 0x501   :  { %v6798_v38 = vrot.slane %v6723_v63, 1  ;;  %v15081_v0 = vmax.f32 %v6672_v53, %v6674_v30  ;;  %v7208_v60 = vsel %vm15065_vm9, %v7052_v52, 0.0  ;;  %v11373_v1 = vpop.f32.mrb[28].mxu1  ;;  %v7324_v48 = vld [vmem:[#allocation3 + $0x28] sm:$0xff]  ;;  %v7145_v23 = vsel %vm15071_vm10, %v7004_v10, 0.0 }
 0x502   :  { %7305 = vst.msk [vmem:[#allocation3 + $0x38] sm:$0xff] %vm46_vm0, %v7208_v60  ;;  %v6613_v43 = vadd.f32 %v11373_v1, %v14919_v39  ;;  %v6369_v16 = vpop.f32.mrb[29].mxu1  ;;  %v7396_v35 = vpack.c.bf16 %v7324_v48, %v7322_v62  ;;  %7225 = vst.msk [vmem:[#allocation3 + $0x40] sm:$0xff] %vm46_vm0, %v7145_v23 }
 0x503   :  { %v6799_v6 = vsel %vm2927_vm1, %v6796_v42, %v6798_v38  ;;  %v6800_v13 = vrot.slane %v15081_v0, 1  ;;  %v6611_v2 = vadd.f32 %v14919_v39, %v6369_v16  ;;  %v11374_v55 = vpop.f32.mrb[30].mxu1 }
 0x504   :  { %v6882_v4 = vmax.f32 %v6722_v3, %v6799_v6  ;;  %v6677_v29 = vmax.f32 %v6613_v43, 0.0  ;;  %v6614_v26 = vadd.f32 %v11374_v55, %v14919_v39  ;;  %v6372_v5 = vpop.f32.mrb[31].mxu1  ;;  %10279 = vmatprep.mubr.msk.bf16.mxu1 %vm46_vm0, %v7396_v35 }
 0x505   :  { %v6801_v18 = vsel %vm2927_vm1, %v6798_v38, %v6800_v13  ;;  %v6675_v54 = vmax.f32 %v6611_v2, 0.0  ;;  %v6612_v27 = vadd.f32 %v14919_v39, %v6372_v5  ;;  %v6943_v58 = vld [vmem:[#allocation5 + $0x40] ss:$2 sm:$0xff]  ;;  %v6972_v2 = vand.u32 7, %v12564_v45 }
 0x506   :  { %6914 = vst.msk [vmem:[#allocation5 + $0x58] sm:$0xff] %vm46_vm0, %v6882_v4  ;;  %v6883_v3 = vmax.f32 %v6723_v63, %v6801_v18  ;;  %v6678_v37 = vmax.f32 %v6614_v26, 0.0  ;;  %7246 = vrot.lane.b32.xlu0 %v6943_v58, %s11935_s29  ;;  %v7005_v50 = vrot.slane %v6943_v58, 7  ;;  %v7053_v25 = vrot.slane %v6943_v58, 1 }
 0x507   :  { %v6725_v42 = vmax.f32 %v6675_v54, %v6677_v29  ;;  %v6676_v20 = vmax.f32 %v6612_v27, 0.0  ;;  %vm15161_vm3 = vcmp.ne.s32.totalorder %v6972_v2, 0  ;;  %vm15181_vm4 = vcmp.ne.s32.totalorder %v6972_v2, 7 }
 0x508   :  { %6915 = vst.msk [vmem:[#allocation5 + $0x60] sm:$0xff] %vm46_vm0, %v6883_v3  ;;  %v7054_v46 = vsel %vm2927_vm1, %v7051_v33, %v7053_v25  ;;  %v7006_v9 = vsel %vm3888_vm2, %v7003_v11, %v7005_v50 }
 0x509   :  { %v6802_v19 = vrot.slane %v6725_v42, 1  ;;  %v6726_v7 = vmax.f32 %v6676_v20, %v6678_v37  ;;  %v7209_v61 = vsel %vm15095_vm11, %v7054_v46, 0.0  ;;  %v11377_v12 = vpop.f32.mrb[32].mxu1  ;;  %v15113_v22 = vld [vmem:[#allocation3 + $0x38] sm:$0xff]  ;;  %v7146_v8 = vsel %vm15101_vm12, %v7006_v9, 0.0 }
 0x50a   :  { %7306 = vst.msk [vmem:[#allocation3 + $0x48] sm:$0xff] %vm46_vm0, %v7209_v61  ;;  %v6617_v49 = vadd.f32 %v11377_v12, %v14919_v39  ;;  %v6385_v31 = vpop.f32.mrb[33].mxu1  ;;  %v15120_v28 = vpack.c.bf16 %v15113_v22, %v7324_v48  ;;  %7226 = vst.msk [vmem:[#allocation3 + $0x50] sm:$0xff] %vm46_vm0, %v7146_v8 }
 0x50b   :  { %v6803_v14 = vsel %vm2927_vm1, %v6800_v13, %v6802_v19  ;;  %v6804_v30 = vrot.slane %v6726_v7, 1  ;;  %v6615_v11 = vadd.f32 %v14919_v39, %v6385_v31  ;;  %v11378_v33 = vpop.f32.mrb[34].mxu1 }
 0x50c   :  { %v6884_v63 = vmax.f32 %v15081_v0, %v6803_v14  ;;  %v6681_v53 = vmax.f32 %v6617_v49, 0.0  ;;  %v6618_v52 = vadd.f32 %v11378_v33, %v14919_v39  ;;  %v6388_v10 = vpop.f32.mrb[35].mxu1  ;;  %10343 = vmatprep.mubr.msk.bf16.mxu0 %vm46_vm0, %v15120_v28  ;;  %v6973_v14 = vand.u32 7, %v12587_v59 }
 0x50d   :  { %v6805_v60 = vsel %vm2927_vm1, %v6802_v19, %v6804_v30  ;;  %v6679_v1 = vmax.f32 %v6615_v11, 0.0  ;;  %v6616_v62 = vadd.f32 %v14919_v39, %v6388_v10  ;;  %v6945_v48 = vld [vmem:[#allocation5 + $0x50] ss:$2 sm:$0xff] }
 0x50e   :  { %6916 = vst.msk [vmem:[#allocation5 + $0x68] sm:$0xff] %vm46_vm0, %v6884_v63  ;;  %v6885_v0 = vmax.f32 %v6725_v42, %v6805_v60  ;;  %v6682_v43 = vmax.f32 %v6618_v52, 0.0  ;;  %7248 = vrot.lane.b32.xlu1 %v6945_v48, %s11935_s29  ;;  %v7007_v40 = vrot.slane %v6945_v48, 7  ;;  %v7055_v16 = vrot.slane %v6945_v48, 1 }
 0x50f   :  { %v6727_v35 = vmax.f32 %v6679_v1, %v6681_v53  ;;  %v6680_v6 = vmax.f32 %v6616_v62, 0.0  ;;  %vm15187_vm7 = vcmp.ne.s32.totalorder %v6973_v14, 0  ;;  %vm15207_vm8 = vcmp.ne.s32.totalorder %v6973_v14, 7 }
 0x510   :  { %6917 = vst.msk [vmem:[#allocation5 + $0x70] sm:$0xff] %vm46_vm0, %v6885_v0  ;;  %v7056_v13 = vsel %vm2927_vm1, %v7053_v25, %v7055_v16  ;;  %v7008_v55 = vsel %vm3888_vm2, %v7005_v50, %v7007_v40 }
 0x511   :  { %v6806_v4 = vrot.slane %v6727_v35, 1  ;;  %v6728_v29 = vmax.f32 %v6680_v6, %v6682_v43  ;;  %v7210_v26 = vsel %vm15129_vm13, %v7056_v13, 0.0  ;;  %v11381_v5 = vpop.f32.mrb[36].mxu1  ;;  %v7147_v44 = vsel %vm15135_vm14, %v7008_v55, 0.0 }
 0x512   :  { %7307 = vst.msk [vmem:[#allocation3 + $0x58] sm:$0xff] %vm46_vm0, %v7210_v26  ;;  %v6621_v18 = vadd.f32 %v11381_v5, %v14919_v39  ;;  %v6401_v54 = vpop.f32.mrb[37].mxu1  ;;  %7227 = vst.msk [vmem:[#allocation3 + $0x60] sm:$0xff] %vm46_vm0, %v7147_v44 }
 0x513   :  { %v6807_v45 = vsel %vm2927_vm1, %v6804_v30, %v6806_v4  ;;  %v6808_v27 = vrot.slane %v6728_v29, 1  ;;  %v6619_v58 = vadd.f32 %v14919_v39, %v6401_v54  ;;  %v11382_v41 = vpop.f32.mrb[38].mxu1 }
 0x514   :  { %v6886_v3 = vmax.f32 %v6726_v7, %v6807_v45  ;;  %v6685_v37 = vmax.f32 %v6621_v18, 0.0  ;;  %v6622_v50 = vadd.f32 %v11382_v41, %v14919_v39  ;;  %v6404_v25 = vpop.f32.mrb[39].mxu1 }
 0x515   :  { %v6809_v20 = vsel %vm2927_vm1, %v6806_v4, %v6808_v27  ;;  %v6683_v46 = vmax.f32 %v6619_v58, 0.0  ;;  %v6620_v9 = vadd.f32 %v14919_v39, %v6404_v25  ;;  %v6947_v19 = vld [vmem:[#allocation5 + $0x60] ss:$2 sm:$0xff] }
 0x516   :  { %6918 = vst.msk [vmem:[#allocation5 + $0x78] sm:$0xff] %vm46_vm0, %v6886_v3  ;;  %v6887_v7 = vmax.f32 %v6727_v35, %v6809_v20  ;;  %v6686_v12 = vmax.f32 %v6622_v50, 0.0  ;;  %7250 = vrot.lane.b32.xlu0 %v6947_v19, %s11935_s29  ;;  %v7009_v17 = vrot.slane %v6947_v19, 7  ;;  %v7057_v8 = vrot.slane %v6947_v19, 1 }
 0x517   :  { %v6729_v49 = vmax.f32 %v6683_v46, %v6685_v37  ;;  %v6684_v31 = vmax.f32 %v6620_v9, 0.0 }
 0x518   :  { %6919 = vst.msk [vmem:[#allocation5 + $0x80] sm:$0xff] %vm46_vm0, %v6887_v7  ;;  %v7058_v30 = vsel %vm2927_vm1, %v7055_v16, %v7057_v8  ;;  %v7010_v11 = vsel %vm3888_vm2, %v7007_v40, %v7009_v17 }
 0x519   :  { %v6810_v33 = vrot.slane %v6729_v49, 1  ;;  %v6730_v63 = vmax.f32 %v6684_v31, %v6686_v12  ;;  %v7211_v53 = vsel %vm15155_vm15, %v7058_v30, 0.0  ;;  %v11385_v52 = vpop.f32.mrb[40].mxu1  ;;  %v7148_v10 = vsel %vm15161_vm3, %v7010_v11, 0.0 }
 0x51a   :  { %7308 = vst.msk [vmem:[#allocation3 + $0x68] sm:$0xff] %vm46_vm0, %v7211_v53  ;;  %v6625_v38 = vadd.f32 %v11385_v52, %v14919_v39  ;;  %v6417_v59 = vpop.f32.mrb[41].mxu1  ;;  %7228 = vst.msk [vmem:[#allocation3 + $0x70] sm:$0xff] %vm46_vm0, %v7148_v10 }
 0x51b   :  { %v6811_v60 = vsel %vm2927_vm1, %v6808_v27, %v6810_v33  ;;  %v6812_v1 = vrot.slane %v6730_v63, 1  ;;  %v6623_v62 = vadd.f32 %v14919_v39, %v6417_v59  ;;  %v11386_v48 = vpop.f32.mrb[42].mxu1  ;;  %v6974_v27 = vand.u32 7, %v12649_v56 }
 0x51c   :  { %v6888_v23 = vmax.f32 %v6728_v29, %v6811_v60  ;;  %v6689_v0 = vmax.f32 %v6625_v38, 0.0  ;;  %v6626_v43 = vadd.f32 %v11386_v48, %v14919_v39  ;;  %v6420_v40 = vpop.f32.mrb[43].mxu1  ;;  %v6975_v38 = vand.u32 7, %v12677_v24 }
 0x51d   :  { %v6813_v35 = vsel %vm2927_vm1, %v6810_v33, %v6812_v1  ;;  %v6687_v6 = vmax.f32 %v6623_v62, 0.0  ;;  %v6624_v13 = vadd.f32 %v14919_v39, %v6420_v40  ;;  %v6949_v55 = vld [vmem:[#allocation5 + $0x70] ss:$2 sm:$0xff]  ;;  %vm15213_vm5 = vcmp.ne.s32.totalorder %v6974_v27, 0 }
 0x51e   :  { %6920 = vst.msk [vmem:[#allocation5 + $0x88] sm:$0xff] %vm46_vm0, %v6888_v23  ;;  %v6889_v29 = vmax.f32 %v6729_v49, %v6813_v35  ;;  %v6690_v26 = vmax.f32 %v6626_v43, 0.0  ;;  %7252 = vrot.lane.b32.xlu1 %v6949_v55, %s11935_s29  ;;  %v7011_v2 = vrot.slane %v6949_v55, 7  ;;  %v7059_v5 = vrot.slane %v6949_v55, 1 }
 0x51f   :  { %v6731_v44 = vmax.f32 %v6687_v6, %v6689_v0  ;;  %v6688_v18 = vmax.f32 %v6624_v13, 0.0  ;;  %vm15233_vm6 = vcmp.ne.s32.totalorder %v6974_v27, 7  ;;  %vm15239_vm9 = vcmp.ne.s32.totalorder %v6975_v38, 0 }
 0x520   :  { %6921 = vst.msk [vmem:[#allocation5 + $0x90] sm:$0xff] %vm46_vm0, %v6889_v29  ;;  %v7060_v54 = vsel %vm2927_vm1, %v7057_v8, %v7059_v5  ;;  %v7012_v45 = vsel %vm3888_vm2, %v7009_v17, %v7011_v2  ;;  %vm15259_vm10 = vcmp.ne.s32.totalorder %v6975_v38, 7 }
 0x521   :  { %v6814_v58 = vrot.slane %v6731_v44, 1  ;;  %v6732_v41 = vmax.f32 %v6688_v18, %v6690_v26  ;;  %v7212_v3 = vsel %vm15181_vm4, %v7060_v54, 0.0  ;;  %v11389_v37 = vpop.f32.mrb[44].mxu1  ;;  %v7149_v50 = vsel %vm15187_vm7, %v7012_v45, 0.0 }
 0x522   :  { %7309 = vst.msk [vmem:[#allocation3 + $0x78] sm:$0xff] %vm46_vm0, %v7212_v3  ;;  %v6629_v25 = vadd.f32 %v11389_v37, %v14919_v39  ;;  %v6433_v42 = vpop.f32.mrb[45].mxu1  ;;  %7229 = vst.msk [vmem:[#allocation3 + $0x80] sm:$0xff] %vm46_vm0, %v7149_v50 }
 0x523   :  { %v6815_v20 = vsel %vm2927_vm1, %v6812_v1, %v6814_v58  ;;  %v6816_v46 = vrot.slane %v6732_v41, 1  ;;  %v6627_v56 = vadd.f32 %v14919_v39, %v6433_v42  ;;  %v11390_v9 = vpop.f32.mrb[46].mxu1 }
 0x524   :  { %v6890_v19 = vmax.f32 %v6730_v63, %v6815_v20  ;;  %v6693_v61 = vmax.f32 %v6629_v25, 0.0  ;;  %v6630_v7 = vadd.f32 %v11390_v9, %v14919_v39  ;;  %v6436_v12 = vpop.f32.mrb[47].mxu1  ;;  %v6976_v25 = vand.u32 7, %v12739_v15 }
 0x525   :  { %v6817_v8 = vsel %vm2927_vm1, %v6814_v58, %v6816_v46  ;;  %v6691_v49 = vmax.f32 %v6627_v56, 0.0  ;;  %v6628_v31 = vadd.f32 %v14919_v39, %v6436_v12  ;;  %v6951_v30 = vld [vmem:[#allocation5 + $0x80] ss:$2 sm:$0xff] }
 0x526   :  { %6922 = vst.msk [vmem:[#allocation5 + $0x98] sm:$0xff] %vm46_vm0, %v6890_v19  ;;  %v6891_v33 = vmax.f32 %v6731_v44, %v6817_v8  ;;  %v6694_v63 = vmax.f32 %v6630_v7, 0.0  ;;  %7254 = vrot.lane.b32.xlu0 %v6951_v30, %s11935_s29  ;;  %v7013_v14 = vrot.slane %v6951_v30, 7  ;;  %v7061_v53 = vrot.slane %v6951_v30, 1 }
 0x527   :  { %v6733_v52 = vmax.f32 %v6691_v49, %v6693_v61  ;;  %v6692_v10 = vmax.f32 %v6628_v31, 0.0  ;;  %vm15265_vm11 = vcmp.ne.s32.totalorder %v6976_v25, 0  ;;  %vm15285_vm12 = vcmp.ne.s32.totalorder %v6976_v25, 7 }
 0x528   :  { %6923 = vst.msk [vmem:[#allocation5 + $0xa0] sm:$0xff] %vm46_vm0, %v6891_v33  ;;  %v7062_v59 = vsel %vm2927_vm1, %v7059_v5, %v7061_v53  ;;  %v7014_v60 = vsel %vm3888_vm2, %v7011_v2, %v7013_v14 }
 0x529   :  { %v6818_v1 = vrot.slane %v6733_v52, 1  ;;  %v6734_v62 = vmax.f32 %v6692_v10, %v6694_v63  ;;  %v7213_v48 = vsel %vm15207_vm8, %v7062_v59, 0.0  ;;  %v11393_v23 = vpop.f32.mrb[48].mxu1  ;;  %v7150_v0 = vsel %vm15213_vm5, %v7014_v60, 0.0 }
 0x52a   :  { %7310 = vst.msk [vmem:[#allocation3 + $0x88] sm:$0xff] %vm46_vm0, %v7213_v48  ;;  %v6633_v43 = vadd.f32 %v11393_v23, %v14919_v39  ;;  %v6449_v24 = vpop.f32.mrb[49].mxu1  ;;  %7230 = vst.msk [vmem:[#allocation3 + $0xb0] sm:$0xff] %vm46_vm0, %v7150_v0  ;;  %v6977_v23 = vand.u32 7, %v12762_v32  ;;  %vm7286_vm8 = vcmask 1048064  }
 0x52b   :  { %v6819_v40 = vsel %vm2927_vm1, %v6816_v46, %v6818_v1  ;;  %v6820_v16 = vrot.slane %v6734_v62, 1  ;;  %v6631_v35 = vadd.f32 %v14919_v39, %v6449_v24  ;;  %v11394_v6 = vpop.f32.mrb[50].mxu1 }
 0x52c   :  { %v6892_v13 = vmax.f32 %v6732_v41, %v6819_v40  ;;  %v6697_v55 = vmax.f32 %v6633_v43, 0.0  ;;  %v6634_v4 = vadd.f32 %v11394_v6, %v14919_v39  ;;  %v6452_v29 = vpop.f32.mrb[51].mxu1  ;;  %vm15291_vm13 = vcmp.ne.s32.totalorder %v6977_v23, 0 }
 0x52d   :  { %v6821_v2 = vsel %vm2927_vm1, %v6818_v1, %v6820_v16  ;;  %v6695_v5 = vmax.f32 %v6631_v35, 0.0  ;;  %v6632_v44 = vadd.f32 %v14919_v39, %v6452_v29  ;;  %v6953_v18 = vld [vmem:[#allocation5 + $0x90] ss:$2 sm:$0xff]  ;;  %vm15311_vm14 = vcmp.ne.s32.totalorder %v6977_v23, 7 }
 0x52e   :  { %6924 = vst.msk [vmem:[#allocation5 + $0xa8] sm:$0xff] %vm46_vm0, %v6892_v13  ;;  %v6893_v45 = vmax.f32 %v6733_v52, %v6821_v2  ;;  %v6698_v58 = vmax.f32 %v6634_v4, 0.0  ;;  %7256 = vrot.lane.b32.xlu1 %v6953_v18, %s11935_s29  ;;  %v7015_v27 = vrot.slane %v6953_v18, 7  ;;  %v7063_v41 = vrot.slane %v6953_v18, 1 }
 0x52f   :  { %v6735_v3 = vmax.f32 %v6695_v5, %v6697_v55  ;;  %v6696_v37 = vmax.f32 %v6632_v44, 0.0 }
 0x530   :  { %6925 = vst.msk [vmem:[#allocation5 + $0xb0] sm:$0xff] %vm46_vm0, %v6893_v45  ;;  %v7064_v50 = vsel %vm2927_vm1, %v7061_v53, %v7063_v41  ;;  %v7016_v42 = vsel %vm3888_vm2, %v7013_v14, %v7015_v27 }
 0x531   :  { %v6822_v20 = vrot.slane %v6735_v3, 1  ;;  %v6736_v46 = vmax.f32 %v6696_v37, %v6698_v58  ;;  %v11397_v56 = vpop.f32.mrb[52].mxu1  ;;  %v7214_v9 = vsel %vm15233_vm6, %v7064_v50, 0.0  ;;  %v7151_v19 = vsel %vm15239_vm9, %v7016_v42, 0.0 }
 0x532   :  { %v6637_v61 = vadd.f32 %v11397_v56, %v14919_v39  ;;  %v6465_v7 = vpop.f32.mrb[53].mxu1  ;;  %7311 = vst.msk [vmem:[#allocation3 + $0xb8] sm:$0xff] %vm46_vm0, %v7214_v9  ;;  %7231 = vst.msk [vmem:[#allocation3 + $0xc0] sm:$0xff] %vm46_vm0, %v7151_v19 }
 0x533   :  { %v6823_v15 = vsel %vm2927_vm1, %v6820_v16, %v6822_v20  ;;  %v6824_v12 = vrot.slane %v6736_v46, 1  ;;  %v6635_v17 = vadd.f32 %v14919_v39, %v6465_v7  ;;  %v11398_v8 = vpop.f32.mrb[54].mxu1 }
 0x534   :  { %v6894_v49 = vmax.f32 %v6734_v62, %v6823_v15  ;;  %v6701_v31 = vmax.f32 %v6637_v61, 0.0  ;;  %v6638_v30 = vadd.f32 %v11398_v8, %v14919_v39  ;;  %v6468_v11 = vpop.f32.mrb[55].mxu1 }
 0x535   :  { %v6825_v63 = vsel %vm2927_vm1, %v6822_v20, %v6824_v12  ;;  %v6699_v14 = vmax.f32 %v6635_v17, 0.0  ;;  %v6636_v53 = vadd.f32 %v14919_v39, %v6468_v11  ;;  %v6955_v52 = vld [vmem:[#allocation5 + $0xa0] ss:$2 sm:$0xff] }
 0x536   :  { %6926 = vst.msk [vmem:[#allocation5 + $0xb8] sm:$0xff] %vm46_vm0, %v6894_v49  ;;  %v6895_v59 = vmax.f32 %v6735_v3, %v6825_v63  ;;  %v6702_v60 = vmax.f32 %v6638_v30, 0.0  ;;  %7258 = vrot.lane.b32.xlu0 %v6955_v52, %s11935_s29  ;;  %v7017_v38 = vrot.slane %v6955_v52, 7  ;;  %v7065_v1 = vrot.slane %v6955_v52, 1  ;;  %v11906_v17 = vld [vmem:[%s16138_s4] ss:$0 sm:$0xff] }
 0x537   :  { %v6737_v62 = vmax.f32 %v6699_v14, %v6701_v31  ;;  %v6700_v48 = vmax.f32 %v6636_v53, 0.0 }
 0x538   :  { %6927 = vst.msk [vmem:[#allocation5 + $0xc0] sm:$0xff] %vm46_vm0, %v6895_v59  ;;  %v7066_v0 = vsel %vm2927_vm1, %v7063_v41, %v7065_v1  ;;  %v7018_v43 = vsel %vm3888_vm2, %v7015_v27, %v7017_v38 }
 0x539   :  { %v6826_v24 = vrot.slane %v6737_v62, 1  ;;  %v6738_v40 = vmax.f32 %v6700_v48, %v6702_v60  ;;  %v7215_v16 = vsel %vm15259_vm10, %v7066_v0, 0.0  ;;  %v11401_v35 = vpop.f32.mrb[56].mxu1  ;;  %v7152_v6 = vsel %vm15265_vm11, %v7018_v43, 0.0 }
 0x53a   :  { %7312 = vst.msk [vmem:[#allocation3 + $0xc8] sm:$0xff] %vm46_vm0, %v7215_v16  ;;  %v6641_v13 = vadd.f32 %v11401_v35, %v14919_v39  ;;  %v6481_v32 = vpop.f32.mrb[57].mxu1  ;;  %7232 = vst.msk [vmem:[#allocation3 + $0xd0] sm:$0xff] %vm46_vm0, %v7152_v6 }
 0x53b   :  { %v6827_v55 = vsel %vm2927_vm1, %v6824_v12, %v6826_v24  ;;  %v6828_v4 = vrot.slane %v6738_v40, 1  ;;  %v6639_v29 = vadd.f32 %v14919_v39, %v6481_v32  ;;  %v11402_v26 = vpop.f32.mrb[58].mxu1 }
 0x53c   :  { %v6896_v2 = vmax.f32 %v6736_v46, %v6827_v55  ;;  %v6705_v5 = vmax.f32 %v6641_v13, 0.0  ;;  %v6642_v44 = vadd.f32 %v11402_v26, %v14919_v39  ;;  %v6484_v18 = vpop.f32.mrb[59].mxu1 }
 0x53d   :  { %v6829_v45 = vsel %vm2927_vm1, %v6826_v24, %v6828_v4  ;;  %v6703_v58 = vmax.f32 %v6639_v29, 0.0  ;;  %v6640_v27 = vadd.f32 %v14919_v39, %v6484_v18  ;;  %v6957_v41 = vld [vmem:[#allocation5 + $0xb0] ss:$2 sm:$0xff]  ;;  %v6978_v39 = vand.u32 7, %v12824_v36 }
 0x53e   :  { %6928 = vst.msk [vmem:[#allocation5 + $0xc8] sm:$0xff] %vm46_vm0, %v6896_v2  ;;  %v6897_v37 = vmax.f32 %v6737_v62, %v6829_v45  ;;  %v6706_v50 = vmax.f32 %v6642_v44, 0.0  ;;  %7260 = vrot.lane.b32.xlu1 %v6957_v41, %s11935_s29  ;;  %v7019_v25 = vrot.slane %v6957_v41, 7  ;;  %v7067_v42 = vrot.slane %v6957_v41, 1 }
 0x53f   :  { %v6739_v20 = vmax.f32 %v6703_v58, %v6705_v5  ;;  %v6704_v46 = vmax.f32 %v6640_v27, 0.0  ;;  %vm15316_vm15 = vcmp.ne.s32.totalorder %v6978_v39, 0  ;;  %vm7170_vm3 = vcmp.ne.s32.totalorder %v6978_v39, 7  ;;  %v11745_v39 = vld [vmem:[%s16139_s5 + $0x58] sm:$0xff]  }
 0x540   :  { %6929 = vst.msk [vmem:[#allocation5 + $0xd0] sm:$0xff] %vm46_vm0, %v6897_v37  ;;  %v7068_v56 = vsel %vm2927_vm1, %v7065_v1, %v7067_v42  ;;  %v7020_v9 = vsel %vm3888_vm2, %v7017_v38, %v7019_v25 }
 0x541   :  { %v6830_v19 = vrot.slane %v6739_v20, 1  ;;  %v6740_v61 = vmax.f32 %v6704_v46, %v6706_v50  ;;  %v7216_v7 = vsel %vm15285_vm12, %v7068_v56, 0.0  ;;  %v11405_v15 = vpop.f32.mrb[60].mxu1  ;;  %v7153_v12 = vsel %vm15291_vm13, %v7020_v9, 0.0 }
 0x542   :  { %7313 = vst.msk [vmem:[#allocation3 + $0xd8] sm:$0xff] %vm46_vm0, %v7216_v7  ;;  %v6645_v8 = vadd.f32 %v11906_v17, %v11405_v15  ;;  %v6497_v49 = vpop.f32.mrb[61].mxu1  ;;  %7233 = vst.msk [vmem:[#allocation3 + $0xe0] sm:$0xff] %vm46_vm0, %v7153_v12  ;;  %v6980_v50 = vand.u32 7, %v12909_v57 }
 0x543   :  { %v6831_v36 = vsel %vm2927_vm1, %v6828_v4, %v6830_v19  ;;  %v6832_v31 = vrot.slane %v6740_v61, 1  ;;  %v6643_v30 = vadd.f32 %v11906_v17, %v6497_v49  ;;  %v11406_v11 = vpop.f32.mrb[62].mxu1 }
 0x544   :  { %v6898_v33 = vmax.f32 %v6738_v40, %v6831_v36  ;;  %v6709_v63 = vmax.f32 %v6645_v8, 0.0  ;;  %v6646_v14 = vadd.f32 %v11906_v17, %v11406_v11  ;;  %v6500_v53 = vpop.f32.mrb[63].mxu1  ;;  %v6979_v40 = vand.u32 7, %v12847_v51 }
 0x545   :  { %v6833_v10 = vsel %vm2927_vm1, %v6830_v19, %v6832_v31  ;;  %v6707_v59 = vmax.f32 %v6643_v30, 0.0  ;;  %v6644_v60 = vadd.f32 %v11906_v17, %v6500_v53  ;;  %v6959_v38 = vld [vmem:[#allocation5 + $0xc0] ss:$2 sm:$0xff]  ;;  %vm15356_vm5 = vcmp.ne.s32.totalorder %v6980_v50, 0 }
 0x546   :  { %6930 = vst.msk [vmem:[#allocation5 + $0xd8] sm:$0xff] %vm46_vm0, %v6898_v33  ;;  %v6899_v62 = vmax.f32 %v6739_v20, %v6833_v10  ;;  %v6710_v48 = vmax.f32 %v6646_v14, 0.0  ;;  %7262 = vrot.lane.b32.xlu0 %v6959_v38, %s11935_s29  ;;  %v7021_v0 = vrot.slane %v6959_v38, 7  ;;  %v7069_v23 = vrot.slane %v6959_v38, 1  ;;  %v7328_v53 = vld [vmem:[#allocation3 + $0x48] sm:$0xff]  ;;  %v11744_v20 = vld [vmem:[%s16139_s5 + $0x50] sm:$0xff]  }
 0x547   :  { %v6741_v43 = vmax.f32 %v6707_v59, %v6709_v63  ;;  %v6708_v24 = vmax.f32 %v6644_v60, 0.0  ;;  %vm15335_vm4 = vcmp.ne.s32.totalorder %v6979_v40, 0  ;;  %vm15351_vm7 = vcmp.ne.s32.totalorder %v6979_v40, 7  ;;  %v11734_v60 = vld [vmem:[%s16139_s5] sm:$0xff]   ;;  %v11737_v40 = vld [vmem:[%s16139_s5 + $0x18] sm:$0xff]  }
 0x548   :  { %6931 = vst.msk [vmem:[#allocation5 + $0xe0] sm:$0xff] %vm46_vm0, %v6899_v62  ;;  %v7070_v16 = vsel %vm2927_vm1, %v7067_v42, %v7069_v23  ;;  %v7022_v35 = vsel %vm3888_vm2, %v7019_v25, %v7021_v0  ;;  %v6981_v25 = vand.u32 7, %v12932_v21  ;;  %vm15360_vm6 = vcmp.ne.s32.totalorder %v6980_v50, 7  ;;  %v11735_v62 = vld [vmem:[%s16139_s5 + $0x8] sm:$0xff]   ;;  %v7837_v50 = vld [vmem:[#allocation3 + $0x98] sm:$0xff] }
 0x549   :  { %v6834_v6 = vrot.slane %v6741_v43, 1  ;;  %v6742_v13 = vmax.f32 %v6708_v24, %v6710_v48  ;;  %v7217_v32 = vsel %vm15311_vm14, %v7070_v16, 0.0  ;;  %v7154_v55 = vsel %vm15316_vm15, %v7022_v35, 0.0  ;;  %v7829_v48 = vld [vmem:[#allocation3 + $0x58] sm:$0xff]  ;;  %v7332_v16 = vld [vmem:[#allocation3 + $0x68] sm:$0xff] }
 0x54a   :  { %7314 = vst.msk [vmem:[#allocation3 + $0xe8] sm:$0xff] %vm46_vm0, %v7217_v32  ;;  %7234 = vst.msk [vmem:[#allocation3 + $0xf0] sm:$0xff] %vm46_vm0, %v7154_v55  ;;  %vm15364_vm9 = vcmp.ne.s32.totalorder %v6981_v25, 7  ;;  %vm15368_vm10 = vcmp.ne.s32.totalorder %v6981_v25, 0  ;;  %v7398_v1 = vpack.c.bf16 %v7328_v53, %v15113_v22  ;;  %v15415_v22 = vpack.c.bf16 %v7829_v48, %v7328_v53  ;;  %v7841_v57 = vld [vmem:[#allocation3 + $0xd8] sm:$0xff] }
 0x54b   :  { %v6835_v51 = vsel %vm2927_vm1, %v6832_v31, %v6834_v6  ;;  %v6836_v4 = vrot.slane %v6742_v13, 1  ;;  %v7400_v55 = vpack.c.bf16 %v7332_v16, %v7829_v48 }
 0x54c   :  { %v6900_v29 = vmax.f32 %v6740_v61, %v6835_v51  ;;  %v11739_v51 = vld [vmem:[%s16139_s5 + $0x28] sm:$0xff]  }
 0x54d   :  { %v6837_v26 = vsel %vm2927_vm1, %v6834_v6, %v6836_v4  ;;  %v6870_v2 = vsel %vm2927_vm1, %v6836_v4, 0.0  ;;  %v6961_v5 = vld [vmem:[#allocation5 + $0xd0] ss:$2 sm:$0xff] }
 0x54e   :  { %6932 = vst.msk [vmem:[#allocation5 + $0xe8] sm:$0xff] %vm46_vm0, %v6900_v29  ;;  %v6901_v18 = vmax.f32 %v6741_v43, %v6837_v26  ;;  %v6902_v54 = vmax.f32 %v6742_v13, %v6870_v2  ;;  %7264 = vrot.lane.b32.xlu1 %v6961_v5, %s11935_s29  ;;  %v7023_v45 = vrot.slane %v6961_v5, 7  ;;  %v7071_v58 = vrot.slane %v6961_v5, 1  ;;  %v11736_v43 = vld [vmem:[%s16139_s5 + $0x10] sm:$0xff]   ;;  %v11738_v13 = vld [vmem:[%s16139_s5 + $0x20] sm:$0xff]   ;;  %v7833_v4 = vld [vmem:[#allocation3 + $0x78] sm:$0xff] }
 0x54f   :  { %v11740_v2 = vld [vmem:[%s16139_s5 + $0x30] sm:$0xff]   ;;  %v15441_v44 = vpack.c.bf16 %v7833_v4, %v7332_v16 }
 0x550   :  { %6933 = vst.msk [vmem:[#allocation5 + $0xf0] sm:$0xff] %vm46_vm0, %v6901_v18  ;;  %6934 = vst.msk [vmem:[#allocation5 + $0xf8] sm:$0xff] %vm46_vm0, %v6902_v54  ;;  %v7072_v27 = vsel %vm2927_vm1, %v7069_v23, %v7071_v58  ;;  %v7024_v41 = vsel %vm3888_vm2, %v7021_v0, %v7023_v45  ;;  %v11741_v18 = vld [vmem:[%s16139_s5 + $0x38] sm:$0xff]   ;;  %v7392_v54 = vld [vmem:[#allocation3 + $0x88] sm:$0xff] }
 0x551   :  { %v7218_v3 = vsel %vm7170_vm3, %v7072_v27, 0.0  ;;  %v7155_v37 = vsel %vm15335_vm4, %v7024_v41, 0.0  ;;  %v11742_v27 = vld [vmem:[%s16139_s5 + $0x40] sm:$0xff]  }
 0x552   :  { %7315 = vst.msk [vmem:[#allocation3 + $0xf8] sm:$0xff] %vm46_vm0, %v7218_v3  ;;  %7235 = vst.msk [vmem:[#allocation3 + $0x100] sm:$0xff] %vm46_vm0, %v7155_v37  ;;  %v7402_v3 = vpack.c.bf16 %v7392_v54, %v7833_v4  ;;  %v11743_v37 = vld [vmem:[%s16139_s5 + $0x48] sm:$0xff]   ;;  %v7853_v4 = vld [vmem:[#allocation3 + $0x138] sm:$0xff] }
 0x555   :  { %v6963_v42 = vld [vmem:[#allocation5 + $0xe0] ss:$2 sm:$0xff] }
 0x556   :  { %7266 = vrot.lane.b32.xlu0 %v6963_v42, %s11935_s29  ;;  %v7025_v46 = vrot.slane %v6963_v42, 7  ;;  %v7073_v56 = vrot.slane %v6963_v42, 1 }
 0x557   :  { %v6965_v9 = vld [vmem:[#allocation5 + $0xf0] ss:$2 sm:$0xff] }
 0x558   :  { %v7074_v61 = vsel %vm2927_vm1, %v7071_v58, %v7073_v56  ;;  %v7239_v7 = vpop.permute.xlu0 %7238  ;;  %7268 = vrot.lane.b32.xlu1 %v6965_v9, %s11935_s29  ;;  %v7027_v15 = vrot.slane %v6965_v9, 7  ;;  %v7075_v12 = vrot.slane %v6965_v9, 1  ;;  %v7026_v17 = vsel %vm3888_vm2, %v7023_v45, %v7025_v46  ;;  %v7340_v9 = vld [vmem:[#allocation3 + $0xc8] sm:$0xff] }
 0x559   :  { %v7219_v8 = vsel %vm15351_vm7, %v7074_v61, 0.0  ;;  %7287 = vst.msk [vmem:[#allocation3 + $0x10] sm:$0xff] %vm7286_vm8, %v7239_v7  ;;  %v7156_v49 = vsel %vm15356_vm5, %v7026_v17, 0.0  ;;  %v15474_v7 = vld [vmem:[#allocation3] sm:$0xff] }
 0x55a   :  { %7316 = vst.msk [vmem:[#allocation3 + $0x108] sm:$0xff] %vm46_vm0, %v7219_v8  ;;  %v7076_v36 = vsel %vm2927_vm1, %v7073_v56, %v7075_v12  ;;  %v7093_v31 = vsel %vm2927_vm1, %v7075_v12, 0.0  ;;  %7236 = vst.msk [vmem:[#allocation3 + $0x110] sm:$0xff] %vm46_vm0, %v7156_v49  ;;  %v7028_v30 = vsel %vm3888_vm2, %v7025_v46, %v7027_v15  ;;  %v7861_v56 = vpack.c.bf16 %v7837_v50, %v7392_v54  ;;  %v15477_v12 = vld [vmem:[#allocation3 + $0xb8] sm:$0xff]  ;;  %v7344_v49 = vld [vmem:[#allocation3 + $0xe8] sm:$0xff] }
 0x55b   :  { %v7220_v11 = vsel %vm15360_vm6, %v7076_v36, 0.0  ;;  %v7221_v33 = vsel %vm15364_vm9, %v7093_v31, 0.0  ;;  %v7157_v63 = vsel %vm15368_vm10, %v7028_v30, 0.0  ;;  %v7404_v17 = vpack.c.bf16 %v7340_v9, %v15477_v12 }
 0x55c   :  { %7317 = vst.msk [vmem:[#allocation3 + $0x118] sm:$0xff] %vm46_vm0, %v7220_v11  ;;  %7318 = vst.msk [vmem:[#allocation3 + $0x128] sm:$0xff] %vm46_vm0, %v7221_v33  ;;  %v15480_v8 = vpack.c.bf16 %v7841_v57, %v7340_v9  ;;  %v7406_v33 = vpack.c.bf16 %v7344_v49, %v7841_v57  ;;  %vm9829_vm2 = vcmask 74752  }
 0x55d   :  { %7237 = vst.msk [vmem:[#allocation3 + $0x120] sm:$0xff] %vm46_vm0, %v7157_v63  ;;  %v7845_v63 = vld [vmem:[#allocation3 + $0xf8] sm:$0xff] }
 0x560   :  { %v7241_v14 = vpop.permute.xlu1 %7240  ;;  %v15395_v59 = vld [vmem:[#allocation3 + $0x10] sm:$0xff] }
 0x561   :  { %7288 = vst.msk [vmem:[#allocation3 + $0x20] sm:$0xff] %vm7286_vm8, %v7241_v14 }
 0x568   :  { %v7822_v52 = vld [vmem:[#allocation3 + $0x20] sm:$0xff]  ;;  %v7243_v10 = vpop.permute.xlu0 %7242 }
 0x569   :  { %7289 = vst.msk [vmem:[#allocation3 + $0x30] sm:$0xff] %vm7286_vm8, %v7243_v10  ;;  %v7395_v38 = vpack.c.bf16 %v7822_v52, %v15395_v59  ;;  %v7865_v10 = vpack.c.bf16 %v7845_v63, %v7344_v49 }
 0x56b   :  { %7565 = vmatmul.mubr.bf16.vlgmr.msra.gmra.mrb[64].mxu1 %v7395_v38 }
 0x56c   :  { %10280 = vmatprep.mubr.msk.bf16.mxu1 %vm46_vm0, %v7398_v1  ;;  %7726 = vmatpush1.bf16.msra.mxu1 %v11734_v60  ;;  %v7348_v60 = vld [vmem:[#allocation3 + $0x108] sm:$0xff] }
 0x56d   :  { %7727 = vmatprep.subr.bf16.mxu1 %v11936_v34  ;;  %v7408_v48 = vpack.c.bf16 %v7348_v60, %v7845_v63  ;;  %v11750_v63 = vld [vmem:[%s16141_s7 + $0x50] sm:$0xff]  }
 0x570   :  { %v7824_v0 = vld [vmem:[#allocation3 + $0x30] sm:$0xff]  ;;  %v7245_v23 = vpop.permute.xlu1 %7244  ;;  %7728 = vmatpush1.bf16.msra.mxu1 %v11735_v62 }
 0x571   :  { %v15411_v24 = vpack.c.bf16 %v7824_v0, %v7822_v52  ;;  %7290 = vst.msk [vmem:[#allocation3 + $0x40] sm:$0xff] %vm7286_vm8, %v7245_v23  ;;  %7729 = vmatprep.subr.bf16.mxu1 %v11936_v34 }
 0x573   :  { %8024 = vmatmul.mubr.bf16.vlgmr.msra.gmra.mrb[0].mxu0 %v15411_v24 }
 0x574   :  { %10344 = vmatprep.mubr.msk.bf16.mxu0 %vm46_vm0, %v15415_v22  ;;  %7730 = vmatpush1.bf16.msra.mxu1 %v11736_v43 }
 0x575   :  { %7731 = vmatprep.subr.bf16.mxu1 %v11936_v34 }
 0x578   :  { %v7247_v35 = vpop.permute.xlu0 %7246  ;;  %v7327_v6 = vld [vmem:[#allocation3 + $0x40] sm:$0xff]  ;;  %7732 = vmatpush1.bf16.msra.mxu1 %v11737_v40 }
 0x579   :  { %7291 = vst.msk [vmem:[#allocation3 + $0x50] sm:$0xff] %vm7286_vm8, %v7247_v35  ;;  %v7397_v32 = vpack.c.bf16 %v7327_v6, %v7824_v0  ;;  %7733 = vmatprep.subr.bf16.mxu1 %v11936_v34  ;;  %v7849_v0 = vld [vmem:[#allocation3 + $0x118] sm:$0xff]  ;;  %v7394_v35 = vld [vmem:[#allocation3 + $0x128] sm:$0xff] }
 0x57a   :  { %v7867_v16 = vpack.c.bf16 %v7849_v0, %v7348_v60 }
 0x57b   :  { %7573 = vmatmul.mubr.bf16.gmra.mrb[68].mxu1 %v7397_v32 }
 0x57c   :  { %10281 = vmatprep.mubr.msk.bf16.mxu1 %vm46_vm0, %v7400_v55  ;;  %7734 = vmatpush1.bf16.msra.mxu1 %v11738_v13 }
 0x57d   :  { %7735 = vmatprep.subr.bf16.mxu1 %v11936_v34 }
 0x580   :  { %v7249_v29 = vpop.permute.xlu1 %7248  ;;  %v7828_v26 = vld [vmem:[#allocation3 + $0x50] sm:$0xff]  ;;  %7736 = vmatpush1.bf16.msra.mxu1 %v11739_v51  ;;  %v7410_v51 = vpack.c.bf16 %v7394_v35, %v7849_v0  ;;  %v11755_v0 = vld [vmem:[%s16141_s7 + $0x140] sm:$0xff]  }
 0x581   :  { %7292 = vst.msk [vmem:[#allocation3 + $0x60] sm:$0xff] %vm7286_vm8, %v7249_v29  ;;  %v15438_v5 = vpack.c.bf16 %v7828_v26, %v7327_v6  ;;  %7737 = vmatprep.subr.bf16.mxu1 %v11936_v34  ;;  %10778 = vmatprep.subr.bf16.mxu0 %v11755_v0 }
 0x583   :  { %8032 = vmatmul.mubr.bf16.gmra.mrb[4].mxu0 %v15438_v5 }
 0x584   :  { %10345 = vmatprep.mubr.msk.bf16.mxu0 %vm46_vm0, %v15441_v44  ;;  %7738 = vmatpush1.bf16.msra.mxu1 %v11740_v2  ;;  %v7320_v2 = vld [vmem:[#allocation3 + $0x8] sm:$0xff] }
 0x585   :  { %7739 = vmatprep.subr.bf16.mxu1 %v11936_v34 }
 0x588   :  { %v7251_v45 = vpop.permute.xlu0 %7250  ;;  %v7331_v58 = vld [vmem:[#allocation3 + $0x60] sm:$0xff]  ;;  %7740 = vmatpush1.bf16.msra.mxu1 %v11741_v18  ;;  %v7869_v18 = vpack.c.bf16 %v7853_v4, %v7394_v35  ;;  %v11753_v35 = vld [vmem:[%s16141_s7 + $0x18] sm:$0xff]  }
 0x589   :  { %7293 = vst.msk [vmem:[#allocation3 + $0x70] sm:$0xff] %vm7286_vm8, %v7251_v45  ;;  %v7399_v41 = vpack.c.bf16 %v7331_v58, %v7828_v26  ;;  %7741 = vmatprep.subr.bf16.mxu1 %v11936_v34 }
 0x58b   :  { %7581 = vmatmul.mubr.bf16.gmra.mrb[72].mxu1 %v7399_v41 }
 0x58c   :  { %10282 = vmatprep.mubr.msk.bf16.mxu1 %vm46_vm0, %v7402_v3  ;;  %7742 = vmatpush1.bf16.msra.mxu1 %v11742_v27  ;;  %v7351_v3 = vpack.c.bf16 %v15395_v59, %v15474_v7 }
 0x58d   :  { %7743 = vmatprep.subr.bf16.mxu1 %v11936_v34 }
 0x590   :  { %v7253_v25 = vpop.permute.xlu1 %7252  ;;  %v7832_v42 = vld [vmem:[#allocation3 + $0x70] sm:$0xff]  ;;  %7744 = vmatpush1.bf16.msra.mxu1 %v11743_v37  ;;  %v7336_v37 = vld [vmem:[#allocation3 + $0xa8] sm:$0xff] }
 0x591   :  { %7294 = vst.msk [vmem:[#allocation3 + $0x80] sm:$0xff] %vm7286_vm8, %v7253_v25  ;;  %v15464_v46 = vpack.c.bf16 %v7832_v42, %v7331_v58  ;;  %7745 = vmatprep.subr.bf16.mxu1 %v11936_v34  ;;  %v11908_v58 = vld [vmem:[#allocation3 + $0x18] sm:$0xff]  ;;  %v7360_v50 = vpack.c.bf16 %v15477_v12, %v7336_v37  ;;  %v11766_v37 = vld [vmem:[%s16141_s7 + $0x70] sm:$0xff]  }
 0x592   :  { %v7352_v27 = vpack.c.bf16 %v11908_v58, %v7320_v2  ;;  %v11754_v2 = vld [vmem:[%s16141_s7 + $0x60] sm:$0xff]  }
 0x593   :  { %8040 = vmatmul.mubr.bf16.gmra.mrb[8].mxu0 %v15464_v46  ;;  %v11769_v58 = vld [vmem:[%s16141_s7 + $0x120] sm:$0xff]  }
 0x594   :  { %10346 = vmatprep.mubr.msk.bf16.mxu0 %vm46_vm0, %v7861_v56  ;;  %7746 = vmatpush1.bf16.msra.mxu1 %v11744_v20 }
 0x595   :  { %7747 = vmatprep.subr.bf16.mxu1 %v11936_v34 }
 0x598   :  { %v7255_v21 = vpop.permute.xlu0 %7254  ;;  %v7391_v19 = vld [vmem:[#allocation3 + $0x80] sm:$0xff]  ;;  %7748 = vmatpush1.bf16.msra.mxu1 %v11745_v39 }
 0x599   :  { %7295 = vst.msk [vmem:[#allocation3 + $0xb0] sm:$0xff] %vm7286_vm8, %v7255_v21  ;;  %v7401_v61 = vpack.c.bf16 %v7391_v19, %v7832_v42  ;;  %v7860_v15 = vpack.c.bf16 %v15474_v7, %v7391_v19 }
 0x59b   :  { %7589 = vmatmul.mubr.bf16.gmra.mrb[76].mxu1 %v7401_v61  ;;  %8048 = vmatmul.mubr.bf16.gmra.mrb[12].mxu0 %v7860_v15  ;;  %v11747_v15 = vld [vmem:[%s16141_s7] sm:$0xff]  }
 0x59c   :  { %10283 = vmatprep.mubr.msk.bf16.mxu1 %vm46_vm0, %v7404_v17  ;;  %10347 = vmatprep.mubr.msk.bf16.mxu0 %vm46_vm0, %v15480_v8 }
 0x5a0   :  { %v7257_v34 = vpop.permute.xlu1 %7256  ;;  %v15486_v31 = vld [vmem:[#allocation3 + $0xb0] sm:$0xff] }
 0x5a1   :  { %7296 = vst.msk [vmem:[#allocation3 + $0xc0] sm:$0xff] %vm7286_vm8, %v7257_v34 }
 0x5a8   :  { %v7259_v36 = vpop.permute.xlu0 %7258  ;;  %v7339_v30 = vld [vmem:[#allocation3 + $0xc0] sm:$0xff] }
 0x5a9   :  { %7297 = vst.msk [vmem:[#allocation3 + $0xd0] sm:$0xff] %vm7286_vm8, %v7259_v36  ;;  %v7403_v11 = vpack.c.bf16 %v7339_v30, %v15486_v31 }
 0x5ab   :  { %7597 = vmatmul.mubr.bf16.gmra.mrb[80].mxu1 %v7403_v11  ;;  %v11748_v11 = vld [vmem:[%s16141_s7 + $0x48] sm:$0xff]  }
 0x5ac   :  { %10284 = vmatprep.mubr.msk.bf16.mxu1 %vm46_vm0, %v7406_v33  ;;  %v11749_v33 = vld [vmem:[%s16141_s7 + $0x8] sm:$0xff]  }
 0x5b0   :  { %v7261_v14 = vpop.permute.xlu1 %7260  ;;  %v7840_v53 = vld [vmem:[#allocation3 + $0xd0] sm:$0xff] }
 0x5b1   :  { %7298 = vst.msk [vmem:[#allocation3 + $0xe0] sm:$0xff] %vm7286_vm8, %v7261_v14  ;;  %v7862_v52 = vpack.c.bf16 %v7840_v53, %v7339_v30  ;;  %v11751_v14 = vld [vmem:[%s16141_s7 + $0x10] sm:$0xff]  }
 0x5b3   :  { %8056 = vmatmul.mubr.bf16.gmra.mrb[16].mxu0 %v7862_v52 }
 0x5b4   :  { %10348 = vmatprep.mubr.msk.bf16.mxu0 %vm46_vm0, %v7865_v10 }
 0x5b8   :  { %v7263_v38 = vpop.permute.xlu0 %7262  ;;  %v7343_v1 = vld [vmem:[#allocation3 + $0xe0] sm:$0xff] }
 0x5b9   :  { %7299 = vst.msk [vmem:[#allocation3 + $0xf0] sm:$0xff] %vm7286_vm8, %v7263_v38  ;;  %v7405_v62 = vpack.c.bf16 %v7343_v1, %v7840_v53 }
 0x5bb   :  { %7605 = vmatmul.mubr.bf16.gmra.mrb[84].mxu1 %v7405_v62 }
 0x5bc   :  { %10285 = vmatprep.mubr.msk.bf16.mxu1 %vm46_vm0, %v7408_v48 }
 0x5c0   :  { %v7265_v23 = vpop.permute.xlu1 %7264  ;;  %v7844_v43 = vld [vmem:[#allocation3 + $0xf0] sm:$0xff] }
 0x5c1   :  { %7300 = vst.msk [vmem:[#allocation3 + $0x100] sm:$0xff] %vm7286_vm8, %v7265_v23  ;;  %v7864_v40 = vpack.c.bf16 %v7844_v43, %v7343_v1  ;;  %v11757_v23 = vld [vmem:[%s16141_s7 + $0x100] sm:$0xff]  }
 0x5c2   :  { %10779 = vmatpush3.bf16.msra.mxu0 %v11757_v23 }
 0x5c3   :  { %8064 = vmatmul.mubr.bf16.gmra.mrb[20].mxu0 %v7864_v40 }
 0x5c4   :  { %10349 = vmatprep.mubr.msk.bf16.mxu0 %vm46_vm0, %v7867_v16 }
 0x5c8   :  { %v7267_v6 = vpop.permute.xlu0 %7266  ;;  %v7347_v13 = vld [vmem:[#allocation3 + $0x100] sm:$0xff] }
 0x5c9   :  { %7301 = vst.msk [vmem:[#allocation3 + $0x110] sm:$0xff] %vm7286_vm8, %v7267_v6  ;;  %v7407_v32 = vpack.c.bf16 %v7347_v13, %v7844_v43  ;;  %v11758_v43 = vld [vmem:[%s16141_s7 + $0x148] sm:$0xff]   ;;  %v11761_v6 = vld [vmem:[%s16141_s7 + $0x150] sm:$0xff]  }
 0x5ca   :  { %v7269_v55 = vpop.permute.xlu1 %7268  ;;  %10780 = vmatprep.subr.bf16.mxu0 %v11758_v43 }
 0x5cb   :  { %7302 = vst.msk [vmem:[#allocation3 + $0x120] sm:$0xff] %vm7286_vm8, %v7269_v55  ;;  %7613 = vmatmul.mubr.bf16.gmra.mrb[88].mxu1 %v7407_v32 }
 0x5cc   :  { %10286 = vmatprep.mubr.msk.bf16.mxu1 %vm46_vm0, %v7410_v51  ;;  %v11764_v51 = vld [vmem:[%s16141_s7 + $0x158] sm:$0xff]  }
 0x5d0   :  { %v7848_v29 = vld [vmem:[#allocation3 + $0x110] sm:$0xff] }
 0x5d1   :  { %v7866_v26 = vpack.c.bf16 %v7848_v29, %v7347_v13  ;;  %v11763_v13 = vld [vmem:[%s16141_s7 + $0x110] sm:$0xff]  }
 0x5d2   :  { %v7393_v54 = vld [vmem:[#allocation3 + $0x120] sm:$0xff] }
 0x5d3   :  { %8072 = vmatmul.mubr.bf16.gmra.mrb[24].mxu0 %v7866_v26  ;;  %v7409_v45 = vpack.c.bf16 %v7393_v54, %v7848_v29  ;;  %v7868_v41 = vpack.c.bf16 %v15474_v7, %v7393_v54  ;;  %v11765_v29 = vld [vmem:[%s16141_s7 + $0x118] sm:$0xff]   ;;  %v11760_v54 = vld [vmem:[%s16141_s7 + $0x68] sm:$0xff]  }
 0x5d4   :  { %10350 = vmatprep.mubr.msk.bf16.mxu0 %vm46_vm0, %v7869_v18  ;;  %v11756_v18 = vld [vmem:[%s16141_s7 + $0x20] sm:$0xff]  }
 0x5d5   :  { %7621 = vmatmul.mubr.bf16.gmra.mrb[92].mxu1 %v7409_v45  ;;  %v11767_v45 = vld [vmem:[%s16141_s7 + $0x160] sm:$0xff]  }
 0x5d6   :  { %10299 = vmatprep.mubr.msk.bf16.mxu1 %vm46_vm0, %v7352_v27  ;;  %v11770_v27 = vld [vmem:[%s16141_s7 + $0x168] sm:$0xff]  }
 0x5db   :  { %8080 = vmatmul.mubr.bf16.gmra.mrb[28].mxu0 %v7868_v41  ;;  %v11762_v41 = vld [vmem:[%s16141_s7 + $0x28] sm:$0xff]  }
 0x5dd   :  { %7758 = vmatmul.mubr.bf16.vlgmr.msra.gmra.mrb[96].mxu1 %v7351_v3 }
 0x5de   :  { %10300 = vmatprep.mubr.msk.bf16.mxu1 %vm46_vm0, %v15120_v28  ;;  %v7359_v28 = vpack.c.bf16 %v15486_v31, %v15474_v7  ;;  %v11746_v7 = vld [vmem:[%s16141_s7 + $0x40] sm:$0xff]  }
 0x5df   :  { %10734 = vmatprep.subr.bf16.mxu1 %v11746_v7 }
 0x5e0   :  { %10735 = vmatpush3.bf16.msra.mxu1 %v11747_v15  ;;  %v11777_v15 = vld [vmem:[%s16141_s7 + $0x138] sm:$0xff]  }
 0x5e1   :  { %10736 = vmatprep.subr.bf16.mxu1 %v11748_v11  ;;  %v11779_v11 = vld [vmem:[%s16141_s7 + $0x240] sm:$0xff]  }
 0x5e4   :  { %10737 = vmatpush3.bf16.msra.mxu1 %v11749_v33 }
 0x5e5   :  { %7766 = vmatmul.mubr.bf16.gmra.mrb[100].mxu1 %v15411_v24  ;;  %10738 = vmatprep.subr.bf16.mxu1 %v11750_v63 }
 0x5e6   :  { %10301 = vmatprep.mubr.msk.bf16.mxu1 %vm46_vm0, %v15415_v22 }
 0x5e8   :  { %10739 = vmatpush3.bf16.msra.mxu1 %v11751_v14 }
 0x5ed   :  { %7774 = vmatmul.mubr.bf16.gmra.mrb[104].mxu1 %v15438_v5 }
 0x5ee   :  { %10302 = vmatprep.mubr.msk.bf16.mxu1 %vm46_vm0, %v15441_v44 }
 0x5f5   :  { %7782 = vmatmul.mubr.bf16.gmra.mrb[108].mxu1 %v15464_v46 }
 0x5f6   :  { %10303 = vmatprep.mubr.msk.bf16.mxu1 %vm46_vm0, %v7360_v50  ;;  %v11771_v50 = vld [vmem:[%s16141_s7 + $0x128] sm:$0xff]  }
 0x5fd   :  { %7790 = vmatmul.mubr.bf16.gmra.mrb[112].mxu1 %v7359_v28 }
 0x5fe   :  { %10304 = vmatprep.mubr.msk.bf16.mxu1 %vm46_vm0, %v15480_v8 }
 0x605   :  { %7798 = vmatmul.mubr.bf16.gmra.mrb[116].mxu1 %v7862_v52 }
 0x606   :  { %10305 = vmatprep.mubr.msk.bf16.mxu1 %vm46_vm0, %v7865_v10 }
 0x60d   :  { %7806 = vmatmul.mubr.bf16.gmra.mrb[120].mxu1 %v7864_v40  ;;  %v11759_v40 = vld [vmem:[%s16141_s7 + $0x108] sm:$0xff]  }
 0x60e   :  { %10306 = vmatprep.mubr.msk.bf16.mxu1 %vm46_vm0, %v7867_v16  ;;  %v11752_v16 = vld [vmem:[%s16141_s7 + $0x58] sm:$0xff]   ;;  %10781 = vmatpush3.bf16.msra.mxu0 %v11759_v40 }
 0x60f   :  { %10740 = vmatprep.subr.bf16.mxu1 %v11752_v16  ;;  %10782 = vmatprep.subr.bf16.mxu0 %v11761_v6 }
 0x610   :  { %10741 = vmatpush3.bf16.msra.mxu1 %v11753_v35 }
 0x611   :  { %10742 = vmatprep.subr.bf16.mxu1 %v11754_v2 }
 0x612   :  { %10783 = vmatpush3.bf16.msra.mxu0 %v11763_v13 }
 0x613   :  { %10784 = vmatprep.subr.bf16.mxu0 %v11764_v51 }
 0x614   :  { %10743 = vmatpush3.bf16.msra.mxu1 %v11756_v18 }
 0x615   :  { %7814 = vmatmul.mubr.bf16.gmra.mrb[124].mxu1 %v7866_v26  ;;  %10744 = vmatprep.subr.bf16.mxu1 %v11760_v54 }
 0x616   :  { %10785 = vmatpush3.bf16.msra.mxu0 %v11765_v29 }
 0x617   :  { %10786 = vmatprep.subr.bf16.mxu0 %v11767_v45 }
 0x618   :  { %10745 = vmatpush3.bf16.msra.mxu1 %v11762_v41 }
 0x619   :  { %10746 = vmatprep.subr.bf16.mxu1 %v11766_v37 }
 0x61a   :  { %10787 = vmatpush3.bf16.msra.mxu0 %v11769_v58  ;;  %v15692_v58 = vld [vmem:[%s16140_s6] ss:$0 sm:$0xff] }
 0x61b   :  { %10788 = vmatprep.subr.bf16.mxu0 %v11770_v27 }
 0x61e   :  { %10789 = vmatpush3.bf16.msra.mxu0 %v11771_v50 }
 0x63e   :  { %v15522_v59 = vpop.f32.mrb[64].mxu1 }
 0x63f   :  { %v7568_v24 = vpop.f32.mrb[65].mxu1 }
 0x640   :  { %v15524_v22 = vpop.f32.mrb[66].mxu1  ;;  %v11773_v24 = vld [vmem:[%s16141_s7 + $0x170] sm:$0xff]  }
 0x641   :  { %v7571_v5 = vpop.f32.mrb[67].mxu1  ;;  %10790 = vmatprep.subr.bf16.mxu0 %v11773_v24 }
 0x646   :  { %v15526_v44 = vpop.f32.mrb[0].mxu0 }
 0x647   :  { %v8027_v25 = vpop.f32.mrb[1].mxu0 }
 0x648   :  { %v15528_v42 = vpop.f32.mrb[2].mxu0 }
 0x649   :  { %v8030_v20 = vpop.f32.mrb[3].mxu0 }
 0x64a   :  { %v11768_v20 = vld [vmem:[%s16141_s7 + $0x30] sm:$0xff]  }
 0x64b   :  { %10747 = vmatpush3.bf16.msra.mxu1 %v11768_v20 }
 0x64e   :  { %v15530_v46 = vpop.f32.mrb[68].mxu1 }
 0x64f   :  { %v7576_v56 = vpop.f32.mrb[69].mxu1 }
 0x650   :  { %v15532_v39 = vpop.f32.mrb[70].mxu1  ;;  %v11772_v56 = vld [vmem:[%s16141_s7 + $0x78] sm:$0xff]  }
 0x651   :  { %v7579_v9 = vpop.f32.mrb[71].mxu1  ;;  %10748 = vmatprep.subr.bf16.mxu1 %v11772_v56 }
 0x652   :  { %v11775_v9 = vld [vmem:[%s16141_s7 + $0x130] sm:$0xff]  }
 0x653   :  { %10791 = vmatpush3.bf16.msra.mxu0 %v11775_v9 }
 0x656   :  { %v15534_v57 = vpop.f32.mrb[4].mxu0 }
 0x657   :  { %v8035_v21 = vpop.f32.mrb[5].mxu0 }
 0x658   :  { %v15536_v19 = vpop.f32.mrb[6].mxu0  ;;  %v11776_v21 = vld [vmem:[%s16141_s7 + $0x178] sm:$0xff]  }
 0x659   :  { %v8038_v61 = vpop.f32.mrb[7].mxu0  ;;  %10792 = vmatprep.subr.bf16.mxu0 %v11776_v21 }
 0x65a   :  { %v11774_v61 = vld [vmem:[%s16141_s7 + $0x38] sm:$0xff]   ;;  %10793 = vmatpush3.bf16.msra.mxu0 %v11777_v15 }
 0x65b   :  { %10749 = vmatpush3.bf16.msra.mxu1 %v11774_v61  ;;  %10822 = vmatprep.subr.bf16.mxu0 %v11779_v11 }
 0x65e   :  { %v15544_v12 = vpop.f32.mrb[72].mxu1 }
 0x65f   :  { %v7584_v17 = vpop.f32.mrb[73].mxu1 }
 0x660   :  { %v15546_v8 = vpop.f32.mrb[74].mxu1 }
 0x661   :  { %v7587_v34 = vpop.f32.mrb[75].mxu1 }
 0x666   :  { %v15548_v49 = vpop.f32.mrb[8].mxu0 }
 0x667   :  { %v8043_v36 = vpop.f32.mrb[9].mxu0 }
 0x668   :  { %v15550_v31 = vpop.f32.mrb[10].mxu0 }
 0x669   :  { %v8046_v30 = vpop.f32.mrb[11].mxu0 }
 0x66a   :  { %v11778_v30 = vld [vmem:[%s16141_s7 + $0xc0] sm:$0xff]  }
 0x66b   :  { %10756 = vmatprep.subr.bf16.mxu1 %v11778_v30 }
 0x66e   :  { %v15564_v53 = vpop.f32.mrb[76].mxu1  ;;  %v15566_v52 = vpop.f32.mrb[12].mxu0 }
 0x66f   :  { %v7592_v10 = vpop.f32.mrb[77].mxu1  ;;  %v8051_v60 = vpop.f32.mrb[13].mxu0 }
 0x670   :  { %v15568_v38 = vpop.f32.mrb[78].mxu1  ;;  %v15570_v1 = vpop.f32.mrb[14].mxu0 }
 0x671   :  { %v7595_v62 = vpop.f32.mrb[79].mxu1  ;;  %v8054_v48 = vpop.f32.mrb[15].mxu0 }
 0x67e   :  { %v15596_v32 = vpop.f32.mrb[80].mxu1 }
 0x67f   :  { %v7600_v55 = vpop.f32.mrb[81].mxu1 }
 0x680   :  { %v15601_v4 = vpop.f32.mrb[82].mxu1 }
 0x681   :  { %v7603_v26 = vpop.f32.mrb[83].mxu1 }
 0x686   :  { %v15627_v3 = vpop.f32.mrb[16].mxu0 }
 0x687   :  { %v8059_v28 = vpop.f32.mrb[17].mxu0 }
 0x688   :  { %v15638_v5 = vpop.f32.mrb[18].mxu0 }
 0x689   :  { %v8062_v25 = vpop.f32.mrb[19].mxu0 }
 0x68e   :  { %v15655_v7 = vpop.f32.mrb[84].mxu1 }
 0x68f   :  { %v7608_v17 = vpop.f32.mrb[85].mxu1 }
 0x690   :  { %v15660_v34 = vpop.f32.mrb[86].mxu1 }
 0x691   :  { %v7611_v36 = vpop.f32.mrb[87].mxu1 }
 0x696   :  { %v15668_v33 = vpop.f32.mrb[20].mxu0 }
 0x697   :  { %v8067_v63 = vpop.f32.mrb[21].mxu0 }
 0x698   :  { %v15670_v14 = vpop.f32.mrb[22].mxu0 }
 0x699   :  { %v8070_v10 = vpop.f32.mrb[23].mxu0 }
 0x69e   :  { %v15672_v60 = vpop.f32.mrb[88].mxu1 }
 0x69f   :  { %v7616_v62 = vpop.f32.mrb[89].mxu1 }
 0x6a0   :  { %v15674_v48 = vpop.f32.mrb[90].mxu1 }
 0x6a1   :  { %v7619_v0 = vpop.f32.mrb[91].mxu1 }
 0x6a6   :  { %v15676_v23 = vpop.f32.mrb[24].mxu0 }
 0x6a7   :  { %v8075_v43 = vpop.f32.mrb[25].mxu0 }
 0x6a8   :  { %v15678_v40 = vpop.f32.mrb[92].mxu1  ;;  %v15680_v16 = vpop.f32.mrb[26].mxu0 }
 0x6a9   :  { %v7624_v35 = vpop.f32.mrb[93].mxu1  ;;  %v8078_v6 = vpop.f32.mrb[27].mxu0 }
 0x6aa   :  { %v15682_v13 = vpop.f32.mrb[94].mxu1 }
 0x6ab   :  { %v7627_v55 = vpop.f32.mrb[95].mxu1 }
 0x6ae   :  { %v15684_v51 = vpop.f32.mrb[28].mxu0 }
 0x6af   :  { %v8083_v29 = vpop.f32.mrb[29].mxu0 }
 0x6b0   :  { %v7759_v26 = vpop.f32.mrb[96].mxu1  ;;  %v15686_v2 = vpop.f32.mrb[30].mxu0 }
 0x6b1   :  { %v7760_v18 = vadd.f32 %v7759_v26, %v15522_v59  ;;  %v7761_v54 = vpop.f32.mrb[97].mxu1  ;;  %v8086_v45 = vpop.f32.mrb[31].mxu0 }
 0x6b2   :  { %v7762_v27 = vpop.f32.mrb[98].mxu1 }
 0x6b3   :  { %v8088_v41 = vadd.f32 %v15526_v44, %v7760_v18  ;;  %v7763_v37 = vadd.f32 %v7762_v27, %v15524_v22  ;;  %v7764_v50 = vpop.f32.mrb[99].mxu1 }
 0x6b5   :  { %v8111_v28 = vadd.f32 %v15692_v58, %v8088_v41  ;;  %v8089_v24 = vadd.f32 %v15528_v42, %v7763_v37 }
 0x6b7   :  { %v8112_v25 = vadd.f32 %v15692_v58, %v8089_v24  ;;  %v8127_v20 = vmax.f32 %v8111_v28, 0.0 }
 0x6b8   :  { %v7767_v59 = vpop.f32.mrb[100].mxu1 }
 0x6b9   :  { %v8128_v56 = vmax.f32 %v8112_v25, 0.0  ;;  %v7768_v9 = vadd.f32 %v7767_v59, %v15530_v46  ;;  %v7769_v21 = vpop.f32.mrb[101].mxu1 }
 0x6ba   :  { %v7770_v61 = vpop.f32.mrb[102].mxu1 }
 0x6bb   :  { %v8143_v15 = vmax.f32 %v8127_v20, %v8128_v56  ;;  %v8090_v17 = vadd.f32 %v15534_v57, %v7768_v9  ;;  %v7771_v44 = vadd.f32 %v7770_v61, %v15532_v39  ;;  %v7772_v22 = vpop.f32.mrb[103].mxu1 }
 0x6bd   :  { %v8113_v36 = vadd.f32 %v15692_v58, %v8090_v17  ;;  %v8091_v30 = vadd.f32 %v15536_v19, %v7771_v44  ;;  %v8159_v6 = vrot.slane %v8143_v15, 1 }
 0x6bf   :  { %v8114_v42 = vadd.f32 %v15692_v58, %v8091_v30  ;;  %v8129_v63 = vmax.f32 %v8113_v36, 0.0 }
 0x6c0   :  { %v7775_v11 = vpop.f32.mrb[104].mxu1 }
 0x6c1   :  { %v8130_v10 = vmax.f32 %v8114_v42, 0.0  ;;  %v7776_v62 = vadd.f32 %v7775_v11, %v15544_v12  ;;  %v7777_v46 = vpop.f32.mrb[105].mxu1 }
 0x6c2   :  { %v7778_v0 = vpop.f32.mrb[106].mxu1 }
 0x6c3   :  { %v8144_v43 = vmax.f32 %v8129_v63, %v8130_v10  ;;  %v8092_v35 = vadd.f32 %v15548_v49, %v7776_v62  ;;  %v7779_v57 = vadd.f32 %v7778_v0, %v15546_v8  ;;  %v7780_v39 = vpop.f32.mrb[107].mxu1 }
 0x6c5   :  { %v8160_v55 = vrot.slane %v8144_v43, 1  ;;  %v8115_v29 = vadd.f32 %v15692_v58, %v8092_v35  ;;  %v8093_v19 = vadd.f32 %v15550_v31, %v7779_v57 }
 0x6c7   :  { %v8161_v26 = vsel %vm2927_vm1, %v8159_v6, %v8160_v55  ;;  %v8116_v18 = vadd.f32 %v15692_v58, %v8093_v19  ;;  %v8131_v45 = vmax.f32 %v8115_v29, 0.0 }
 0x6c8   :  { %v8183_v54 = vmax.f32 %v8143_v15, %v8161_v26  ;;  %v7783_v12 = vpop.f32.mrb[108].mxu1 }
 0x6c9   :  { %v8132_v27 = vmax.f32 %v8116_v18, 0.0  ;;  %v7784_v41 = vadd.f32 %v7783_v12, %v15564_v53  ;;  %v7785_v49 = vpop.f32.mrb[109].mxu1 }
 0x6ca   :  { %8191 = vst [vmem:[#allocation6] sm:$0xff] %v8183_v54  ;;  %v7786_v8 = vpop.f32.mrb[110].mxu1 }
 0x6cb   :  { %v8145_v37 = vmax.f32 %v8131_v45, %v8132_v27  ;;  %v8094_v50 = vadd.f32 %v15566_v52, %v7784_v41  ;;  %v7787_v28 = vadd.f32 %v7786_v8, %v15568_v38  ;;  %v7788_v24 = vpop.f32.mrb[111].mxu1 }
 0x6cd   :  { %v8162_v31 = vrot.slane %v8145_v37, 1  ;;  %v8117_v25 = vadd.f32 %v15692_v58, %v8094_v50  ;;  %v8095_v59 = vadd.f32 %v15570_v1, %v7787_v28 }
 0x6cf   :  { %v8163_v20 = vsel %vm2927_vm1, %v8160_v55, %v8162_v31  ;;  %v8118_v56 = vadd.f32 %v15692_v58, %v8095_v59  ;;  %v8133_v21 = vmax.f32 %v8117_v25, 0.0 }
 0x6d0   :  { %v8184_v9 = vmax.f32 %v8144_v43, %v8163_v20  ;;  %v7791_v53 = vpop.f32.mrb[112].mxu1 }
 0x6d1   :  { %v8134_v61 = vmax.f32 %v8118_v56, 0.0  ;;  %v7792_v15 = vadd.f32 %v7791_v53, %v15596_v32  ;;  %v7793_v17 = vpop.f32.mrb[113].mxu1 }
 0x6d2   :  { %8192 = vst [vmem:[#allocation6 + $0x8] sm:$0xff] %v8184_v9  ;;  %v7794_v52 = vpop.f32.mrb[114].mxu1 }
 0x6d3   :  { %v8146_v38 = vmax.f32 %v8133_v21, %v8134_v61  ;;  %v8096_v44 = vadd.f32 %v15627_v3, %v7792_v15  ;;  %v7795_v22 = vadd.f32 %v7794_v52, %v15601_v4  ;;  %v7796_v36 = vpop.f32.mrb[115].mxu1 }
 0x6d5   :  { %v8164_v1 = vrot.slane %v8146_v38, 1  ;;  %v8119_v30 = vadd.f32 %v15692_v58, %v8096_v44  ;;  %v8097_v42 = vadd.f32 %v15638_v5, %v7795_v22 }
 0x6d7   :  { %v8165_v11 = vsel %vm2927_vm1, %v8162_v31, %v8164_v1  ;;  %v8120_v63 = vadd.f32 %v15692_v58, %v8097_v42  ;;  %v8135_v46 = vmax.f32 %v8119_v30, 0.0 }
 0x6d8   :  { %v8185_v10 = vmax.f32 %v8145_v37, %v8165_v11  ;;  %v7799_v32 = vpop.f32.mrb[116].mxu1 }
 0x6d9   :  { %v8199_v62 = vld [vmem:[#allocation6] ss:$2 sm:$0xff]  ;;  %v8136_v0 = vmax.f32 %v8120_v63, 0.0  ;;  %v7800_v43 = vadd.f32 %v7799_v32, %v15655_v7  ;;  %v7801_v3 = vpop.f32.mrb[117].mxu1 }
 0x6da   :  { %8206 = vst [vmem:[#allocation7] sm:$0xff] %v8199_v62  ;;  %8193 = vst [vmem:[#allocation6 + $0x10] sm:$0xff] %v8185_v10  ;;  %v7802_v4 = vpop.f32.mrb[118].mxu1 }
 0x6db   :  { %v8147_v35 = vmax.f32 %v8135_v46, %v8136_v0  ;;  %v8098_v57 = vadd.f32 %v15668_v33, %v7800_v43  ;;  %v7803_v5 = vadd.f32 %v7802_v4, %v15660_v34  ;;  %v7804_v39 = vpop.f32.mrb[119].mxu1 }
 0x6dd   :  { %v8166_v6 = vrot.slane %v8147_v35, 1  ;;  %v8121_v55 = vadd.f32 %v15692_v58, %v8098_v57  ;;  %v8099_v29 = vadd.f32 %v15670_v14, %v7803_v5 }
 0x6df   :  { %v8167_v19 = vsel %vm2927_vm1, %v8164_v1, %v8166_v6  ;;  %v8122_v26 = vadd.f32 %v15692_v58, %v8099_v29  ;;  %v8137_v54 = vmax.f32 %v8121_v55, 0.0 }
 0x6e0   :  { %v8186_v7 = vmax.f32 %v8146_v38, %v8167_v19  ;;  %v7807_v18 = vpop.f32.mrb[120].mxu1 }
 0x6e1   :  { %v8138_v12 = vmax.f32 %v8122_v26, 0.0  ;;  %v7808_v45 = vadd.f32 %v7807_v18, %v15672_v60  ;;  %v7809_v27 = vpop.f32.mrb[121].mxu1 }
 0x6e2   :  { %8194 = vst [vmem:[#allocation6 + $0x18] sm:$0xff] %v8186_v7  ;;  %v7810_v33 = vpop.f32.mrb[122].mxu1 }
 0x6e3   :  { %v8148_v34 = vmax.f32 %v8137_v54, %v8138_v12  ;;  %v8100_v41 = vadd.f32 %v15676_v23, %v7808_v45  ;;  %v7811_v49 = vadd.f32 %v7810_v33, %v15674_v48  ;;  %v7812_v8 = vpop.f32.mrb[123].mxu1 }
 0x6e5   :  { %v8168_v14 = vrot.slane %v8148_v34, 1  ;;  %v8123_v37 = vadd.f32 %v15692_v58, %v8100_v41  ;;  %v8101_v50 = vadd.f32 %v15680_v16, %v7811_v49  ;;  %v11780_v49 = vld [vmem:[%s16141_s7 + $0x80] sm:$0xff]  }
 0x6e7   :  { %v8169_v28 = vsel %vm2927_vm1, %v8166_v6, %v8168_v14  ;;  %v8124_v24 = vadd.f32 %v15692_v58, %v8101_v50  ;;  %v8139_v59 = vmax.f32 %v8123_v37, 0.0  ;;  %v11781_v50 = vld [vmem:[%s16141_s7 + $0x200] sm:$0xff]  }
 0x6e8   :  { %v8187_v31 = vmax.f32 %v8147_v35, %v8169_v28  ;;  %v7815_v60 = vpop.f32.mrb[124].mxu1 }
 0x6e9   :  { %v8201_v25 = vld [vmem:[#allocation6 + $0x10] ss:$2 sm:$0xff]  ;;  %v8140_v20 = vmax.f32 %v8124_v24, 0.0  ;;  %v7816_v56 = vadd.f32 %v7815_v60, %v15678_v40  ;;  %v7817_v23 = vpop.f32.mrb[125].mxu1  ;;  %v11783_v24 = vld [vmem:[%s16141_s7 + $0xc8] sm:$0xff]  }
 0x6ea   :  { %8207 = vst [vmem:[#allocation7 + $0x8] sm:$0xff] %v8201_v25  ;;  %8195 = vst [vmem:[#allocation6 + $0x20] sm:$0xff] %v8187_v31  ;;  %v7818_v48 = vpop.f32.mrb[126].mxu1  ;;  %v11784_v25 = vld [vmem:[%s16141_s7 + $0x248] sm:$0xff]  }
 0x6eb   :  { %v8149_v9 = vmax.f32 %v8139_v59, %v8140_v20  ;;  %v8102_v53 = vadd.f32 %v15684_v51, %v7816_v56  ;;  %v7819_v16 = vadd.f32 %v7818_v48, %v15682_v13  ;;  %v7820_v21 = vpop.f32.mrb[127].mxu1  ;;  %v11785_v20 = vld [vmem:[%s16141_s7 + $0x88] sm:$0xff]   ;;  %v11787_v56 = vld [vmem:[%s16141_s7 + $0xd0] sm:$0xff]  }
 0x6ec   :  { %v11786_v48 = vld [vmem:[%s16141_s7 + $0x208] sm:$0xff]   ;;  %v11791_v21 = vld [vmem:[%s16141_s7 + $0xd8] sm:$0xff]  }
 0x6ed   :  { %v8170_v61 = vrot.slane %v8149_v9, 1  ;;  %v8125_v15 = vadd.f32 %v15692_v58, %v8102_v53  ;;  %v8103_v17 = vadd.f32 %v15686_v2, %v7819_v16  ;;  %v11938_v2 = vmov 1983009808   ;;  %v11789_v16 = vld [vmem:[%s16141_s7 + $0x90] sm:$0xff]  }
 0x6ee   :  { %v8267_v63 = vunpack.c.l.s4 %v11938_v2  ;;  %v11805_v2 = vld [vmem:[%s16141_s7 + $0xb0] sm:$0xff]  }
 0x6ef   :  { %v8171_v52 = vsel %vm2927_vm1, %v8168_v14, %v8170_v61  ;;  %v8126_v38 = vadd.f32 %v15692_v58, %v8103_v17  ;;  %v8141_v44 = vmax.f32 %v8125_v15, 0.0  ;;  %v11792_v15 = vld [vmem:[%s16141_s7 + $0x258] sm:$0xff]  }
 0x6f0   :  { %v8188_v40 = vmax.f32 %v8148_v34, %v8171_v52  ;;  %v8268_v43 = vunpack.c.0.s8 %v8267_v63  ;;  %v11793_v17 = vld [vmem:[%s16141_s7 + $0x98] sm:$0xff]   ;;  %v11795_v52 = vld [vmem:[%s16141_s7 + $0xe0] sm:$0xff]  }
 0x6f1   :  { %v8142_v22 = vmax.f32 %v8126_v38, 0.0  ;;  %v11794_v38 = vld [vmem:[%s16141_s7 + $0x218] sm:$0xff]  }
 0x6f2   :  { %8196 = vst [vmem:[#allocation6 + $0x28] sm:$0xff] %v8188_v40  ;;  %v15750_v57 = vsub.s32 %v8268_v43, %v12278_v47  ;;  %v11796_v40 = vld [vmem:[%s16141_s7 + $0x260] sm:$0xff]   ;;  %v11807_v63 = vld [vmem:[%s16141_s7 + $0xf8] sm:$0xff]  }
 0x6f3   :  { %v8150_v36 = vmax.f32 %v8141_v44, %v8142_v22  ;;  %v11797_v44 = vld [vmem:[%s16141_s7 + $0xa0] sm:$0xff]   ;;  %v11799_v22 = vld [vmem:[%s16141_s7 + $0xe8] sm:$0xff]  }
 0x6f4   :  { %v11811_v43 = vld [vmem:[%s16141_s7 + $0x1c0] sm:$0xff]  }
 0x6f5   :  { %v8172_v1 = vrot.slane %v8150_v36, 1 }
 0x6f7   :  { %v8173_v51 = vsel %vm2927_vm1, %v8170_v61, %v8172_v1  ;;  %v8182_v13 = vsel %vm2927_vm1, %v8172_v1, 0.0  ;;  %v11790_v61 = vld [vmem:[%s16141_s7 + $0x210] sm:$0xff]   ;;  %v11800_v1 = vld [vmem:[%s16141_s7 + $0x268] sm:$0xff]   ;;  %vm11939_vm1 = vmmov 0  }
 0x6f8   :  { %v8189_v30 = vmax.f32 %v8149_v9, %v8173_v51  ;;  %v8190_v42 = vmax.f32 %v8150_v36, %v8182_v13  ;;  %v11788_v9 = vld [vmem:[%s16141_s7 + $0x250] sm:$0xff]   ;;  %v11798_v36 = vld [vmem:[%s16141_s7 + $0x220] sm:$0xff]   ;;  %v11801_v51 = vld [vmem:[%s16141_s7 + $0xa8] sm:$0xff]  }
 0x6f9   :  { %v8203_v11 = vld [vmem:[#allocation6 + $0x20] ss:$2 sm:$0xff]  ;;  %v11803_v13 = vld [vmem:[%s16141_s7 + $0xf0] sm:$0xff]  }
 0x6fa   :  { %8208 = vst [vmem:[#allocation7 + $0x10] sm:$0xff] %v8203_v11  ;;  %8197 = vst [vmem:[#allocation6 + $0x30] sm:$0xff] %v8189_v30  ;;  %v11802_v30 = vld [vmem:[%s16141_s7 + $0x228] sm:$0xff]   ;;  %v11804_v11 = vld [vmem:[%s16141_s7 + $0x270] sm:$0xff]  }
 0x6fb   :  { %8198 = vst [vmem:[#allocation6 + $0x38] sm:$0xff] %v8190_v42 }
 0x701   :  { %v8210_v58 = vld [vmem:[#allocation7] ss:$16 sm:$0x3]  ;;  %v8213_v32 = vld [vmem:[#allocation7 + $0x1] ss:$16 sm:$0x3] }
 0x702   :  { %v8205_v10 = vld [vmem:[#allocation6 + $0x30] ss:$2 sm:$0xff]  ;;  %8211 = vst [vmem:[#allocation8] sm:$0x3] %v8210_v58  ;;  %8214 = vst [vmem:[#allocation8 + $0x2] sm:$0x3] %v8213_v32 }
 0x703   :  { %8209 = vst [vmem:[#allocation7 + $0x18] sm:$0xff] %v8205_v10  ;;  %v8216_v62 = vld [vmem:[#allocation7 + $0x2] ss:$16 sm:$0x3] }
 0x704   :  { %8217 = vst [vmem:[#allocation8 + $0x4] sm:$0x3] %v8216_v62  ;;  %v8219_v46 = vld [vmem:[#allocation7 + $0x3] ss:$16 sm:$0x3]  ;;  %v11808_v62 = vld [vmem:[%s16141_s7 + $0x278] sm:$0xff]  }
 0x705   :  { %v8222_v0 = vld [vmem:[#allocation7 + $0x4] ss:$16 sm:$0x3]  ;;  %8220 = vst [vmem:[#allocation8 + $0x6] sm:$0x3] %v8219_v46  ;;  %v11809_v46 = vld [vmem:[%s16141_s7 + $0xb8] sm:$0xff]  }
 0x706   :  { %8223 = vst [vmem:[#allocation8 + $0x8] sm:$0x3] %v8222_v0  ;;  %v8225_v3 = vld [vmem:[#allocation7 + $0x5] ss:$16 sm:$0x3] }
 0x707   :  { %v8228_v4 = vld [vmem:[#allocation7 + $0x6] ss:$16 sm:$0x3]  ;;  %8226 = vst [vmem:[#allocation8 + $0xa] sm:$0x3] %v8225_v3  ;;  %v11810_v3 = vld [vmem:[%s16141_s7 + $0x238] sm:$0xff]  }
 0x708   :  { %8229 = vst [vmem:[#allocation8 + $0xc] sm:$0x3] %v8228_v4  ;;  %v8231_v35 = vld [vmem:[#allocation7 + $0x7] ss:$16 sm:$0x3] }
 0x709   :  { %8232 = vst [vmem:[#allocation8 + $0xe] sm:$0x3] %v8231_v35  ;;  %v11806_v58 = vld [vmem:[%s16141_s7 + $0x230] sm:$0xff]   ;;  %v11812_v35 = vld [vmem:[%s16141_s7 + $0x340] sm:$0xff]  }
 0x70a   :  { %v8234_v5 = vld [vmem:[#allocation7 + $0x8] ss:$16 sm:$0x3]  ;;  %v8237_v39 = vld [vmem:[#allocation7 + $0x9] ss:$16 sm:$0x3] }
 0x70b   :  { %8235 = vst [vmem:[#allocation8 + $0x10] sm:$0x3] %v8234_v5  ;;  %8238 = vst [vmem:[#allocation8 + $0x12] sm:$0x3] %v8237_v39  ;;  %v11813_v5 = vld [vmem:[%s16141_s7 + $0x180] sm:$0xff]  }
 0x70c   :  { %v8240_v6 = vld [vmem:[#allocation7 + $0xa] ss:$16 sm:$0x3]  ;;  %v8243_v55 = vld [vmem:[#allocation7 + $0xb] ss:$16 sm:$0x3] }
 0x70d   :  { %v8257_v29 = vld [vmem:[#allocation8] sm:$0xff]  ;;  %8241 = vst [vmem:[#allocation8 + $0x14] sm:$0x3] %v8240_v6  ;;  %8244 = vst [vmem:[#allocation8 + $0x16] sm:$0x3] %v8243_v55  ;;  %v11816_v55 = vld [vmem:[%s16141_s7 + $0x1c8] sm:$0xff]  }
 0x70e   :  { %v8246_v19 = vld [vmem:[#allocation7 + $0xc] ss:$16 sm:$0x3]  ;;  %v8272_v26 = vrot.slane %v8257_v29, %v15750_v57  ;;  %v8265_v7 = vcombine.high %v8257_v29, %v8257_v29  ;;  %v8249_v18 = vld [vmem:[#allocation7 + $0xd] ss:$16 sm:$0x3] }
 0x70f   :  { %8247 = vst [vmem:[#allocation8 + $0x18] sm:$0x3] %v8246_v19  ;;  %v8252_v54 = vld [vmem:[#allocation7 + $0xe] ss:$16 sm:$0x3]  ;;  %v11815_v19 = vld [vmem:[%s16141_s7 + $0x300] sm:$0xff]  }
 0x710   :  { %v15753_v12 = vld [vmem:[#allocation8 + $0x8] sm:$0xff]  ;;  %8250 = vst [vmem:[#allocation8 + $0x1a] sm:$0x3] %v8249_v18  ;;  %8253 = vst [vmem:[#allocation8 + $0x1c] sm:$0x3] %v8252_v54  ;;  %v8280_v45 = vcombine.high %v8272_v26, %v8272_v26  ;;  %v15758_v33 = vrot.slane %v8265_v7, %v15750_v57  ;;  %v8349_v14 = vpack.c.bf16 %v8272_v26, %v8272_v26 }
 0x711   :  { %v8255_v47 = vld [vmem:[#allocation7 + $0xf] ss:$16 sm:$0x3]  ;;  %v8289_v27 = vrot.slane %v15753_v12, %v15750_v57  ;;  %v8282_v42 = vcombine.high %v15753_v12, %v15753_v12  ;;  %v11820_v12 = vld [vmem:[%s16141_s7 + $0x1d0] sm:$0xff]  }
 0x712   :  { %8256 = vst [vmem:[#allocation8 + $0x1e] sm:$0x3] %v8255_v47  ;;  %v8350_v34 = vpack.c.bf16 %v8280_v45, %v8280_v45  ;;  %v8281_v8 = vcombine.high %v15758_v33, %v15758_v33  ;;  %v8351_v6 = vpack.c.bf16 %v15758_v33, %v15758_v33  ;;  %v11817_v7 = vld [vmem:[%s16141_s7 + $0x348] sm:$0xff]   ;;  %v11821_v45 = vld [vmem:[%s16141_s7 + $0x350] sm:$0xff]   ;;  %v11824_v33 = vld [vmem:[%s16141_s7 + $0x1d8] sm:$0xff]  }
 0x713   :  { %v8297_v41 = vcombine.high %v8289_v27, %v8289_v27  ;;  %v8353_v60 = vpack.c.bf16 %v8289_v27, %v8289_v27  ;;  %v15856_v32 = vrot.slane %v8282_v42, %v15750_v57  ;;  %v11818_v54 = vld [vmem:[%s16141_s7 + $0x188] sm:$0xff]   ;;  %v11822_v27 = vld [vmem:[%s16141_s7 + $0x190] sm:$0xff]   ;;  %v11852_v42 = vld [vmem:[%s16141_s7 + $0x298] sm:$0xff]  }
 0x714   :  { %9428 = vmatprep.mubr.bf16.mxu1 %v8350_v34  ;;  %v8352_v28 = vpack.c.bf16 %v8281_v8, %v8281_v8  ;;  %v15771_v31 = vld [vmem:[#allocation8 + $0x10] sm:$0xff]  ;;  %v11819_v47 = vld [vmem:[%s16141_s7 + $0x308] sm:$0xff]   ;;  %v11828_v8 = vld [vmem:[%s16141_s7 + $0x1e0] sm:$0xff]  }
 0x715   :  { %v8354_v37 = vpack.c.bf16 %v8297_v41, %v8297_v41  ;;  %9429 = vmatmul.mubr.bf16.vlgmr.msra.gmra.mrb[128].mxu1 %v8349_v14  ;;  %v15778_v59 = vrot.slane %v15771_v31, %v15750_v57  ;;  %v8298_v4 = vcombine.high %v15856_v32, %v15856_v32  ;;  %v11823_v34 = vld [vmem:[%s16141_s7 + $0x310] sm:$0xff]   ;;  %v11825_v41 = vld [vmem:[%s16141_s7 + $0x358] sm:$0xff]  }
 0x716   :  { %10757 = vmatpush3.bf16.msra.mxu1 %v11780_v49  ;;  %9468 = vmatprep.mubr.bf16.mxu1 %v8352_v28  ;;  %v11826_v49 = vld [vmem:[%s16141_s7 + $0x198] sm:$0xff]   ;;  %v11832_v28 = vld [vmem:[%s16141_s7 + $0x1e8] sm:$0xff]  }
 0x717   :  { %9508 = vmatprep.mubr.bf16.mxu0 %v8354_v37  ;;  %v8314_v23 = vcombine.high %v15778_v59, %v15778_v59  ;;  %10758 = vmatprep.subr.bf16.mxu1 %v11783_v24  ;;  %v8356_v29 = vpack.c.bf16 %v8298_v4, %v8298_v4  ;;  %v8357_v26 = vpack.c.bf16 %v15778_v59, %v15778_v59  ;;  %v11827_v14 = vld [vmem:[%s16141_s7 + $0x318] sm:$0xff]   ;;  %v11829_v37 = vld [vmem:[%s16141_s7 + $0x360] sm:$0xff]   ;;  %v11836_v59 = vld [vmem:[%s16141_s7 + $0x1f0] sm:$0xff]  }
 0x718   :  { %9509 = vmatmul.mubr.bf16.vlgmr.msra.gmra.mrb[32].mxu0 %v8353_v60  ;;  %v11831_v24 = vld [vmem:[%s16141_s7 + $0x320] sm:$0xff]   ;;  %v11833_v60 = vld [vmem:[%s16141_s7 + $0x368] sm:$0xff]  }
 0x719   :  { %10823 = vmatpush3.bf16.msra.mxu0 %v11781_v50  ;;  %v8358_v53 = vpack.c.bf16 %v8314_v23, %v8314_v23  ;;  %v15850_v10 = vld [vmem:[#allocation8 + $0x18] sm:$0xff]  ;;  %v11830_v50 = vld [vmem:[%s16141_s7 + $0x1a0] sm:$0xff]   ;;  %v11837_v23 = vld [vmem:[%s16141_s7 + $0x370] sm:$0xff]  }
 0x71a   :  { %10824 = vmatprep.subr.bf16.mxu0 %v11784_v25  ;;  %10759 = vmatpush3.bf16.msra.mxu1 %v11785_v20  ;;  %v15866_v0 = vrot.slane %v15850_v10, %v15750_v57  ;;  %v11834_v25 = vld [vmem:[%s16141_s7 + $0x1a8] sm:$0xff]  }
 0x71b   :  { %10760 = vmatprep.subr.bf16.mxu1 %v11787_v56  ;;  %9588 = vmatprep.mubr.bf16.mxu0 %v8358_v53  ;;  %v11835_v20 = vld [vmem:[%s16141_s7 + $0x328] sm:$0xff]   ;;  %v8299_v56 = vcombine.high %v15771_v31, %v15771_v31  ;;  %v11839_v31 = vld [vmem:[%s16141_s7 + $0x330] sm:$0xff]  }
 0x71c   :  { %v8331_v39 = vcombine.high %v15866_v0, %v15866_v0 }
 0x71d   :  { %10825 = vmatpush3.bf16.msra.mxu0 %v11786_v48  ;;  %v11838_v48 = vld [vmem:[%s16141_s7 + $0x1b0] sm:$0xff]   ;;  %v8313_v53 = vrot.slane %v8299_v56, %v15750_v57 }
 0x71e   :  { %10826 = vmatprep.subr.bf16.mxu0 %v11788_v9  ;;  %10761 = vmatpush3.bf16.msra.mxu1 %v11789_v16  ;;  %v8362_v18 = vpack.c.bf16 %v8331_v39, %v8331_v39  ;;  %v11840_v9 = vld [vmem:[%s16141_s7 + $0x1f8] sm:$0xff]  }
 0x71f   :  { %10762 = vmatprep.subr.bf16.mxu1 %v11791_v21  ;;  %v11841_v16 = vld [vmem:[%s16141_s7 + $0x378] sm:$0xff]  }
 0x720   :  { %v11842_v21 = vld [vmem:[%s16141_s7 + $0x1b8] sm:$0xff]  }
 0x721   :  { %10827 = vmatpush3.bf16.msra.mxu0 %v11790_v61  ;;  %v11844_v61 = vld [vmem:[%s16141_s7 + $0x2c0] sm:$0xff]  }
 0x722   :  { %10828 = vmatprep.subr.bf16.mxu0 %v11792_v15  ;;  %10763 = vmatpush3.bf16.msra.mxu1 %v11793_v17  ;;  %v11843_v15 = vld [vmem:[%s16141_s7 + $0x338] sm:$0xff]   ;;  %v8315_v17 = vcombine.high %v8313_v53, %v8313_v53 }
 0x723   :  { %10764 = vmatprep.subr.bf16.mxu1 %v11795_v52  ;;  %v11845_v52 = vld [vmem:[%s16141_s7 + $0x280] sm:$0xff]  }
 0x725   :  { %10829 = vmatpush3.bf16.msra.mxu0 %v11794_v38  ;;  %v8355_v38 = vpack.c.bf16 %v15856_v32, %v15856_v32  ;;  %v11857_v32 = vld [vmem:[%s16141_s7 + $0x2f0] sm:$0xff]  }
 0x726   :  { %10830 = vmatprep.subr.bf16.mxu0 %v11796_v40  ;;  %10765 = vmatpush3.bf16.msra.mxu1 %v11797_v44  ;;  %v11847_v40 = vld [vmem:[%s16141_s7 + $0x2c8] sm:$0xff]   ;;  %v8360_v44 = vpack.c.bf16 %v8315_v17, %v8315_v17 }
 0x727   :  { %10766 = vmatprep.subr.bf16.mxu1 %v11799_v22  ;;  %v8361_v22 = vpack.c.bf16 %v15866_v0, %v15866_v0  ;;  %v11859_v0 = vld [vmem:[%s16141_s7 + $0x2f8] sm:$0xff]  }
 0x729   :  { %10831 = vmatpush3.bf16.msra.mxu0 %v11798_v36  ;;  %v15991_v36 = vld [vmem:[#allocation3] sm:$0xff] }
 0x72a   :  { %10832 = vmatprep.subr.bf16.mxu0 %v11800_v1  ;;  %10767 = vmatpush3.bf16.msra.mxu1 %v11801_v51  ;;  %v11848_v1 = vld [vmem:[%s16141_s7 + $0x288] sm:$0xff]   ;;  %v11849_v51 = vld [vmem:[%s16141_s7 + $0x2d0] sm:$0xff]  }
 0x72b   :  { %10768 = vmatprep.subr.bf16.mxu1 %v11803_v13  ;;  %v11850_v13 = vld [vmem:[%s16141_s7 + $0x290] sm:$0xff]  }
 0x72d   :  { %10833 = vmatpush3.bf16.msra.mxu0 %v11802_v30  ;;  %v11851_v30 = vld [vmem:[%s16141_s7 + $0x2d8] sm:$0xff]  }
 0x72e   :  { %10834 = vmatprep.subr.bf16.mxu0 %v11804_v11  ;;  %10769 = vmatpush3.bf16.msra.mxu1 %v11805_v2  ;;  %v11853_v11 = vld [vmem:[%s16141_s7 + $0x2e0] sm:$0xff]  }
 0x72f   :  { %10770 = vmatprep.subr.bf16.mxu1 %v11807_v63  ;;  %v11854_v2 = vld [vmem:[%s16141_s7 + $0x2a0] sm:$0xff]   ;;  %v11855_v63 = vld [vmem:[%s16141_s7 + $0x2e8] sm:$0xff]  }
 0x731   :  { %10835 = vmatpush3.bf16.msra.mxu0 %v11806_v58  ;;  %v11856_v58 = vld [vmem:[%s16141_s7 + $0x2a8] sm:$0xff]  }
 0x732   :  { %10836 = vmatprep.subr.bf16.mxu0 %v11808_v62  ;;  %10771 = vmatpush3.bf16.msra.mxu1 %v11809_v46  ;;  %v8316_v62 = vcombine.high %v15850_v10, %v15850_v10  ;;  %v11858_v46 = vld [vmem:[%s16141_s7 + $0x2b0] sm:$0xff]   ;;  %v11861_v10 = vld [vmem:[%s16141_s7 + $0x3c0] sm:$0xff]  }
 0x733   :  { %10800 = vmatprep.subr.bf16.mxu1 %v11811_v43 }
 0x734   :  { %v8330_v43 = vrot.slane %v8316_v62, %v15750_v57  ;;  %v11864_v57 = vld [vmem:[%s16141_s7 + $0x3c8] sm:$0xff]  }
 0x735   :  { %10837 = vmatpush3.bf16.msra.mxu0 %v11810_v3  ;;  %9469 = vmatmul.mubr.bf16.vlgmr.msra.gmra.mrb[132].mxu1 %v8351_v6  ;;  %v11860_v3 = vld [vmem:[%s16141_s7 + $0x2b8] sm:$0xff]   ;;  %v11865_v6 = vld [vmem:[%s16141_s7 + $0x388] sm:$0xff]  }
 0x736   :  { %10866 = vmatprep.subr.bf16.mxu0 %v11812_v35  ;;  %10801 = vmatpush3.bf16.msra.mxu1 %v11813_v5  ;;  %v8332_v4 = vcombine.high %v8330_v43, %v8330_v43  ;;  %v11862_v35 = vld [vmem:[%s16141_s7 + $0x380] sm:$0xff]   ;;  %v8359_v5 = vpack.c.bf16 %v8313_v53, %v8313_v53  ;;  %v11885_v53 = vld [vmem:[%s16143_s9 + $0x38] sm:$0xff]  }
 0x737   :  { %9548 = vmatprep.mubr.bf16.mxu1 %v8356_v29  ;;  %10802 = vmatprep.subr.bf16.mxu1 %v11816_v55  ;;  %v11866_v55 = vld [vmem:[%s16141_s7 + $0x3d0] sm:$0xff]  }
 0x738   :  { %9589 = vmatmul.mubr.bf16.vlgmr.msra.gmra.mrb[36].mxu0 %v8357_v26  ;;  %v8364_v39 = vpack.c.bf16 %v8332_v4, %v8332_v4  ;;  %v11867_v29 = vld [vmem:[%s16141_s7 + $0x390] sm:$0xff]   ;;  %v11869_v26 = vld [vmem:[%s16141_s7 + $0x398] sm:$0xff]  }
 0x739   :  { %10867 = vmatpush3.bf16.msra.mxu0 %v11815_v19  ;;  %9668 = vmatprep.mubr.bf16.mxu0 %v8362_v18  ;;  %v11868_v19 = vld [vmem:[%s16141_s7 + $0x3d8] sm:$0xff]   ;;  %v11871_v18 = vld [vmem:[%s16141_s7 + $0x3a0] sm:$0xff]  }
 0x73a   :  { %10868 = vmatprep.subr.bf16.mxu0 %v11817_v7  ;;  %10803 = vmatpush3.bf16.msra.mxu1 %v11818_v54  ;;  %v11870_v7 = vld [vmem:[%s16141_s7 + $0x3e0] sm:$0xff]   ;;  %v11872_v54 = vld [vmem:[%s16141_s7 + $0x3e8] sm:$0xff]  }
 0x73b   :  { %10804 = vmatprep.subr.bf16.mxu1 %v11820_v12  ;;  %v11873_v12 = vld [vmem:[%s16141_s7 + $0x3a8] sm:$0xff]  }
 0x73d   :  { %10869 = vmatpush3.bf16.msra.mxu0 %v11819_v47  ;;  %v11874_v47 = vld [vmem:[%s16141_s7 + $0x3f0] sm:$0xff]  }
 0x73e   :  { %10870 = vmatprep.subr.bf16.mxu0 %v11821_v45  ;;  %10805 = vmatpush3.bf16.msra.mxu1 %v11822_v27  ;;  %v11875_v45 = vld [vmem:[%s16141_s7 + $0x3b0] sm:$0xff]   ;;  %v11876_v27 = vld [vmem:[%s16141_s7 + $0x3f8] sm:$0xff]  }
 0x73f   :  { %10806 = vmatprep.subr.bf16.mxu1 %v11824_v33  ;;  %v11877_v33 = vld [vmem:[%s16141_s7 + $0x3b8] sm:$0xff]  }
 0x741   :  { %10871 = vmatpush3.bf16.msra.mxu0 %v11823_v34  ;;  %v8363_v34 = vpack.c.bf16 %v8330_v43, %v8330_v43 }
 0x742   :  { %10872 = vmatprep.subr.bf16.mxu0 %v11825_v41  ;;  %10807 = vmatpush3.bf16.msra.mxu1 %v11826_v49  ;;  %v11878_v41 = vld [vmem:[%s16143_s9] sm:$0xff]   ;;  %v11879_v49 = vld [vmem:[%s16143_s9 + $0x8] sm:$0xff]  }
 0x743   :  { %10808 = vmatprep.subr.bf16.mxu1 %v11828_v8  ;;  %v11880_v8 = vld [vmem:[%s16143_s9 + $0x10] sm:$0xff]  }
 0x745   :  { %10873 = vmatpush3.bf16.msra.mxu0 %v11827_v14  ;;  %v11881_v14 = vld [vmem:[%s16143_s9 + $0x18] sm:$0xff]  }
 0x746   :  { %10874 = vmatprep.subr.bf16.mxu0 %v11829_v37  ;;  %10809 = vmatpush3.bf16.msra.mxu1 %v11830_v50  ;;  %v11882_v37 = vld [vmem:[%s16143_s9 + $0x20] sm:$0xff]   ;;  %v11883_v50 = vld [vmem:[%s16143_s9 + $0x28] sm:$0xff]  }
 0x747   :  { %10810 = vmatprep.subr.bf16.mxu1 %v11832_v28 }
 0x749   :  { %10875 = vmatpush3.bf16.msra.mxu0 %v11831_v24 }
 0x74a   :  { %10876 = vmatprep.subr.bf16.mxu0 %v11833_v60  ;;  %10811 = vmatpush3.bf16.msra.mxu1 %v11834_v25 }
 0x74b   :  { %10812 = vmatprep.subr.bf16.mxu1 %v11836_v59 }
 0x74d   :  { %10877 = vmatpush3.bf16.msra.mxu0 %v11835_v20 }
 0x74e   :  { %10878 = vmatprep.subr.bf16.mxu0 %v11837_v23  ;;  %10813 = vmatpush3.bf16.msra.mxu1 %v11838_v48  ;;  %v11884_v23 = vld [vmem:[%s16143_s9 + $0x30] sm:$0xff]  }
 0x74f   :  { %10814 = vmatprep.subr.bf16.mxu1 %v11840_v9 }
 0x751   :  { %10879 = vmatpush3.bf16.msra.mxu0 %v11839_v31 }
 0x752   :  { %10880 = vmatprep.subr.bf16.mxu0 %v11841_v16  ;;  %10815 = vmatpush3.bf16.msra.mxu1 %v11842_v21  ;;  %v10352_v16 = vld [vmem:[%s16142_s8] ss:$0 sm:$0xff] }
 0x753   :  { %10844 = vmatprep.subr.bf16.mxu1 %v11844_v61 }
 0x755   :  { %10881 = vmatpush3.bf16.msra.mxu0 %v11843_v15  ;;  %9549 = vmatmul.mubr.bf16.vlgmr.msra.gmra.mrb[136].mxu1 %v8355_v38 }
 0x756   :  { %11407 = vmatprep.subr.bf16.mxu0 %v15991_v36  ;;  %10845 = vmatpush3.bf16.msra.mxu1 %v11845_v52 }
 0x757   :  { %9628 = vmatprep.mubr.bf16.mxu1 %v8360_v44  ;;  %10846 = vmatprep.subr.bf16.mxu1 %v11847_v40 }
 0x758   :  { %9669 = vmatmul.mubr.bf16.vlgmr.msra.gmra.mrb[40].mxu0 %v8361_v22 }
 0x759   :  { %11408 = vmatpush3.bf16.msra.mxu0 %v11878_v41  ;;  %11423 = vmatprep.mubr.msk.bf16.mxu0 %vm11939_vm1, %v15991_v36 }
 0x75a   :  { %10847 = vmatpush3.bf16.msra.mxu1 %v11848_v1  ;;  %11409 = vmatprep.subr.bf16.mxu0 %v15991_v36 }
 0x75b   :  { %10848 = vmatprep.subr.bf16.mxu1 %v11849_v51 }
 0x75d   :  { %11410 = vmatpush3.bf16.msra.mxu0 %v11879_v49 }
 0x75e   :  { %10849 = vmatpush3.bf16.msra.mxu1 %v11850_v13  ;;  %11411 = vmatprep.subr.bf16.mxu0 %v15991_v36 }
 0x75f   :  { %10850 = vmatprep.subr.bf16.mxu1 %v11851_v30 }
 0x761   :  { %11412 = vmatpush3.bf16.msra.mxu0 %v11880_v8 }
 0x762   :  { %10851 = vmatpush3.bf16.msra.mxu1 %v11852_v42  ;;  %11413 = vmatprep.subr.bf16.mxu0 %v15991_v36 }
 0x763   :  { %10852 = vmatprep.subr.bf16.mxu1 %v11853_v11 }
 0x765   :  { %11414 = vmatpush3.bf16.msra.mxu0 %v11881_v14 }
 0x766   :  { %10853 = vmatpush3.bf16.msra.mxu1 %v11854_v2  ;;  %11415 = vmatprep.subr.bf16.mxu0 %v15991_v36 }
 0x767   :  { %10854 = vmatprep.subr.bf16.mxu1 %v11855_v63 }
 0x769   :  { %11416 = vmatpush3.bf16.msra.mxu0 %v11882_v37 }
 0x76a   :  { %10855 = vmatpush3.bf16.msra.mxu1 %v11856_v58  ;;  %11417 = vmatprep.subr.bf16.mxu0 %v15991_v36 }
 0x76b   :  { %10856 = vmatprep.subr.bf16.mxu1 %v11857_v32 }
 0x76d   :  { %11418 = vmatpush3.bf16.msra.mxu0 %v11883_v50 }
 0x76e   :  { %10857 = vmatpush3.bf16.msra.mxu1 %v11858_v46  ;;  %11419 = vmatprep.subr.bf16.mxu0 %v15991_v36 }
 0x76f   :  { %10858 = vmatprep.subr.bf16.mxu1 %v11859_v0 }
 0x771   :  { %11420 = vmatpush3.bf16.msra.mxu0 %v11884_v23 }
 0x772   :  { %10859 = vmatpush3.bf16.msra.mxu1 %v11860_v3  ;;  %11421 = vmatprep.subr.bf16.mxu0 %v15991_v36 }
 0x773   :  { %10888 = vmatprep.subr.bf16.mxu1 %v11861_v10 }
 0x775   :  { %9629 = vmatmul.mubr.bf16.vlgmr.msra.gmra.mrb[140].mxu1 %v8359_v5  ;;  %11422 = vmatpush3.bf16.msra.mxu0 %v11885_v53 }
 0x776   :  { %10889 = vmatpush3.bf16.msra.mxu1 %v11862_v35  ;;  %9708 = vmatprep.mubr.bf16.mxu1 %v8364_v39 }
 0x777   :  { %10890 = vmatprep.subr.bf16.mxu1 %v11864_v57 }
 0x77a   :  { %10891 = vmatpush3.bf16.msra.mxu1 %v11865_v6 }
 0x77b   :  { %10892 = vmatprep.subr.bf16.mxu1 %v11866_v55 }
 0x77e   :  { %10893 = vmatpush3.bf16.msra.mxu1 %v11867_v29 }
 0x77f   :  { %10894 = vmatprep.subr.bf16.mxu1 %v11868_v19 }
 0x782   :  { %10895 = vmatpush3.bf16.msra.mxu1 %v11869_v26 }
 0x783   :  { %10896 = vmatprep.subr.bf16.mxu1 %v11870_v7 }
 0x786   :  { %10897 = vmatpush3.bf16.msra.mxu1 %v11871_v18 }
 0x787   :  { %10898 = vmatprep.subr.bf16.mxu1 %v11872_v54 }
 0x78a   :  { %10899 = vmatpush3.bf16.msra.mxu1 %v11873_v12 }
 0x78b   :  { %10900 = vmatprep.subr.bf16.mxu1 %v11874_v47  ;;  %v10481_v47 = vld [vmem:[%s16144_s10] ss:$0 sm:$0xff] }
 0x78e   :  { %10901 = vmatpush3.bf16.msra.mxu1 %v11875_v45 }
 0x78f   :  { %10902 = vmatprep.subr.bf16.mxu1 %v11876_v27 }
 0x792   :  { %10903 = vmatpush3.bf16.msra.mxu1 %v11877_v33 }
 0x795   :  { %9709 = vmatmul.mubr.bf16.vlgmr.msra.gmra.mrb[144].mxu1 %v8363_v34 }
 0x7e8   :  { %v10750_v28 = vpop.f32.mrb[128].mxu1 }
 0x7e9   :  { %v10751_v24 = vpop.f32.mrb[129].mxu1 }
 0x7ea   :  { %v10752_v25 = vadd.f32 %v10751_v24, %v10750_v28  ;;  %v10753_v59 = vpop.f32.mrb[130].mxu1 }
 0x7eb   :  { %v10794_v60 = vpop.f32.mrb[32].mxu0  ;;  %v10754_v56 = vpop.f32.mrb[131].mxu1 }
 0x7ec   :  { %v10795_v20 = vpop.f32.mrb[33].mxu0  ;;  %v9431_v15 = vadd.f32 %v10752_v25, %v10352_v16 }
 0x7ed   :  { %v10796_v48 = vadd.f32 %v10795_v20, %v10794_v60  ;;  %v10797_v9 = vpop.f32.mrb[34].mxu0 }
 0x7ee   :  { %v10798_v31 = vpop.f32.mrb[35].mxu0 }
 0x808   :  { %v10772_v21 = vpop.f32.mrb[132].mxu1 }
 0x809   :  { %v10773_v61 = vpop.f32.mrb[133].mxu1 }
 0x80a   :  { %v10774_v52 = vadd.f32 %v10773_v61, %v10772_v21  ;;  %v10775_v38 = vpop.f32.mrb[134].mxu1 }
 0x80b   :  { %v10838_v17 = vpop.f32.mrb[36].mxu0  ;;  %v10776_v44 = vpop.f32.mrb[135].mxu1 }
 0x80c   :  { %v10839_v40 = vpop.f32.mrb[37].mxu0  ;;  %v9471_v22 = vadd.f32 %v10774_v52, %v9431_v15 }
 0x80d   :  { %v10840_v1 = vadd.f32 %v10839_v40, %v10838_v17  ;;  %v10841_v51 = vpop.f32.mrb[38].mxu0 }
 0x80e   :  { %v10842_v13 = vpop.f32.mrb[39].mxu0  ;;  %v9511_v30 = vadd.f32 %v10796_v48, %v9471_v22 }
 0x828   :  { %v10816_v42 = vpop.f32.mrb[136].mxu1 }
 0x829   :  { %v10817_v11 = vpop.f32.mrb[137].mxu1 }
 0x82a   :  { %v10818_v2 = vadd.f32 %v10817_v11, %v10816_v42  ;;  %v10819_v63 = vpop.f32.mrb[138].mxu1 }
 0x82b   :  { %v10882_v36 = vpop.f32.mrb[40].mxu0  ;;  %v10820_v32 = vpop.f32.mrb[139].mxu1 }
 0x82c   :  { %v10883_v58 = vpop.f32.mrb[41].mxu0  ;;  %v9551_v62 = vadd.f32 %v10818_v2, %v9511_v30 }
 0x82d   :  { %v10884_v46 = vadd.f32 %v10883_v58, %v10882_v36  ;;  %v10885_v0 = vpop.f32.mrb[42].mxu0 }
 0x82e   :  { %v10886_v43 = vpop.f32.mrb[43].mxu0  ;;  %v9591_v3 = vadd.f32 %v10840_v1, %v9551_v62 }
 0x848   :  { %v10860_v10 = vpop.f32.mrb[140].mxu1 }
 0x849   :  { %v10861_v4 = vpop.f32.mrb[141].mxu1 }
 0x84a   :  { %v10862_v35 = vadd.f32 %v10861_v4, %v10860_v10  ;;  %v10863_v5 = vpop.f32.mrb[142].mxu1 }
 0x84b   :  { %v10864_v57 = vpop.f32.mrb[143].mxu1 }
 0x84c   :  { %v9631_v39 = vadd.f32 %v10862_v35, %v9591_v3 }
 0x84e   :  { %v9671_v6 = vadd.f32 %v10884_v46, %v9631_v39 }
 0x868   :  { %v10904_v55 = vpop.f32.mrb[144].mxu1 }
 0x869   :  { %v10905_v29 = vpop.f32.mrb[145].mxu1 }
 0x86a   :  { %v10906_v19 = vadd.f32 %v10905_v29, %v10904_v55  ;;  %v10907_v26 = vpop.f32.mrb[146].mxu1 }
 0x86b   :  { %v10908_v7 = vpop.f32.mrb[147].mxu1 }
 0x86c   :  { %v9711_v18 = vadd.f32 %v10906_v19, %v9671_v6 }
 0x86e   :  { %v9716_v54 = vmax.f32 %v9711_v18, 0.0 }
 0x870   :  { %v9717_v12 = vpack.c.bf16 %v9716_v54, %v9716_v54 }
 0x872   :  { %11424 = vmatmul.mubr.bf16.vlgmr.msra.gmra.mrb[44].mxu0 %v9717_v12 }
 0x945   :  { %v9823_v45 = vpop.f32.mrb[44].mxu0 }
 0x946   :  { %v9824_v27 = vadd.f32 %v10481_v47, %v9823_v45  ;;  %v11425_v33 = vpop.f32.mrb[45].mxu0 }
 0x947   :  { %v9826_v34 = vpop.f32.mrb[46].mxu0 }
 0x948   :  { %v11426_v41 = vpop.f32.mrb[47].mxu0  ;;  %9830 = vst.msk [vmem:[#allocation9] sm:$0x3] %vm9829_vm2, %v9824_v27 }
 0x949   :  { %11921 = shalt.err (!%p11918_p4)
}
 0x94a   :  { %s11922_s10 = scalar_lea.hbm %s16145_s11, 32 }
 0x94b   :  { %p11923_p5 = scmp.ne.s32.totalorder %s16145_s11, %s11922_s10  ;;  %p11926_p6 = scmp.lt.u32.totalorder %s11922_s10, %s16145_s11 }
 0x94d   :  { %p11928_p7 = pnand %p11926_p6, %p11923_p5 }
 0x94f   :  { %11931 = shalt.err (!%p11928_p7)
}
 0x950   :  { %9840 = dma.vmem_to_hbm [thread:$0]  %s9838_s2, 32, %s16145_s11, [#allocation10]  }
 0x951   :  { %11932 = dma.done.wait [#allocation10], 32  }
 0x952   :  { %11933 = vsyncadd [#allocation10], 4294967264 }
 0x953   :  { %9844 = vsyncpa [#allocation10], 1 }

</bundles_post_ra>
